<compile_context>
chip_gen: v5e
topology: v5e:2x2
jax: 0.10.0
libtpu: 0.0.40
codegen_flags: <defaults>
</compile_context>

<pallas_src>
import functools

import jax
import jax.numpy as jnp
import numpy as np
from jax.experimental import pallas as pl
from jax.experimental.pallas import tpu as pltpu

# ---- module constants (from chatbot.py) -------------------------------------
BLOCK_SIZE = 128              # causal-mask / max context length
N_EMBD = 384
NUM_HEADS = 6
HEAD_SIZE = N_EMBD // NUM_HEADS     # 64
# dropout = 0.2 in the PyTorch module; treated as inference -> identity.


# ---- fused kernel ------------------------------------------------------------
def _mha_fused_kernel(x_ref, wqkv_ref, wp_ref, bp_ref, o_ref, *,
                      num_heads, head_size):
    """Fused multi-head causal attention + output projection for one batch elem.

    x_ref:    (1, T, C)        activations of current batch element
    wqkv_ref: (C, 3*H*Hs)      [q heads | k heads | v heads]; q pre-scaled
    wp_ref:   (H*Hs, C)        output projection weight
    bp_ref:   (1, C)           output projection bias
    o_ref:    (1, T, C)        projected output (lane-dense, C = 384)
    """
    x = x_ref[0]                                                       # (T, C)
    T = x.shape[0]
    hhs = num_heads * head_size

    # Single fused QKV matmul: (T, C) @ (C, 3*H*Hs).
    qkv = jnp.dot(x, wqkv_ref[...], preferred_element_type=jnp.float32)

    # Causal mask, built once and reused by every head.
    row = jax.lax.broadcasted_iota(jnp.int32, (T, T), 0)
    col = jax.lax.broadcasted_iota(jnp.int32, (T, T), 1)
    causal = row >= col

    head_outs = []
    for h in range(num_heads):                       # static unroll (H = 6)
        q = qkv[:, h * head_size:(h + 1) * head_size]                  # (T, Hs)
        k = qkv[:, hhs + h * head_size:hhs + (h + 1) * head_size]      # (T, Hs)
        v = qkv[:, 2 * hhs + h * head_size:2 * hhs + (h + 1) * head_size]

        # q @ k^T without materializing the transpose: contract Hs with Hs.
        scores = jax.lax.dot_general(
            q, k, (((1,), (1,)), ((), ())),
            preferred_element_type=jnp.float32)                        # (T, T)
        scores = jnp.where(causal, scores, -jnp.inf)

        # numerically-stable softmax over last axis
        m = jnp.max(scores, axis=-1, keepdims=True)
        p = jnp.exp(scores - m)
        denom = jnp.sum(p, axis=-1, keepdims=True)
        r = pl.reciprocal(denom, approx=True)        # EUP slot
        r = r * (2.0 - denom * r)                    # one Newton step -> ~f32
        wei = p * r

        # attention dropout: identity in inference mode
        head_outs.append(
            jnp.dot(wei, v, preferred_element_type=jnp.float32))       # (T, Hs)

    concat = jnp.concatenate(head_outs, axis=-1)                       # (T, H*Hs)
    y = jnp.dot(concat, wp_ref[...], preferred_element_type=jnp.float32)
    y = y + bp_ref[...]                                                # (T, C)

    # output dropout: identity in inference mode
    o_ref[0] = y.astype(o_ref.dtype)


# ---- wrapper -----------------------------------------------------------------
def multi_head_attention(x, wq, wk, wv, w_proj, b_proj):
    """wq/wk/wv: (H, C, Hs) stored as (in, out); w_proj: (H*Hs, C); b_proj: (C,)."""
    B, T, C = x.shape
    H, _, Hs = wq.shape
    scale = Hs ** -0.5

    # Host-side (one-time) weight fusion: (H, C, Hs) -> (C, H*Hs), then
    # concat [q | k | v] along the output axis. Scale folded into Wq.
    def cat_heads(w):
        return jnp.transpose(w, (1, 0, 2)).reshape(C, H * Hs)

    wqkv = jnp.concatenate(
        [cat_heads(wq) * scale, cat_heads(wk), cat_heads(wv)], axis=-1)  # (C, 3*H*Hs)

    kernel = functools.partial(_mha_fused_kernel, num_heads=H, head_size=Hs)

    out = pl.pallas_call(
        kernel,
        out_shape=jax.ShapeDtypeStruct((B, T, C), x.dtype),
        grid_spec=pltpu.PrefetchScalarGridSpec(
            num_scalar_prefetch=0,
            grid=(B,),
            in_specs=[
                pl.BlockSpec((1, T, C), lambda b: (b, 0, 0)),
                pl.BlockSpec((C, 3 * H * Hs), lambda b: (0, 0)),
                pl.BlockSpec((H * Hs, C), lambda b: (0, 0)),
                pl.BlockSpec((1, C), lambda b: (0, 0)),
            ],
            out_specs=pl.BlockSpec((1, T, C), lambda b: (b, 0, 0)),
        ),
        compiler_params=pltpu.CompilerParams(
            dimension_semantics=("parallel",)),
    )(x, wqkv, w_proj, b_proj.reshape(1, C))

    return out


# ---- pure-JAX reference (for correctness check) -------------------------------
def reference(x, wq, wk, wv, w_proj, b_proj):
    B, T, C = x.shape
    outs = []
    for h in range(wq.shape[0]):
        q = x @ wq[h]
        k = x @ wk[h]
        v = x @ wv[h]
        wei = (q @ jnp.swapaxes(k, -2, -1)) * (k.shape[-1] ** -0.5)
        mask = jnp.tril(jnp.ones((T, T), dtype=bool))
        wei = jnp.where(mask, wei, -jnp.inf)
        wei = jax.nn.softmax(wei, axis=-1)
        outs.append(wei @ v)
    cat = jnp.concatenate(outs, axis=-1)
    return cat @ w_proj + b_proj


# ---- driver -------------------------------------------------------------------
if __name__ == "__main__":
    B, T = 2, BLOCK_SIZE     # T = block_size = 128, small batch
    C, H, Hs = N_EMBD, NUM_HEADS, HEAD_SIZE

    key = jax.random.PRNGKey(0)
    kx, kq, kk, kv, kw, kb = jax.random.split(key, 6)

    x = jax.random.normal(kx, (B, T, C), dtype=jnp.float32)

    # nn.Linear default init: U(-1/sqrt(fan_in), 1/sqrt(fan_in)); stored as (in, out).
    lim_qkv = 1.0 / np.sqrt(C)
    wq = jax.random.uniform(kq, (H, C, Hs), jnp.float32, -lim_qkv, lim_qkv)
    wk = jax.random.uniform(kk, (H, C, Hs), jnp.float32, -lim_qkv, lim_qkv)
    wv = jax.random.uniform(kv, (H, C, Hs), jnp.float32, -lim_qkv, lim_qkv)

    lim_p = 1.0 / np.sqrt(H * Hs)
    w_proj = jax.random.uniform(kw, (H * Hs, C), jnp.float32, -lim_p, lim_p)
    b_proj = jax.random.uniform(kb, (C,), jnp.float32, -lim_p, lim_p)

    out = multi_head_attention(x, wq, wk, wv, w_proj, b_proj)
    out = jax.block_until_ready(out)

    ref = reference(x, wq, wk, wv, w_proj, b_proj)
    np.testing.assert_allclose(np.asarray(out), np.asarray(ref),
                               rtol=1e-4, atol=2e-4)

    print("KERNEL_OK")
</pallas_src>

<mosaic_0001>
module attributes {stable_mosaic.version = 11 : i64} {
  func.func @_mha_fused_kernel(%arg0: i32, %arg1: memref<1x128x384xf32, #tpu.memory_space<vmem>>, %arg2: memref<384x1152xf32, #tpu.memory_space<vmem>>, %arg3: memref<384x384xf32, #tpu.memory_space<vmem>>, %arg4: memref<1x384xf32, #tpu.memory_space<vmem>>, %arg5: memref<1x128x384xf32, #tpu.memory_space<vmem>>) attributes {dimension_semantics = [#tpu.dimension_semantics<parallel>], iteration_bounds = array<i64: 2>, scalar_prefetch = 0 : i64, scratch_operands = 0 : i64, tpu.core_type = #tpu.core_type<tc>, window_params = [{transform_indices = @transform_0, window_bounds = array<i64: 1, 128, 384>}, {pipeline_mode = #tpu.pipeline_mode<synchronous>, transform_indices = @transform_1, window_bounds = array<i64: 384, 1152>}, {pipeline_mode = #tpu.pipeline_mode<synchronous>, transform_indices = @transform_2, window_bounds = array<i64: 384, 384>}, {pipeline_mode = #tpu.pipeline_mode<synchronous>, transform_indices = @transform_3, window_bounds = array<i64: 1, 384>}, {transform_indices = @transform_4, window_bounds = array<i64: 1, 128, 384>}]} {
    %c0 = arith.constant 0 : index
    %c0_0 = arith.constant 0 : index
    %c0_1 = arith.constant 0 : index
    %0 = vector.load %arg1[%c0, %c0_0, %c0_1] : memref<1x128x384xf32, #tpu.memory_space<vmem>>, vector<1x128x384xf32>
    %1 = vector.shape_cast %0 : vector<1x128x384xf32> to vector<128x384xf32>
    %c0_2 = arith.constant 0 : index
    %c0_3 = arith.constant 0 : index
    %2 = vector.load %arg2[%c0_2, %c0_3] : memref<384x1152xf32, #tpu.memory_space<vmem>>, vector<384x1152xf32>
    %cst = arith.constant dense<0.000000e+00> : vector<128x1152xf32>
    %3 = tpu.matmul %1, %2, %cst {dimension_numbers = #tpu.dot_dimension_numbers<[1], [0], [0], [1], [0, 0, 1, 1], [], []>} : vector<128x384xf32>, vector<384x1152xf32>, vector<128x1152xf32> -> vector<128x1152xf32>
    %4 = tpu.iota {dimensions = array<i32: 0>} : vector<128x128xi32>
    %5 = tpu.iota {dimensions = array<i32: 1>} : vector<128x128xi32>
    %6 = arith.cmpi sge, %4, %5 : vector<128x128xi32>
    %7 = vector.extract_strided_slice %3 {offsets = [0, 0], sizes = [128, 64], strides = [1, 1]} : vector<128x1152xf32> to vector<128x64xf32>
    %8 = vector.extract_strided_slice %3 {offsets = [0, 384], sizes = [128, 64], strides = [1, 1]} : vector<128x1152xf32> to vector<128x64xf32>
    %9 = vector.extract_strided_slice %3 {offsets = [0, 768], sizes = [128, 64], strides = [1, 1]} : vector<128x1152xf32> to vector<128x64xf32>
    %cst_4 = arith.constant dense<0.000000e+00> : vector<128x128xf32>
    %10 = tpu.matmul %7, %8, %cst_4 {dimension_numbers = #tpu.dot_dimension_numbers<[1], [1], [0], [0], [0, 0, 1, 0], [], []>} : vector<128x64xf32>, vector<128x64xf32>, vector<128x128xf32> -> vector<128x128xf32>
    %cst_5 = arith.constant 0xFF800000 : f32
    %11 = vector.broadcast %cst_5 : f32 to vector<128x128xf32>
    %12 = arith.select %6, %10, %11 : vector<128x128xi1>, vector<128x128xf32>
    %cst_6 = arith.constant dense<0xFF800000> : vector<128xf32>
    %13 = vector.multi_reduction <maximumf>, %12, %cst_6 [1] : vector<128x128xf32> to vector<128xf32>
    %14 = vector.shape_cast %13 : vector<128xf32> to vector<128x1xf32>
    %15 = vector.broadcast %14 : vector<128x1xf32> to vector<128x128xf32>
    %16 = arith.subf %12, %15 : vector<128x128xf32>
    %17 = math.exp %16 : vector<128x128xf32>
    %cst_7 = arith.constant dense<0.000000e+00> : vector<128xf32>
    %18 = vector.multi_reduction <add>, %17, %cst_7 [1] : vector<128x128xf32> to vector<128xf32>
    %19 = vector.shape_cast %18 : vector<128xf32> to vector<128x1xf32>
    %20 = tpu.reciprocal %19 {approx = true} : vector<128x1xf32> -> vector<128x1xf32>
    %21 = arith.mulf %19, %20 : vector<128x1xf32>
    %cst_8 = arith.constant 2.000000e+00 : f32
    %22 = vector.broadcast %cst_8 : f32 to vector<128x1xf32>
    %23 = arith.subf %22, %21 : vector<128x1xf32>
    %24 = arith.mulf %20, %23 : vector<128x1xf32>
    %25 = vector.broadcast %24 : vector<128x1xf32> to vector<128x128xf32>
    %26 = arith.mulf %17, %25 : vector<128x128xf32>
    %cst_9 = arith.constant dense<0.000000e+00> : vector<128x64xf32>
    %27 = tpu.matmul %26, %9, %cst_9 {dimension_numbers = #tpu.dot_dimension_numbers<[1], [0], [0], [1], [0, 0, 1, 1], [], []>} : vector<128x128xf32>, vector<128x64xf32>, vector<128x64xf32> -> vector<128x64xf32>
    %28 = vector.extract_strided_slice %3 {offsets = [0, 64], sizes = [128, 64], strides = [1, 1]} : vector<128x1152xf32> to vector<128x64xf32>
    %29 = vector.extract_strided_slice %3 {offsets = [0, 448], sizes = [128, 64], strides = [1, 1]} : vector<128x1152xf32> to vector<128x64xf32>
    %30 = vector.extract_strided_slice %3 {offsets = [0, 832], sizes = [128, 64], strides = [1, 1]} : vector<128x1152xf32> to vector<128x64xf32>
    %cst_10 = arith.constant dense<0.000000e+00> : vector<128x128xf32>
    %31 = tpu.matmul %28, %29, %cst_10 {dimension_numbers = #tpu.dot_dimension_numbers<[1], [1], [0], [0], [0, 0, 1, 0], [], []>} : vector<128x64xf32>, vector<128x64xf32>, vector<128x128xf32> -> vector<128x128xf32>
    %cst_11 = arith.constant 0xFF800000 : f32
    %32 = vector.broadcast %cst_11 : f32 to vector<128x128xf32>
    %33 = arith.select %6, %31, %32 : vector<128x128xi1>, vector<128x128xf32>
    %cst_12 = arith.constant dense<0xFF800000> : vector<128xf32>
    %34 = vector.multi_reduction <maximumf>, %33, %cst_12 [1] : vector<128x128xf32> to vector<128xf32>
    %35 = vector.shape_cast %34 : vector<128xf32> to vector<128x1xf32>
    %36 = vector.broadcast %35 : vector<128x1xf32> to vector<128x128xf32>
    %37 = arith.subf %33, %36 : vector<128x128xf32>
    %38 = math.exp %37 : vector<128x128xf32>
    %cst_13 = arith.constant dense<0.000000e+00> : vector<128xf32>
    %39 = vector.multi_reduction <add>, %38, %cst_13 [1] : vector<128x128xf32> to vector<128xf32>
    %40 = vector.shape_cast %39 : vector<128xf32> to vector<128x1xf32>
    %41 = tpu.reciprocal %40 {approx = true} : vector<128x1xf32> -> vector<128x1xf32>
    %42 = arith.mulf %40, %41 : vector<128x1xf32>
    %cst_14 = arith.constant 2.000000e+00 : f32
    %43 = vector.broadcast %cst_14 : f32 to vector<128x1xf32>
    %44 = arith.subf %43, %42 : vector<128x1xf32>
    %45 = arith.mulf %41, %44 : vector<128x1xf32>
    %46 = vector.broadcast %45 : vector<128x1xf32> to vector<128x128xf32>
    %47 = arith.mulf %38, %46 : vector<128x128xf32>
    %cst_15 = arith.constant dense<0.000000e+00> : vector<128x64xf32>
    %48 = tpu.matmul %47, %30, %cst_15 {dimension_numbers = #tpu.dot_dimension_numbers<[1], [0], [0], [1], [0, 0, 1, 1], [], []>} : vector<128x128xf32>, vector<128x64xf32>, vector<128x64xf32> -> vector<128x64xf32>
    %49 = vector.extract_strided_slice %3 {offsets = [0, 128], sizes = [128, 64], strides = [1, 1]} : vector<128x1152xf32> to vector<128x64xf32>
    %50 = vector.extract_strided_slice %3 {offsets = [0, 512], sizes = [128, 64], strides = [1, 1]} : vector<128x1152xf32> to vector<128x64xf32>
    %51 = vector.extract_strided_slice %3 {offsets = [0, 896], sizes = [128, 64], strides = [1, 1]} : vector<128x1152xf32> to vector<128x64xf32>
    %cst_16 = arith.constant dense<0.000000e+00> : vector<128x128xf32>
    %52 = tpu.matmul %49, %50, %cst_16 {dimension_numbers = #tpu.dot_dimension_numbers<[1], [1], [0], [0], [0, 0, 1, 0], [], []>} : vector<128x64xf32>, vector<128x64xf32>, vector<128x128xf32> -> vector<128x128xf32>
    %cst_17 = arith.constant 0xFF800000 : f32
    %53 = vector.broadcast %cst_17 : f32 to vector<128x128xf32>
    %54 = arith.select %6, %52, %53 : vector<128x128xi1>, vector<128x128xf32>
    %cst_18 = arith.constant dense<0xFF800000> : vector<128xf32>
    %55 = vector.multi_reduction <maximumf>, %54, %cst_18 [1] : vector<128x128xf32> to vector<128xf32>
    %56 = vector.shape_cast %55 : vector<128xf32> to vector<128x1xf32>
    %57 = vector.broadcast %56 : vector<128x1xf32> to vector<128x128xf32>
    %58 = arith.subf %54, %57 : vector<128x128xf32>
    %59 = math.exp %58 : vector<128x128xf32>
    %cst_19 = arith.constant dense<0.000000e+00> : vector<128xf32>
    %60 = vector.multi_reduction <add>, %59, %cst_19 [1] : vector<128x128xf32> to vector<128xf32>
    %61 = vector.shape_cast %60 : vector<128xf32> to vector<128x1xf32>
    %62 = tpu.reciprocal %61 {approx = true} : vector<128x1xf32> -> vector<128x1xf32>
    %63 = arith.mulf %61, %62 : vector<128x1xf32>
    %cst_20 = arith.constant 2.000000e+00 : f32
    %64 = vector.broadcast %cst_20 : f32 to vector<128x1xf32>
    %65 = arith.subf %64, %63 : vector<128x1xf32>
    %66 = arith.mulf %62, %65 : vector<128x1xf32>
    %67 = vector.broadcast %66 : vector<128x1xf32> to vector<128x128xf32>
    %68 = arith.mulf %59, %67 : vector<128x128xf32>
    %cst_21 = arith.constant dense<0.000000e+00> : vector<128x64xf32>
    %69 = tpu.matmul %68, %51, %cst_21 {dimension_numbers = #tpu.dot_dimension_numbers<[1], [0], [0], [1], [0, 0, 1, 1], [], []>} : vector<128x128xf32>, vector<128x64xf32>, vector<128x64xf32> -> vector<128x64xf32>
    %70 = vector.extract_strided_slice %3 {offsets = [0, 192], sizes = [128, 64], strides = [1, 1]} : vector<128x1152xf32> to vector<128x64xf32>
    %71 = vector.extract_strided_slice %3 {offsets = [0, 576], sizes = [128, 64], strides = [1, 1]} : vector<128x1152xf32> to vector<128x64xf32>
    %72 = vector.extract_strided_slice %3 {offsets = [0, 960], sizes = [128, 64], strides = [1, 1]} : vector<128x1152xf32> to vector<128x64xf32>
    %cst_22 = arith.constant dense<0.000000e+00> : vector<128x128xf32>
    %73 = tpu.matmul %70, %71, %cst_22 {dimension_numbers = #tpu.dot_dimension_numbers<[1], [1], [0], [0], [0, 0, 1, 0], [], []>} : vector<128x64xf32>, vector<128x64xf32>, vector<128x128xf32> -> vector<128x128xf32>
    %cst_23 = arith.constant 0xFF800000 : f32
    %74 = vector.broadcast %cst_23 : f32 to vector<128x128xf32>
    %75 = arith.select %6, %73, %74 : vector<128x128xi1>, vector<128x128xf32>
    %cst_24 = arith.constant dense<0xFF800000> : vector<128xf32>
    %76 = vector.multi_reduction <maximumf>, %75, %cst_24 [1] : vector<128x128xf32> to vector<128xf32>
    %77 = vector.shape_cast %76 : vector<128xf32> to vector<128x1xf32>
    %78 = vector.broadcast %77 : vector<128x1xf32> to vector<128x128xf32>
    %79 = arith.subf %75, %78 : vector<128x128xf32>
    %80 = math.exp %79 : vector<128x128xf32>
    %cst_25 = arith.constant dense<0.000000e+00> : vector<128xf32>
    %81 = vector.multi_reduction <add>, %80, %cst_25 [1] : vector<128x128xf32> to vector<128xf32>
    %82 = vector.shape_cast %81 : vector<128xf32> to vector<128x1xf32>
    %83 = tpu.reciprocal %82 {approx = true} : vector<128x1xf32> -> vector<128x1xf32>
    %84 = arith.mulf %82, %83 : vector<128x1xf32>
    %cst_26 = arith.constant 2.000000e+00 : f32
    %85 = vector.broadcast %cst_26 : f32 to vector<128x1xf32>
    %86 = arith.subf %85, %84 : vector<128x1xf32>
    %87 = arith.mulf %83, %86 : vector<128x1xf32>
    %88 = vector.broadcast %87 : vector<128x1xf32> to vector<128x128xf32>
    %89 = arith.mulf %80, %88 : vector<128x128xf32>
    %cst_27 = arith.constant dense<0.000000e+00> : vector<128x64xf32>
    %90 = tpu.matmul %89, %72, %cst_27 {dimension_numbers = #tpu.dot_dimension_numbers<[1], [0], [0], [1], [0, 0, 1, 1], [], []>} : vector<128x128xf32>, vector<128x64xf32>, vector<128x64xf32> -> vector<128x64xf32>
    %91 = vector.extract_strided_slice %3 {offsets = [0, 256], sizes = [128, 64], strides = [1, 1]} : vector<128x1152xf32> to vector<128x64xf32>
    %92 = vector.extract_strided_slice %3 {offsets = [0, 640], sizes = [128, 64], strides = [1, 1]} : vector<128x1152xf32> to vector<128x64xf32>
    %93 = vector.extract_strided_slice %3 {offsets = [0, 1024], sizes = [128, 64], strides = [1, 1]} : vector<128x1152xf32> to vector<128x64xf32>
    %cst_28 = arith.constant dense<0.000000e+00> : vector<128x128xf32>
    %94 = tpu.matmul %91, %92, %cst_28 {dimension_numbers = #tpu.dot_dimension_numbers<[1], [1], [0], [0], [0, 0, 1, 0], [], []>} : vector<128x64xf32>, vector<128x64xf32>, vector<128x128xf32> -> vector<128x128xf32>
    %cst_29 = arith.constant 0xFF800000 : f32
    %95 = vector.broadcast %cst_29 : f32 to vector<128x128xf32>
    %96 = arith.select %6, %94, %95 : vector<128x128xi1>, vector<128x128xf32>
    %cst_30 = arith.constant dense<0xFF800000> : vector<128xf32>
    %97 = vector.multi_reduction <maximumf>, %96, %cst_30 [1] : vector<128x128xf32> to vector<128xf32>
    %98 = vector.shape_cast %97 : vector<128xf32> to vector<128x1xf32>
    %99 = vector.broadcast %98 : vector<128x1xf32> to vector<128x128xf32>
    %100 = arith.subf %96, %99 : vector<128x128xf32>
    %101 = math.exp %100 : vector<128x128xf32>
    %cst_31 = arith.constant dense<0.000000e+00> : vector<128xf32>
    %102 = vector.multi_reduction <add>, %101, %cst_31 [1] : vector<128x128xf32> to vector<128xf32>
    %103 = vector.shape_cast %102 : vector<128xf32> to vector<128x1xf32>
    %104 = tpu.reciprocal %103 {approx = true} : vector<128x1xf32> -> vector<128x1xf32>
    %105 = arith.mulf %103, %104 : vector<128x1xf32>
    %cst_32 = arith.constant 2.000000e+00 : f32
    %106 = vector.broadcast %cst_32 : f32 to vector<128x1xf32>
    %107 = arith.subf %106, %105 : vector<128x1xf32>
    %108 = arith.mulf %104, %107 : vector<128x1xf32>
    %109 = vector.broadcast %108 : vector<128x1xf32> to vector<128x128xf32>
    %110 = arith.mulf %101, %109 : vector<128x128xf32>
    %cst_33 = arith.constant dense<0.000000e+00> : vector<128x64xf32>
    %111 = tpu.matmul %110, %93, %cst_33 {dimension_numbers = #tpu.dot_dimension_numbers<[1], [0], [0], [1], [0, 0, 1, 1], [], []>} : vector<128x128xf32>, vector<128x64xf32>, vector<128x64xf32> -> vector<128x64xf32>
    %112 = vector.extract_strided_slice %3 {offsets = [0, 320], sizes = [128, 64], strides = [1, 1]} : vector<128x1152xf32> to vector<128x64xf32>
    %113 = vector.extract_strided_slice %3 {offsets = [0, 704], sizes = [128, 64], strides = [1, 1]} : vector<128x1152xf32> to vector<128x64xf32>
    %114 = vector.extract_strided_slice %3 {offsets = [0, 1088], sizes = [128, 64], strides = [1, 1]} : vector<128x1152xf32> to vector<128x64xf32>
    %cst_34 = arith.constant dense<0.000000e+00> : vector<128x128xf32>
    %115 = tpu.matmul %112, %113, %cst_34 {dimension_numbers = #tpu.dot_dimension_numbers<[1], [1], [0], [0], [0, 0, 1, 0], [], []>} : vector<128x64xf32>, vector<128x64xf32>, vector<128x128xf32> -> vector<128x128xf32>
    %cst_35 = arith.constant 0xFF800000 : f32
    %116 = vector.broadcast %cst_35 : f32 to vector<128x128xf32>
    %117 = arith.select %6, %115, %116 : vector<128x128xi1>, vector<128x128xf32>
    %cst_36 = arith.constant dense<0xFF800000> : vector<128xf32>
    %118 = vector.multi_reduction <maximumf>, %117, %cst_36 [1] : vector<128x128xf32> to vector<128xf32>
    %119 = vector.shape_cast %118 : vector<128xf32> to vector<128x1xf32>
    %120 = vector.broadcast %119 : vector<128x1xf32> to vector<128x128xf32>
    %121 = arith.subf %117, %120 : vector<128x128xf32>
    %122 = math.exp %121 : vector<128x128xf32>
    %cst_37 = arith.constant dense<0.000000e+00> : vector<128xf32>
    %123 = vector.multi_reduction <add>, %122, %cst_37 [1] : vector<128x128xf32> to vector<128xf32>
    %124 = vector.shape_cast %123 : vector<128xf32> to vector<128x1xf32>
    %125 = tpu.reciprocal %124 {approx = true} : vector<128x1xf32> -> vector<128x1xf32>
    %126 = arith.mulf %124, %125 : vector<128x1xf32>
    %cst_38 = arith.constant 2.000000e+00 : f32
    %127 = vector.broadcast %cst_38 : f32 to vector<128x1xf32>
    %128 = arith.subf %127, %126 : vector<128x1xf32>
    %129 = arith.mulf %125, %128 : vector<128x1xf32>
    %130 = vector.broadcast %129 : vector<128x1xf32> to vector<128x128xf32>
    %131 = arith.mulf %122, %130 : vector<128x128xf32>
    %cst_39 = arith.constant dense<0.000000e+00> : vector<128x64xf32>
    %132 = tpu.matmul %131, %114, %cst_39 {dimension_numbers = #tpu.dot_dimension_numbers<[1], [0], [0], [1], [0, 0, 1, 1], [], []>} : vector<128x128xf32>, vector<128x64xf32>, vector<128x64xf32> -> vector<128x64xf32>
    %133 = tpu.concatenate %27, %48, %69, %90, %111, %132 in 1 : vector<128x64xf32>, vector<128x64xf32>, vector<128x64xf32>, vector<128x64xf32>, vector<128x64xf32>, vector<128x64xf32> -> vector<128x384xf32>
    %c0_40 = arith.constant 0 : index
    %c0_41 = arith.constant 0 : index
    %134 = vector.load %arg3[%c0_40, %c0_41] : memref<384x384xf32, #tpu.memory_space<vmem>>, vector<384x384xf32>
    %cst_42 = arith.constant dense<0.000000e+00> : vector<128x384xf32>
    %135 = tpu.matmul %133, %134, %cst_42 {dimension_numbers = #tpu.dot_dimension_numbers<[1], [0], [0], [1], [0, 0, 1, 1], [], []>} : vector<128x384xf32>, vector<384x384xf32>, vector<128x384xf32> -> vector<128x384xf32>
    %c0_43 = arith.constant 0 : index
    %c0_44 = arith.constant 0 : index
    %136 = vector.load %arg4[%c0_43, %c0_44] : memref<1x384xf32, #tpu.memory_space<vmem>>, vector<1x384xf32>
    %137 = vector.broadcast %136 : vector<1x384xf32> to vector<128x384xf32>
    %138 = arith.addf %135, %137 : vector<128x384xf32>
    %c0_45 = arith.constant 0 : index
    %c0_46 = arith.constant 0 : index
    %c0_47 = arith.constant 0 : index
    %139 = vector.load %arg5[%c0_45, %c0_46, %c0_47] : memref<1x128x384xf32, #tpu.memory_space<vmem>>, vector<1x128x384xf32>
    %140 = vector.shape_cast %139 : vector<1x128x384xf32> to vector<128x384xf32>
    %141 = vector.shape_cast %138 : vector<128x384xf32> to vector<1x128x384xf32>
    tpu.vector_store %arg5[%c0_45, %c0_46, %c0_47], %141 {strides = array<i32>} : memref<1x128x384xf32, #tpu.memory_space<vmem>>, vector<1x128x384xf32>,
    return
  }
  func.func @transform_0(%arg0: i32) -> (i32, i32, i32) {
    %c0_i32 = arith.constant 0 : i32
    %c0_i32_0 = arith.constant 0 : i32
    %c0_i32_1 = arith.constant 0 : i32
    return %arg0, %c0_i32, %c0_i32_0 : i32, i32, i32
  }
  func.func @transform_1(%arg0: i32) -> (i32, i32) {
    %c0_i32 = arith.constant 0 : i32
    %c0_i32_0 = arith.constant 0 : i32
    %c0_i32_1 = arith.constant 0 : i32
    return %c0_i32, %c0_i32_0 : i32, i32
  }
  func.func @transform_2(%arg0: i32) -> (i32, i32) {
    %c0_i32 = arith.constant 0 : i32
    %c0_i32_0 = arith.constant 0 : i32
    %c0_i32_1 = arith.constant 0 : i32
    return %c0_i32, %c0_i32_0 : i32, i32
  }
  func.func @transform_3(%arg0: i32) -> (i32, i32) {
    %c0_i32 = arith.constant 0 : i32
    %c0_i32_0 = arith.constant 0 : i32
    %c0_i32_1 = arith.constant 0 : i32
    return %c0_i32, %c0_i32_0 : i32, i32
  }
  func.func @transform_4(%arg0: i32) -> (i32, i32, i32) {
    %c0_i32 = arith.constant 0 : i32
    %c0_i32_0 = arith.constant 0 : i32
    %c0_i32_1 = arith.constant 0 : i32
    return %arg0, %c0_i32, %c0_i32_0 : i32, i32, i32
  }
}

</mosaic_0001>

<bundles_post_ra>
// kernel: tpu_custom_call.1
= control target key start
LH: loop header
LB: loop body
LE: loop exit
PB: predicated region body
PF: predicated region fallthrough
CT: control target
= control target key end

     0   :  { %9 = vsyncpa [#allocation3], 0  ;;  %s12474_s0 = inlined_call_operand.hbm [shape: f32[2,128,384], index: 0, kind: input, shape index: {}]   ;;  %s12475_s1 = inlined_call_operand.hbm [shape: f32[384,1152], index: 1, kind: input, shape index: {}]   ;;  %s12476_s2 = inlined_call_operand.hbm [shape: f32[384,384], index: 2, kind: input, shape index: {}]   ;;  %s12477_s3 = inlined_call_operand.hbm [shape: f32[1,384], index: 3, kind: input, shape index: {}]   ;;  %s12478_s4 = inlined_call_operand.hbm [shape: f32[2,128,384], index: 4, kind: output, shape index: {}]  }
   0x1   :  { %11 = vsyncpa [#allocation3 + $0x1], 0 }
   0x2   :  { %12 = vsyncpa [#allocation6], 0 }
   0x3   :  { %13 = vsyncpa [#allocation9], 0 }
   0x4   :  { %14 = vsyncpa [#allocation4], 0 }
   0x5   :  { %16 = vsyncpa [#allocation4 + $0x1], 0  ;;  %s7860_s15 = smov 0   ;;  %s7862_s16 = smov 0  }
   0x6   :  { %s7864_s17 = smov 0   ;;  %s7866_s18 = smov 0  }
   0x7 LB: > { %s7881_s19 = sadd.s32 4294967295, %s7823_s18   ;;  %s6572_s20 = sadd.s32 4294967294, %s7823_s18   ;;  %s7823_s18 = sphi %s7866_s18, %s13338_s18   ;;  %s7819_s17 = sphi %s7864_s17, %s13337_s17   ;;  %s7815_s16 = sphi %s7862_s16, %s13336_s16   ;;  %s7811_s15 = sphi %s7860_s15, %s13335_s15  }
   0x8   : > { %p42_p0 = scmp.ne.s32.totalorder %s7815_s16, %s7811_s15  ;;  %p43_p1 = scmp.eq.s32.totalorder %s7881_s19, 0 }
   0x9   : > { %p129_p2 = scmp.eq.s32.totalorder %s7881_s19, 1  ;;  %p135_p3 = scmp.eq.s32.totalorder %s6572_s20, 1 }
   0xa   : > { %p7890_p4 = por %p43_p1, %p42_p0  ;;  %p6573_p5 = scmp.ge.s32.totalorder %s7823_s18, 1 }
   0xb   : > { %p7895_p6 = por %p135_p3, %p42_p0  ;;  %p142_p7 = scmp.lt.s32.totalorder %s7823_s18, 3 }
   0xc   : > { %s153_s25 = sshll.u32 %s12475_s1, 4  ;;  %s7825_s27 = smov [#allocation5]   ;;  %s154_s25 = int_to_ptr.hbm [resolvable:$true] %s153_s25 }
   0xd   : > { %p7903_p8 = pnand %p6573_p5, %p142_p7  ;;  %s155_s28 = sshll.u32 %s7825_s27, 4  ;;  %s156_s28 = int_to_ptr.vmem [resolvable:$true] %s155_s28 }
   0xe   : > { %s167_s6 = sshll.u32 %s12476_s2, 4  ;;  %s7826_s7 = smov 1152   ;;  %s168_s6 = int_to_ptr.hbm [resolvable:$true] %s167_s6 }
   0xf   : > { %p6798_p9 = pneg %p7903_p8  ;;  %s7827_s8 = smov 72  }
  0x10   : > { %s7828_s9 = smov [#allocation7]   ;;  %s12479_s11 = smov 384  }
  0x11   : > { %p7911_p10 = pnand %p6798_p9, %p43_p1  ;;  %s169_s10 = sshll.u32 %s7828_s9, 4  ;;  %s170_s10 = int_to_ptr.vmem [resolvable:$true] %s169_s10 }
  0x12   : > { %s12480_s12 = smov 24   ;;  %s182_s20 = sshll.u32 %s12477_s3, 4  ;;  %s183_s20 = int_to_ptr.hbm [resolvable:$true] %s182_s20 }
  0x13   : > { %6801 = dma.hbm_to_vmem [thread:$0]  (!%p7911_p10), %s154_s25, 55296, %s156_s28, [#allocation6], %s7826_s7, %s7826_s7, %s7827_s8  }
  0x14   : > { %6804 = dma.hbm_to_vmem [thread:$0]  (!%p7911_p10), %s168_s6, 18432, %s170_s10, [#allocation6], %s12479_s11, %s12479_s11, %s12480_s12  }
  0x15   : > { %s7831_s23 = smov [#allocation8]   ;;  %s7932_s25 = sadd.s32 1, %s7823_s18  }
  0x16   : > { %s184_s24 = sshll.u32 %s7831_s23, 4  ;;  %s26_s27 = ssub.s32 %s7823_s18, %s7932_s25  ;;  %s185_s24 = int_to_ptr.vmem [resolvable:$true] %s184_s24 }
  0x17   : > { %6807 = dma.hbm_to_vmem [thread:$0]  (!%p7911_p10), %s183_s20, 48, %s185_s24, [#allocation9]  }
  0x18   : > { %s29_s28 = sadd.s32 1, %s7819_s17  ;;  %p27_p12 = scmp.eq.s32.totalorder %s26_s27, 0 }
  0x19   : > { %p36_p13 = scmp.ne.s32.totalorder %s7819_s17, %s7815_s16  ;;  %p37_p0 = scmp.eq.s32.totalorder %s7823_s18, 0 }
  0x1a   : > { %p6819_p3 = scmp.lt.s32.totalorder %s7823_s18, 2  ;;  %s195_s6 = sand.u32 1, %s7819_s17  }
  0x1b   : > { %s7942_s30 = scalar_select %p27_p12, %s7819_s17, %s29_s28  }
  0x1c   : > { %p38_p5 = por %p37_p0, %p36_p13  ;;  %p7946_p7 = por %p129_p2, %p36_p13 }
  0x1d   : > { %s6779_s29 = smul.u32 384, %s7823_s18  ;;  %s196_s24 = scalar_lea.sflag [#allocation3], %s195_s6 }
  0x1e   : > { %s6778_s7 = smul.u32 384, %s195_s6  ;;  %p7955_p9 = pnand %p6819_p3, %p38_p5 }
  0x1f   : > { %s204_s10 = scalar_lea.hbm %s12474_s0, %s6779_s29  ;;  %s7726_s9 = scalar_lea.hbm %s12474_s0, 768 }
  0x20   : > { %s205_s14 = sshll.u32 %s204_s10, 4  ;;  %s199_s20 = scalar_lea.vmem [#allocation2], %s6778_s7  ;;  %s206_s14 = int_to_ptr.hbm [resolvable:$true] %s205_s14 }
  0x21   : > { %s207_s23 = sshll.u32 %s199_s20, 4  ;;  %s7719_s27 = sshra.s32 %s206_s14, 4  ;;  %s208_s23 = int_to_ptr.vmem [resolvable:$true] %s207_s23  ;;  %s7720_s27 = int_to_ptr.hbm [resolvable:$true] %s7719_s27 }
  0x22   : > { %s7721_s28 = scalar_lea.hbm %s7720_s27, 384  ;;  %p7723_p10 = pneg %p7955_p9 }
  0x23   : > { %p7722_p2 = scmp.ne.s32.totalorder %s7720_s27, %s7721_s28  ;;  %p7727_p0 = scmp.lt.s32.totalorder %s7720_s27, %s12474_s0 }
  0x24   : > { %p7728_p3 = scmp.lt.s32.totalorder %s7726_s9, %s7721_s28 }
  0x25   : > { %p7724_p12 = pnand %p7723_p10, %p7722_p2 }
  0x26   : > { %p7729_p5 = por %p7728_p3, %p7727_p0 }
  0x27   : > { %p7725_p13 = pneg %p7724_p12 }
  0x29   : > { %p7730_p11 = pnand %p7729_p5, %p7725_p13 }
  0x2b   : > { %7733 = shalt.err (!%p7730_p11)
}
  0x2c   : > { %s12703_s6 = smov 24   ;;  %s12704_s7 = smov 384  }
  0x2d   : > { %6811 = dma.hbm_to_vmem [thread:$0]  (!%p7955_p9), %s206_s14, 6144, %s208_s23, %s196_s24, %s12704_s7, %s12704_s7, %s12703_s6  }
  0x2e   : > { %219 = sbr.rel (%p7903_p8) target bundleno = 2513 (0x9d1), region = 36 }
  0x33   : > { %s7975_s10 = sand.u32 1, %s7815_s16  }
  0x34   : > { %s6780_s11 = smul.u32 384, %s7975_s10  ;;  %s222_s12 = scalar_lea.sflag [#allocation3], %s7975_s10 }
  0x36   : > { %s7981_s20 = scalar_lea.vmem [#allocation2], %s6780_s11 }
  0x37   : > { %7794 = dma.done.wait (%p7890_p4), %s222_s12, 6144  }
  0x38   : > { %7796 = vsyncadd (%p7890_p4), %s222_s12, 4294961152 }
  0x39   : > { %7798 = dma.done.wait (%p43_p1), [#allocation6], 73728  }
  0x3a   : > { %7800 = vsyncadd (%p43_p1), [#allocation6], 4294893568 }
  0x3b   : > { %7802 = dma.done.wait (%p43_p1), [#allocation9], 48  }
  0x3c   : > { %7804 = vsyncadd (%p43_p1), [#allocation9], 4294967248  ;;  %v449_v0 = vld [vmem:[#allocation5 + $0x438] sm:$0xff]  ;;  %v450_v3 = vld [vmem:[#allocation5 + $0x440] sm:$0xff]  ;;  %s7832_s21 = smov 64   ;;  %vm12611_vm0 = vcmask 523264  }
  0x3d   : > { %v593_v1 = vld [vmem:[#allocation5 + $0x8b8] sm:$0xff]  ;;  %746 = vmatpush.msra.mxu0 %v449_v0  ;;  %v440_v4 = vld [vmem:[#allocation5 + $0x3f0] sm:$0xff]  ;;  %941 = vmatpush.msra.mxu3 %v450_v3  ;;  %v431_v8 = vld [vmem:[#allocation5 + $0x3a8] sm:$0xff]  ;;  %s12143_s26 = scalar_lea.vmem [#allocation10], %s6780_s11  ;;  %s6781_s13 = smul.u32 384, %s7881_s19 }
  0x3e   : > { %v737_v2 = vld [vmem:[#allocation5 + $0xd38] sm:$0xff]  ;;  %811 = vmatpush.msra.mxu1 %v593_v1  ;;  %v584_v5 = vld [vmem:[#allocation5 + $0x870] sm:$0xff]  ;;  %v575_v9 = vld [vmem:[#allocation5 + $0x828] sm:$0xff]  ;;  %s6467_s27 = sshll.u32 %s12143_s26, 4  ;;  %s6455_s28 = scalar_lea.sflag [#allocation4], %s7975_s10  ;;  %s6468_s27 = int_to_ptr.vmem [resolvable:$true] %s6467_s27 }
  0x3f   : > { %876 = vmatpush.msra.mxu2 %v737_v2  ;;  %v728_v6 = vld [vmem:[#allocation5 + $0xcf0] sm:$0xff]  ;;  %v441_v7 = vld [vmem:[#allocation5 + $0x3f8] sm:$0xff]  ;;  %747 = vmatpush.msra.mxu0 %v440_v4  ;;  %v719_v10 = vld [vmem:[#allocation5 + $0xca8] sm:$0xff]  ;;  %s6466_s24 = scalar_lea.hbm %s12478_s4, %s6781_s13  ;;  %s7769_s7 = scalar_lea.hbm %s12478_s4, 768 }
  0x40   : > { %812 = vmatpush.msra.mxu1 %v584_v5  ;;  %v432_v11 = vld [vmem:[#allocation5 + $0x3b0] sm:$0xff]  ;;  %942 = vmatpush.msra.mxu3 %v441_v7  ;;  %v422_v12 = vld [vmem:[#allocation5 + $0x360] sm:$0xff]  ;;  %v423_v15 = vld [vmem:[#allocation5 + $0x368] sm:$0xff]  ;;  %s6469_s19 = sshll.u32 %s6466_s24, 4  ;;  %s6470_s19 = int_to_ptr.hbm [resolvable:$true] %s6469_s19 }
  0x41   : > { %877 = vmatpush.msra.mxu2 %v728_v6  ;;  %v566_v13 = vld [vmem:[#allocation5 + $0x7e0] sm:$0xff]  ;;  %748 = vmatpush.msra.mxu0 %v431_v8  ;;  %v413_v16 = vld [vmem:[#allocation5 + $0x318] sm:$0xff]  ;;  %v404_v20 = vld [vmem:[#allocation5 + $0x2d0] sm:$0xff]  ;;  %s7763_s29 = sshra.s32 %s6470_s19, 4  ;;  %s7764_s29 = int_to_ptr.hbm [resolvable:$true] %s7763_s29 }
  0x42   : > { %813 = vmatpush.msra.mxu1 %v575_v9  ;;  %v710_v14 = vld [vmem:[#allocation5 + $0xc60] sm:$0xff]  ;;  %943 = vmatpush.msra.mxu3 %v432_v11  ;;  %v557_v17 = vld [vmem:[#allocation5 + $0x798] sm:$0xff]  ;;  %v548_v21 = vld [vmem:[#allocation5 + $0x750] sm:$0xff]  ;;  %s7765_s8 = scalar_lea.hbm %s7764_s29, 384  ;;  %p7770_p11 = scmp.lt.s32.totalorder %s7764_s29, %s12478_s4 }
  0x43   : > { %878 = vmatpush.msra.mxu2 %v719_v10  ;;  %749 = vmatpush.msra.mxu0 %v422_v12  ;;  %v701_v18 = vld [vmem:[#allocation5 + $0xc18] sm:$0xff]  ;;  %v414_v19 = vld [vmem:[#allocation5 + $0x320] sm:$0xff]  ;;  %v692_v22 = vld [vmem:[#allocation5 + $0xbd0] sm:$0xff]  ;;  %p7766_p1 = scmp.ne.s32.totalorder %s7764_s29, %s7765_s8  ;;  %p7771_p9 = scmp.lt.s32.totalorder %s7769_s7, %s7765_s8 }
  0x44   : > { %814 = vmatpush.msra.mxu1 %v566_v13  ;;  %944 = vmatpush.msra.mxu3 %v423_v15  ;;  %v405_v23 = vld [vmem:[#allocation5 + $0x2d8] sm:$0xff]  ;;  %v395_v24 = vld [vmem:[#allocation5 + $0x288] sm:$0xff]  ;;  %v396_v27 = vld [vmem:[#allocation5 + $0x290] sm:$0xff] }
  0x45   : > { %879 = vmatpush.msra.mxu2 %v710_v14  ;;  %750 = vmatpush.msra.mxu0 %v413_v16  ;;  %v539_v25 = vld [vmem:[#allocation5 + $0x708] sm:$0xff]  ;;  %v386_v28 = vld [vmem:[#allocation5 + $0x240] sm:$0xff]  ;;  %v377_v32 = vld [vmem:[#allocation5 + $0x1f8] sm:$0xff]  ;;  %p7767_p4 = pnand %p7766_p1, %p7946_p7  ;;  %p7772_p2 = por %p7771_p9, %p7770_p11 }
  0x46   : > { %815 = vmatpush.msra.mxu1 %v557_v17  ;;  %945 = vmatpush.msra.mxu3 %v414_v19  ;;  %v683_v26 = vld [vmem:[#allocation5 + $0xb88] sm:$0xff]  ;;  %v530_v29 = vld [vmem:[#allocation5 + $0x6c0] sm:$0xff]  ;;  %v521_v33 = vld [vmem:[#allocation5 + $0x678] sm:$0xff] }
  0x47   : > { %880 = vmatpush.msra.mxu2 %v701_v18  ;;  %751 = vmatpush.msra.mxu0 %v404_v20  ;;  %v674_v30 = vld [vmem:[#allocation5 + $0xb40] sm:$0xff]  ;;  %v387_v31 = vld [vmem:[#allocation5 + $0x248] sm:$0xff]  ;;  %v665_v34 = vld [vmem:[#allocation5 + $0xaf8] sm:$0xff]  ;;  %p7768_p8 = pneg %p7767_p4 }
  0x48   : > { %816 = vmatpush.msra.mxu1 %v548_v21  ;;  %946 = vmatpush.msra.mxu3 %v405_v23  ;;  %v378_v35 = vld [vmem:[#allocation5 + $0x200] sm:$0xff]  ;;  %v368_v36 = vld [vmem:[#allocation5 + $0x1b0] sm:$0xff]  ;;  %v369_v39 = vld [vmem:[#allocation5 + $0x1b8] sm:$0xff] }
  0x49   : > { %881 = vmatpush.msra.mxu2 %v692_v22  ;;  %752 = vmatpush.msra.mxu0 %v395_v24  ;;  %v512_v37 = vld [vmem:[#allocation5 + $0x630] sm:$0xff]  ;;  %v359_v40 = vld [vmem:[#allocation5 + $0x168] sm:$0xff]  ;;  %v350_v44 = vld [vmem:[#allocation5 + $0x120] sm:$0xff]  ;;  %p7773_p10 = pnand %p7772_p2, %p7768_p8 }
  0x4a   : > { %817 = vmatpush.msra.mxu1 %v539_v25  ;;  %947 = vmatpush.msra.mxu3 %v396_v27  ;;  %v656_v38 = vld [vmem:[#allocation5 + $0xab0] sm:$0xff]  ;;  %v503_v41 = vld [vmem:[#allocation5 + $0x5e8] sm:$0xff]  ;;  %v494_v45 = vld [vmem:[#allocation5 + $0x5a0] sm:$0xff] }
  0x4b   : > { %882 = vmatpush.msra.mxu2 %v683_v26  ;;  %753 = vmatpush.msra.mxu0 %v386_v28  ;;  %v647_v42 = vld [vmem:[#allocation5 + $0xa68] sm:$0xff]  ;;  %v360_v43 = vld [vmem:[#allocation5 + $0x170] sm:$0xff]  ;;  %v638_v46 = vld [vmem:[#allocation5 + $0xa20] sm:$0xff] }
  0x4c   : > { %818 = vmatpush.msra.mxu1 %v530_v29  ;;  %948 = vmatpush.msra.mxu3 %v387_v31  ;;  %v351_v47 = vld [vmem:[#allocation5 + $0x128] sm:$0xff]  ;;  %v341_v48 = vld [vmem:[#allocation5 + $0xd8] sm:$0xff]  ;;  %v342_v51 = vld [vmem:[#allocation5 + $0xe0] sm:$0xff] }
  0x4d   : > { %883 = vmatpush.msra.mxu2 %v674_v30  ;;  %754 = vmatpush.msra.mxu0 %v377_v32  ;;  %v485_v49 = vld [vmem:[#allocation5 + $0x558] sm:$0xff]  ;;  %v332_v52 = vld [vmem:[#allocation5 + $0x90] sm:$0xff]  ;;  %v323_v56 = vld [vmem:[#allocation5 + $0x48] sm:$0xff] }
  0x4e   : > { %819 = vmatpush.msra.mxu1 %v521_v33  ;;  %949 = vmatpush.msra.mxu3 %v378_v35  ;;  %v629_v50 = vld [vmem:[#allocation5 + $0x9d8] sm:$0xff]  ;;  %v476_v53 = vld [vmem:[#allocation5 + $0x510] sm:$0xff]  ;;  %v467_v57 = vld [vmem:[#allocation5 + $0x4c8] sm:$0xff] }
  0x4f   : > { %884 = vmatpush.msra.mxu2 %v665_v34  ;;  %755 = vmatpush.msra.mxu0 %v368_v36  ;;  %v620_v54 = vld [vmem:[#allocation5 + $0x990] sm:$0xff]  ;;  %v333_v55 = vld [vmem:[#allocation5 + $0x98] sm:$0xff]  ;;  %v611_v58 = vld [vmem:[#allocation5 + $0x948] sm:$0xff] }
  0x50   : > { %820 = vmatpush.msra.mxu1 %v512_v37  ;;  %950 = vmatpush.msra.mxu3 %v369_v39  ;;  %v324_v59 = vld [vmem:[#allocation5 + $0x50] sm:$0xff]  ;;  %v314_v60 = vld [vmem:[#allocation5] sm:$0xff]  ;;  %v315_v63 = vld [vmem:[#allocation5 + $0x8] sm:$0xff] }
  0x51   : > { %885 = vmatpush.msra.mxu2 %v656_v38  ;;  %756 = vmatpush.msra.mxu0 %v359_v40  ;;  %v458_v61 = vld [vmem:[#allocation5 + $0x480] sm:$0xff]  ;;  %v7999_v1 = vld [vmem:[%s7981_s20 + $0x8] sm:$0xff]  ;;  %v8002_v2 = vld [vmem:[%s7981_s20 + $0x10] sm:$0xff] }
  0x52   : > { %821 = vmatpush.msra.mxu1 %v503_v41  ;;  %951 = vmatpush.msra.mxu3 %v360_v43  ;;  %v602_v62 = vld [vmem:[#allocation5 + $0x900] sm:$0xff]  ;;  %v451_v3 = vld [vmem:[#allocation5 + $0x448] sm:$0xff]  ;;  %v585_v8 = vld [vmem:[#allocation5 + $0x878] sm:$0xff] }
  0x53   : > { %886 = vmatpush.msra.mxu2 %v647_v42  ;;  %757 = vmatpush.msra.mxu0 %v350_v44  ;;  %v7996_v0 = vld [vmem:[%s7981_s20] sm:$0xff]  ;;  %v595_v6 = vld [vmem:[#allocation5 + $0x8c8] sm:$0xff]  ;;  %v729_v9 = vld [vmem:[#allocation5 + $0xcf8] sm:$0xff] }
  0x54   : > { %822 = vmatpush.msra.mxu1 %v494_v45  ;;  %952 = vmatpush.msra.mxu3 %v351_v47  ;;  %v594_v4 = vld [vmem:[#allocation5 + $0x8c0] sm:$0xff]  ;;  %v433_v11 = vld [vmem:[#allocation5 + $0x3b8] sm:$0xff]  ;;  %v576_v12 = vld [vmem:[#allocation5 + $0x830] sm:$0xff] }
  0x55   : > { %887 = vmatpush.msra.mxu2 %v638_v46  ;;  %758 = vmatpush.msra.mxu0 %v341_v48  ;;  %v738_v5 = vld [vmem:[#allocation5 + $0xd40] sm:$0xff]  ;;  %v720_v13 = vld [vmem:[#allocation5 + $0xcb0] sm:$0xff]  ;;  %v577_v14 = vld [vmem:[#allocation5 + $0x838] sm:$0xff] }
  0x56   : > { %823 = vmatpush.msra.mxu1 %v485_v49  ;;  %953 = vmatpush.msra.mxu3 %v342_v51  ;;  %v442_v7 = vld [vmem:[#allocation5 + $0x400] sm:$0xff]  ;;  %v8009_v15 = vld [vmem:[%s7981_s20 + $0x18] sm:$0xff]  ;;  %v8015_v17 = vld [vmem:[%s7981_s20 + $0x28] sm:$0xff] }
  0x57   : > { %888 = vmatpush.msra.mxu2 %v629_v50  ;;  %759 = vmatpush.msra.mxu0 %v332_v52  ;;  %v586_v10 = vld [vmem:[#allocation5 + $0x880] sm:$0xff]  ;;  %v424_v18 = vld [vmem:[#allocation5 + $0x370] sm:$0xff]  ;;  %v567_v19 = vld [vmem:[#allocation5 + $0x7e8] sm:$0xff] }
  0x58   : > { %824 = vmatpush.msra.mxu1 %v476_v53  ;;  %954 = vmatpush.msra.mxu3 %v333_v55  ;;  %v8012_v16 = vld [vmem:[%s7981_s20 + $0x20] sm:$0xff]  ;;  %v711_v20 = vld [vmem:[#allocation5 + $0xc68] sm:$0xff]  ;;  %v568_v21 = vld [vmem:[#allocation5 + $0x7f0] sm:$0xff] }
  0x59   : > { %889 = vmatpush.msra.mxu2 %v620_v54  ;;  %760 = vmatpush.msra.mxu0 %v323_v56  ;;  %v415_v22 = vld [vmem:[#allocation5 + $0x328] sm:$0xff]  ;;  %v558_v23 = vld [vmem:[#allocation5 + $0x7a0] sm:$0xff]  ;;  %v549_v27 = vld [vmem:[#allocation5 + $0x758] sm:$0xff] }
  0x5a   : > { %825 = vmatpush.msra.mxu1 %v467_v57  ;;  %955 = vmatpush.msra.mxu3 %v324_v59  ;;  %v702_v24 = vld [vmem:[#allocation5 + $0xc20] sm:$0xff]  ;;  %v559_v25 = vld [vmem:[#allocation5 + $0x7a8] sm:$0xff]  ;;  %v693_v28 = vld [vmem:[#allocation5 + $0xbd8] sm:$0xff] }
  0x5b   : > { %890 = vmatpush.msra.mxu2 %v611_v58  ;;  %761 = vmatpush.msra.mxu0 %v314_v60  ;;  %v406_v26 = vld [vmem:[#allocation5 + $0x2e0] sm:$0xff]  ;;  %v8022_v30 = vld [vmem:[%s7981_s20 + $0x30] sm:$0xff]  ;;  %v8025_v31 = vld [vmem:[%s7981_s20 + $0x38] sm:$0xff] }
  0x5c   : > { %826 = vmatpush.msra.mxu1 %v458_v61  ;;  %956 = vmatpush.msra.mxu3 %v315_v63  ;;  %v550_v29 = vld [vmem:[#allocation5 + $0x760] sm:$0xff]  ;;  %v397_v33 = vld [vmem:[#allocation5 + $0x298] sm:$0xff]  ;;  %v540_v34 = vld [vmem:[#allocation5 + $0x710] sm:$0xff] }
  0x5d   : > { %891 = vmatpush.msra.mxu2 %v602_v62  ;;  %762 = vmatmul.f32.vlgmr.msra.gmra.mxu0 %v7996_v0  ;;  %v8028_v32 = vld [vmem:[%s7981_s20 + $0x40] sm:$0xff]  ;;  %v684_v35 = vld [vmem:[#allocation5 + $0xb90] sm:$0xff]  ;;  %v541_v36 = vld [vmem:[#allocation5 + $0x718] sm:$0xff] }
  0x5e   : > { %827 = vmatmul.f32.vlgmr.msra.gmra.mxu1 %v7999_v1  ;;  %892 = vmatmul.f32.vlgmr.msra.gmra.mxu2 %v8002_v2  ;;  %v8035_v37 = vld [vmem:[%s7981_s20 + $0x48] sm:$0xff]  ;;  %v8038_v38 = vld [vmem:[%s7981_s20 + $0x50] sm:$0xff]  ;;  %v8041_v39 = vld [vmem:[%s7981_s20 + $0x58] sm:$0xff] }
  0x5f   : > { %957 = vmatmul.f32.vlgmr.msra.gmra.mxu3 %v7996_v0  ;;  %1136 = vmatpush.msrb.mxu2 %v451_v3  ;;  %v388_v40 = vld [vmem:[#allocation5 + $0x250] sm:$0xff]  ;;  %v531_v41 = vld [vmem:[#allocation5 + $0x6c8] sm:$0xff]  ;;  %v8048_v44 = vld [vmem:[%s7981_s20 + $0x60] sm:$0xff] }
  0x60   : > { %1006 = vmatpush.msrb.mxu0 %v594_v4  ;;  %1071 = vmatpush.msrb.mxu1 %v738_v5  ;;  %v675_v42 = vld [vmem:[#allocation5 + $0xb48] sm:$0xff]  ;;  %v532_v43 = vld [vmem:[#allocation5 + $0x6d0] sm:$0xff]  ;;  %v522_v48 = vld [vmem:[#allocation5 + $0x680] sm:$0xff] }
  0x61   : > { %1201 = vmatpush.msrb.mxu3 %v595_v6  ;;  %1137 = vmatpush.msrb.mxu2 %v442_v7  ;;  %v8051_v45 = vld [vmem:[%s7981_s20 + $0x68] sm:$0xff]  ;;  %v8054_v46 = vld [vmem:[%s7981_s20 + $0x70] sm:$0xff]  ;;  %v666_v49 = vld [vmem:[#allocation5 + $0xb00] sm:$0xff] }
  0x62   : > { %1007 = vmatpush.msrb.mxu0 %v585_v8  ;;  %1072 = vmatpush.msrb.mxu1 %v729_v9  ;;  %v379_v47 = vld [vmem:[#allocation5 + $0x208] sm:$0xff]  ;;  %v8061_v51 = vld [vmem:[%s7981_s20 + $0x78] sm:$0xff]  ;;  %v8064_v52 = vld [vmem:[%s7981_s20 + $0x80] sm:$0xff] }
  0x63   : > { %1202 = vmatpush.msrb.mxu3 %v586_v10  ;;  %1138 = vmatpush.msrb.mxu2 %v433_v11  ;;  %v523_v50 = vld [vmem:[#allocation5 + $0x688] sm:$0xff]  ;;  %v370_v54 = vld [vmem:[#allocation5 + $0x1c0] sm:$0xff]  ;;  %v513_v55 = vld [vmem:[#allocation5 + $0x638] sm:$0xff] }
  0x64   : > { %1008 = vmatpush.msrb.mxu0 %v576_v12  ;;  %1073 = vmatpush.msrb.mxu1 %v720_v13  ;;  %v8067_v53 = vld [vmem:[%s7981_s20 + $0x88] sm:$0xff]  ;;  %v657_v56 = vld [vmem:[#allocation5 + $0xab8] sm:$0xff]  ;;  %v514_v57 = vld [vmem:[#allocation5 + $0x640] sm:$0xff] }
  0x65   : > { %1203 = vmatpush.msrb.mxu3 %v577_v14  ;;  %765 = vmatmul.f32.gmra.mxu0 %v8009_v15  ;;  %v8074_v58 = vld [vmem:[%s7981_s20 + $0x90] sm:$0xff]  ;;  %v8077_v59 = vld [vmem:[%s7981_s20 + $0x98] sm:$0xff]  ;;  %v8080_v60 = vld [vmem:[%s7981_s20 + $0xa0] sm:$0xff] }
  0x66   : > { %830 = vmatmul.f32.gmra.mxu1 %v8012_v16  ;;  %895 = vmatmul.f32.gmra.mxu2 %v8015_v17  ;;  %v361_v61 = vld [vmem:[#allocation5 + $0x178] sm:$0xff]  ;;  %v504_v62 = vld [vmem:[#allocation5 + $0x5f0] sm:$0xff]  ;;  %v8087_v4 = vld [vmem:[%s7981_s20 + $0xa8] sm:$0xff] }
  0x67   : > { %960 = vmatmul.f32.gmra.mxu3 %v8009_v15  ;;  %1139 = vmatpush.msrb.mxu2 %v424_v18  ;;  %v648_v63 = vld [vmem:[#allocation5 + $0xa70] sm:$0xff]  ;;  %v505_v3 = vld [vmem:[#allocation5 + $0x5f8] sm:$0xff]  ;;  %v495_v8 = vld [vmem:[#allocation5 + $0x5a8] sm:$0xff] }
  0x68   : > { %1009 = vmatpush.msrb.mxu0 %v567_v19  ;;  %1074 = vmatpush.msrb.mxu1 %v711_v20  ;;  %v8090_v5 = vld [vmem:[%s7981_s20 + $0xb0] sm:$0xff]  ;;  %v8093_v6 = vld [vmem:[%s7981_s20 + $0xb8] sm:$0xff]  ;;  %v639_v9 = vld [vmem:[#allocation5 + $0xa28] sm:$0xff] }
  0x69   : > { %1204 = vmatpush.msrb.mxu3 %v568_v21  ;;  %1140 = vmatpush.msrb.mxu2 %v415_v22  ;;  %v352_v7 = vld [vmem:[#allocation5 + $0x130] sm:$0xff]  ;;  %v8100_v11 = vld [vmem:[%s7981_s20 + $0xc0] sm:$0xff]  ;;  %v8103_v12 = vld [vmem:[%s7981_s20 + $0xc8] sm:$0xff] }
  0x6a   : > { %1010 = vmatpush.msrb.mxu0 %v558_v23  ;;  %1075 = vmatpush.msrb.mxu1 %v702_v24  ;;  %v496_v10 = vld [vmem:[#allocation5 + $0x5b0] sm:$0xff]  ;;  %v343_v14 = vld [vmem:[#allocation5 + $0xe8] sm:$0xff]  ;;  %v486_v18 = vld [vmem:[#allocation5 + $0x560] sm:$0xff] }
  0x6b   : > { %1205 = vmatpush.msrb.mxu3 %v559_v25  ;;  %1141 = vmatpush.msrb.mxu2 %v406_v26  ;;  %v8106_v13 = vld [vmem:[%s7981_s20 + $0xd0] sm:$0xff]  ;;  %v630_v19 = vld [vmem:[#allocation5 + $0x9e0] sm:$0xff]  ;;  %v487_v20 = vld [vmem:[#allocation5 + $0x568] sm:$0xff] }
  0x6c   : > { %1011 = vmatpush.msrb.mxu0 %v549_v27  ;;  %1076 = vmatpush.msrb.mxu1 %v693_v28  ;;  %v8113_v21 = vld [vmem:[%s7981_s20 + $0xd8] sm:$0xff]  ;;  %v8116_v22 = vld [vmem:[%s7981_s20 + $0xe0] sm:$0xff]  ;;  %v8119_v23 = vld [vmem:[%s7981_s20 + $0xe8] sm:$0xff] }
  0x6d   : > { %1206 = vmatpush.msrb.mxu3 %v550_v29  ;;  %768 = vmatmul.f32.gmra.mxu0 %v8022_v30  ;;  %v334_v24 = vld [vmem:[#allocation5 + $0xa0] sm:$0xff]  ;;  %v477_v25 = vld [vmem:[#allocation5 + $0x518] sm:$0xff]  ;;  %v8126_v28 = vld [vmem:[%s7981_s20 + $0xf0] sm:$0xff] }
  0x6e   : > { %833 = vmatmul.f32.gmra.mxu1 %v8025_v31  ;;  %898 = vmatmul.f32.gmra.mxu2 %v8028_v32  ;;  %v621_v26 = vld [vmem:[#allocation5 + $0x998] sm:$0xff]  ;;  %v478_v27 = vld [vmem:[#allocation5 + $0x520] sm:$0xff] }
  0x6f   : > { %963 = vmatmul.f32.gmra.mxu3 %v8022_v30  ;;  %1142 = vmatpush.msrb.mxu2 %v397_v33  ;;  %v8129_v29 = vld [vmem:[%s7981_s20 + $0xf8] sm:$0xff]  ;;  %v8132_v33 = vld [vmem:[%s7981_s20 + $0x100] sm:$0xff] }
  0x70   : > { %1012 = vmatpush.msrb.mxu0 %v540_v34  ;;  %1077 = vmatpush.msrb.mxu1 %v684_v35  ;;  %v325_v34 = vld [vmem:[#allocation5 + $0x58] sm:$0xff]  ;;  %v468_v35 = vld [vmem:[#allocation5 + $0x4d0] sm:$0xff] }
  0x71   : > { %1207 = vmatpush.msrb.mxu3 %v541_v36  ;;  %1143 = vmatpush.msrb.mxu2 %v388_v40  ;;  %v612_v36 = vld [vmem:[#allocation5 + $0x950] sm:$0xff]  ;;  %v469_v40 = vld [vmem:[#allocation5 + $0x4d8] sm:$0xff] }
  0x72   : > { %1013 = vmatpush.msrb.mxu0 %v531_v41  ;;  %1078 = vmatpush.msrb.mxu1 %v675_v42  ;;  %v8139_v41 = vld [vmem:[%s7981_s20 + $0x108] sm:$0xff]  ;;  %v8142_v42 = vld [vmem:[%s7981_s20 + $0x110] sm:$0xff] }
  0x73   : > { %1208 = vmatpush.msrb.mxu3 %v532_v43  ;;  %1144 = vmatpush.msrb.mxu2 %v379_v47  ;;  %v8145_v43 = vld [vmem:[%s7981_s20 + $0x118] sm:$0xff]  ;;  %v316_v47 = vld [vmem:[#allocation5 + $0x10] sm:$0xff] }
  0x74   : > { %1014 = vmatpush.msrb.mxu0 %v522_v48  ;;  %1079 = vmatpush.msrb.mxu1 %v666_v49  ;;  %v459_v48 = vld [vmem:[#allocation5 + $0x488] sm:$0xff] }
  0x75   : > { %771 = vmatmul.f32.gmra.mxu0 %v8035_v37  ;;  %1209 = vmatpush.msrb.mxu3 %v523_v50  ;;  %v603_v49 = vld [vmem:[#allocation5 + $0x908] sm:$0xff]  ;;  %v8152_v50 = vld [vmem:[%s7981_s20 + $0x120] sm:$0xff] }
  0x76   : > { %836 = vmatmul.f32.gmra.mxu1 %v8038_v38  ;;  %901 = vmatmul.f32.gmra.mxu2 %v8041_v39 }
  0x77   : > { %966 = vmatmul.f32.gmra.mxu3 %v8035_v37  ;;  %1145 = vmatpush.msrb.mxu2 %v370_v54  ;;  %v8155_v54 = vld [vmem:[%s7981_s20 + $0x128] sm:$0xff] }
  0x78   : > { %1015 = vmatpush.msrb.mxu0 %v513_v55  ;;  %1080 = vmatpush.msrb.mxu1 %v657_v56  ;;  %v8158_v55 = vld [vmem:[%s7981_s20 + $0x130] sm:$0xff] }
  0x79   : > { %1210 = vmatpush.msrb.mxu3 %v514_v57  ;;  %1146 = vmatpush.msrb.mxu2 %v361_v61  ;;  %v460_v56 = vld [vmem:[#allocation5 + $0x490] sm:$0xff]  ;;  %v739_v61 = vld [vmem:[#allocation5 + $0xd48] sm:$0xff] }
  0x7a   : > { %1016 = vmatpush.msrb.mxu0 %v504_v62  ;;  %1081 = vmatpush.msrb.mxu1 %v648_v63  ;;  %v596_v57 = vld [vmem:[#allocation5 + $0x8d0] sm:$0xff]  ;;  %v8165_v63 = vld [vmem:[%s7981_s20 + $0x138] sm:$0xff] }
  0x7b   : > { %1211 = vmatpush.msrb.mxu3 %v505_v3  ;;  %1147 = vmatpush.msrb.mxu2 %v352_v7  ;;  %v452_v62 = vld [vmem:[#allocation5 + $0x450] sm:$0xff]  ;;  %v8168_v3 = vld [vmem:[%s7981_s20 + $0x140] sm:$0xff]  ;;  %v8171_v7 = vld [vmem:[%s7981_s20 + $0x148] sm:$0xff] }
  0x7c   : > { %1017 = vmatpush.msrb.mxu0 %v495_v8  ;;  %1082 = vmatpush.msrb.mxu1 %v639_v9  ;;  %v740_v8 = vld [vmem:[#allocation5 + $0xd50] sm:$0xff]  ;;  %v587_v9 = vld [vmem:[#allocation5 + $0x888] sm:$0xff] }
  0x7d   : > { %774 = vmatmul.f32.gmra.mxu0 %v8048_v44  ;;  %1212 = vmatpush.msrb.mxu3 %v496_v10  ;;  %v730_v10 = vld [vmem:[#allocation5 + $0xd00] sm:$0xff] }
  0x7e   : > { %839 = vmatmul.f32.gmra.mxu1 %v8051_v45  ;;  %904 = vmatmul.f32.gmra.mxu2 %v8054_v46 }
  0x7f   : > { %969 = vmatmul.f32.gmra.mxu3 %v8048_v44  ;;  %1148 = vmatpush.msrb.mxu2 %v343_v14  ;;  %v443_v14 = vld [vmem:[#allocation5 + $0x408] sm:$0xff] }
  0x80   : > { %1018 = vmatpush.msrb.mxu0 %v486_v18  ;;  %1083 = vmatpush.msrb.mxu1 %v630_v19  ;;  %v8178_v18 = vld [vmem:[%s7981_s20 + $0x150] sm:$0xff]  ;;  %v8181_v19 = vld [vmem:[%s7981_s20 + $0x158] sm:$0xff] }
  0x81   : > { %1213 = vmatpush.msrb.mxu3 %v487_v20  ;;  %1149 = vmatpush.msrb.mxu2 %v334_v24  ;;  %v8184_v20 = vld [vmem:[%s7981_s20 + $0x160] sm:$0xff]  ;;  %v731_v24 = vld [vmem:[#allocation5 + $0xd08] sm:$0xff] }
  0x82   : > { %1019 = vmatpush.msrb.mxu0 %v477_v25  ;;  %1084 = vmatpush.msrb.mxu1 %v621_v26  ;;  %v578_v25 = vld [vmem:[#allocation5 + $0x840] sm:$0xff]  ;;  %v8191_v26 = vld [vmem:[%s7981_s20 + $0x168] sm:$0xff] }
  0x83   : > { %1214 = vmatpush.msrb.mxu3 %v478_v27  ;;  %1150 = vmatpush.msrb.mxu2 %v325_v34  ;;  %v8194_v27 = vld [vmem:[%s7981_s20 + $0x170] sm:$0xff]  ;;  %v721_v34 = vld [vmem:[#allocation5 + $0xcb8] sm:$0xff] }
  0x84   : > { %1020 = vmatpush.msrb.mxu0 %v468_v35  ;;  %1085 = vmatpush.msrb.mxu1 %v612_v36  ;;  %v434_v35 = vld [vmem:[#allocation5 + $0x3c0] sm:$0xff]  ;;  %v8197_v36 = vld [vmem:[%s7981_s20 + $0x178] sm:$0xff] }
  0x85   : > { %777 = vmatmul.f32.gmra.mxu0 %v8061_v51  ;;  %1215 = vmatpush.msrb.mxu3 %v469_v40  ;;  %v722_v40 = vld [vmem:[#allocation5 + $0xcc0] sm:$0xff] }
  0x86   : > { %842 = vmatmul.f32.gmra.mxu1 %v8064_v52  ;;  %907 = vmatmul.f32.gmra.mxu2 %v8067_v53 }
  0x87   : > { %972 = vmatmul.f32.gmra.mxu3 %v8061_v51  ;;  %1151 = vmatpush.msrb.mxu2 %v316_v47  ;;  %v569_v47 = vld [vmem:[#allocation5 + $0x7f8] sm:$0xff] }
  0x88   : > { %1021 = vmatpush.msrb.mxu0 %v459_v48  ;;  %1086 = vmatpush.msrb.mxu1 %v603_v49 }
  0x89   : > { %1216 = vmatpush.msrb.mxu3 %v460_v56  ;;  %1396 = vmatpush.msra.mxu2 %v596_v57  ;;  %v712_v56 = vld [vmem:[#allocation5 + $0xc70] sm:$0xff]  ;;  %v425_v57 = vld [vmem:[#allocation5 + $0x378] sm:$0xff] }
  0x8a   : > { %1266 = vmatpush.msra.mxu0 %v739_v61  ;;  %1331 = vmatpush.msra.mxu1 %v452_v62  ;;  %v713_v61 = vld [vmem:[#allocation5 + $0xc78] sm:$0xff] }
  0x8b   : > { %1461 = vmatpush.msra.mxu3 %v740_v8  ;;  %1397 = vmatpush.msra.mxu2 %v587_v9  ;;  %v560_v8 = vld [vmem:[#allocation5 + $0x7b0] sm:$0xff] }
  0x8c   : > { %1267 = vmatpush.msra.mxu0 %v730_v10  ;;  %1332 = vmatpush.msra.mxu1 %v443_v14 }
  0x8d   : > { %780 = vmatmul.f32.gmra.mxu0 %v8074_v58  ;;  %1462 = vmatpush.msra.mxu3 %v731_v24 }
  0x8e   : > { %845 = vmatmul.f32.gmra.mxu1 %v8077_v59  ;;  %910 = vmatmul.f32.gmra.mxu2 %v8080_v60 }
  0x8f   : > { %975 = vmatmul.f32.gmra.mxu3 %v8074_v58  ;;  %1398 = vmatpush.msra.mxu2 %v578_v25 }
  0x90   : > { %1268 = vmatpush.msra.mxu0 %v721_v34  ;;  %1333 = vmatpush.msra.mxu1 %v434_v35  ;;  %v703_v34 = vld [vmem:[#allocation5 + $0xc28] sm:$0xff]  ;;  %v416_v35 = vld [vmem:[#allocation5 + $0x330] sm:$0xff] }
  0x91   : > { %1463 = vmatpush.msra.mxu3 %v722_v40  ;;  %1399 = vmatpush.msra.mxu2 %v569_v47 }
  0x92   : > { %1269 = vmatpush.msra.mxu0 %v712_v56  ;;  %1334 = vmatpush.msra.mxu1 %v425_v57  ;;  %v694_v57 = vld [vmem:[#allocation5 + $0xbe0] sm:$0xff] }
  0x93   : > { %1464 = vmatpush.msra.mxu3 %v713_v61  ;;  %1400 = vmatpush.msra.mxu2 %v560_v8  ;;  %v407_v61 = vld [vmem:[#allocation5 + $0x2e8] sm:$0xff] }
  0x94   : > { %1270 = vmatpush.msra.mxu0 %v703_v34  ;;  %1335 = vmatpush.msra.mxu1 %v416_v35  ;;  %v685_v34 = vld [vmem:[#allocation5 + $0xb98] sm:$0xff]  ;;  %v398_v35 = vld [vmem:[#allocation5 + $0x2a0] sm:$0xff] }
  0x95   : > { %783 = vmatmul.f32.gmra.mxu0 %v8087_v4 }
  0x96   : > { %848 = vmatmul.f32.gmra.mxu1 %v8090_v5  ;;  %913 = vmatmul.f32.gmra.mxu2 %v8093_v6 }
  0x97   : > { %978 = vmatmul.f32.gmra.mxu3 %v8087_v4  ;;  %1271 = vmatpush.msra.mxu0 %v694_v57  ;;  %v389_v57 = vld [vmem:[#allocation5 + $0x258] sm:$0xff] }
  0x98   : > { %1336 = vmatpush.msra.mxu1 %v407_v61 }
  0x99   : > { %1272 = vmatpush.msra.mxu0 %v685_v34 }
  0x9a   : > { %1337 = vmatpush.msra.mxu1 %v398_v35 }
  0x9c   : > { %1338 = vmatpush.msra.mxu1 %v389_v57 }
  0x9d   : > { %786 = vmatmul.f32.gmra.mxu0 %v8100_v11 }
  0x9e   : > { %851 = vmatmul.f32.gmra.mxu1 %v8103_v12  ;;  %916 = vmatmul.f32.gmra.mxu2 %v8106_v13 }
  0x9f   : > { %981 = vmatmul.f32.gmra.mxu3 %v8100_v11 }
  0xa5   : > { %789 = vmatmul.f32.gmra.mxu0 %v8113_v21 }
  0xa6   : > { %854 = vmatmul.f32.gmra.mxu1 %v8116_v22  ;;  %919 = vmatmul.f32.gmra.mxu2 %v8119_v23 }
  0xa7   : > { %984 = vmatmul.f32.gmra.mxu3 %v8113_v21 }
  0xad   : > { %792 = vmatmul.f32.gmra.mxu0 %v8126_v28 }
  0xae   : > { %857 = vmatmul.f32.gmra.mxu1 %v8129_v29  ;;  %922 = vmatmul.f32.gmra.mxu2 %v8132_v33 }
  0xaf   : > { %987 = vmatmul.f32.gmra.mxu3 %v8126_v28 }
  0xb5   : > { %795 = vmatmul.f32.gmra.mxu0 %v8139_v41 }
  0xb6   : > { %860 = vmatmul.f32.gmra.mxu1 %v8142_v42  ;;  %925 = vmatmul.f32.gmra.mxu2 %v8145_v43 }
  0xb7   : > { %990 = vmatmul.f32.gmra.mxu3 %v8139_v41 }
  0xbd   : > { %798 = vmatmul.f32.gmra.mxu0 %v8152_v50 }
  0xbe   : > { %863 = vmatmul.f32.gmra.mxu1 %v8155_v54  ;;  %928 = vmatmul.f32.gmra.mxu2 %v8158_v55 }
  0xbf   : > { %993 = vmatmul.f32.gmra.mxu3 %v8152_v50 }
  0xc5   : > { %801 = vmatmul.f32.gmra.mxu0 %v8165_v63 }
  0xc6   : > { %866 = vmatmul.f32.gmra.mxu1 %v8168_v3  ;;  %931 = vmatmul.f32.gmra.mxu2 %v8171_v7 }
  0xc7   : > { %996 = vmatmul.f32.gmra.mxu3 %v8165_v63 }
  0xcd   : > { %804 = vmatmul.f32.gmra.mxu0 %v8178_v18 }
  0xce   : > { %869 = vmatmul.f32.gmra.mxu1 %v8181_v19  ;;  %934 = vmatmul.f32.gmra.mxu2 %v8184_v20 }
  0xcf   : > { %999 = vmatmul.f32.gmra.mxu3 %v8178_v18 }
  0xd5   : > { %807 = vmatmul.f32.gmra.mxu0 %v8191_v26 }
  0xd6   : > { %872 = vmatmul.f32.gmra.mxu1 %v8194_v27  ;;  %937 = vmatmul.f32.gmra.mxu2 %v8197_v36 }
  0xd7   : > { %1002 = vmatmul.f32.gmra.mxu3 %v8191_v26 }
  0xda   : > { %v763_v48 = vpop.f32.mrf.mxu0 }
  0xdb   : > { %v828_v49 = vpop.f32.mrf.mxu1 }
  0xdc   : > { %v829_v62 = vadd.f32 %v828_v49, %v763_v48 }
  0xdd   : > { %1022 = vmatmul.f32.vlgmr.msrb.gmra.mxu0 %v7999_v1 }
  0xde   : > { %1087 = vmatmul.f32.vlgmr.msrb.gmra.mxu1 %v8002_v2  ;;  %1152 = vmatmul.f32.vlgmr.msrb.gmra.mxu2 %v7996_v0  ;;  %v704_v0 = vld [vmem:[#allocation5 + $0xc30] sm:$0xff]  ;;  %v551_v2 = vld [vmem:[#allocation5 + $0x768] sm:$0xff] }
  0xdf   : > { %1217 = vmatmul.f32.vlgmr.msrb.gmra.mxu3 %v7999_v1  ;;  %1401 = vmatpush.msra.mxu2 %v551_v2 }
  0xe0   : > { %1465 = vmatpush.msra.mxu3 %v704_v0 }
  0xe1   : > { %v893_v9 = vpop.f32.mrf.mxu2 }
  0xe2   : > { %v8207_v10 = vpop.f32.mrf.mxu3  ;;  %v766_v14 = vpop.f32.mrf.mxu0  ;;  %v8209_v25 = vadd.f32 %v893_v9, %v829_v62 }
  0xe3   : > { %v831_v24 = vpop.f32.mrf.mxu1 }
  0xe4   : > { %12705 = vst [vmem:[#allocation15_spill] sm:$0xff] %v8209_v25  ;;  %2971 = vrot.lane.b32.xlu2 %v8209_v25, %s7832_s21  ;;  %v832_v1 = vadd.f32 %v831_v24, %v766_v14 }
  0xe5   : > { %1025 = vmatmul.f32.gmra.mxu0 %v8012_v16 }
  0xe6   : > { %1090 = vmatmul.f32.gmra.mxu1 %v8015_v17  ;;  %1155 = vmatmul.f32.gmra.mxu2 %v8009_v15  ;;  %v695_v15 = vld [vmem:[#allocation5 + $0xbe8] sm:$0xff]  ;;  %v542_v17 = vld [vmem:[#allocation5 + $0x720] sm:$0xff] }
  0xe7   : > { %1220 = vmatmul.f32.gmra.mxu3 %v8012_v16  ;;  %1402 = vmatpush.msra.mxu2 %v542_v17  ;;  %v380_v17 = vld [vmem:[#allocation5 + $0x210] sm:$0xff] }
  0xe8   : > { %1466 = vmatpush.msra.mxu3 %v695_v15  ;;  %1339 = vmatpush.msra.mxu1 %v380_v17 }
  0xe9   : > { %v896_v40 = vpop.f32.mrf.mxu2 }
  0xea   : > { %v8217_v47 = vpop.f32.mrf.mxu3  ;;  %v769_v48 = vpop.f32.mrf.mxu0  ;;  %v8219_v56 = vadd.f32 %v896_v40, %v832_v1 }
  0xeb   : > { %v834_v49 = vpop.f32.mrf.mxu1 }
  0xec   : > { %12706 = vst [vmem:[#allocation16_spill] sm:$0xff] %v8219_v56  ;;  %2973 = vrot.lane.b32.xlu0 %v8219_v56, %s7832_s21  ;;  %v835_v16 = vadd.f32 %v834_v49, %v769_v48  ;;  %v676_v49 = vld [vmem:[#allocation5 + $0xb50] sm:$0xff]  ;;  %v319_v56 = vld [vmem:[#allocation5 + $0x28] sm:$0xff] }
  0xed   : > { %1028 = vmatmul.f32.gmra.mxu0 %v8025_v31 }
  0xee   : > { %1093 = vmatmul.f32.gmra.mxu1 %v8028_v32  ;;  %1158 = vmatmul.f32.gmra.mxu2 %v8022_v30  ;;  %v686_v30 = vld [vmem:[#allocation5 + $0xba0] sm:$0xff]  ;;  %v533_v32 = vld [vmem:[#allocation5 + $0x6d8] sm:$0xff] }
  0xef   : > { %1223 = vmatmul.f32.gmra.mxu3 %v8025_v31  ;;  %1403 = vmatpush.msra.mxu2 %v533_v32 }
  0xf0   : > { %1467 = vmatpush.msra.mxu3 %v686_v30  ;;  %1273 = vmatpush.msra.mxu0 %v676_v49 }
  0xf1   : > { %v899_v62 = vpop.f32.mrf.mxu2 }
  0xf2   : > { %v8227_v8 = vpop.f32.mrf.mxu3  ;;  %v8229_v9 = vadd.f32 %v899_v62, %v835_v16  ;;  %v772_v14 = vpop.f32.mrf.mxu0  ;;  %v667_v16 = vld [vmem:[#allocation5 + $0xb08] sm:$0xff] }
  0xf3   : > { %v837_v24 = vpop.f32.mrf.mxu1  ;;  %1274 = vmatpush.msra.mxu0 %v667_v16 }
  0xf4   : > { %12707 = vst [vmem:[#allocation17_spill] sm:$0xff] %v8229_v9  ;;  %2975 = vrot.lane.b32.xlu0 %v8229_v9, %s7832_s21  ;;  %v838_v31 = vadd.f32 %v837_v24, %v772_v14 }
  0xf5   : > { %1031 = vmatmul.f32.gmra.mxu0 %v8038_v38 }
  0xf6   : > { %1096 = vmatmul.f32.gmra.mxu1 %v8041_v39  ;;  %1161 = vmatmul.f32.gmra.mxu2 %v8035_v37  ;;  %v677_v37 = vld [vmem:[#allocation5 + $0xb58] sm:$0xff]  ;;  %v524_v39 = vld [vmem:[#allocation5 + $0x690] sm:$0xff] }
  0xf7   : > { %1226 = vmatmul.f32.gmra.mxu3 %v8038_v38  ;;  %1404 = vmatpush.msra.mxu2 %v524_v39  ;;  %v649_v39 = vld [vmem:[#allocation5 + $0xa78] sm:$0xff] }
  0xf8   : > { %1468 = vmatpush.msra.mxu3 %v677_v37 }
  0xf9   : > { %v902_v0 = vpop.f32.mrf.mxu2 }
  0xfa   : > { %v8237_v1 = vpop.f32.mrf.mxu3  ;;  %v8239_v2 = vadd.f32 %v902_v0, %v838_v31  ;;  %v775_v40 = vpop.f32.mrf.mxu0  ;;  %v658_v0 = vld [vmem:[#allocation5 + $0xac0] sm:$0xff] }
  0xfb   : > { %v840_v48 = vpop.f32.mrf.mxu1  ;;  %1275 = vmatpush.msra.mxu0 %v658_v0 }
  0xfc   : > { %12708 = vst [vmem:[#allocation18_spill] sm:$0xff] %v8239_v2  ;;  %2977 = vrot.lane.b32.xlu0 %v8239_v2, %s7832_s21  ;;  %v841_v38 = vadd.f32 %v840_v48, %v775_v40  ;;  %v371_v40 = vld [vmem:[#allocation5 + $0x1c8] sm:$0xff] }
  0xfd   : > { %1034 = vmatmul.f32.gmra.mxu0 %v8051_v45  ;;  %1340 = vmatpush.msra.mxu1 %v371_v40  ;;  %v8587_v2 = vld [vmem:[%s7981_s20 + $0x108] sm:$0xff] }
  0xfe   : > { %1099 = vmatmul.f32.gmra.mxu1 %v8054_v46  ;;  %1164 = vmatmul.f32.gmra.mxu2 %v8048_v44  ;;  %v668_v44 = vld [vmem:[#allocation5 + $0xb10] sm:$0xff]  ;;  %v515_v46 = vld [vmem:[#allocation5 + $0x648] sm:$0xff] }
  0xff   : > { %1229 = vmatmul.f32.gmra.mxu3 %v8051_v45  ;;  %1405 = vmatpush.msra.mxu2 %v515_v46  ;;  %v353_v46 = vld [vmem:[#allocation5 + $0x138] sm:$0xff] }
 0x100   : > { %1469 = vmatpush.msra.mxu3 %v668_v44  ;;  %1276 = vmatpush.msra.mxu0 %v649_v39 }
 0x101   : > { %v905_v61 = vpop.f32.mrf.mxu2 }
 0x102   : > { %v8247_v15 = vpop.f32.mrf.mxu3  ;;  %v8249_v62 = vadd.f32 %v905_v61, %v841_v38  ;;  %v778_v14 = vpop.f32.mrf.mxu0  ;;  %v362_v61 = vld [vmem:[#allocation5 + $0x180] sm:$0xff] }
 0x103   : > { %v843_v24 = vpop.f32.mrf.mxu1  ;;  %1341 = vmatpush.msra.mxu1 %v362_v61  ;;  %v622_v61 = vld [vmem:[#allocation5 + $0x9a0] sm:$0xff] }
 0x104   : > { %12709 = vst [vmem:[#allocation19_spill] sm:$0xff] %v8249_v62  ;;  %2979 = vrot.lane.b32.xlu2 %v8249_v62, %s7832_s21  ;;  %v844_v45 = vadd.f32 %v843_v24, %v778_v14 }
 0x105   : > { %1037 = vmatmul.f32.gmra.mxu0 %v8064_v52  ;;  %1342 = vmatpush.msra.mxu1 %v353_v46  ;;  %v326_v46 = vld [vmem:[#allocation5 + $0x60] sm:$0xff] }
 0x106   : > { %1102 = vmatmul.f32.gmra.mxu1 %v8067_v53  ;;  %1167 = vmatmul.f32.gmra.mxu2 %v8061_v51  ;;  %v659_v51 = vld [vmem:[#allocation5 + $0xac8] sm:$0xff]  ;;  %v506_v53 = vld [vmem:[#allocation5 + $0x600] sm:$0xff] }
 0x107   : > { %1232 = vmatmul.f32.gmra.mxu3 %v8064_v52  ;;  %1406 = vmatpush.msra.mxu2 %v506_v53 }
 0x108   : > { %1470 = vmatpush.msra.mxu3 %v659_v51  ;;  %v631_v51 = vld [vmem:[#allocation5 + $0x9e8] sm:$0xff] }
 0x109   : > { %v908_v34 = vpop.f32.mrf.mxu2 }
 0x10a   : > { %v8257_v35 = vpop.f32.mrf.mxu3  ;;  %v8259_v30 = vadd.f32 %v908_v34, %v844_v45  ;;  %v781_v31 = vpop.f32.mrf.mxu0  ;;  %v640_v45 = vld [vmem:[#allocation5 + $0xa30] sm:$0xff] }
 0x10b   : > { %v846_v32 = vpop.f32.mrf.mxu1  ;;  %1277 = vmatpush.msra.mxu0 %v640_v45  ;;  %v613_v45 = vld [vmem:[#allocation5 + $0x958] sm:$0xff] }
 0x10c   : > { %12710 = vst [vmem:[#allocation20_spill] sm:$0xff] %v8259_v30  ;;  %2981 = vrot.lane.b32.xlu0 %v8259_v30, %s7832_s21  ;;  %v847_v52 = vadd.f32 %v846_v32, %v781_v31 }
 0x10d   : > { %1040 = vmatmul.f32.gmra.mxu0 %v8077_v59 }
 0x10e   : > { %1105 = vmatmul.f32.gmra.mxu1 %v8080_v60  ;;  %1170 = vmatmul.f32.gmra.mxu2 %v8074_v58  ;;  %v650_v58 = vld [vmem:[#allocation5 + $0xa80] sm:$0xff]  ;;  %v497_v60 = vld [vmem:[#allocation5 + $0x5b8] sm:$0xff] }
 0x10f   : > { %1235 = vmatmul.f32.gmra.mxu3 %v8077_v59  ;;  %1407 = vmatpush.msra.mxu2 %v497_v60 }
 0x110   : > { %1471 = vmatpush.msra.mxu3 %v650_v58  ;;  %1278 = vmatpush.msra.mxu0 %v631_v51  ;;  %v335_v58 = vld [vmem:[#allocation5 + $0xa8] sm:$0xff]  ;;  %v317_v51 = vld [vmem:[#allocation5 + $0x18] sm:$0xff] }
 0x111   : > { %v911_v48 = vpop.f32.mrf.mxu2 }
 0x112   : > { %v8267_v49 = vpop.f32.mrf.mxu3  ;;  %v8269_v57 = vadd.f32 %v911_v48, %v847_v52  ;;  %v784_v37 = vpop.f32.mrf.mxu0  ;;  %v344_v52 = vld [vmem:[#allocation5 + $0xf0] sm:$0xff]  ;;  %1279 = vmatpush.msra.mxu0 %v622_v61 }
 0x113   : > { %v849_v38 = vpop.f32.mrf.mxu1  ;;  %1343 = vmatpush.msra.mxu1 %v344_v52 }
 0x114   : > { %12711 = vst [vmem:[#allocation21_spill] sm:$0xff] %v8269_v57  ;;  %2983 = vrot.lane.b32.xlu0 %v8269_v57, %s7832_s21  ;;  %v850_v59 = vadd.f32 %v849_v38, %v784_v37  ;;  %1280 = vmatpush.msra.mxu0 %v613_v45  ;;  %v8567_v57 = vld [vmem:[%s7981_s20 + $0xf0] sm:$0xff] }
 0x115   : > { %1043 = vmatmul.f32.gmra.mxu0 %v8090_v5  ;;  %1344 = vmatpush.msra.mxu1 %v335_v58 }
 0x116   : > { %1108 = vmatmul.f32.gmra.mxu1 %v8093_v6  ;;  %1173 = vmatmul.f32.gmra.mxu2 %v8087_v4  ;;  %v641_v4 = vld [vmem:[#allocation5 + $0xa38] sm:$0xff]  ;;  %v488_v6 = vld [vmem:[#allocation5 + $0x570] sm:$0xff] }
 0x117   : > { %1238 = vmatmul.f32.gmra.mxu3 %v8090_v5  ;;  %1408 = vmatpush.msra.mxu2 %v488_v6 }
 0x118   : > { %1472 = vmatpush.msra.mxu3 %v641_v4  ;;  %1345 = vmatpush.msra.mxu1 %v326_v46 }
 0x119   : > { %v914_v16 = vpop.f32.mrf.mxu2 }
 0x11a   : > { %v8277_v17 = vpop.f32.mrf.mxu3  ;;  %v8279_v14 = vadd.f32 %v914_v16, %v850_v59  ;;  %v787_v24 = vpop.f32.mrf.mxu0  ;;  %1346 = vmatpush.msra.mxu1 %v317_v51 }
 0x11b   : > { %v852_v44 = vpop.f32.mrf.mxu1 }
 0x11c   : > { %12712 = vst [vmem:[#allocation22_spill] sm:$0xff] %v8279_v14  ;;  %2985 = vrot.lane.b32.xlu0 %v8279_v14, %s7832_s21  ;;  %v853_v5 = vadd.f32 %v852_v44, %v787_v24 }
 0x11d   : > { %1046 = vmatmul.f32.gmra.mxu0 %v8103_v12 }
 0x11e   : > { %1111 = vmatmul.f32.gmra.mxu1 %v8106_v13  ;;  %1176 = vmatmul.f32.gmra.mxu2 %v8100_v11  ;;  %v632_v11 = vld [vmem:[#allocation5 + $0x9f0] sm:$0xff]  ;;  %v479_v13 = vld [vmem:[#allocation5 + $0x528] sm:$0xff] }
 0x11f   : > { %1241 = vmatmul.f32.gmra.mxu3 %v8103_v12  ;;  %1409 = vmatpush.msra.mxu2 %v479_v13 }
 0x120   : > { %1473 = vmatpush.msra.mxu3 %v632_v11 }
 0x121   : > { %v917_v34 = vpop.f32.mrf.mxu2 }
 0x122   : > { %v8287_v31 = vpop.f32.mrf.mxu3  ;;  %v790_v32 = vpop.f32.mrf.mxu0  ;;  %v8289_v40 = vadd.f32 %v917_v34, %v853_v5 }
 0x123   : > { %v855_v0 = vpop.f32.mrf.mxu1 }
 0x124   : > { %12713 = vst [vmem:[#allocation23_spill] sm:$0xff] %v8289_v40  ;;  %2987 = vrot.lane.b32.xlu1 %v8289_v40, %s7832_s21  ;;  %v856_v12 = vadd.f32 %v855_v0, %v790_v32  ;;  %v604_v0 = vld [vmem:[#allocation5 + $0x910] sm:$0xff] }
 0x125   : > { %1049 = vmatmul.f32.gmra.mxu0 %v8116_v22 }
 0x126   : > { %1114 = vmatmul.f32.gmra.mxu1 %v8119_v23  ;;  %1179 = vmatmul.f32.gmra.mxu2 %v8113_v21  ;;  %v623_v21 = vld [vmem:[#allocation5 + $0x9a8] sm:$0xff]  ;;  %v470_v23 = vld [vmem:[#allocation5 + $0x4e0] sm:$0xff] }
 0x127   : > { %1244 = vmatmul.f32.gmra.mxu3 %v8116_v22  ;;  %1410 = vmatpush.msra.mxu2 %v470_v23 }
 0x128   : > { %1474 = vmatpush.msra.mxu3 %v623_v21  ;;  %1281 = vmatpush.msra.mxu0 %v604_v0 }
 0x129   : > { %v920_v53 = vpop.f32.mrf.mxu2 }
 0x12a   : > { %v8297_v48 = vpop.f32.mrf.mxu3  ;;  %v8299_v37 = vadd.f32 %v920_v53, %v856_v12  ;;  %v793_v38 = vpop.f32.mrf.mxu0 }
 0x12b   : > { %v858_v39 = vpop.f32.mrf.mxu1 }
 0x12c   : > { %12714 = vst [vmem:[#allocation24_spill] sm:$0xff] %v8299_v37  ;;  %2989 = vrot.lane.b32.xlu0 %v8299_v37, %s7832_s21  ;;  %v859_v22 = vadd.f32 %v858_v39, %v793_v38  ;;  %v453_v38 = vld [vmem:[#allocation5 + $0x458] sm:$0xff] }
 0x12d   : > { %1052 = vmatmul.f32.gmra.mxu0 %v8129_v29  ;;  %v597_v39 = vld [vmem:[#allocation5 + $0x8d8] sm:$0xff] }
 0x12e   : > { %1117 = vmatmul.f32.gmra.mxu1 %v8132_v33  ;;  %1182 = vmatmul.f32.gmra.mxu2 %v8126_v28  ;;  %v614_v28 = vld [vmem:[#allocation5 + $0x960] sm:$0xff]  ;;  %v461_v33 = vld [vmem:[#allocation5 + $0x498] sm:$0xff] }
 0x12f   : > { %1247 = vmatmul.f32.gmra.mxu3 %v8129_v29  ;;  %1411 = vmatpush.msra.mxu2 %v461_v33  ;;  %v435_v33 = vld [vmem:[#allocation5 + $0x3c8] sm:$0xff]  ;;  %v8547_v37 = vld [vmem:[%s7981_s20 + $0xd8] sm:$0xff] }
 0x130   : > { %1475 = vmatpush.msra.mxu3 %v614_v28  ;;  %1526 = vmatpush.msrb.mxu0 %v453_v38 }
 0x131   : > { %v923_v59 = vpop.f32.mrf.mxu2  ;;  %1591 = vmatpush.msrb.mxu1 %v597_v39 }
 0x132   : > { %v8307_v60 = vpop.f32.mrf.mxu3  ;;  %v8309_v16 = vadd.f32 %v923_v59, %v859_v22  ;;  %v796_v24 = vpop.f32.mrf.mxu0  ;;  %v444_v59 = vld [vmem:[#allocation5 + $0x410] sm:$0xff] }
 0x133   : > { %v861_v44 = vpop.f32.mrf.mxu1  ;;  %1527 = vmatpush.msrb.mxu0 %v444_v59 }
 0x134   : > { %12715 = vst [vmem:[#allocation25_spill] sm:$0xff] %v8309_v16  ;;  %2991 = vrot.lane.b32.xlu1 %v8309_v16, %s7832_s21  ;;  %v862_v29 = vadd.f32 %v861_v44, %v796_v24  ;;  %v588_v24 = vld [vmem:[#allocation5 + $0x890] sm:$0xff] }
 0x135   : > { %1055 = vmatmul.f32.gmra.mxu0 %v8142_v42  ;;  %1592 = vmatpush.msrb.mxu1 %v588_v24  ;;  %v8387_v24 = vld [vmem:[%s7981_s20 + $0x18] sm:$0xff] }
 0x136   : > { %1120 = vmatmul.f32.gmra.mxu1 %v8145_v43  ;;  %1185 = vmatmul.f32.gmra.mxu2 %v8139_v41  ;;  %v605_v41 = vld [vmem:[#allocation5 + $0x918] sm:$0xff] }
 0x137   : > { %1250 = vmatmul.f32.gmra.mxu3 %v8142_v42  ;;  %v741_v43 = vld [vmem:[#allocation5 + $0xd58] sm:$0xff]  ;;  %1528 = vmatpush.msrb.mxu0 %v435_v33 }
 0x138   : > { %1476 = vmatpush.msra.mxu3 %v605_v41  ;;  %1656 = vmatpush.msrb.mxu2 %v741_v43  ;;  %v427_v43 = vld [vmem:[#allocation5 + $0x388] sm:$0xff] }
 0x139   : > { %v926_v4 = vpop.f32.mrf.mxu2 }
 0x13a   : > { %v8317_v5 = vpop.f32.mrf.mxu3  ;;  %v8319_v6 = vadd.f32 %v926_v4, %v862_v29  ;;  %v799_v34 = vpop.f32.mrf.mxu0  ;;  %v579_v4 = vld [vmem:[#allocation5 + $0x848] sm:$0xff] }
 0x13b   : > { %v864_v32 = vpop.f32.mrf.mxu1  ;;  %1593 = vmatpush.msrb.mxu1 %v579_v4 }
 0x13c   : > { %12716 = vst [vmem:[#allocation26_spill] sm:$0xff] %v8319_v6  ;;  %2993 = vrot.lane.b32.xlu0 %v8319_v6, %s7832_s21  ;;  %v865_v42 = vadd.f32 %v864_v32, %v799_v34 }
 0x13d   : > { %1058 = vmatmul.f32.gmra.mxu0 %v8155_v54 }
 0x13e   : > { %1123 = vmatmul.f32.gmra.mxu1 %v8158_v55  ;;  %1188 = vmatmul.f32.gmra.mxu2 %v8152_v50  ;;  %v454_v50 = vld [vmem:[#allocation5 + $0x460] sm:$0xff]  ;;  %v732_v55 = vld [vmem:[#allocation5 + $0xd10] sm:$0xff] }
 0x13f   : > { %1253 = vmatmul.f32.gmra.mxu3 %v8155_v54  ;;  %1657 = vmatpush.msrb.mxu2 %v732_v55 }
 0x140   : > { %1721 = vmatpush.msrb.mxu3 %v454_v50 }
 0x141   : > { %v929_v52 = vpop.f32.mrf.mxu2 }
 0x142   : > { %v8327_v11 = vpop.f32.mrf.mxu3  ;;  %v8329_v12 = vadd.f32 %v929_v52, %v865_v42  ;;  %v802_v13 = vpop.f32.mrf.mxu0  ;;  %v570_v42 = vld [vmem:[#allocation5 + $0x800] sm:$0xff] }
 0x143   : > { %v867_v53 = vpop.f32.mrf.mxu1  ;;  %1594 = vmatpush.msrb.mxu1 %v570_v42  ;;  %v8415_v42 = vld [vmem:[%s7981_s20 + $0x38] sm:$0xff] }
 0x144   : > { %12717 = vst [vmem:[#allocation27_spill] sm:$0xff] %v8329_v12  ;;  %2995 = vrot.lane.b32.xlu0 %v8329_v12, %s7832_s21  ;;  %v868_v54 = vadd.f32 %v867_v53, %v802_v13  ;;  %v8373_v13 = vld [vmem:[%s7981_s20 + $0x8] sm:$0xff]  ;;  %v705_v53 = vld [vmem:[#allocation5 + $0xc38] sm:$0xff]  ;;  %v8527_v12 = vld [vmem:[%s7981_s20 + $0xc0] sm:$0xff] }
 0x145   : > { %1061 = vmatmul.f32.gmra.mxu0 %v8168_v3 }
 0x146   : > { %1126 = vmatmul.f32.gmra.mxu1 %v8171_v7  ;;  %1191 = vmatmul.f32.gmra.mxu2 %v8165_v63  ;;  %v445_v63 = vld [vmem:[#allocation5 + $0x418] sm:$0xff]  ;;  %v723_v7 = vld [vmem:[#allocation5 + $0xcc8] sm:$0xff] }
 0x147   : > { %1256 = vmatmul.f32.gmra.mxu3 %v8168_v3  ;;  %1658 = vmatpush.msrb.mxu2 %v723_v7  ;;  %v8395_v7 = vld [vmem:[%s7981_s20 + $0x20] sm:$0xff] }
 0x148   : > { %1722 = vmatpush.msrb.mxu3 %v445_v63  ;;  %v8391_v63 = vld [vmem:[%s7981_s20 + $0x28] sm:$0xff] }
 0x149   : > { %v932_v61 = vpop.f32.mrf.mxu2 }
 0x14a   : > { %v8337_v58 = vpop.f32.mrf.mxu3  ;;  %v8339_v21 = vadd.f32 %v932_v61, %v868_v54  ;;  %v805_v22 = vpop.f32.mrf.mxu0  ;;  %v417_v61 = vld [vmem:[#allocation5 + $0x338] sm:$0xff] }
 0x14b   : > { %v870_v23 = vpop.f32.mrf.mxu1 }
 0x14c   : > { %12718 = vst [vmem:[#allocation28_spill] sm:$0xff] %v8339_v21  ;;  %2997 = vrot.lane.b32.xlu0 %v8339_v21, %s7832_s21  ;;  %v871_v3 = vadd.f32 %v870_v23, %v805_v22  ;;  %v561_v22 = vld [vmem:[#allocation5 + $0x7b8] sm:$0xff] }
 0x14d   : > { %1064 = vmatmul.f32.gmra.mxu0 %v8181_v19  ;;  %1595 = vmatpush.msrb.mxu1 %v561_v22 }
 0x14e   : > { %1129 = vmatmul.f32.gmra.mxu1 %v8184_v20  ;;  %1194 = vmatmul.f32.gmra.mxu2 %v8178_v18  ;;  %v436_v18 = vld [vmem:[#allocation5 + $0x3d0] sm:$0xff]  ;;  %v714_v20 = vld [vmem:[#allocation5 + $0xc80] sm:$0xff] }
 0x14f   : > { %1259 = vmatmul.f32.gmra.mxu3 %v8181_v19  ;;  %1659 = vmatpush.msrb.mxu2 %v714_v20 }
 0x150   : > { %1723 = vmatpush.msrb.mxu3 %v436_v18  ;;  %v408_v18 = vld [vmem:[#allocation5 + $0x2f0] sm:$0xff] }
 0x151   : > { %v935_v44 = vpop.f32.mrf.mxu2  ;;  %1660 = vmatpush.msrb.mxu2 %v705_v53 }
 0x152   : > { %v8347_v45 = vpop.f32.mrf.mxu3  ;;  %v8349_v46 = vadd.f32 %v935_v44, %v871_v3  ;;  %v808_v28 = vpop.f32.mrf.mxu0  ;;  %1724 = vmatpush.msrb.mxu3 %v427_v43  ;;  %v418_v3 = vld [vmem:[#allocation5 + $0x340] sm:$0xff] }
 0x153   : > { %v873_v29 = vpop.f32.mrf.mxu1 }
 0x154   : > { %12719 = vst [vmem:[#allocation29_spill] sm:$0xff] %v8349_v46  ;;  %2999 = vrot.lane.b32.xlu0 %v8349_v46, %s7832_s21  ;;  %v874_v19 = vadd.f32 %v873_v29, %v808_v28  ;;  %1725 = vmatpush.msrb.mxu3 %v418_v3  ;;  %v8431_v3 = vld [vmem:[%s7981_s20 + $0x48] sm:$0xff] }
 0x155   : > { %1067 = vmatmul.f32.gmra.mxu0 %v8194_v27 }
 0x156   : > { %1132 = vmatmul.f32.gmra.mxu1 %v8197_v36  ;;  %1197 = vmatmul.f32.gmra.mxu2 %v8191_v26  ;;  %v426_v36 = vld [vmem:[#allocation5 + $0x380] sm:$0xff] }
 0x157   : > { %1262 = vmatmul.f32.gmra.mxu3 %v8194_v27  ;;  %1529 = vmatpush.msrb.mxu0 %v426_v36  ;;  %v8364_v26 = vld [vmem:[%s7981_s20] sm:$0xff]  ;;  %v8368_v27 = vld [vmem:[%s7981_s20 + $0x10] sm:$0xff]  ;;  %v409_v36 = vld [vmem:[#allocation5 + $0x2f8] sm:$0xff] }
 0x158   : > { %1726 = vmatpush.msrb.mxu3 %v409_v36  ;;  %v534_v36 = vld [vmem:[#allocation5 + $0x6e0] sm:$0xff] }
 0x159   : > { %v938_v34 = vpop.f32.mrf.mxu2  ;;  %1530 = vmatpush.msrb.mxu0 %v417_v61 }
 0x15a   : > { %v8357_v32 = vpop.f32.mrf.mxu3  ;;  %v8359_v0 = vadd.f32 %v938_v34, %v874_v19  ;;  %v1023_v51 = vpop.f32.mrf.mxu0  ;;  %v552_v19 = vld [vmem:[#allocation5 + $0x770] sm:$0xff] }
 0x15b   : > { %v1088_v41 = vpop.f32.mrf.mxu1  ;;  %v1024_v52 = vadd.f32 %v1023_v51, %v8207_v10  ;;  %1531 = vmatpush.msrb.mxu0 %v408_v18  ;;  %1596 = vmatpush.msrb.mxu1 %v552_v19  ;;  %v8407_v51 = vld [vmem:[%s7981_s20 + $0x30] sm:$0xff] }
 0x15c   : > { %12720 = vst [vmem:[#allocation30_spill] sm:$0xff] %v8359_v0  ;;  %3001 = vrot.lane.b32.xlu0 %v8359_v0, %s7832_s21  ;;  %v8507_v0 = vld [vmem:[%s7981_s20 + $0xa8] sm:$0xff] }
 0x15d   : > { %1282 = vmatmul.f32.vlgmr.msra.gmra.mxu0 %v8368_v27  ;;  %v8377_v50 = vadd.f32 %v1088_v41, %v1024_v52  ;;  %v8411_v41 = vld [vmem:[%s7981_s20 + $0x40] sm:$0xff] }
 0x15e   : > { %1347 = vmatmul.f32.vlgmr.msra.gmra.mxu1 %v8364_v26  ;;  %1412 = vmatmul.f32.vlgmr.msra.gmra.mxu2 %v8373_v13 }
 0x15f   : > { %1477 = vmatmul.f32.vlgmr.msra.gmra.mxu3 %v8368_v27  ;;  %12721 = vst [vmem:[#allocation31_spill] sm:$0xff] %v8377_v50 }
 0x161   : > { %v1153_v38 = vpop.f32.mrf.mxu2 }
 0x162   : > { %v1218_v39 = vpop.f32.mrf.mxu3  ;;  %v1026_v55 = vpop.f32.mrf.mxu0 }
 0x163   : > { %v8379_v54 = vadd.f32 %v1218_v39, %v1153_v38  ;;  %v1091_v10 = vpop.f32.mrf.mxu1  ;;  %v1027_v23 = vadd.f32 %v1026_v55, %v8217_v47  ;;  %v696_v47 = vld [vmem:[#allocation5 + $0xbf0] sm:$0xff]  ;;  %v399_v55 = vld [vmem:[#allocation5 + $0x2a8] sm:$0xff] }
 0x164   : > { %3935 = vrot.lane.b32.xlu0 %v8377_v50, %s7832_s21  ;;  %1661 = vmatpush.msrb.mxu2 %v696_v47  ;;  %v400_v47 = vld [vmem:[#allocation5 + $0x2b0] sm:$0xff] }
 0x165   : > { %v8384_v59 = vadd.f32 %v1091_v10, %v1027_v23  ;;  %1285 = vmatmul.f32.gmra.mxu0 %v8391_v63  ;;  %v543_v10 = vld [vmem:[#allocation5 + $0x728] sm:$0xff]  ;;  %v8427_v23 = vld [vmem:[%s7981_s20 + $0x58] sm:$0xff]  ;;  %1727 = vmatpush.msrb.mxu3 %v400_v47 }
 0x166   : > { %1350 = vmatmul.f32.gmra.mxu1 %v8387_v24  ;;  %1415 = vmatmul.f32.gmra.mxu2 %v8395_v7 }
 0x167   : > { %12722 = vst [vmem:[#allocation32_spill] sm:$0xff] %v8384_v59  ;;  %1480 = vmatmul.f32.gmra.mxu3 %v8391_v63  ;;  %3937 = vrot.lane.b32.xlu1 %v8384_v59, %s7832_s21 }
 0x168   : > { %1532 = vmatpush.msrb.mxu0 %v399_v55  ;;  %1597 = vmatpush.msrb.mxu1 %v543_v10  ;;  %v8455_v55 = vld [vmem:[%s7981_s20 + $0x68] sm:$0xff] }
 0x169   : > { %v1156_v44 = vpop.f32.mrf.mxu2 }
 0x16a   : > { %v1221_v28 = vpop.f32.mrf.mxu3  ;;  %v1029_v33 = vpop.f32.mrf.mxu0  ;;  %1598 = vmatpush.msrb.mxu1 %v534_v36  ;;  %v8467_v36 = vld [vmem:[%s7981_s20 + $0x78] sm:$0xff] }
 0x16b   : > { %v8401_v29 = vadd.f32 %v1221_v28, %v1156_v44  ;;  %v1094_v4 = vpop.f32.mrf.mxu1  ;;  %v1030_v20 = vadd.f32 %v1029_v33, %v8227_v8  ;;  %v687_v8 = vld [vmem:[#allocation5 + $0xba8] sm:$0xff]  ;;  %v8435_v44 = vld [vmem:[%s7981_s20 + $0x50] sm:$0xff] }
 0x16c   : > { %1662 = vmatpush.msrb.mxu2 %v687_v8 }
 0x16d   : > { %v8404_v34 = vadd.f32 %v1094_v4, %v1030_v20  ;;  %1288 = vmatmul.f32.gmra.mxu0 %v8411_v41  ;;  %v390_v20 = vld [vmem:[#allocation5 + $0x260] sm:$0xff] }
 0x16e   : > { %1353 = vmatmul.f32.gmra.mxu1 %v8407_v51  ;;  %1418 = vmatmul.f32.gmra.mxu2 %v8415_v42 }
 0x16f   : > { %12723 = vst [vmem:[#allocation33_spill] sm:$0xff] %v8404_v34  ;;  %1483 = vmatmul.f32.gmra.mxu3 %v8411_v41  ;;  %3939 = vrot.lane.b32.xlu2 %v8404_v34, %s7832_s21  ;;  %v8487_v34 = vld [vmem:[%s7981_s20 + $0x90] sm:$0xff] }
 0x170   : > { %1533 = vmatpush.msrb.mxu0 %v390_v20 }
 0x171   : > { %v1159_v43 = vpop.f32.mrf.mxu2 }
 0x172   : > { %v1224_v52 = vpop.f32.mrf.mxu3  ;;  %v1032_v38 = vpop.f32.mrf.mxu0 }
 0x173   : > { %v8421_v53 = vadd.f32 %v1224_v52, %v1159_v43  ;;  %v1097_v39 = vpop.f32.mrf.mxu1  ;;  %v1033_v61 = vadd.f32 %v1032_v38, %v8237_v1  ;;  %v678_v1 = vld [vmem:[#allocation5 + $0xb60] sm:$0xff]  ;;  %v8451_v38 = vld [vmem:[%s7981_s20 + $0x70] sm:$0xff] }
 0x174   : > { %1663 = vmatpush.msrb.mxu2 %v678_v1  ;;  %v8447_v52 = vld [vmem:[%s7981_s20 + $0x60] sm:$0xff] }
 0x175   : > { %v8424_v22 = vadd.f32 %v1097_v39, %v1033_v61  ;;  %1291 = vmatmul.f32.gmra.mxu0 %v8427_v23  ;;  %v391_v39 = vld [vmem:[#allocation5 + $0x268] sm:$0xff] }
 0x176   : > { %1356 = vmatmul.f32.gmra.mxu1 %v8431_v3  ;;  %1421 = vmatmul.f32.gmra.mxu2 %v8435_v44 }
 0x177   : > { %12724 = vst [vmem:[#allocation34_spill] sm:$0xff] %v8424_v22  ;;  %1486 = vmatmul.f32.gmra.mxu3 %v8427_v23  ;;  %3941 = vrot.lane.b32.xlu1 %v8424_v22, %s7832_s21 }
 0x178   : > { %1728 = vmatpush.msrb.mxu3 %v391_v39  ;;  %v382_v39 = vld [vmem:[#allocation5 + $0x220] sm:$0xff] }
 0x179   : > { %v1162_v28 = vpop.f32.mrf.mxu2 }
 0x17a   : > { %v1227_v33 = vpop.f32.mrf.mxu3  ;;  %v1035_v18 = vpop.f32.mrf.mxu0  ;;  %1729 = vmatpush.msrb.mxu3 %v382_v39  ;;  %v8491_v39 = vld [vmem:[%s7981_s20 + $0xa0] sm:$0xff] }
 0x17b   : > { %v8441_v4 = vadd.f32 %v1227_v33, %v1162_v28  ;;  %v1100_v19 = vpop.f32.mrf.mxu1  ;;  %v1036_v8 = vadd.f32 %v1035_v18, %v8247_v15  ;;  %v669_v15 = vld [vmem:[#allocation5 + $0xb18] sm:$0xff] }
 0x17c   : > { %1664 = vmatpush.msrb.mxu2 %v669_v15  ;;  %v381_v33 = vld [vmem:[#allocation5 + $0x218] sm:$0xff]  ;;  %v8475_v15 = vld [vmem:[%s7981_s20 + $0x80] sm:$0xff] }
 0x17d   : > { %v8444_v43 = vadd.f32 %v1100_v19, %v1036_v8  ;;  %1294 = vmatmul.f32.gmra.mxu0 %v8451_v38  ;;  %v525_v18 = vld [vmem:[#allocation5 + $0x698] sm:$0xff]  ;;  %v8471_v8 = vld [vmem:[%s7981_s20 + $0x88] sm:$0xff] }
 0x17e   : > { %1359 = vmatmul.f32.gmra.mxu1 %v8447_v52  ;;  %1424 = vmatmul.f32.gmra.mxu2 %v8455_v55 }
 0x17f   : > { %12725 = vst [vmem:[#allocation35_spill] sm:$0xff] %v8444_v43  ;;  %1489 = vmatmul.f32.gmra.mxu3 %v8451_v38  ;;  %3943 = vrot.lane.b32.xlu2 %v8444_v43, %s7832_s21 }
 0x180   : > { %1534 = vmatpush.msrb.mxu0 %v381_v33  ;;  %1599 = vmatpush.msrb.mxu1 %v525_v18  ;;  %v372_v18 = vld [vmem:[#allocation5 + $0x1d0] sm:$0xff] }
 0x181   : > { %v1165_v10 = vpop.f32.mrf.mxu2 }
 0x182   : > { %v1230_v61 = vpop.f32.mrf.mxu3  ;;  %v1038_v1 = vpop.f32.mrf.mxu0  ;;  %1535 = vmatpush.msrb.mxu0 %v372_v18 }
 0x183   : > { %v8461_v47 = vadd.f32 %v1230_v61, %v1165_v10  ;;  %v1103_v28 = vpop.f32.mrf.mxu1  ;;  %v1039_v19 = vadd.f32 %v1038_v1, %v8257_v35  ;;  %v660_v35 = vld [vmem:[#allocation5 + $0xad0] sm:$0xff] }
 0x184   : > { %1665 = vmatpush.msrb.mxu2 %v660_v35  ;;  %v373_v35 = vld [vmem:[#allocation5 + $0x1d8] sm:$0xff] }
 0x185   : > { %v8464_v20 = vadd.f32 %v1103_v28, %v1039_v19  ;;  %1297 = vmatmul.f32.gmra.mxu0 %v8471_v8  ;;  %v516_v19 = vld [vmem:[#allocation5 + $0x650] sm:$0xff]  ;;  %1730 = vmatpush.msrb.mxu3 %v373_v35  ;;  %v8511_v35 = vld [vmem:[%s7981_s20 + $0xb8] sm:$0xff] }
 0x186   : > { %1362 = vmatmul.f32.gmra.mxu1 %v8467_v36  ;;  %1427 = vmatmul.f32.gmra.mxu2 %v8475_v15 }
 0x187   : > { %12726 = vst [vmem:[#allocation36_spill] sm:$0xff] %v8464_v20  ;;  %1492 = vmatmul.f32.gmra.mxu3 %v8471_v8  ;;  %3945 = vrot.lane.b32.xlu1 %v8464_v20, %s7832_s21  ;;  %v507_v20 = vld [vmem:[#allocation5 + $0x608] sm:$0xff] }
 0x188   : > { %1600 = vmatpush.msrb.mxu1 %v516_v19  ;;  %v363_v19 = vld [vmem:[#allocation5 + $0x188] sm:$0xff] }
 0x189   : > { %v1168_v10 = vpop.f32.mrf.mxu2  ;;  %1536 = vmatpush.msrb.mxu0 %v363_v19  ;;  %v354_v19 = vld [vmem:[#allocation5 + $0x140] sm:$0xff] }
 0x18a   : > { %v1233_v61 = vpop.f32.mrf.mxu3  ;;  %v1041_v28 = vpop.f32.mrf.mxu0  ;;  %1601 = vmatpush.msrb.mxu1 %v507_v20 }
 0x18b   : > { %v8481_v1 = vadd.f32 %v1233_v61, %v1168_v10  ;;  %v1106_v33 = vpop.f32.mrf.mxu1  ;;  %v1042_v43 = vadd.f32 %v1041_v28, %v8267_v49  ;;  %v8495_v10 = vld [vmem:[%s7981_s20 + $0x98] sm:$0xff]  ;;  %v651_v49 = vld [vmem:[#allocation5 + $0xa88] sm:$0xff]  ;;  %1537 = vmatpush.msrb.mxu0 %v354_v19 }
 0x18c   : > { %1666 = vmatpush.msrb.mxu2 %v651_v49  ;;  %v364_v49 = vld [vmem:[#allocation5 + $0x190] sm:$0xff]  ;;  %v345_v19 = vld [vmem:[#allocation5 + $0xf8] sm:$0xff] }
 0x18d   : > { %v8484_v22 = vadd.f32 %v1106_v33, %v1042_v43  ;;  %1300 = vmatmul.f32.gmra.mxu0 %v8491_v39  ;;  %1731 = vmatpush.msrb.mxu3 %v364_v49  ;;  %v8531_v49 = vld [vmem:[%s7981_s20 + $0xd0] sm:$0xff] }
 0x18e   : > { %1365 = vmatmul.f32.gmra.mxu1 %v8487_v34  ;;  %1430 = vmatmul.f32.gmra.mxu2 %v8495_v10 }
 0x18f   : > { %12727 = vst [vmem:[#allocation37_spill] sm:$0xff] %v8484_v22  ;;  %1495 = vmatmul.f32.gmra.mxu3 %v8491_v39  ;;  %3947 = vrot.lane.b32.xlu1 %v8484_v22, %s7832_s21  ;;  %v498_v22 = vld [vmem:[#allocation5 + $0x5c0] sm:$0xff] }
 0x190   : > { %1602 = vmatpush.msrb.mxu1 %v498_v22  ;;  %1538 = vmatpush.msrb.mxu0 %v345_v19  ;;  %v336_v19 = vld [vmem:[#allocation5 + $0xb0] sm:$0xff] }
 0x191   : > { %v1171_v43 = vpop.f32.mrf.mxu2 }
 0x192   : > { %v1236_v61 = vpop.f32.mrf.mxu3  ;;  %v1044_v33 = vpop.f32.mrf.mxu0  ;;  %1539 = vmatpush.msrb.mxu0 %v336_v19  ;;  %v327_v19 = vld [vmem:[#allocation5 + $0x68] sm:$0xff] }
 0x193   : > { %v8501_v28 = vadd.f32 %v1236_v61, %v1171_v43  ;;  %v1109_v18 = vpop.f32.mrf.mxu1  ;;  %v1045_v59 = vadd.f32 %v1044_v33, %v8277_v17  ;;  %v8515_v43 = vld [vmem:[%s7981_s20 + $0xb0] sm:$0xff]  ;;  %v642_v17 = vld [vmem:[#allocation5 + $0xa40] sm:$0xff] }
 0x194   : > { %1667 = vmatpush.msrb.mxu2 %v642_v17  ;;  %v355_v17 = vld [vmem:[#allocation5 + $0x148] sm:$0xff]  ;;  %1540 = vmatpush.msrb.mxu0 %v327_v19  ;;  %v318_v19 = vld [vmem:[#allocation5 + $0x20] sm:$0xff] }
 0x195   : > { %v8504_v50 = vadd.f32 %v1109_v18, %v1045_v59  ;;  %1303 = vmatmul.f32.gmra.mxu0 %v8511_v35  ;;  %1732 = vmatpush.msrb.mxu3 %v355_v17  ;;  %v8551_v17 = vld [vmem:[%s7981_s20 + $0xe8] sm:$0xff] }
 0x196   : > { %1368 = vmatmul.f32.gmra.mxu1 %v8507_v0  ;;  %1433 = vmatmul.f32.gmra.mxu2 %v8515_v43 }
 0x197   : > { %12728 = vst [vmem:[#allocation38_spill] sm:$0xff] %v8504_v50  ;;  %1498 = vmatmul.f32.gmra.mxu3 %v8511_v35  ;;  %3949 = vrot.lane.b32.xlu0 %v8504_v50, %s7832_s21  ;;  %v489_v50 = vld [vmem:[#allocation5 + $0x578] sm:$0xff] }
 0x198   : > { %1603 = vmatpush.msrb.mxu1 %v489_v50  ;;  %1541 = vmatpush.msrb.mxu0 %v318_v19 }
 0x199   : > { %v1174_v59 = vpop.f32.mrf.mxu2 }
 0x19a   : > { %v1239_v20 = vpop.f32.mrf.mxu3  ;;  %v1047_v33 = vpop.f32.mrf.mxu0 }
 0x19b   : > { %v8521_v61 = vadd.f32 %v1239_v20, %v1174_v59  ;;  %v1112_v18 = vpop.f32.mrf.mxu1  ;;  %v1048_v46 = vadd.f32 %v1047_v33, %v8287_v31  ;;  %v8535_v59 = vld [vmem:[%s7981_s20 + $0xc8] sm:$0xff]  ;;  %v633_v31 = vld [vmem:[#allocation5 + $0x9f8] sm:$0xff] }
 0x19c   : > { %1668 = vmatpush.msrb.mxu2 %v633_v31  ;;  %v346_v31 = vld [vmem:[#allocation5 + $0x100] sm:$0xff] }
 0x19d   : > { %v8524_v21 = vadd.f32 %v1112_v18, %v1048_v46  ;;  %1306 = vmatmul.f32.gmra.mxu0 %v8531_v49  ;;  %1733 = vmatpush.msrb.mxu3 %v346_v31  ;;  %v8571_v31 = vld [vmem:[%s7981_s20 + $0x100] sm:$0xff] }
 0x19e   : > { %1371 = vmatmul.f32.gmra.mxu1 %v8527_v12  ;;  %1436 = vmatmul.f32.gmra.mxu2 %v8535_v59 }
 0x19f   : > { %12729 = vst [vmem:[#allocation39_spill] sm:$0xff] %v8524_v21  ;;  %1501 = vmatmul.f32.gmra.mxu3 %v8531_v49  ;;  %3951 = vrot.lane.b32.xlu0 %v8524_v21, %s7832_s21  ;;  %v480_v21 = vld [vmem:[#allocation5 + $0x530] sm:$0xff] }
 0x1a0   : > { %1604 = vmatpush.msrb.mxu1 %v480_v21 }
 0x1a1   : > { %v1177_v46 = vpop.f32.mrf.mxu2 }
 0x1a2   : > { %v1242_v22 = vpop.f32.mrf.mxu3  ;;  %v1050_v33 = vpop.f32.mrf.mxu0 }
 0x1a3   : > { %v8541_v20 = vadd.f32 %v1242_v22, %v1177_v46  ;;  %v1115_v18 = vpop.f32.mrf.mxu1  ;;  %v1051_v6 = vadd.f32 %v1050_v33, %v8297_v48  ;;  %v8555_v46 = vld [vmem:[%s7981_s20 + $0xe0] sm:$0xff]  ;;  %v624_v48 = vld [vmem:[#allocation5 + $0x9b0] sm:$0xff] }
 0x1a4   : > { %1669 = vmatpush.msrb.mxu2 %v624_v48  ;;  %v337_v48 = vld [vmem:[#allocation5 + $0xb8] sm:$0xff] }
 0x1a5   : > { %v8544_v16 = vadd.f32 %v1115_v18, %v1051_v6  ;;  %1309 = vmatmul.f32.gmra.mxu0 %v8551_v17  ;;  %1734 = vmatpush.msrb.mxu3 %v337_v48  ;;  %v8591_v48 = vld [vmem:[%s7981_s20 + $0x118] sm:$0xff] }
 0x1a6   : > { %1374 = vmatmul.f32.gmra.mxu1 %v8547_v37  ;;  %1439 = vmatmul.f32.gmra.mxu2 %v8555_v46 }
 0x1a7   : > { %12730 = vst [vmem:[#allocation40_spill] sm:$0xff] %v8544_v16  ;;  %1504 = vmatmul.f32.gmra.mxu3 %v8551_v17  ;;  %3953 = vrot.lane.b32.xlu2 %v8544_v16, %s7832_s21  ;;  %v471_v16 = vld [vmem:[#allocation5 + $0x4e8] sm:$0xff] }
 0x1a8   : > { %1605 = vmatpush.msrb.mxu1 %v471_v16 }
 0x1a9   : > { %v1180_v6 = vpop.f32.mrf.mxu2 }
 0x1aa   : > { %v1245_v50 = vpop.f32.mrf.mxu3  ;;  %v1053_v33 = vpop.f32.mrf.mxu0 }
 0x1ab   : > { %v8561_v22 = vadd.f32 %v1245_v50, %v1180_v6  ;;  %v1118_v18 = vpop.f32.mrf.mxu1  ;;  %v1054_v40 = vadd.f32 %v1053_v33, %v8307_v60  ;;  %v8575_v6 = vld [vmem:[%s7981_s20 + $0xf8] sm:$0xff]  ;;  %v615_v60 = vld [vmem:[#allocation5 + $0x968] sm:$0xff] }
 0x1ac   : > { %1670 = vmatpush.msrb.mxu2 %v615_v60  ;;  %v328_v60 = vld [vmem:[#allocation5 + $0x70] sm:$0xff] }
 0x1ad   : > { %v8564_v14 = vadd.f32 %v1118_v18, %v1054_v40  ;;  %1312 = vmatmul.f32.gmra.mxu0 %v8571_v31  ;;  %1735 = vmatpush.msrb.mxu3 %v328_v60  ;;  %v8611_v60 = vld [vmem:[%s7981_s20 + $0x130] sm:$0xff] }
 0x1ae   : > { %1377 = vmatmul.f32.gmra.mxu1 %v8567_v57  ;;  %1442 = vmatmul.f32.gmra.mxu2 %v8575_v6  ;;  %12735 = vst [vmem:[#allocation45_spill] sm:$0xff] %v8611_v60 }
 0x1af   : > { %12731 = vst [vmem:[#allocation41_spill] sm:$0xff] %v8564_v14  ;;  %1507 = vmatmul.f32.gmra.mxu3 %v8571_v31  ;;  %3955 = vrot.lane.b32.xlu0 %v8564_v14, %s7832_s21  ;;  %v462_v14 = vld [vmem:[#allocation5 + $0x4a0] sm:$0xff] }
 0x1b0   : > { %1606 = vmatpush.msrb.mxu1 %v462_v14  ;;  %v455_v14 = vld [vmem:[#allocation5 + $0x468] sm:$0xff]  ;;  %1736 = vmatpush.msrb.mxu3 %v319_v56 }
 0x1b1   : > { %v1183_v40 = vpop.f32.mrf.mxu2  ;;  %v8633_v56 = vld [vmem:[%s7981_s20 + $0x148] sm:$0xff] }
 0x1b2   : > { %v1248_v21 = vpop.f32.mrf.mxu3  ;;  %v1056_v33 = vpop.f32.mrf.mxu0  ;;  %12741 = vst [vmem:[#allocation51_spill] sm:$0xff] %v8633_v56 }
 0x1b3   : > { %v8581_v50 = vadd.f32 %v1248_v21, %v1183_v40  ;;  %v1121_v18 = vpop.f32.mrf.mxu1  ;;  %v1057_v30 = vadd.f32 %v1056_v33, %v8317_v5  ;;  %v8595_v40 = vld [vmem:[%s7981_s20 + $0x110] sm:$0xff]  ;;  %v606_v5 = vld [vmem:[#allocation5 + $0x920] sm:$0xff] }
 0x1b4   : > { %1671 = vmatpush.msrb.mxu2 %v606_v5  ;;  %v8615_v5 = vld [vmem:[%s7981_s20 + $0x128] sm:$0xff] }
 0x1b5   : > { %v8584_v62 = vadd.f32 %v1121_v18, %v1057_v30  ;;  %1315 = vmatmul.f32.gmra.mxu0 %v8591_v48  ;;  %12736 = vst [vmem:[#allocation46_spill] sm:$0xff] %v8615_v5 }
 0x1b6   : > { %1380 = vmatmul.f32.gmra.mxu1 %v8587_v2  ;;  %1445 = vmatmul.f32.gmra.mxu2 %v8595_v40 }
 0x1b7   : > { %12732 = vst [vmem:[#allocation42_spill] sm:$0xff] %v8584_v62  ;;  %1510 = vmatmul.f32.gmra.mxu3 %v8591_v48  ;;  %3957 = vrot.lane.b32.xlu2 %v8584_v62, %s7832_s21  ;;  %v8607_v62 = vld [vmem:[%s7981_s20 + $0x120] sm:$0xff] }
 0x1b8   : > { %12734 = vst [vmem:[#allocation44_spill] sm:$0xff] %v8607_v62  ;;  %1916 = vmatpush.msra.mxu2 %v455_v14  ;;  %v742_v14 = vld [vmem:[#allocation5 + $0xd60] sm:$0xff] }
 0x1b9   : > { %v1186_v30 = vpop.f32.mrf.mxu2  ;;  %1851 = vmatpush.msra.mxu1 %v742_v14  ;;  %v590_v14 = vld [vmem:[#allocation5 + $0x8a0] sm:$0xff] }
 0x1ba   : > { %v1251_v16 = vpop.f32.mrf.mxu3  ;;  %v1059_v33 = vpop.f32.mrf.mxu0 }
 0x1bb   : > { %v8601_v21 = vadd.f32 %v1251_v16, %v1186_v30  ;;  %v1124_v18 = vpop.f32.mrf.mxu1  ;;  %v1060_v9 = vadd.f32 %v1059_v33, %v8327_v11 }
 0x1bd   : > { %v8604_v25 = vadd.f32 %v1124_v18, %v1060_v9  ;;  %1318 = vmatmul.f32.gmra.mxu0 %v8611_v60  ;;  %v8621_v9 = vpop.permute.xlu0 %2973 }
 0x1be   : > { %1383 = vmatmul.f32.gmra.mxu1 %v8607_v62  ;;  %1448 = vmatmul.f32.gmra.mxu2 %v8615_v5  ;;  %12737 = vst [vmem:[#allocation47_spill] sm:$0xff] %v8621_v9  ;;  %v598_v5 = vld [vmem:[#allocation5 + $0x8e0] sm:$0xff]  ;;  %v8629_v62 = vld [vmem:[%s7981_s20 + $0x138] sm:$0xff] }
 0x1bf   : > { %12733 = vst [vmem:[#allocation43_spill] sm:$0xff] %v8604_v25  ;;  %1513 = vmatmul.f32.gmra.mxu3 %v8611_v60  ;;  %3959 = vrot.lane.b32.xlu0 %v8604_v25, %s7832_s21  ;;  %v599_v25 = vld [vmem:[#allocation5 + $0x8e8] sm:$0xff]  ;;  %v8637_v9 = vld [vmem:[%s7981_s20 + $0x140] sm:$0xff] }
 0x1c0   : > { %12740 = vst [vmem:[#allocation50_spill] sm:$0xff] %v8629_v62  ;;  %1786 = vmatpush.msra.mxu0 %v598_v5  ;;  %1981 = vmatpush.msra.mxu3 %v599_v25  ;;  %v8655_v25 = vld [vmem:[%s7981_s20 + $0x150] sm:$0xff]  ;;  %v733_v5 = vld [vmem:[#allocation5 + $0xd18] sm:$0xff] }
 0x1c1   : > { %v1189_v11 = vpop.f32.mrf.mxu2  ;;  %12742 = vst [vmem:[#allocation52_spill] sm:$0xff] %v8637_v9  ;;  %1852 = vmatpush.msra.mxu1 %v733_v5  ;;  %v724_v5 = vld [vmem:[#allocation5 + $0xcd0] sm:$0xff] }
 0x1c2   : > { %v1254_v30 = vpop.f32.mrf.mxu3  ;;  %v1062_v33 = vpop.f32.mrf.mxu0  ;;  %12746 = vst [vmem:[#allocation56_spill] sm:$0xff] %v8655_v25  ;;  %1982 = vmatpush.msra.mxu3 %v590_v14  ;;  %v581_v14 = vld [vmem:[#allocation5 + $0x858] sm:$0xff] }
 0x1c3   : > { %v8623_v16 = vadd.f32 %v1254_v30, %v1189_v11  ;;  %v1127_v18 = vpop.f32.mrf.mxu1  ;;  %v1063_v19 = vadd.f32 %v1062_v33, %v8337_v58  ;;  %v446_v58 = vld [vmem:[#allocation5 + $0x420] sm:$0xff]  ;;  %1853 = vmatpush.msra.mxu1 %v724_v5  ;;  %v572_v5 = vld [vmem:[#allocation5 + $0x810] sm:$0xff] }
 0x1c4   : > { %1917 = vmatpush.msra.mxu2 %v446_v58  ;;  %v8659_v58 = vld [vmem:[%s7981_s20 + $0x158] sm:$0xff]  ;;  %1983 = vmatpush.msra.mxu3 %v581_v14  ;;  %v419_v14 = vld [vmem:[#allocation5 + $0x348] sm:$0xff] }
 0x1c5   : > { %12738 = vst [vmem:[#allocation48_spill] sm:$0xff] %v8623_v16  ;;  %v8626_v60 = vadd.f32 %v1127_v18, %v1063_v19  ;;  %1321 = vmatmul.f32.gmra.mxu0 %v8633_v56  ;;  %v8643_v33 = vpop.permute.xlu0 %2975 }
 0x1c6   : > { %1386 = vmatmul.f32.gmra.mxu1 %v8629_v62  ;;  %1451 = vmatmul.f32.gmra.mxu2 %v8637_v9  ;;  %12743 = vst [vmem:[#allocation53_spill] sm:$0xff] %v8643_v33  ;;  %v589_v9 = vld [vmem:[#allocation5 + $0x898] sm:$0xff] }
 0x1c7   : > { %12739 = vst [vmem:[#allocation49_spill] sm:$0xff] %v8626_v60  ;;  %1516 = vmatmul.f32.gmra.mxu3 %v8633_v56  ;;  %3961 = vrot.lane.b32.xlu2 %v8626_v60, %s7832_s21  ;;  %v8651_v60 = vld [vmem:[%s7981_s20 + $0x160] sm:$0xff] }
 0x1c8   : > { %12745 = vst [vmem:[#allocation55_spill] sm:$0xff] %v8651_v60  ;;  %1787 = vmatpush.msra.mxu0 %v589_v9  ;;  %v8677_v9 = vld [vmem:[%s7981_s20 + $0x168] sm:$0xff]  ;;  %1984 = vmatpush.msra.mxu3 %v572_v5 }
 0x1c9   : > { %v1192_v11 = vpop.f32.mrf.mxu2  ;;  %12747 = vst [vmem:[#allocation57_spill] sm:$0xff] %v8659_v58 }
 0x1ca   : > { %v1257_v30 = vpop.f32.mrf.mxu3  ;;  %v1065_v19 = vpop.f32.mrf.mxu0 }
 0x1cb   : > { %v8645_v18 = vadd.f32 %v1257_v30, %v1192_v11  ;;  %v1066_v16 = vadd.f32 %v1065_v19, %v8347_v45  ;;  %v1130_v56 = vpop.f32.mrf.mxu1  ;;  %v437_v45 = vld [vmem:[#allocation5 + $0x3d8] sm:$0xff] }
 0x1cc   : > { %1918 = vmatpush.msra.mxu2 %v437_v45  ;;  %v8681_v45 = vld [vmem:[%s7981_s20 + $0x170] sm:$0xff] }
 0x1cd   : > { %v8648_v62 = vadd.f32 %v1130_v56, %v1066_v16  ;;  %1324 = vmatmul.f32.gmra.mxu0 %v8651_v60  ;;  %12751 = vst [vmem:[#allocation61_spill] sm:$0xff] %v8681_v45 }
 0x1ce   : > { %1389 = vmatmul.f32.gmra.mxu1 %v8655_v25  ;;  %1454 = vmatmul.f32.gmra.mxu2 %v8659_v58  ;;  %v580_v58 = vld [vmem:[#allocation5 + $0x850] sm:$0xff] }
 0x1cf   : > { %12744 = vst [vmem:[#allocation54_spill] sm:$0xff] %v8648_v62  ;;  %1519 = vmatmul.f32.gmra.mxu3 %v8651_v60  ;;  %3963 = vrot.lane.b32.xlu0 %v8648_v62, %s7832_s21  ;;  %v8668_v60 = vpop.permute.xlu0 %2977  ;;  %v8673_v62 = vld [vmem:[%s7981_s20 + $0x178] sm:$0xff] }
 0x1d0   : > { %12749 = vst [vmem:[#allocation59_spill] sm:$0xff] %v8668_v60  ;;  %1788 = vmatpush.msra.mxu0 %v580_v58  ;;  %v715_v58 = vld [vmem:[#allocation5 + $0xc88] sm:$0xff] }
 0x1d1   : > { %v1195_v16 = vpop.f32.mrf.mxu2  ;;  %1854 = vmatpush.msra.mxu1 %v715_v58  ;;  %v410_v58 = vld [vmem:[#allocation5 + $0x300] sm:$0xff] }
 0x1d2   : > { %v1260_v56 = vpop.f32.mrf.mxu3  ;;  %v1068_v30 = vpop.f32.mrf.mxu0 }
 0x1d3   : > { %v8665_v11 = vadd.f32 %v1260_v56, %v1195_v16  ;;  %v1069_v19 = vadd.f32 %v1068_v30, %v8357_v32  ;;  %v1133_v33 = vpop.f32.mrf.mxu1  ;;  %v428_v32 = vld [vmem:[#allocation5 + $0x390] sm:$0xff] }
 0x1d4   : > { %1919 = vmatpush.msra.mxu2 %v428_v32 }
 0x1d5   : > { %12748 = vst [vmem:[#allocation58_spill] sm:$0xff] %v8665_v11  ;;  %v8670_v25 = vadd.f32 %v1133_v33, %v1069_v19  ;;  %1327 = vmatmul.f32.gmra.mxu0 %v8673_v62  ;;  %v571_v11 = vld [vmem:[#allocation5 + $0x808] sm:$0xff] }
 0x1d6   : > { %1392 = vmatmul.f32.gmra.mxu1 %v8677_v9  ;;  %1457 = vmatmul.f32.gmra.mxu2 %v8681_v45 }
 0x1d7   : > { %12750 = vst [vmem:[#allocation60_spill] sm:$0xff] %v8670_v25  ;;  %1522 = vmatmul.f32.gmra.mxu3 %v8673_v62  ;;  %3965 = vrot.lane.b32.xlu2 %v8670_v25, %s7832_s21  ;;  %v8689_v60 = vpop.permute.xlu0 %2981 }
 0x1d8   : > { %12752 = vst [vmem:[#allocation62_spill] sm:$0xff] %v8689_v60  ;;  %1789 = vmatpush.msra.mxu0 %v571_v11  ;;  %1920 = vmatpush.msra.mxu2 %v419_v14  ;;  %v574_v60 = vld [vmem:[#allocation5 + $0x820] sm:$0xff] }
 0x1d9   : > { %v1198_v33 = vpop.f32.mrf.mxu2 }
 0x1da   : > { %v1263_v16 = vpop.f32.mrf.mxu3  ;;  %v1283_v30 = vpop.f32.mrf.mxu0  ;;  %1921 = vmatpush.msra.mxu2 %v410_v58 }
 0x1db   : > { %v8687_v56 = vadd.f32 %v1263_v16, %v1198_v33  ;;  %v1348_v19 = vpop.f32.mrf.mxu1  ;;  %v8692_v45 = vadd.f32 %v1283_v30, %v8379_v54 }
 0x1dd   : > { %12753 = vst [vmem:[#allocation63_spill] sm:$0xff] %v8692_v45  ;;  %1542 = vmatmul.f32.vlgmr.msrb.gmra.mxu0 %v8364_v26 }
 0x1de   : > { %1607 = vmatmul.f32.vlgmr.msrb.gmra.mxu1 %v8373_v13  ;;  %1672 = vmatmul.f32.vlgmr.msrb.gmra.mxu2 %v8368_v27  ;;  %v706_v27 = vld [vmem:[#allocation5 + $0xc40] sm:$0xff] }
 0x1df   : > { %1737 = vmatmul.f32.vlgmr.msrb.gmra.mxu3 %v8364_v26  ;;  %4899 = vrot.lane.b32.xlu2 %v8692_v45, %s7832_s21  ;;  %v562_v26 = vld [vmem:[#allocation5 + $0x7c0] sm:$0xff]  ;;  %v8707_v11 = vpop.permute.xlu0 %2983 }
 0x1e0   : > { %12755 = vst [vmem:[#allocation65_spill] sm:$0xff] %v8707_v11  ;;  %1790 = vmatpush.msra.mxu0 %v562_v26  ;;  %1855 = vmatpush.msra.mxu1 %v706_v27  ;;  %v401_v26 = vld [vmem:[#allocation5 + $0x2b8] sm:$0xff]  ;;  %v635_v11 = vld [vmem:[#allocation5 + $0xa08] sm:$0xff] }
 0x1e1   : > { %v1413_v32 = vpop.f32.mrf.mxu2  ;;  %1922 = vmatpush.msra.mxu2 %v401_v26  ;;  %v535_v26 = vld [vmem:[#allocation5 + $0x6e8] sm:$0xff] }
 0x1e2   : > { %v1478_v54 = vpop.f32.mrf.mxu3  ;;  %v1414_v33 = vadd.f32 %v1413_v32, %v1348_v19  ;;  %v1286_v16 = vpop.f32.mrf.mxu0  ;;  %v563_v19 = vld [vmem:[#allocation5 + $0x7c8] sm:$0xff] }
 0x1e3   : > { %v1351_v30 = vpop.f32.mrf.mxu1  ;;  %v8703_v25 = vadd.f32 %v1286_v16, %v8401_v29  ;;  %1985 = vmatpush.msra.mxu3 %v563_v19  ;;  %v554_v16 = vld [vmem:[#allocation5 + $0x780] sm:$0xff] }
 0x1e4   : > { %v8700_v13 = vadd.f32 %v1478_v54, %v1414_v33  ;;  %v553_v54 = vld [vmem:[#allocation5 + $0x778] sm:$0xff] }
 0x1e5   : > { %12754 = vst [vmem:[#allocation64_spill] sm:$0xff] %v8703_v25  ;;  %1545 = vmatmul.f32.gmra.mxu0 %v8387_v24  ;;  %4901 = vrot.lane.b32.xlu0 %v8703_v25, %s7832_s21  ;;  %v697_v33 = vld [vmem:[#allocation5 + $0xbf8] sm:$0xff] }
 0x1e6   : > { %1610 = vmatmul.f32.gmra.mxu1 %v8395_v7  ;;  %1675 = vmatmul.f32.gmra.mxu2 %v8391_v63 }
 0x1e7   : > { %1740 = vmatmul.f32.gmra.mxu3 %v8387_v24  ;;  %3003 = vrot.lane.b32.xlu1 %v8700_v13, %s7832_s21 }
 0x1e8   : > { %1791 = vmatpush.msra.mxu0 %v553_v54  ;;  %1856 = vmatpush.msra.mxu1 %v697_v33 }
 0x1e9   : > { %v1416_v29 = vpop.f32.mrf.mxu2  ;;  %1986 = vmatpush.msra.mxu3 %v554_v16 }
 0x1ea   : > { %v1481_v7 = vpop.f32.mrf.mxu3  ;;  %v1417_v5 = vadd.f32 %v1416_v29, %v1351_v30  ;;  %v1289_v14 = vpop.f32.mrf.mxu0  ;;  %v544_v29 = vld [vmem:[#allocation5 + $0x730] sm:$0xff] }
 0x1eb   : > { %v1354_v32 = vpop.f32.mrf.mxu1  ;;  %v8718_v24 = vadd.f32 %v1289_v14, %v8421_v53  ;;  %v8728_v53 = vpop.permute.xlu0 %2985  ;;  %v392_v14 = vld [vmem:[#allocation5 + $0x270] sm:$0xff]  ;;  %1792 = vmatpush.msra.mxu0 %v544_v29 }
 0x1ec   : > { %v8715_v63 = vadd.f32 %v1481_v7, %v1417_v5  ;;  %12757 = vst [vmem:[#allocation67_spill] sm:$0xff] %v8728_v53  ;;  %v688_v7 = vld [vmem:[#allocation5 + $0xbb0] sm:$0xff]  ;;  %v545_v5 = vld [vmem:[#allocation5 + $0x738] sm:$0xff]  ;;  %1923 = vmatpush.msra.mxu2 %v392_v14  ;;  %v670_v14 = vld [vmem:[#allocation5 + $0xb20] sm:$0xff] }
 0x1ed   : > { %12756 = vst [vmem:[#allocation66_spill] sm:$0xff] %v8718_v24  ;;  %1548 = vmatmul.f32.gmra.mxu0 %v8407_v51  ;;  %1857 = vmatpush.msra.mxu1 %v688_v7 }
 0x1ee   : > { %1613 = vmatmul.f32.gmra.mxu1 %v8415_v42  ;;  %1678 = vmatmul.f32.gmra.mxu2 %v8411_v41 }
 0x1ef   : > { %1743 = vmatmul.f32.gmra.mxu3 %v8407_v51  ;;  %4903 = vrot.lane.b32.xlu1 %v8718_v24, %s7832_s21 }
 0x1f0   : > { %3005 = vrot.lane.b32.xlu0 %v8715_v63, %s7832_s21  ;;  %1987 = vmatpush.msra.mxu3 %v545_v5  ;;  %v526_v5 = vld [vmem:[#allocation5 + $0x6a0] sm:$0xff] }
 0x1f1   : > { %v1419_v30 = vpop.f32.mrf.mxu2  ;;  %1793 = vmatpush.msra.mxu0 %v535_v26  ;;  %v517_v26 = vld [vmem:[#allocation5 + $0x658] sm:$0xff] }
 0x1f2   : > { %v1484_v42 = vpop.f32.mrf.mxu3  ;;  %v1420_v27 = vadd.f32 %v1419_v30, %v1354_v32  ;;  %v1292_v41 = vpop.f32.mrf.mxu0  ;;  %v679_v30 = vld [vmem:[#allocation5 + $0xb68] sm:$0xff] }
 0x1f3   : > { %v1357_v19 = vpop.f32.mrf.mxu1  ;;  %v8733_v58 = vadd.f32 %v1292_v41, %v8441_v4  ;;  %v8743_v4 = vpop.permute.xlu0 %2989  ;;  %1858 = vmatpush.msra.mxu1 %v679_v30  ;;  %1794 = vmatpush.msra.mxu0 %v526_v5  ;;  %v661_v30 = vld [vmem:[#allocation5 + $0xad8] sm:$0xff] }
 0x1f4   : > { %v8730_v51 = vadd.f32 %v1484_v42, %v1420_v27  ;;  %12759 = vst [vmem:[#allocation69_spill] sm:$0xff] %v8743_v4  ;;  %v536_v42 = vld [vmem:[#allocation5 + $0x6f0] sm:$0xff]  ;;  %v383_v27 = vld [vmem:[#allocation5 + $0x228] sm:$0xff] }
 0x1f5   : > { %12758 = vst [vmem:[#allocation68_spill] sm:$0xff] %v8733_v58  ;;  %1551 = vmatmul.f32.gmra.mxu0 %v8431_v3  ;;  %4905 = vrot.lane.b32.xlu2 %v8733_v58, %s7832_s21 }
 0x1f6   : > { %1616 = vmatmul.f32.gmra.mxu1 %v8435_v44  ;;  %1681 = vmatmul.f32.gmra.mxu2 %v8427_v23 }
 0x1f7   : > { %1746 = vmatmul.f32.gmra.mxu3 %v8431_v3  ;;  %3007 = vrot.lane.b32.xlu1 %v8730_v51, %s7832_s21 }
 0x1f8   : > { %1988 = vmatpush.msra.mxu3 %v536_v42  ;;  %1924 = vmatpush.msra.mxu2 %v383_v27  ;;  %v518_v42 = vld [vmem:[#allocation5 + $0x660] sm:$0xff]  ;;  %v365_v27 = vld [vmem:[#allocation5 + $0x198] sm:$0xff] }
 0x1f9   : > { %v1422_v32 = vpop.f32.mrf.mxu2  ;;  %1859 = vmatpush.msra.mxu1 %v670_v14  ;;  %1795 = vmatpush.msra.mxu0 %v517_v26  ;;  %v652_v14 = vld [vmem:[#allocation5 + $0xa90] sm:$0xff]  ;;  %v491_v26 = vld [vmem:[#allocation5 + $0x588] sm:$0xff] }
 0x1fa   : > { %v1487_v44 = vpop.f32.mrf.mxu3  ;;  %v1423_v54 = vadd.f32 %v1422_v32, %v1357_v19  ;;  %v1295_v23 = vpop.f32.mrf.mxu0  ;;  %v527_v32 = vld [vmem:[#allocation5 + $0x6a8] sm:$0xff] }
 0x1fb   : > { %v1360_v33 = vpop.f32.mrf.mxu1  ;;  %v8748_v16 = vadd.f32 %v1295_v23, %v8461_v47  ;;  %v8758_v47 = vpop.permute.xlu0 %2993  ;;  %1989 = vmatpush.msra.mxu3 %v527_v32  ;;  %1860 = vmatpush.msra.mxu1 %v661_v30  ;;  %v509_v32 = vld [vmem:[#allocation5 + $0x618] sm:$0xff] }
 0x1fc   : > { %v8745_v3 = vadd.f32 %v1487_v44, %v1423_v54  ;;  %12761 = vst [vmem:[#allocation71_spill] sm:$0xff] %v8758_v47  ;;  %v374_v44 = vld [vmem:[#allocation5 + $0x1e0] sm:$0xff]  ;;  %v601_v47 = vld [vmem:[#allocation5 + $0x8f8] sm:$0xff] }
 0x1fd   : > { %12760 = vst [vmem:[#allocation70_spill] sm:$0xff] %v8748_v16  ;;  %1554 = vmatmul.f32.gmra.mxu0 %v8447_v52  ;;  %4907 = vrot.lane.b32.xlu2 %v8748_v16, %s7832_s21 }
 0x1fe   : > { %1619 = vmatmul.f32.gmra.mxu1 %v8455_v55  ;;  %1684 = vmatmul.f32.gmra.mxu2 %v8451_v38 }
 0x1ff   : > { %1749 = vmatmul.f32.gmra.mxu3 %v8447_v52  ;;  %3009 = vrot.lane.b32.xlu0 %v8745_v3, %s7832_s21 }
 0x200   : > { %1925 = vmatpush.msra.mxu2 %v374_v44  ;;  %1990 = vmatpush.msra.mxu3 %v518_v42  ;;  %v356_v44 = vld [vmem:[#allocation5 + $0x150] sm:$0xff]  ;;  %v499_v42 = vld [vmem:[#allocation5 + $0x5c8] sm:$0xff] }
 0x201   : > { %v1425_v41 = vpop.f32.mrf.mxu2  ;;  %1861 = vmatpush.msra.mxu1 %v652_v14  ;;  %v490_v14 = vld [vmem:[#allocation5 + $0x580] sm:$0xff] }
 0x202   : > { %v1490_v55 = vpop.f32.mrf.mxu3  ;;  %v1426_v19 = vadd.f32 %v1425_v41, %v1360_v33  ;;  %v1298_v38 = vpop.f32.mrf.mxu0  ;;  %1926 = vmatpush.msra.mxu2 %v365_v27  ;;  %1991 = vmatpush.msra.mxu3 %v509_v32  ;;  %v643_v27 = vld [vmem:[#allocation5 + $0xa48] sm:$0xff]  ;;  %v744_v32 = vld [vmem:[#allocation5 + $0xd70] sm:$0xff] }
 0x203   : > { %v1363_v29 = vpop.f32.mrf.mxu1  ;;  %v8763_v7 = vadd.f32 %v1298_v38, %v8481_v1  ;;  %1862 = vmatpush.msra.mxu1 %v643_v27  ;;  %v717_v27 = vld [vmem:[#allocation5 + $0xc98] sm:$0xff] }
 0x204   : > { %v8760_v52 = vadd.f32 %v1490_v55, %v1426_v19  ;;  %1927 = vmatpush.msra.mxu2 %v356_v44  ;;  %v634_v44 = vld [vmem:[#allocation5 + $0xa00] sm:$0xff] }
 0x205   : > { %12762 = vst [vmem:[#allocation72_spill] sm:$0xff] %v8763_v7  ;;  %1557 = vmatmul.f32.gmra.mxu0 %v8467_v36  ;;  %1863 = vmatpush.msra.mxu1 %v634_v44 }
 0x206   : > { %1622 = vmatmul.f32.gmra.mxu1 %v8475_v15  ;;  %1687 = vmatmul.f32.gmra.mxu2 %v8471_v8  ;;  %v8773_v15 = vpop.permute.xlu0 %2995 }
 0x207   : > { %1752 = vmatmul.f32.gmra.mxu3 %v8467_v36  ;;  %3011 = vrot.lane.b32.xlu1 %v8760_v52, %s7832_s21  ;;  %12763 = vst [vmem:[#allocation73_spill] sm:$0xff] %v8773_v15 }
 0x208   : > { %4909 = vrot.lane.b32.xlu0 %v8763_v7, %s7832_s21 }
 0x209   : > { %v1428_v1 = vpop.f32.mrf.mxu2 }
 0x20a   : > { %v1493_v54 = vpop.f32.mrf.mxu3  ;;  %v1429_v23 = vadd.f32 %v1428_v1, %v1363_v29  ;;  %v1301_v8 = vpop.f32.mrf.mxu0 }
 0x20b   : > { %v1366_v33 = vpop.f32.mrf.mxu1 }
 0x20c   : > { %v8775_v36 = vadd.f32 %v1493_v54, %v1429_v23 }
 0x20d   : > { %1560 = vmatmul.f32.gmra.mxu0 %v8487_v34 }
 0x20e   : > { %1625 = vmatmul.f32.gmra.mxu1 %v8495_v10  ;;  %1690 = vmatmul.f32.gmra.mxu2 %v8491_v39  ;;  %v8783_v10 = vpop.permute.xlu0 %2997  ;;  %v8788_v39 = vadd.f32 %v1301_v8, %v8501_v28  ;;  %v500_v28 = vld [vmem:[#allocation5 + $0x5d0] sm:$0xff] }
 0x20f   : > { %1755 = vmatmul.f32.gmra.mxu3 %v8487_v34  ;;  %12764 = vst [vmem:[#allocation74_spill] sm:$0xff] %v8783_v10  ;;  %v508_v34 = vld [vmem:[#allocation5 + $0x610] sm:$0xff] }
 0x210   : > { %3013 = vrot.lane.b32.xlu0 %v8775_v36, %s7832_s21  ;;  %12765 = vst [vmem:[#allocation75_spill] sm:$0xff] %v8788_v39  ;;  %1796 = vmatpush.msra.mxu0 %v508_v34  ;;  %v464_v34 = vld [vmem:[#allocation5 + $0x4b0] sm:$0xff] }
 0x211   : > { %v1431_v41 = vpop.f32.mrf.mxu2  ;;  %1992 = vmatpush.msra.mxu3 %v500_v28 }
 0x212   : > { %v1496_v55 = vpop.f32.mrf.mxu3  ;;  %v1432_v19 = vadd.f32 %v1431_v41, %v1366_v33  ;;  %v1304_v38 = vpop.f32.mrf.mxu0  ;;  %1797 = vmatpush.msra.mxu0 %v499_v42  ;;  %v625_v42 = vld [vmem:[#allocation5 + $0x9b8] sm:$0xff] }
 0x213   : > { %v1369_v29 = vpop.f32.mrf.mxu1  ;;  %v8804_v33 = vadd.f32 %v1304_v38, %v8521_v61  ;;  %v482_v61 = vld [vmem:[#allocation5 + $0x540] sm:$0xff]  ;;  %1993 = vmatpush.msra.mxu3 %v491_v26  ;;  %v481_v26 = vld [vmem:[#allocation5 + $0x538] sm:$0xff]  ;;  %1864 = vmatpush.msra.mxu1 %v625_v42  ;;  %v663_v42 = vld [vmem:[#allocation5 + $0xae8] sm:$0xff] }
 0x214   : > { %v8785_v5 = vadd.f32 %v1496_v55, %v1432_v19  ;;  %1798 = vmatpush.msra.mxu0 %v490_v14  ;;  %v616_v14 = vld [vmem:[#allocation5 + $0x970] sm:$0xff] }
 0x215   : > { %1563 = vmatmul.f32.gmra.mxu0 %v8507_v0  ;;  %12767 = vst [vmem:[#allocation77_spill] sm:$0xff] %v8804_v33  ;;  %1994 = vmatpush.msra.mxu3 %v482_v61  ;;  %v329_v61 = vld [vmem:[#allocation5 + $0x78] sm:$0xff] }
 0x216   : > { %1628 = vmatmul.f32.gmra.mxu1 %v8515_v43  ;;  %1693 = vmatmul.f32.gmra.mxu2 %v8511_v35  ;;  %v8808_v30 = vpop.permute.xlu0 %2999 }
 0x217   : > { %1758 = vmatmul.f32.gmra.mxu3 %v8507_v0  ;;  %3015 = vrot.lane.b32.xlu1 %v8785_v5, %s7832_s21  ;;  %12768 = vst [vmem:[#allocation78_spill] sm:$0xff] %v8808_v30 }
 0x218   : > { %4911 = vrot.lane.b32.xlu0 %v8788_v39, %s7832_s21  ;;  %1799 = vmatpush.msra.mxu0 %v481_v26  ;;  %v12777_v26 = vld [vmem:[#allocation45_spill] sm:$0xff] }
 0x219   : > { %v1434_v1 = vpop.f32.mrf.mxu2  ;;  %1865 = vmatpush.msra.mxu1 %v616_v14 }
 0x21a   : > { %v1499_v54 = vpop.f32.mrf.mxu3  ;;  %v1435_v43 = vadd.f32 %v1434_v1, %v1369_v29  ;;  %v1307_v23 = vpop.f32.mrf.mxu0  ;;  %v735_v1 = vld [vmem:[#allocation5 + $0xd28] sm:$0xff] }
 0x21b   : > { %v1372_v35 = vpop.f32.mrf.mxu1  ;;  %v8801_v8 = vadd.f32 %v1307_v23, %v8541_v20  ;;  %v347_v20 = vld [vmem:[#allocation5 + $0x108] sm:$0xff] }
 0x21c   : > { %v8798_v0 = vadd.f32 %v1499_v54, %v1435_v43  ;;  %1928 = vmatpush.msra.mxu2 %v347_v20  ;;  %v708_v20 = vld [vmem:[#allocation5 + $0xc50] sm:$0xff] }
 0x21d   : > { %12766 = vst [vmem:[#allocation76_spill] sm:$0xff] %v8801_v8  ;;  %1566 = vmatmul.f32.gmra.mxu0 %v8527_v12  ;;  %4915 = vrot.lane.b32.xlu2 %v8801_v8, %s7832_s21 }
 0x21e   : > { %1631 = vmatmul.f32.gmra.mxu1 %v8535_v59  ;;  %1696 = vmatmul.f32.gmra.mxu2 %v8531_v49  ;;  %v473_v49 = vld [vmem:[#allocation5 + $0x4f8] sm:$0xff]  ;;  %v8831_v28 = vpop.permute.xlu0 %3001 }
 0x21f   : > { %1761 = vmatmul.f32.gmra.mxu3 %v8527_v12  ;;  %4913 = vrot.lane.b32.xlu1 %v8804_v33, %s7832_s21  ;;  %12770 = vst [vmem:[#allocation80_spill] sm:$0xff] %v8831_v28 }
 0x220   : > { %3017 = vrot.lane.b32.xlu0 %v8798_v0, %s7832_s21  ;;  %1995 = vmatpush.msra.mxu3 %v473_v49 }
 0x221   : > { %v1437_v59 = vpop.f32.mrf.mxu2 }
 0x222   : > { %v1502_v41 = vpop.f32.mrf.mxu3  ;;  %v1438_v12 = vadd.f32 %v1437_v59, %v1372_v35  ;;  %v1310_v55 = vpop.f32.mrf.mxu0  ;;  %1996 = vmatpush.msra.mxu3 %v464_v34  ;;  %v726_v35 = vld [vmem:[#allocation5 + $0xce0] sm:$0xff]  ;;  %v472_v34 = vld [vmem:[#allocation5 + $0x4f0] sm:$0xff] }
 0x223   : > { %v1375_v19 = vpop.f32.mrf.mxu1  ;;  %v8821_v29 = vadd.f32 %v1310_v55, %v8561_v22  ;;  %v338_v22 = vld [vmem:[#allocation5 + $0xc0] sm:$0xff]  ;;  %1800 = vmatpush.msra.mxu0 %v472_v34  ;;  %v456_v34 = vld [vmem:[#allocation5 + $0x470] sm:$0xff] }
 0x224   : > { %v8818_v38 = vadd.f32 %v1502_v41, %v1438_v12  ;;  %2241 = vmatpush.msrb.mxu3 %v744_v32  ;;  %1929 = vmatpush.msra.mxu2 %v338_v22  ;;  %v320_v32 = vld [vmem:[#allocation5 + $0x30] sm:$0xff] }
 0x225   : > { %12769 = vst [vmem:[#allocation79_spill] sm:$0xff] %v8821_v29  ;;  %1569 = vmatmul.f32.gmra.mxu0 %v8547_v37  ;;  %4917 = vrot.lane.b32.xlu2 %v8821_v29, %s7832_s21  ;;  %v537_v29 = vld [vmem:[#allocation5 + $0x6f8] sm:$0xff] }
 0x226   : > { %1634 = vmatmul.f32.gmra.mxu1 %v8555_v46  ;;  %1699 = vmatmul.f32.gmra.mxu2 %v8551_v17 }
 0x227   : > { %1764 = vmatmul.f32.gmra.mxu3 %v8547_v37  ;;  %3019 = vrot.lane.b32.xlu1 %v8818_v38, %s7832_s21 }
 0x228   : > { %2242 = vmatpush.msrb.mxu3 %v735_v1  ;;  %1930 = vmatpush.msra.mxu2 %v329_v61  ;;  %v654_v61 = vld [vmem:[#allocation5 + $0xaa0] sm:$0xff] }
 0x229   : > { %v1440_v46 = vpop.f32.mrf.mxu2 }
 0x22a   : > { %v1505_v54 = vpop.f32.mrf.mxu3  ;;  %v1441_v17 = vadd.f32 %v1440_v46, %v1375_v19  ;;  %v1313_v37 = vpop.f32.mrf.mxu0  ;;  %2243 = vmatpush.msrb.mxu3 %v726_v35  ;;  %v699_v19 = vld [vmem:[#allocation5 + $0xc08] sm:$0xff]  ;;  %1931 = vmatpush.msra.mxu2 %v320_v32  ;;  %v672_v46 = vld [vmem:[#allocation5 + $0xb30] sm:$0xff] }
 0x22b   : > { %v1378_v43 = vpop.f32.mrf.mxu1  ;;  %v8846_v55 = vadd.f32 %v1313_v37, %v8581_v50  ;;  %v690_v50 = vld [vmem:[#allocation5 + $0xbc0] sm:$0xff]  ;;  %v607_v35 = vld [vmem:[#allocation5 + $0x928] sm:$0xff] }
 0x22c   : > { %v8833_v23 = vadd.f32 %v1505_v54, %v1441_v17  ;;  %2244 = vmatpush.msrb.mxu3 %v717_v27  ;;  %v12775_v17 = vld [vmem:[#allocation44_spill] sm:$0xff]  ;;  %v12776_v37 = vld [vmem:[#allocation46_spill] sm:$0xff]  ;;  %1866 = vmatpush.msra.mxu1 %v607_v35 }
 0x22d   : > { %1572 = vmatmul.f32.gmra.mxu0 %v8567_v57  ;;  %12772 = vst [vmem:[#allocation82_spill] sm:$0xff] %v8846_v55  ;;  %v600_v27 = vld [vmem:[#allocation5 + $0x8f0] sm:$0xff] }
 0x22e   : > { %1637 = vmatmul.f32.gmra.mxu1 %v8575_v6  ;;  %1702 = vmatmul.f32.gmra.mxu2 %v8571_v31  ;;  %v8841_v6 = vpop.permute.xlu0 %3935 }
 0x22f   : > { %1767 = vmatmul.f32.gmra.mxu3 %v8567_v57  ;;  %3021 = vrot.lane.b32.xlu0 %v8833_v23, %s7832_s21  ;;  %12771 = vst [vmem:[#allocation81_spill] sm:$0xff] %v8841_v6  ;;  %v348_v6 = vld [vmem:[#allocation5 + $0x110] sm:$0xff] }
 0x230   : > { %2245 = vmatpush.msrb.mxu3 %v708_v20  ;;  %2176 = vmatpush.msrb.mxu2 %v600_v27  ;;  %v734_v27 = vld [vmem:[#allocation5 + $0xd20] sm:$0xff] }
 0x231   : > { %v1443_v59 = vpop.f32.mrf.mxu2  ;;  %2111 = vmatpush.msrb.mxu1 %v456_v34 }
 0x232   : > { %v1508_v41 = vpop.f32.mrf.mxu3  ;;  %v1444_v49 = vadd.f32 %v1443_v59, %v1378_v43  ;;  %v1316_v12 = vpop.f32.mrf.mxu0  ;;  %2246 = vmatpush.msrb.mxu3 %v699_v19  ;;  %v463_v43 = vld [vmem:[#allocation5 + $0x4a8] sm:$0xff] }
 0x233   : > { %v1381_v31 = vpop.f32.mrf.mxu1  ;;  %v8861_v54 = vadd.f32 %v1316_v12, %v8601_v21  ;;  %1801 = vmatpush.msra.mxu0 %v463_v43  ;;  %v743_v19 = vld [vmem:[#allocation5 + $0xd68] sm:$0xff] }
 0x234   : > { %v8843_v57 = vadd.f32 %v1508_v41, %v1444_v49  ;;  %2247 = vmatpush.msrb.mxu3 %v690_v50 }
 0x235   : > { %1575 = vmatmul.f32.gmra.mxu0 %v8587_v2  ;;  %12774 = vst [vmem:[#allocation84_spill] sm:$0xff] %v8861_v54 }
 0x236   : > { %1640 = vmatmul.f32.gmra.mxu1 %v8595_v40  ;;  %1705 = vmatmul.f32.gmra.mxu2 %v8591_v48  ;;  %v681_v40 = vld [vmem:[#allocation5 + $0xb78] sm:$0xff]  ;;  %v8856_v1 = vpop.permute.xlu0 %3949 }
 0x237   : > { %1770 = vmatmul.f32.gmra.mxu3 %v8587_v2  ;;  %3023 = vrot.lane.b32.xlu1 %v8843_v57, %s7832_s21  ;;  %12773 = vst [vmem:[#allocation83_spill] sm:$0xff] %v8856_v1 }
 0x238   : > { %4919 = vrot.lane.b32.xlu0 %v8846_v55, %s7832_s21  ;;  %2248 = vmatpush.msrb.mxu3 %v681_v40  ;;  %v12780_v40 = vld [vmem:[#allocation50_spill] sm:$0xff] }
 0x239   : > { %v1446_v44 = vpop.f32.mrf.mxu2  ;;  %2046 = vmatpush.msrb.mxu0 %v743_v19  ;;  %v12786_v19 = vld [vmem:[#allocation48_spill] sm:$0xff] }
 0x23a   : > { %v1511_v22 = vpop.f32.mrf.mxu3  ;;  %v8858_v2 = vpop.f32.mrf.mxu0  ;;  %2249 = vmatpush.msrb.mxu3 %v672_v46  ;;  %v1447_v59 = vadd.f32 %v1446_v44, %v1381_v31  ;;  %v12781_v46 = vld [vmem:[#allocation52_spill] sm:$0xff]  ;;  %v645_v31 = vld [vmem:[#allocation5 + $0xa58] sm:$0xff] }
 0x23b   : > { %v1384_v48 = vpop.f32.mrf.mxu1  ;;  %2047 = vmatpush.msrb.mxu0 %v734_v27  ;;  %v8896_v34 = vadd.f32 %v8858_v2, %v12786_v19  ;;  %v12792_v27 = vld [vmem:[#allocation58_spill] sm:$0xff] }
 0x23c   : > { %2250 = vmatpush.msrb.mxu3 %v663_v42  ;;  %v8878_v44 = vadd.f32 %v1511_v22, %v1447_v59  ;;  %v627_v22 = vld [vmem:[#allocation5 + $0x9c8] sm:$0xff] }
 0x23d   : > { %1578 = vmatmul.f32.gmra.mxu0 %v12775_v17  ;;  %v12784_v59 = vld [vmem:[#allocation56_spill] sm:$0xff]  ;;  %12787 = vst [vmem:[#allocation50_spill] sm:$0xff] %v8896_v34 }
 0x23e   : > { %1643 = vmatmul.f32.gmra.mxu1 %v12776_v37  ;;  %1708 = vmatmul.f32.gmra.mxu2 %v12777_v26  ;;  %v8869_v14 = vpop.permute.xlu0 %3951 }
 0x23f   : > { %1773 = vmatmul.f32.gmra.mxu3 %v12775_v17  ;;  %12778 = vst [vmem:[#allocation44_spill] sm:$0xff] %v8869_v14  ;;  %v591_v17 = vld [vmem:[#allocation5 + $0x8a8] sm:$0xff] }
 0x240   : > { %4921 = vrot.lane.b32.xlu0 %v8861_v54, %s7832_s21  ;;  %2251 = vmatpush.msrb.mxu3 %v654_v61 }
 0x241   : > { %v1449_v21 = vpop.f32.mrf.mxu2  ;;  %2177 = vmatpush.msrb.mxu2 %v591_v17 }
 0x242   : > { %v1514_v20 = vpop.f32.mrf.mxu3  ;;  %v1450_v41 = vadd.f32 %v1449_v21, %v1384_v48  ;;  %v1322_v49 = vpop.f32.mrf.mxu0  ;;  %v12782_v48 = vld [vmem:[#allocation51_spill] sm:$0xff]  ;;  %2252 = vmatpush.msrb.mxu3 %v645_v31 }
 0x243   : > { %v1387_v12 = vpop.f32.mrf.mxu1  ;;  %v8874_v50 = vadd.f32 %v1322_v49, %v8645_v18  ;;  %v636_v18 = vld [vmem:[#allocation5 + $0xa10] sm:$0xff]  ;;  %v447_v49 = vld [vmem:[#allocation5 + $0x428] sm:$0xff] }
 0x244   : > { %v8871_v32 = vadd.f32 %v1514_v20, %v1450_v41  ;;  %2253 = vmatpush.msrb.mxu3 %v636_v18  ;;  %v618_v20 = vld [vmem:[#allocation5 + $0x980] sm:$0xff]  ;;  %v12785_v41 = vld [vmem:[#allocation57_spill] sm:$0xff]  ;;  %2112 = vmatpush.msrb.mxu1 %v447_v49 }
 0x245   : > { %12779 = vst [vmem:[#allocation46_spill] sm:$0xff] %v8874_v50  ;;  %1581 = vmatmul.f32.gmra.mxu0 %v12780_v40  ;;  %4925 = vrot.lane.b32.xlu1 %v8874_v50, %s7832_s21  ;;  %v725_v18 = vld [vmem:[#allocation5 + $0xcd8] sm:$0xff] }
 0x246   : > { %1646 = vmatmul.f32.gmra.mxu1 %v12781_v46  ;;  %1711 = vmatmul.f32.gmra.mxu2 %v12782_v48  ;;  %v8888_v61 = vpop.permute.xlu0 %3955  ;;  %v582_v46 = vld [vmem:[#allocation5 + $0x860] sm:$0xff] }
 0x247   : > { %1776 = vmatmul.f32.gmra.mxu3 %v12780_v40  ;;  %3027 = vrot.lane.b32.xlu2 %v8871_v32, %s7832_s21  ;;  %12783 = vst [vmem:[#allocation45_spill] sm:$0xff] %v8888_v61  ;;  %v609_v40 = vld [vmem:[#allocation5 + $0x938] sm:$0xff] }
 0x248   : > { %3025 = vrot.lane.b32.xlu0 %v8878_v44, %s7832_s21  ;;  %2254 = vmatpush.msrb.mxu3 %v627_v22  ;;  %v689_v61 = vld [vmem:[#allocation5 + $0xbb8] sm:$0xff] }
 0x249   : > { %v1452_v37 = vpop.f32.mrf.mxu2  ;;  %2178 = vmatpush.msrb.mxu2 %v582_v46  ;;  %2048 = vmatpush.msrb.mxu0 %v725_v18  ;;  %v8925_v18 = vld [vmem:[%s7981_s20 + $0x8] sm:$0xff] }
 0x24a   : > { %v1517_v43 = vpop.f32.mrf.mxu3  ;;  %v1453_v35 = vadd.f32 %v1452_v37, %v1387_v12  ;;  %v1325_v26 = vpop.f32.mrf.mxu0  ;;  %v12788_v12 = vld [vmem:[#allocation55_spill] sm:$0xff]  ;;  %2255 = vmatpush.msrb.mxu3 %v618_v20 }
 0x24b   : > { %v1390_v42 = vpop.f32.mrf.mxu1  ;;  %v438_v37 = vld [vmem:[#allocation5 + $0x3e0] sm:$0xff]  ;;  %v8912_v20 = vadd.f32 %v1325_v26, %v12792_v27 }
 0x24c   : > { %v8890_v21 = vadd.f32 %v1517_v43, %v1453_v35  ;;  %2256 = vmatpush.msrb.mxu3 %v609_v40  ;;  %2113 = vmatpush.msrb.mxu1 %v438_v37  ;;  %v12791_v35 = vld [vmem:[#allocation61_spill] sm:$0xff] }
 0x24d   : > { %1584 = vmatmul.f32.gmra.mxu0 %v12784_v59  ;;  %12793 = vst [vmem:[#allocation56_spill] sm:$0xff] %v8912_v20  ;;  %v8929_v37 = vld [vmem:[%s7981_s20 + $0x10] sm:$0xff] }
 0x24e   : > { %1649 = vmatmul.f32.gmra.mxu1 %v12785_v41  ;;  %1714 = vmatmul.f32.gmra.mxu2 %v12788_v12  ;;  %v8904_v43 = vpop.permute.xlu0 %3959  ;;  %v716_v12 = vld [vmem:[#allocation5 + $0xc90] sm:$0xff] }
 0x24f   : > { %1779 = vmatmul.f32.gmra.mxu3 %v12784_v59  ;;  %3029 = vrot.lane.b32.xlu1 %v8890_v21, %s7832_s21  ;;  %12789 = vst [vmem:[#allocation52_spill] sm:$0xff] %v8904_v43  ;;  %v573_v59 = vld [vmem:[#allocation5 + $0x818] sm:$0xff] }
 0x250   : > { %4923 = vrot.lane.b32.xlu0 %v8896_v34, %s7832_s21  ;;  %2179 = vmatpush.msrb.mxu2 %v573_v59 }
 0x251   : > { %v1455_v31 = vpop.f32.mrf.mxu2  ;;  %2049 = vmatpush.msrb.mxu0 %v716_v12 }
 0x252   : > { %v1520_v48 = vpop.f32.mrf.mxu3  ;;  %v1328_v2 = vpop.f32.mrf.mxu0  ;;  %v1456_v41 = vadd.f32 %v1455_v31, %v1390_v42  ;;  %v8933_v31 = vld [vmem:[%s7981_s20] sm:$0xff] }
 0x253   : > { %v1393_v17 = vpop.f32.mrf.mxu1  ;;  %v8907_v22 = vadd.f32 %v1328_v2, %v8687_v56  ;;  %v8920_v56 = vpop.permute.xlu2 %2971 }
 0x254   : > { %12794 = vst [vmem:[#allocation57_spill] sm:$0xff] %v8920_v56  ;;  %v1521_v42 = vadd.f32 %v1520_v48, %v1456_v41 }
 0x255   : > { %12790 = vst [vmem:[#allocation51_spill] sm:$0xff] %v8907_v22  ;;  %1587 = vmatmul.f32.gmra.mxu0 %v8677_v9  ;;  %4929 = vrot.lane.b32.xlu2 %v8907_v22, %s7832_s21 }
 0x256   : > { %1652 = vmatmul.f32.gmra.mxu1 %v12791_v35  ;;  %1717 = vmatmul.f32.gmra.mxu2 %v8673_v62  ;;  %v8922_v40 = vpop.permute.xlu0 %3963  ;;  %v564_v35 = vld [vmem:[#allocation5 + $0x7d0] sm:$0xff] }
 0x257   : > { %1782 = vmatmul.f32.gmra.mxu3 %v8677_v9  ;;  %v429_v9 = vld [vmem:[#allocation5 + $0x398] sm:$0xff]  ;;  %12795 = vst [vmem:[#allocation48_spill] sm:$0xff] %v8922_v40  ;;  %2180 = vmatpush.msrb.mxu2 %v564_v35  ;;  %v8952_v35 = vld [vmem:[%s7981_s20 + $0x20] sm:$0xff] }
 0x258   : > { %4927 = vrot.lane.b32.xlu0 %v8912_v20, %s7832_s21  ;;  %2114 = vmatpush.msrb.mxu1 %v429_v9 }
 0x259   : > { %v1458_v49 = vpop.f32.mrf.mxu2 }
 0x25a   : > { %v1459_v26 = vadd.f32 %v1458_v49, %v1393_v17  ;;  %v1523_v19 = vpop.f32.mrf.mxu3  ;;  %v1543_v62 = vpop.f32.mrf.mxu0 }
 0x25b   : > { %v1608_v46 = vpop.f32.mrf.mxu1  ;;  %v8937_v17 = vpop.permute.xlu1 %2987 }
 0x25c   : > { %v1524_v2 = vadd.f32 %v1523_v19, %v1459_v26  ;;  %12796 = vst [vmem:[#allocation55_spill] sm:$0xff] %v8937_v17  ;;  %v8942_v27 = vpop.permute.xlu2 %2979  ;;  %v1609_v48 = vadd.f32 %v1608_v46, %v1543_v62  ;;  %v707_v26 = vld [vmem:[#allocation5 + $0xc48] sm:$0xff]  ;;  %v420_v19 = vld [vmem:[#allocation5 + $0x350] sm:$0xff]  ;;  %v8960_v46 = vld [vmem:[%s7981_s20 + $0x18] sm:$0xff] }
 0x25d   : > { %1802 = vmatmul.f32.vlgmr.msra.gmra.mxu0 %v8925_v18  ;;  %12797 = vst [vmem:[#allocation61_spill] sm:$0xff] %v8942_v27  ;;  %2115 = vmatpush.msrb.mxu1 %v420_v19  ;;  %v8956_v62 = vld [vmem:[%s7981_s20 + $0x28] sm:$0xff] }
 0x25e   : > { %1867 = vmatmul.f32.vlgmr.msra.gmra.mxu1 %v8929_v37  ;;  %1932 = vmatmul.f32.vlgmr.msra.gmra.mxu2 %v8933_v31  ;;  %v8947_v12 = vpop.permute.xlu0 %4901 }
 0x25f   : > { %1997 = vmatmul.f32.vlgmr.msra.gmra.mxu3 %v8925_v18  ;;  %3033 = vrot.lane.b32.xlu2 %v1524_v2, %s7832_s21  ;;  %12798 = vst [vmem:[#allocation58_spill] sm:$0xff] %v8947_v12 }
 0x260   : > { %6583 = vmatpush.xpose.msk.msra.mxu3 %vm12611_vm0, %v1524_v2  ;;  %3031 = vrot.lane.b32.xlu0 %v1521_v42, %s7832_s21 }
 0x261   : > { %v1673_v59 = vpop.f32.mrf.mxu2  ;;  %2050 = vmatpush.msrb.mxu0 %v707_v26 }
 0x262   : > { %v8944_v41 = vpop.f32.mrf.mxu3  ;;  %v1546_v49 = vpop.f32.mrf.mxu0  ;;  %v8949_v2 = vadd.f32 %v1673_v59, %v1609_v48  ;;  %v555_v48 = vld [vmem:[#allocation5 + $0x788] sm:$0xff] }
 0x263   : > { %v1611_v9 = vpop.f32.mrf.mxu1  ;;  %2181 = vmatpush.msrb.mxu2 %v555_v48  ;;  %v8981_v48 = vld [vmem:[%s7981_s20 + $0x38] sm:$0xff] }
 0x264   : > { %6584 = vmatpush.xpose.msk.msra.mxu3 %vm12611_vm0, %v1521_v42  ;;  %12799 = vst [vmem:[#allocation85_spill] sm:$0xff] %v8949_v2  ;;  %v8964_v42 = vpop.permute.xlu1 %2991  ;;  %v1612_v26 = vadd.f32 %v1611_v9, %v1546_v49  ;;  %v8970_v59 = vpop.permute.xlu2 %3939  ;;  %v411_v9 = vld [vmem:[#allocation5 + $0x308] sm:$0xff] }
 0x265   : > { %1805 = vmatmul.f32.gmra.mxu0 %v8952_v35  ;;  %12800 = vst [vmem:[#allocation86_spill] sm:$0xff] %v8964_v42  ;;  %2116 = vmatpush.msrb.mxu1 %v411_v9  ;;  %v546_v9 = vld [vmem:[#allocation5 + $0x740] sm:$0xff] }
 0x266   : > { %1870 = vmatmul.f32.gmra.mxu1 %v8956_v62  ;;  %1935 = vmatmul.f32.gmra.mxu2 %v8960_v46  ;;  %12801 = vst [vmem:[#allocation87_spill] sm:$0xff] %v8970_v59 }
 0x267   : > { %2000 = vmatmul.f32.gmra.mxu3 %v8952_v35  ;;  %3967 = vrot.lane.b32.xlu2 %v8949_v2, %s7832_s21 }
 0x268   : > { %6585 = vmatpush.xpose.msk.msra.mxu3 %vm12611_vm0, %v8890_v21  ;;  %v698_v21 = vld [vmem:[#allocation5 + $0xc00] sm:$0xff]  ;;  %2182 = vmatpush.msrb.mxu2 %v546_v9 }
 0x269   : > { %v1676_v19 = vpop.f32.mrf.mxu2  ;;  %2051 = vmatpush.msrb.mxu0 %v698_v21 }
 0x26a   : > { %v8972_v12 = vadd.f32 %v1676_v19, %v1612_v26  ;;  %v8974_v22 = vpop.f32.mrf.mxu3  ;;  %v1549_v49 = vpop.f32.mrf.mxu0  ;;  %v8987_v19 = vld [vmem:[%s7981_s20 + $0x40] sm:$0xff]  ;;  %2183 = vmatpush.msrb.mxu2 %v537_v29  ;;  %v9039_v29 = vld [vmem:[%s7981_s20 + $0x68] sm:$0xff] }
 0x26b   : > { %v1614_v20 = vpop.f32.mrf.mxu1  ;;  %v8984_v26 = vpop.permute.xlu0 %3005  ;;  %2052 = vmatpush.msrb.mxu0 %v689_v61 }
 0x26c   : > { %12802 = vst [vmem:[#allocation88_spill] sm:$0xff] %v8972_v12  ;;  %6586 = vmatpush.xpose.msk.msra.mxu3 %vm12611_vm0, %v8871_v32  ;;  %3969 = vrot.lane.b32.xlu1 %v8972_v12, %s7832_s21  ;;  %v8991_v32 = vld [vmem:[%s7981_s20 + $0x30] sm:$0xff]  ;;  %v8994_v40 = vpop.permute.xlu1 %3937  ;;  %v1615_v21 = vadd.f32 %v1614_v20, %v1549_v49  ;;  %v8999_v50 = vpop.permute.xlu2 %3943  ;;  %v402_v49 = vld [vmem:[#allocation5 + $0x2c0] sm:$0xff] }
 0x26d   : > { %1808 = vmatmul.f32.gmra.mxu0 %v8981_v48  ;;  %12803 = vst [vmem:[#allocation89_spill] sm:$0xff] %v8984_v26  ;;  %2117 = vmatpush.msrb.mxu1 %v402_v49  ;;  %v393_v49 = vld [vmem:[#allocation5 + $0x278] sm:$0xff] }
 0x26e   : > { %1873 = vmatmul.f32.gmra.mxu1 %v8987_v19  ;;  %1938 = vmatmul.f32.gmra.mxu2 %v8991_v32  ;;  %12804 = vst [vmem:[#allocation90_spill] sm:$0xff] %v8994_v40 }
 0x26f   : > { %2003 = vmatmul.f32.gmra.mxu3 %v8981_v48  ;;  %12805 = vst [vmem:[#allocation91_spill] sm:$0xff] %v8999_v50  ;;  %2118 = vmatpush.msrb.mxu1 %v393_v49 }
 0x270   : > { %6587 = vmatpush.xpose.msk.msra.mxu3 %vm12611_vm0, %v8878_v44  ;;  %v9010_v44 = vld [vmem:[%s7981_s20 + $0x50] sm:$0xff] }
 0x271   : > { %v1679_v34 = vpop.f32.mrf.mxu2 }
 0x272   : > { %v9001_v43 = vadd.f32 %v1679_v34, %v1615_v21  ;;  %v9003_v54 = vpop.f32.mrf.mxu3  ;;  %v1552_v55 = vpop.f32.mrf.mxu0  ;;  %v9016_v34 = vld [vmem:[%s7981_s20 + $0x58] sm:$0xff]  ;;  %v9020_v21 = vld [vmem:[%s7981_s20 + $0x48] sm:$0xff] }
 0x273   : > { %v1617_v20 = vpop.f32.mrf.mxu1  ;;  %v9013_v9 = vpop.permute.xlu0 %3009 }
 0x274   : > { %12806 = vst [vmem:[#allocation92_spill] sm:$0xff] %v9001_v43  ;;  %6588 = vmatpush.xpose.msk.msra.mxu3 %vm12611_vm0, %v8843_v57  ;;  %3971 = vrot.lane.b32.xlu2 %v9001_v43, %s7832_s21  ;;  %v9023_v57 = vpop.permute.xlu1 %3941  ;;  %v1618_v61 = vadd.f32 %v1617_v20, %v1552_v55  ;;  %v9028_v8 = vpop.permute.xlu2 %3953  ;;  %v680_v55 = vld [vmem:[#allocation5 + $0xb70] sm:$0xff]  ;;  %v439_v43 = vld [vmem:[#allocation5 + $0x3e8] sm:$0xff] }
 0x275   : > { %1811 = vmatmul.f32.gmra.mxu0 %v9010_v44  ;;  %12807 = vst [vmem:[#allocation93_spill] sm:$0xff] %v9023_v57 }
 0x276   : > { %1876 = vmatmul.f32.gmra.mxu1 %v9016_v34  ;;  %1941 = vmatmul.f32.gmra.mxu2 %v9020_v21  ;;  %12808 = vst [vmem:[#allocation94_spill] sm:$0xff] %v9028_v8 }
 0x277   : > { %2006 = vmatmul.f32.gmra.mxu3 %v9010_v44  ;;  %2053 = vmatpush.msrb.mxu0 %v680_v55  ;;  %v528_v55 = vld [vmem:[#allocation5 + $0x6b0] sm:$0xff] }
 0x278   : > { %6589 = vmatpush.xpose.msk.msra.mxu3 %vm12611_vm0, %v8833_v23  ;;  %v9043_v23 = vld [vmem:[%s7981_s20 + $0x70] sm:$0xff]  ;;  %2184 = vmatpush.msrb.mxu2 %v528_v55  ;;  %v9072_v55 = vld [vmem:[%s7981_s20 + $0x88] sm:$0xff] }
 0x279   : > { %v1682_v14 = vpop.f32.mrf.mxu2 }
 0x27a   : > { %v9030_v33 = vadd.f32 %v1682_v14, %v1618_v61  ;;  %v9032_v1 = vpop.f32.mrf.mxu3  ;;  %v1555_v39 = vpop.f32.mrf.mxu0  ;;  %v9047_v14 = vld [vmem:[%s7981_s20 + $0x60] sm:$0xff] }
 0x27b   : > { %v1620_v20 = vpop.f32.mrf.mxu1  ;;  %v9053_v8 = vpop.permute.xlu0 %4909 }
 0x27c   : > { %12809 = vst [vmem:[#allocation95_spill] sm:$0xff] %v9030_v33  ;;  %6590 = vmatpush.xpose.msk.msra.mxu3 %vm12611_vm0, %v8818_v38  ;;  %3973 = vrot.lane.b32.xlu1 %v9030_v33, %s7832_s21  ;;  %v9050_v61 = vpop.permute.xlu1 %3945  ;;  %v1621_v38 = vadd.f32 %v1620_v20, %v1555_v39  ;;  %v9057_v7 = vpop.permute.xlu2 %3957  ;;  %v671_v20 = vld [vmem:[#allocation5 + $0xb28] sm:$0xff] }
 0x27d   : > { %1814 = vmatmul.f32.gmra.mxu0 %v9039_v29  ;;  %12810 = vst [vmem:[#allocation96_spill] sm:$0xff] %v9050_v61 }
 0x27e   : > { %1879 = vmatmul.f32.gmra.mxu1 %v9043_v23  ;;  %1944 = vmatmul.f32.gmra.mxu2 %v9047_v14  ;;  %12811 = vst [vmem:[#allocation97_spill] sm:$0xff] %v9053_v8  ;;  %v384_v8 = vld [vmem:[#allocation5 + $0x230] sm:$0xff] }
 0x27f   : > { %2009 = vmatmul.f32.gmra.mxu3 %v9039_v29  ;;  %12812 = vst [vmem:[#allocation98_spill] sm:$0xff] %v9057_v7  ;;  %2054 = vmatpush.msrb.mxu0 %v671_v20 }
 0x280   : > { %6591 = vmatpush.xpose.msk.msra.mxu3 %vm12611_vm0, %v8798_v0  ;;  %v9068_v0 = vld [vmem:[%s7981_s20 + $0x80] sm:$0xff]  ;;  %2119 = vmatpush.msrb.mxu1 %v384_v8 }
 0x281   : > { %v1685_v16 = vpop.f32.mrf.mxu2 }
 0x282   : > { %v9059_v50 = vadd.f32 %v1685_v16, %v1621_v38  ;;  %v9061_v61 = vpop.f32.mrf.mxu3  ;;  %v1558_v39 = vpop.f32.mrf.mxu0  ;;  %v9076_v16 = vld [vmem:[%s7981_s20 + $0x78] sm:$0xff] }
 0x283   : > { %v1623_v49 = vpop.f32.mrf.mxu1  ;;  %v9086_v58 = vpop.permute.xlu0 %3013 }
 0x284   : > { %6592 = vmatpush.xpose.msk.msra.mxu3 %vm12611_vm0, %v8785_v5  ;;  %3975 = vrot.lane.b32.xlu2 %v9059_v50, %s7832_s21  ;;  %v1624_v38 = vadd.f32 %v1623_v49, %v1558_v39  ;;  %v519_v5 = vld [vmem:[#allocation5 + $0x668] sm:$0xff]  ;;  %v9082_v20 = vpop.permute.xlu1 %3947  ;;  %v9084_v7 = vpop.permute.xlu2 %3961  ;;  %v662_v49 = vld [vmem:[#allocation5 + $0xae0] sm:$0xff] }
 0x285   : > { %1817 = vmatmul.f32.gmra.mxu0 %v9068_v0  ;;  %2185 = vmatpush.msrb.mxu2 %v519_v5  ;;  %12813 = vst [vmem:[#allocation99_spill] sm:$0xff] %v9082_v20  ;;  %v375_v5 = vld [vmem:[#allocation5 + $0x1e8] sm:$0xff]  ;;  %v9101_v20 = vld [vmem:[%s7981_s20 + $0xa0] sm:$0xff] }
 0x286   : > { %1882 = vmatmul.f32.gmra.mxu1 %v9072_v55  ;;  %1947 = vmatmul.f32.gmra.mxu2 %v9076_v16  ;;  %12814 = vst [vmem:[#allocation100_spill] sm:$0xff] %v9084_v7  ;;  %v9097_v7 = vld [vmem:[%s7981_s20 + $0x98] sm:$0xff] }
 0x287   : > { %2012 = vmatmul.f32.gmra.mxu3 %v9068_v0  ;;  %2055 = vmatpush.msrb.mxu0 %v662_v49 }
 0x288   : > { %6593 = vmatpush.xpose.msk.msra.mxu3 %vm12611_vm0, %v8775_v36  ;;  %2120 = vmatpush.msrb.mxu1 %v375_v5 }
 0x289   : > { %v1688_v57 = vpop.f32.mrf.mxu2 }
 0x28a   : > { %v9088_v24 = vadd.f32 %v1688_v57, %v1624_v38  ;;  %v9090_v39 = vpop.f32.mrf.mxu3  ;;  %v1561_v8 = vpop.f32.mrf.mxu0  ;;  %v9105_v57 = vld [vmem:[%s7981_s20 + $0x90] sm:$0xff] }
 0x28b   : > { %v1626_v36 = vpop.f32.mrf.mxu1  ;;  %v9119_v5 = vpop.permute.xlu0 %4911 }
 0x28c   : > { %6594 = vmatpush.xpose.msk.msra.mxu3 %vm12611_vm0, %v8760_v52  ;;  %3977 = vrot.lane.b32.xlu1 %v9088_v24, %s7832_s21  ;;  %v1627_v38 = vadd.f32 %v1626_v36, %v1561_v8  ;;  %v510_v52 = vld [vmem:[#allocation5 + $0x620] sm:$0xff]  ;;  %v9111_v49 = vpop.permute.xlu2 %3965  ;;  %v9113_v59 = vpop.permute.xlu1 %3003  ;;  %v653_v36 = vld [vmem:[#allocation5 + $0xa98] sm:$0xff]  ;;  %12817 = vst [vmem:[#allocation103_spill] sm:$0xff] %v9119_v5 }
 0x28d   : > { %1820 = vmatmul.f32.gmra.mxu0 %v9097_v7  ;;  %2186 = vmatpush.msrb.mxu2 %v510_v52  ;;  %12815 = vst [vmem:[#allocation101_spill] sm:$0xff] %v9111_v49  ;;  %v366_v52 = vld [vmem:[#allocation5 + $0x1a0] sm:$0xff]  ;;  %v9126_v49 = vld [vmem:[%s7981_s20 + $0xb0] sm:$0xff] }
 0x28e   : > { %1885 = vmatmul.f32.gmra.mxu1 %v9101_v20  ;;  %1950 = vmatmul.f32.gmra.mxu2 %v9105_v57  ;;  %12816 = vst [vmem:[#allocation102_spill] sm:$0xff] %v9113_v59 }
 0x28f   : > { %2015 = vmatmul.f32.gmra.mxu3 %v9097_v7  ;;  %2056 = vmatpush.msrb.mxu0 %v653_v36  ;;  %12818 = vst [vmem:[#allocation104_spill] sm:$0xff] %v9126_v49  ;;  %v501_v36 = vld [vmem:[#allocation5 + $0x5d8] sm:$0xff] }
 0x290   : > { %6595 = vmatpush.xpose.msk.msra.mxu3 %vm12611_vm0, %v8745_v3  ;;  %2121 = vmatpush.msrb.mxu1 %v366_v52 }
 0x291   : > { %v1691_v25 = vpop.f32.mrf.mxu2  ;;  %2187 = vmatpush.msrb.mxu2 %v501_v36  ;;  %v339_v36 = vld [vmem:[#allocation5 + $0xc8] sm:$0xff] }
 0x292   : > { %v9115_v40 = vadd.f32 %v1691_v25, %v1627_v38  ;;  %v9117_v45 = vpop.f32.mrf.mxu3  ;;  %v1564_v8 = vpop.f32.mrf.mxu0  ;;  %v9130_v25 = vld [vmem:[%s7981_s20 + $0xb8] sm:$0xff]  ;;  %v9134_v38 = vld [vmem:[%s7981_s20 + $0xa8] sm:$0xff] }
 0x293   : > { %v1629_v3 = vpop.f32.mrf.mxu1  ;;  %12819 = vst [vmem:[#allocation105_spill] sm:$0xff] %v9130_v25 }
 0x294   : > { %6596 = vmatpush.xpose.msk.msra.mxu3 %vm12611_vm0, %v8730_v51  ;;  %3979 = vrot.lane.b32.xlu2 %v9115_v40, %s7832_s21  ;;  %12820 = vst [vmem:[#allocation106_spill] sm:$0xff] %v9134_v38  ;;  %v1630_v5 = vadd.f32 %v1629_v3, %v1564_v8  ;;  %v357_v51 = vld [vmem:[#allocation5 + $0x158] sm:$0xff]  ;;  %v644_v3 = vld [vmem:[#allocation5 + $0xa50] sm:$0xff]  ;;  %v9144_v52 = vpop.permute.xlu1 %4903  ;;  %v9148_v15 = vpop.permute.xlu2 %4899 }
 0x295   : > { %1823 = vmatmul.f32.gmra.mxu0 %v9126_v49  ;;  %2122 = vmatpush.msrb.mxu1 %v357_v51  ;;  %12822 = vst [vmem:[#allocation108_spill] sm:$0xff] %v9144_v52  ;;  %v9163_v51 = vld [vmem:[%s7981_s20 + $0xc0] sm:$0xff]  ;;  %v492_v52 = vld [vmem:[#allocation5 + $0x590] sm:$0xff] }
 0x296   : > { %1888 = vmatmul.f32.gmra.mxu1 %v9130_v25  ;;  %1953 = vmatmul.f32.gmra.mxu2 %v9134_v38  ;;  %12823 = vst [vmem:[#allocation109_spill] sm:$0xff] %v9148_v15  ;;  %v321_v15 = vld [vmem:[#allocation5 + $0x38] sm:$0xff] }
 0x297   : > { %2018 = vmatmul.f32.gmra.mxu3 %v9126_v49  ;;  %2123 = vmatpush.msrb.mxu1 %v348_v6  ;;  %v9159_v6 = vld [vmem:[%s7981_s20 + $0xd0] sm:$0xff]  ;;  %12826 = vst [vmem:[#allocation112_spill] sm:$0xff] %v9163_v51 }
 0x298   : > { %6597 = vmatpush.xpose.msk.msra.mxu3 %vm12611_vm0, %v8715_v63  ;;  %2057 = vmatpush.msrb.mxu0 %v644_v3  ;;  %12825 = vst [vmem:[#allocation111_spill] sm:$0xff] %v9159_v6 }
 0x299   : > { %v1694_v28 = vpop.f32.mrf.mxu2  ;;  %2124 = vmatpush.msrb.mxu1 %v339_v36  ;;  %2188 = vmatpush.msrb.mxu2 %v492_v52  ;;  %v9176_v52 = vld [vmem:[%s7981_s20 + $0xe0] sm:$0xff] }
 0x29a   : > { %v9140_v30 = vadd.f32 %v1694_v28, %v1630_v5  ;;  %v9142_v10 = vpop.f32.mrf.mxu3  ;;  %v1567_v8 = vpop.f32.mrf.mxu0  ;;  %v9153_v28 = vld [vmem:[%s7981_s20 + $0xc8] sm:$0xff]  ;;  %2058 = vmatpush.msrb.mxu0 %v635_v11  ;;  %12829 = vst [vmem:[#allocation115_spill] sm:$0xff] %v9176_v52 }
 0x29b   : > { %12821 = vst [vmem:[#allocation107_spill] sm:$0xff] %v9142_v10  ;;  %v1632_v63 = vpop.f32.mrf.mxu1  ;;  %v9156_v5 = vpop.permute.xlu0 %3017  ;;  %v583_v11 = vld [vmem:[#allocation5 + $0x868] sm:$0xff] }
 0x29c   : > { %6598 = vmatpush.xpose.msk.msra.mxu3 %vm12611_vm0, %v8700_v13  ;;  %3981 = vrot.lane.b32.xlu1 %v9140_v30, %s7832_s21  ;;  %12824 = vst [vmem:[#allocation110_spill] sm:$0xff] %v9153_v28  ;;  %v330_v13 = vld [vmem:[#allocation5 + $0x80] sm:$0xff]  ;;  %v1633_v3 = vadd.f32 %v1632_v63, %v1567_v8  ;;  %v592_v63 = vld [vmem:[#allocation5 + $0x8b0] sm:$0xff]  ;;  %v9171_v36 = vpop.permute.xlu2 %4905 }
 0x29d   : > { %1826 = vmatmul.f32.gmra.mxu0 %v9153_v28  ;;  %2125 = vmatpush.msrb.mxu1 %v330_v13  ;;  %12828 = vst [vmem:[#allocation114_spill] sm:$0xff] %v9171_v36  ;;  %v483_v36 = vld [vmem:[#allocation5 + $0x548] sm:$0xff] }
 0x29e   : > { %1891 = vmatmul.f32.gmra.mxu1 %v9159_v6  ;;  %1956 = vmatmul.f32.gmra.mxu2 %v9163_v51 }
 0x29f   : > { %2021 = vmatmul.f32.gmra.mxu3 %v9153_v28  ;;  %2126 = vmatpush.msrb.mxu1 %v321_v15 }
 0x2a0   : > { %2189 = vmatpush.msrb.mxu2 %v483_v36  ;;  %v9205_v36 = vld [vmem:[%s7981_s20 + $0x100] sm:$0xff] }
 0x2a1   : > { %v1697_v42 = vpop.f32.mrf.mxu2  ;;  %2371 = vmatpush.msra.mxu1 %v601_v47  ;;  %v9188_v47 = vld [vmem:[%s7981_s20 + $0xd8] sm:$0xff]  ;;  %12835 = vst [vmem:[#allocation121_spill] sm:$0xff] %v9205_v36 }
 0x2a2   : > { %v9167_v4 = vadd.f32 %v1697_v42, %v1633_v3  ;;  %v9169_v17 = vpop.f32.mrf.mxu3  ;;  %v1570_v53 = vpop.f32.mrf.mxu0  ;;  %v9184_v3 = vld [vmem:[%s7981_s20 + $0xe8] sm:$0xff]  ;;  %12832 = vst [vmem:[#allocation118_spill] sm:$0xff] %v9188_v47 }
 0x2a3   : > { %12827 = vst [vmem:[#allocation113_spill] sm:$0xff] %v9169_v17  ;;  %v1635_v8 = vpop.f32.mrf.mxu1  ;;  %v9179_v42 = vpop.permute.xlu1 %3007  ;;  %2372 = vmatpush.msra.mxu1 %v592_v63 }
 0x2a4   : > { %3983 = vrot.lane.b32.xlu2 %v9167_v4, %s7832_s21  ;;  %12830 = vst [vmem:[#allocation116_spill] sm:$0xff] %v9179_v42  ;;  %v9181_v13 = vpop.permute.xlu0 %3021  ;;  %v1636_v15 = vadd.f32 %v1635_v8, %v1570_v53  ;;  %v565_v53 = vld [vmem:[#allocation5 + $0x7d8] sm:$0xff] }
 0x2a5   : > { %1829 = vmatmul.f32.gmra.mxu0 %v9176_v52  ;;  %12831 = vst [vmem:[#allocation117_spill] sm:$0xff] %v9184_v3  ;;  %2373 = vmatpush.msra.mxu1 %v583_v11  ;;  %v9199_v8 = vld [vmem:[%s7981_s20 + $0xf8] sm:$0xff] }
 0x2a6   : > { %1894 = vmatmul.f32.gmra.mxu1 %v9184_v3  ;;  %1959 = vmatmul.f32.gmra.mxu2 %v9188_v47  ;;  %v626_v47 = vld [vmem:[#allocation5 + $0x9c0] sm:$0xff]  ;;  %12834 = vst [vmem:[#allocation120_spill] sm:$0xff] %v9199_v8 }
 0x2a7   : > { %2024 = vmatmul.f32.gmra.mxu3 %v9176_v52  ;;  %2374 = vmatpush.msra.mxu1 %v574_v60  ;;  %v556_v60 = vld [vmem:[#allocation5 + $0x790] sm:$0xff] }
 0x2a8   : > { %2059 = vmatpush.msrb.mxu0 %v626_v47  ;;  %v474_v47 = vld [vmem:[#allocation5 + $0x500] sm:$0xff] }
 0x2a9   : > { %v1700_v27 = vpop.f32.mrf.mxu2  ;;  %2375 = vmatpush.msra.mxu1 %v565_v53  ;;  %2190 = vmatpush.msrb.mxu2 %v474_v47  ;;  %v9230_v47 = vld [vmem:[%s7981_s20 + $0x118] sm:$0xff] }
 0x2aa   : > { %v9192_v56 = vadd.f32 %v1700_v27, %v1636_v15  ;;  %v9194_v3 = vpop.f32.mrf.mxu3  ;;  %v1573_v28 = vpop.f32.mrf.mxu0  ;;  %v9209_v27 = vld [vmem:[%s7981_s20 + $0xf0] sm:$0xff]  ;;  %12841 = vst [vmem:[#allocation127_spill] sm:$0xff] %v9230_v47 }
 0x2ab   : > { %12833 = vst [vmem:[#allocation119_spill] sm:$0xff] %v9194_v3  ;;  %v1638_v51 = vpop.f32.mrf.mxu1  ;;  %v9202_v63 = vpop.permute.xlu1 %3011  ;;  %v547_v3 = vld [vmem:[#allocation5 + $0x748] sm:$0xff]  ;;  %2376 = vmatpush.msra.mxu1 %v556_v60 }
 0x2ac   : > { %3985 = vrot.lane.b32.xlu1 %v9192_v56, %s7832_s21  ;;  %12836 = vst [vmem:[#allocation122_spill] sm:$0xff] %v9209_v27  ;;  %v1639_v11 = vadd.f32 %v1638_v51, %v1573_v28  ;;  %v9213_v15 = vpop.permute.xlu2 %4907  ;;  %v9215_v52 = vpop.permute.xlu0 %4919  ;;  %v617_v51 = vld [vmem:[#allocation5 + $0x978] sm:$0xff] }
 0x2ad   : > { %1832 = vmatmul.f32.gmra.mxu0 %v9199_v8  ;;  %12837 = vst [vmem:[#allocation123_spill] sm:$0xff] %v9213_v15  ;;  %2377 = vmatpush.msra.mxu1 %v547_v3  ;;  %v529_v3 = vld [vmem:[#allocation5 + $0x6b8] sm:$0xff] }
 0x2ae   : > { %1897 = vmatmul.f32.gmra.mxu1 %v9205_v36  ;;  %1962 = vmatmul.f32.gmra.mxu2 %v9209_v27  ;;  %12838 = vst [vmem:[#allocation124_spill] sm:$0xff] %v9215_v52  ;;  %v9224_v52 = vld [vmem:[%s7981_s20 + $0x110] sm:$0xff] }
 0x2af   : > { %2027 = vmatmul.f32.gmra.mxu3 %v9199_v8  ;;  %v538_v8 = vld [vmem:[#allocation5 + $0x700] sm:$0xff]  ;;  %2060 = vmatpush.msrb.mxu0 %v617_v51  ;;  %12840 = vst [vmem:[#allocation126_spill] sm:$0xff] %v9224_v52  ;;  %v465_v51 = vld [vmem:[#allocation5 + $0x4b8] sm:$0xff] }
 0x2b0   : > { %2378 = vmatpush.msra.mxu1 %v538_v8  ;;  %2191 = vmatpush.msrb.mxu2 %v465_v51  ;;  %v745_v51 = vld [vmem:[#allocation5 + $0xd78] sm:$0xff] }
 0x2b1   : > { %v1703_v36 = vpop.f32.mrf.mxu2 }
 0x2b2   : > { %v9217_v6 = vadd.f32 %v1703_v36, %v1639_v11  ;;  %v9219_v27 = vpop.f32.mrf.mxu3  ;;  %v1576_v28 = vpop.f32.mrf.mxu0  ;;  %v9234_v36 = vld [vmem:[%s7981_s20 + $0x108] sm:$0xff]  ;;  %2379 = vmatpush.msra.mxu1 %v529_v3  ;;  %v9253_v3 = vld [vmem:[%s7981_s20 + $0x130] sm:$0xff]  ;;  %2436 = vmatpush.msra.mxu2 %v745_v51 }
 0x2b3   : > { %12839 = vst [vmem:[#allocation125_spill] sm:$0xff] %v9219_v27  ;;  %v1641_v53 = vpop.f32.mrf.mxu1  ;;  %v9227_v60 = vpop.permute.xlu1 %3015  ;;  %v520_v27 = vld [vmem:[#allocation5 + $0x670] sm:$0xff]  ;;  %v9278_v51 = vld [vmem:[%s7981_s20 + $0x148] sm:$0xff] }
 0x2b4   : > { %3987 = vrot.lane.b32.xlu1 %v9217_v6, %s7832_s21  ;;  %12842 = vst [vmem:[#allocation128_spill] sm:$0xff] %v9234_v36  ;;  %v1642_v11 = vadd.f32 %v1641_v53, %v1576_v28  ;;  %v9238_v15 = vpop.permute.xlu2 %4915  ;;  %v9240_v17 = vpop.permute.xlu0 %4921  ;;  %2380 = vmatpush.msra.mxu1 %v520_v27  ;;  %v608_v53 = vld [vmem:[#allocation5 + $0x930] sm:$0xff]  ;;  %v502_v27 = vld [vmem:[#allocation5 + $0x5e0] sm:$0xff] }
 0x2b5   : > { %1835 = vmatmul.f32.gmra.mxu0 %v9224_v52  ;;  %12843 = vst [vmem:[#allocation129_spill] sm:$0xff] %v9238_v15  ;;  %v9249_v15 = vld [vmem:[%s7981_s20 + $0x128] sm:$0xff] }
 0x2b6   : > { %1900 = vmatmul.f32.gmra.mxu1 %v9230_v47  ;;  %1965 = vmatmul.f32.gmra.mxu2 %v9234_v36  ;;  %12844 = vst [vmem:[#allocation130_spill] sm:$0xff] %v9240_v17  ;;  %v493_v17 = vld [vmem:[#allocation5 + $0x598] sm:$0xff] }
 0x2b7   : > { %2030 = vmatmul.f32.gmra.mxu3 %v9224_v52  ;;  %v511_v52 = vld [vmem:[#allocation5 + $0x628] sm:$0xff]  ;;  %2061 = vmatpush.msrb.mxu0 %v608_v53  ;;  %12846 = vst [vmem:[#allocation132_spill] sm:$0xff] %v9249_v15 }
 0x2b8   : > { %12847 = vst [vmem:[#allocation133_spill] sm:$0xff] %v9253_v3  ;;  %2381 = vmatpush.msra.mxu1 %v511_v52 }
 0x2b9   : > { %v1706_v47 = vpop.f32.mrf.mxu2  ;;  %12853 = vst [vmem:[#allocation139_spill] sm:$0xff] %v9278_v51 }
 0x2ba   : > { %v9242_v2 = vadd.f32 %v1706_v47, %v1642_v11  ;;  %v9244_v36 = vpop.f32.mrf.mxu3  ;;  %v1579_v28 = vpop.f32.mrf.mxu0  ;;  %v9257_v47 = vld [vmem:[%s7981_s20 + $0x120] sm:$0xff]  ;;  %2382 = vmatpush.msra.mxu1 %v502_v27  ;;  %v457_v27 = vld [vmem:[#allocation5 + $0x478] sm:$0xff] }
 0x2bb   : > { %12845 = vst [vmem:[#allocation131_spill] sm:$0xff] %v9244_v36  ;;  %v1644_v8 = vpop.f32.mrf.mxu1  ;;  %v9261_v53 = vpop.permute.xlu1 %4913  ;;  %2306 = vmatpush.msra.mxu0 %v457_v27  ;;  %v9297_v27 = vld [vmem:[%s7981_s20 + $0x158] sm:$0xff] }
 0x2bc   : > { %3989 = vrot.lane.b32.xlu0 %v9242_v2, %s7832_s21  ;;  %12848 = vst [vmem:[#allocation134_spill] sm:$0xff] %v9257_v47  ;;  %v1645_v11 = vadd.f32 %v1644_v8, %v1579_v28  ;;  %v9263_v36 = vpop.permute.xlu2 %4917  ;;  %2383 = vmatpush.msra.mxu1 %v493_v17  ;;  %v9269_v8 = vpop.permute.xlu0 %3025  ;;  %v475_v17 = vld [vmem:[#allocation5 + $0x508] sm:$0xff] }
 0x2bd   : > { %1838 = vmatmul.f32.gmra.mxu0 %v9249_v15  ;;  %12849 = vst [vmem:[#allocation135_spill] sm:$0xff] %v9261_v53  ;;  %v9274_v53 = vld [vmem:[%s7981_s20 + $0x140] sm:$0xff] }
 0x2be   : > { %1903 = vmatmul.f32.gmra.mxu1 %v9253_v3  ;;  %1968 = vmatmul.f32.gmra.mxu2 %v9257_v47  ;;  %12850 = vst [vmem:[#allocation136_spill] sm:$0xff] %v9263_v36  ;;  %v736_v36 = vld [vmem:[#allocation5 + $0xd30] sm:$0xff] }
 0x2bf   : > { %2033 = vmatmul.f32.gmra.mxu3 %v9249_v15  ;;  %v484_v15 = vld [vmem:[#allocation5 + $0x550] sm:$0xff]  ;;  %12852 = vst [vmem:[#allocation138_spill] sm:$0xff] %v9274_v53  ;;  %2437 = vmatpush.msra.mxu2 %v736_v36 }
 0x2c0   : > { %2384 = vmatpush.msra.mxu1 %v484_v15  ;;  %12856 = vst [vmem:[#allocation142_spill] sm:$0xff] %v9297_v27 }
 0x2c1   : > { %v1709_v3 = vpop.f32.mrf.mxu2 }
 0x2c2   : > { %v9265_v59 = vadd.f32 %v1709_v3, %v1645_v11  ;;  %v9267_v47 = vpop.f32.mrf.mxu3  ;;  %v1582_v28 = vpop.f32.mrf.mxu0  ;;  %v9282_v3 = vld [vmem:[%s7981_s20 + $0x138] sm:$0xff]  ;;  %2385 = vmatpush.msra.mxu1 %v475_v17  ;;  %v9303_v17 = vld [vmem:[%s7981_s20 + $0x160] sm:$0xff] }
 0x2c3   : > { %12851 = vst [vmem:[#allocation137_spill] sm:$0xff] %v9267_v47  ;;  %v1647_v52 = vpop.f32.mrf.mxu1  ;;  %v466_v47 = vld [vmem:[#allocation5 + $0x4c0] sm:$0xff]  ;;  %v9286_v12 = vpop.permute.xlu1 %3019 }
 0x2c4   : > { %3991 = vrot.lane.b32.xlu0 %v9265_v59, %s7832_s21  ;;  %12854 = vst [vmem:[#allocation140_spill] sm:$0xff] %v9282_v3  ;;  %v1648_v11 = vadd.f32 %v1647_v52, %v1582_v28  ;;  %2386 = vmatpush.msra.mxu1 %v466_v47  ;;  %v9292_v28 = vpop.permute.xlu2 %3027  ;;  %v448_v52 = vld [vmem:[#allocation5 + $0x430] sm:$0xff]  ;;  %v9300_v36 = vpop.permute.xlu0 %4923 }
 0x2c5   : > { %1841 = vmatmul.f32.gmra.mxu0 %v9274_v53  ;;  %12857 = vst [vmem:[#allocation143_spill] sm:$0xff] %v9300_v36 }
 0x2c6   : > { %1906 = vmatmul.f32.gmra.mxu1 %v9278_v51  ;;  %1971 = vmatmul.f32.gmra.mxu2 %v9282_v3  ;;  %12858 = vst [vmem:[#allocation144_spill] sm:$0xff] %v9303_v17 }
 0x2c7   : > { %2036 = vmatmul.f32.gmra.mxu3 %v9274_v53  ;;  %2307 = vmatpush.msra.mxu0 %v448_v52  ;;  %v9327_v52 = vld [vmem:[%s7981_s20 + $0x168] sm:$0xff] }
 0x2c9   : > { %v1712_v51 = vpop.f32.mrf.mxu2  ;;  %2308 = vmatpush.msra.mxu0 %v439_v43 }
 0x2ca   : > { %v9288_v26 = vadd.f32 %v1712_v51, %v1648_v11  ;;  %v9290_v49 = vpop.f32.mrf.mxu3  ;;  %v1585_v3 = vpop.f32.mrf.mxu0  ;;  %v9307_v51 = vld [vmem:[%s7981_s20 + $0x150] sm:$0xff]  ;;  %v727_v11 = vld [vmem:[#allocation5 + $0xce8] sm:$0xff] }
 0x2cb   : > { %12855 = vst [vmem:[#allocation141_spill] sm:$0xff] %v9290_v49  ;;  %v1650_v15 = vpop.f32.mrf.mxu1  ;;  %2438 = vmatpush.msra.mxu2 %v727_v11  ;;  %v9311_v53 = vpop.permute.xlu1 %3023 }
 0x2cc   : > { %3993 = vrot.lane.b32.xlu2 %v9288_v26, %s7832_s21  ;;  %12859 = vst [vmem:[#allocation145_spill] sm:$0xff] %v9307_v51  ;;  %v1651_v47 = vadd.f32 %v1650_v15, %v1585_v3  ;;  %v9315_v25 = vpop.permute.xlu2 %4929  ;;  %v9319_v3 = vld [vmem:[%s7981_s20 + $0x170] sm:$0xff]  ;;  %v9323_v15 = vld [vmem:[%s7981_s20 + $0x178] sm:$0xff]  ;;  %v9331_v11 = vpop.permute.xlu0 %4927 }
 0x2cd   : > { %1844 = vmatmul.f32.gmra.mxu0 %v9297_v27  ;;  %12861 = vst [vmem:[#allocation147_spill] sm:$0xff] %v9315_v25 }
 0x2ce   : > { %1909 = vmatmul.f32.gmra.mxu1 %v9303_v17  ;;  %1974 = vmatmul.f32.gmra.mxu2 %v9307_v51  ;;  %12862 = vst [vmem:[#allocation148_spill] sm:$0xff] %v9323_v15 }
 0x2cf   : > { %2039 = vmatmul.f32.gmra.mxu3 %v9297_v27  ;;  %12863 = vst [vmem:[#allocation149_spill] sm:$0xff] %v9331_v11 }
 0x2d1   : > { %v1715_v36 = vpop.f32.mrf.mxu2 }
 0x2d2   : > { %v1716_v49 = vadd.f32 %v1715_v36, %v1651_v47  ;;  %v9313_v38 = vpop.f32.mrf.mxu3  ;;  %v1588_v17 = vpop.f32.mrf.mxu0  ;;  %v718_v47 = vld [vmem:[#allocation5 + $0xca0] sm:$0xff] }
 0x2d3   : > { %12860 = vst [vmem:[#allocation146_spill] sm:$0xff] %v9313_v38  ;;  %v1653_v10 = vpop.f32.mrf.mxu1  ;;  %2439 = vmatpush.msra.mxu2 %v718_v47  ;;  %v9335_v42 = vpop.permute.xlu1 %4925  ;;  %v421_v47 = vld [vmem:[#allocation5 + $0x358] sm:$0xff] }
 0x2d4   : > { %3995 = vrot.lane.b32.xlu0 %v1716_v49, %s7832_s21  ;;  %v1654_v36 = vadd.f32 %v1653_v10, %v1588_v17  ;;  %12864 = vst [vmem:[#allocation150_spill] sm:$0xff] %v9335_v42  ;;  %v3034_v10 = vpop.permute.xlu2 %3033  ;;  %v709_v17 = vld [vmem:[#allocation5 + $0xc58] sm:$0xff] }
 0x2d5   : > { %1847 = vmatmul.f32.gmra.mxu0 %v9319_v3  ;;  %2440 = vmatpush.msra.mxu2 %v709_v17  ;;  %v412_v17 = vld [vmem:[#allocation5 + $0x310] sm:$0xff] }
 0x2d6   : > { %1912 = vmatmul.f32.gmra.mxu1 %v9323_v15  ;;  %1977 = vmatmul.f32.gmra.mxu2 %v9327_v52 }
 0x2d7   : > { %2042 = vmatmul.f32.gmra.mxu3 %v9319_v3 }
 0x2d9   : > { %v1718_v25 = vpop.f32.mrf.mxu2 }
 0x2da   : > { %v1719_v27 = vadd.f32 %v1718_v25, %v1654_v36  ;;  %v9333_v51 = vpop.f32.mrf.mxu3  ;;  %v1803_v38 = vpop.f32.mrf.mxu0  ;;  %v430_v25 = vld [vmem:[#allocation5 + $0x3a0] sm:$0xff] }
 0x2db   : > { %v1804_v15 = vadd.f32 %v1803_v38, %v8944_v41  ;;  %v1868_v33 = vpop.f32.mrf.mxu1  ;;  %2309 = vmatpush.msra.mxu0 %v430_v25  ;;  %v3032_v41 = vpop.permute.xlu0 %3031 }
 0x2dc   : > { %3997 = vrot.lane.b32.xlu0 %v1719_v27, %s7832_s21 }
 0x2dd   : > { %2062 = vmatmul.f32.vlgmr.msrb.gmra.mxu0 %v8929_v37  ;;  %v9340_v43 = vadd.f32 %v1868_v33, %v1804_v15 }
 0x2de   : > { %2127 = vmatmul.f32.vlgmr.msrb.gmra.mxu1 %v8933_v31  ;;  %2192 = vmatmul.f32.vlgmr.msrb.gmra.mxu2 %v8925_v18 }
 0x2df   : > { %2257 = vmatmul.f32.vlgmr.msrb.gmra.mxu3 %v8929_v37  ;;  %6615 = vmatpush.xpose.msk.msrb.mxu1 %vm12611_vm0, %v3034_v10  ;;  %v700_v10 = vld [vmem:[#allocation5 + $0xc10] sm:$0xff] }
 0x2e0   : > { %6647 = vmatpush.xpose.msk.msrb.mxu3 %vm12611_vm0, %v1719_v27  ;;  %4931 = vrot.lane.b32.xlu2 %v9340_v43, %s7832_s21  ;;  %v3030_v27 = vpop.permute.xlu1 %3029 }
 0x2e1   : > { %v1933_v33 = vpop.f32.mrf.mxu2  ;;  %2310 = vmatpush.msra.mxu0 %v421_v47  ;;  %2441 = vmatpush.msra.mxu2 %v700_v10  ;;  %v12869_v10 = vld [vmem:[#allocation105_spill] sm:$0xff] }
 0x2e2   : > { %v1998_v38 = vpop.f32.mrf.mxu3  ;;  %v1806_v31 = vpop.f32.mrf.mxu0 }
 0x2e3   : > { %6616 = vmatpush.xpose.msk.msrb.mxu1 %vm12611_vm0, %v3032_v41  ;;  %v9350_v18 = vadd.f32 %v1998_v38, %v1933_v33  ;;  %v1807_v37 = vadd.f32 %v1806_v31, %v8974_v22  ;;  %v1871_v15 = vpop.f32.mrf.mxu1  ;;  %2311 = vmatpush.msra.mxu0 %v412_v17  ;;  %v403_v41 = vld [vmem:[#allocation5 + $0x2c8] sm:$0xff]  ;;  %v394_v33 = vld [vmem:[#allocation5 + $0x280] sm:$0xff]  ;;  %v385_v38 = vld [vmem:[#allocation5 + $0x238] sm:$0xff] }
 0x2e4   : > { %6648 = vmatpush.xpose.msk.msrb.mxu3 %vm12611_vm0, %v1716_v49  ;;  %v376_v31 = vld [vmem:[#allocation5 + $0x1f0] sm:$0xff]  ;;  %v646_v17 = vld [vmem:[#allocation5 + $0xa60] sm:$0xff] }
 0x2e5   : > { %2065 = vmatmul.f32.gmra.mxu0 %v8956_v62  ;;  %v9355_v36 = vadd.f32 %v1871_v15, %v1807_v37  ;;  %v12865_v37 = vld [vmem:[#allocation95_spill] sm:$0xff] }
 0x2e6   : > { %2130 = vmatmul.f32.gmra.mxu1 %v8960_v46  ;;  %2195 = vmatmul.f32.gmra.mxu2 %v8952_v35 }
 0x2e7   : > { %2260 = vmatmul.f32.gmra.mxu3 %v8956_v62  ;;  %6617 = vmatpush.xpose.msk.msrb.mxu1 %vm12611_vm0, %v3030_v27 }
 0x2e8   : > { %6649 = vmatpush.xpose.msk.msrb.mxu3 %vm12611_vm0, %v9288_v26  ;;  %4933 = vrot.lane.b32.xlu2 %v9355_v36, %s7832_s21 }
 0x2e9   : > { %v1936_v22 = vpop.f32.mrf.mxu2  ;;  %2312 = vmatpush.msra.mxu0 %v403_v41  ;;  %v12875_v41 = vld [vmem:[#allocation85_spill] sm:$0xff] }
 0x2ea   : > { %v2001_v49 = vpop.f32.mrf.mxu3  ;;  %v1809_v35 = vpop.f32.mrf.mxu0 }
 0x2eb   : > { %6618 = vmatpush.xpose.msk.msrb.mxu1 %vm12611_vm0, %v9292_v28  ;;  %v9367_v46 = vadd.f32 %v2001_v49, %v1936_v22  ;;  %v1810_v62 = vadd.f32 %v1809_v35, %v9003_v54  ;;  %v1874_v25 = vpop.f32.mrf.mxu1  ;;  %v691_v28 = vld [vmem:[#allocation5 + $0xbc8] sm:$0xff]  ;;  %2313 = vmatpush.msra.mxu0 %v394_v33  ;;  %v12870_v49 = vld [vmem:[#allocation106_spill] sm:$0xff] }
 0x2ec   : > { %6650 = vmatpush.xpose.msk.msrb.mxu3 %vm12611_vm0, %v9265_v59  ;;  %2442 = vmatpush.msra.mxu2 %v691_v28  ;;  %v12871_v35 = vld [vmem:[#allocation104_spill] sm:$0xff] }
 0x2ed   : > { %2068 = vmatmul.f32.gmra.mxu0 %v8987_v19  ;;  %v9373_v26 = vadd.f32 %v1874_v25, %v1810_v62  ;;  %v367_v62 = vld [vmem:[#allocation5 + $0x1a8] sm:$0xff]  ;;  %v12872_v25 = vld [vmem:[#allocation89_spill] sm:$0xff] }
 0x2ee   : > { %2133 = vmatmul.f32.gmra.mxu1 %v8991_v32  ;;  %2198 = vmatmul.f32.gmra.mxu2 %v8981_v48  ;;  %v12873_v28 = vld [vmem:[#allocation88_spill] sm:$0xff] }
 0x2ef   : > { %2263 = vmatmul.f32.gmra.mxu3 %v8987_v19  ;;  %6619 = vmatpush.xpose.msk.msrb.mxu1 %vm12611_vm0, %v9269_v8  ;;  %v12878_v33 = vld [vmem:[#allocation112_spill] sm:$0xff] }
 0x2f0   : > { %6651 = vmatpush.xpose.msk.msrb.mxu3 %vm12611_vm0, %v9242_v2  ;;  %4935 = vrot.lane.b32.xlu1 %v9373_v26, %s7832_s21 }
 0x2f1   : > { %v1939_v54 = vpop.f32.mrf.mxu2  ;;  %2314 = vmatpush.msra.mxu0 %v385_v38  ;;  %v12880_v38 = vld [vmem:[#allocation119_spill] sm:$0xff] }
 0x2f2   : > { %v2004_v59 = vpop.f32.mrf.mxu3  ;;  %v1812_v48 = vpop.f32.mrf.mxu0 }
 0x2f3   : > { %6620 = vmatpush.xpose.msk.msrb.mxu1 %vm12611_vm0, %v9311_v53  ;;  %v9386_v32 = vadd.f32 %v2004_v59, %v1939_v54  ;;  %v1813_v19 = vadd.f32 %v1812_v48, %v9032_v1  ;;  %v1877_v8 = vpop.f32.mrf.mxu1  ;;  %v682_v53 = vld [vmem:[#allocation5 + $0xb80] sm:$0xff]  ;;  %2315 = vmatpush.msra.mxu0 %v376_v31 }
 0x2f4   : > { %6652 = vmatpush.xpose.msk.msrb.mxu3 %vm12611_vm0, %v9217_v6  ;;  %2443 = vmatpush.msra.mxu2 %v682_v53  ;;  %v12874_v48 = vld [vmem:[#allocation102_spill] sm:$0xff]  ;;  %v12876_v53 = vld [vmem:[#allocation113_spill] sm:$0xff]  ;;  %v12883_v31 = vld [vmem:[#allocation115_spill] sm:$0xff] }
 0x2f5   : > { %2071 = vmatmul.f32.gmra.mxu0 %v9016_v34  ;;  %v9392_v2 = vadd.f32 %v1877_v8, %v1813_v19 }
 0x2f6   : > { %2136 = vmatmul.f32.gmra.mxu1 %v9020_v21  ;;  %2201 = vmatmul.f32.gmra.mxu2 %v9010_v44 }
 0x2f7   : > { %2266 = vmatmul.f32.gmra.mxu3 %v9016_v34  ;;  %6621 = vmatpush.xpose.msk.msrb.mxu1 %vm12611_vm0, %v9181_v13 }
 0x2f8   : > { %6653 = vmatpush.xpose.msk.msrb.mxu3 %vm12611_vm0, %v9192_v56  ;;  %4937 = vrot.lane.b32.xlu0 %v9392_v2, %s7832_s21 }
 0x2f9   : > { %v1942_v1 = vpop.f32.mrf.mxu2  ;;  %2316 = vmatpush.msra.mxu0 %v367_v62  ;;  %v619_v62 = vld [vmem:[#allocation5 + $0x988] sm:$0xff] }
 0x2fa   : > { %v2007_v6 = vpop.f32.mrf.mxu3  ;;  %v1815_v44 = vpop.f32.mrf.mxu0 }
 0x2fb   : > { %6622 = vmatpush.xpose.msk.msrb.mxu1 %vm12611_vm0, %v9286_v12  ;;  %v9405_v21 = vadd.f32 %v2007_v6, %v1942_v1  ;;  %v1816_v34 = vadd.f32 %v1815_v44, %v9061_v61  ;;  %v1880_v13 = vpop.f32.mrf.mxu1  ;;  %v673_v12 = vld [vmem:[#allocation5 + $0xb38] sm:$0xff]  ;;  %v358_v44 = vld [vmem:[#allocation5 + $0x160] sm:$0xff] }
 0x2fc   : > { %6654 = vmatpush.xpose.msk.msrb.mxu3 %vm12611_vm0, %v9167_v4  ;;  %2444 = vmatpush.msra.mxu2 %v673_v12  ;;  %v12879_v12 = vld [vmem:[#allocation110_spill] sm:$0xff] }
 0x2fd   : > { %2074 = vmatmul.f32.gmra.mxu0 %v9043_v23  ;;  %v9411_v56 = vadd.f32 %v1880_v13, %v1816_v34  ;;  %v12877_v34 = vld [vmem:[#allocation111_spill] sm:$0xff] }
 0x2fe   : > { %2139 = vmatmul.f32.gmra.mxu1 %v9047_v14  ;;  %2204 = vmatmul.f32.gmra.mxu2 %v9039_v29 }
 0x2ff   : > { %2269 = vmatmul.f32.gmra.mxu3 %v9043_v23  ;;  %6623 = vmatpush.xpose.msk.msrb.mxu1 %vm12611_vm0, %v9156_v5 }
 0x300   : > { %6655 = vmatpush.xpose.msk.msrb.mxu3 %vm12611_vm0, %v9140_v30  ;;  %4939 = vrot.lane.b32.xlu0 %v9411_v56, %s7832_s21 }
 0x301   : > { %v1945_v4 = vpop.f32.mrf.mxu2  ;;  %2317 = vmatpush.msra.mxu0 %v358_v44  ;;  %v12891_v44 = vld [vmem:[#allocation126_spill] sm:$0xff] }
 0x302   : > { %v2010_v61 = vpop.f32.mrf.mxu3  ;;  %v1818_v29 = vpop.f32.mrf.mxu0 }
 0x303   : > { %6624 = vmatpush.xpose.msk.msrb.mxu1 %vm12611_vm0, %v9227_v60  ;;  %v9424_v14 = vadd.f32 %v2010_v61, %v1945_v4  ;;  %v1819_v23 = vadd.f32 %v1818_v29, %v9090_v39  ;;  %v1883_v5 = vpop.f32.mrf.mxu1  ;;  %v664_v60 = vld [vmem:[#allocation5 + $0xaf0] sm:$0xff]  ;;  %v637_v4 = vld [vmem:[#allocation5 + $0xa18] sm:$0xff] }
 0x304   : > { %6656 = vmatpush.xpose.msk.msrb.mxu3 %vm12611_vm0, %v9115_v40  ;;  %2445 = vmatpush.msra.mxu2 %v664_v60 }
 0x305   : > { %2077 = vmatmul.f32.gmra.mxu0 %v9072_v55  ;;  %v9430_v30 = vadd.f32 %v1883_v5, %v1819_v23 }
 0x306   : > { %2142 = vmatmul.f32.gmra.mxu1 %v9076_v16  ;;  %2207 = vmatmul.f32.gmra.mxu2 %v9068_v0 }
 0x307   : > { %2272 = vmatmul.f32.gmra.mxu3 %v9072_v55  ;;  %6625 = vmatpush.xpose.msk.msrb.mxu1 %vm12611_vm0, %v9086_v58 }
 0x308   : > { %6657 = vmatpush.xpose.msk.msrb.mxu3 %vm12611_vm0, %v9088_v24  ;;  %4941 = vrot.lane.b32.xlu0 %v9430_v30, %s7832_s21 }
 0x309   : > { %v1948_v40 = vpop.f32.mrf.mxu2 }
 0x30a   : > { %v2013_v39 = vpop.f32.mrf.mxu3  ;;  %v1821_v0 = vpop.f32.mrf.mxu0 }
 0x30b   : > { %6626 = vmatpush.xpose.msk.msrb.mxu1 %vm12611_vm0, %v9202_v63  ;;  %v9443_v16 = vadd.f32 %v2013_v39, %v1948_v40  ;;  %v1822_v58 = vadd.f32 %v1821_v0, %v9117_v45  ;;  %v1886_v55 = vpop.f32.mrf.mxu1  ;;  %v655_v63 = vld [vmem:[#allocation5 + $0xaa8] sm:$0xff]  ;;  %v349_v39 = vld [vmem:[#allocation5 + $0x118] sm:$0xff] }
 0x30c   : > { %6658 = vmatpush.xpose.msk.msrb.mxu3 %vm12611_vm0, %v9059_v50  ;;  %2446 = vmatpush.msra.mxu2 %v655_v63  ;;  %v12881_v0 = vld [vmem:[#allocation117_spill] sm:$0xff] }
 0x30d   : > { %2080 = vmatmul.f32.gmra.mxu0 %v9101_v20  ;;  %v9449_v24 = vadd.f32 %v1886_v55, %v1822_v58  ;;  %v12882_v55 = vld [vmem:[#allocation118_spill] sm:$0xff]  ;;  %v628_v63 = vld [vmem:[#allocation5 + $0x9d0] sm:$0xff] }
 0x30e   : > { %2145 = vmatmul.f32.gmra.mxu1 %v9105_v57  ;;  %2210 = vmatmul.f32.gmra.mxu2 %v9097_v7  ;;  %v12866_v57 = vld [vmem:[#allocation116_spill] sm:$0xff] }
 0x30f   : > { %2275 = vmatmul.f32.gmra.mxu3 %v9101_v20  ;;  %6627 = vmatpush.xpose.msk.msrb.mxu1 %vm12611_vm0, %v9013_v9  ;;  %v12867_v20 = vld [vmem:[#allocation92_spill] sm:$0xff]  ;;  %v12868_v9 = vld [vmem:[#allocation107_spill] sm:$0xff] }
 0x310   : > { %6659 = vmatpush.xpose.msk.msrb.mxu3 %vm12611_vm0, %v12865_v37  ;;  %4943 = vrot.lane.b32.xlu2 %v9449_v24, %s7832_s21 }
 0x311   : > { %v1951_v45 = vpop.f32.mrf.mxu2  ;;  %2447 = vmatpush.msra.mxu2 %v646_v17  ;;  %2318 = vmatpush.msra.mxu0 %v349_v39  ;;  %v9531_v39 = vpop.permute.xlu2 %3967 }
 0x312   : > { %v2016_v50 = vpop.f32.mrf.mxu3  ;;  %v1824_v7 = vpop.f32.mrf.mxu0 }
 0x313   : > { %6628 = vmatpush.xpose.msk.msrb.mxu1 %vm12611_vm0, %v12866_v57  ;;  %v9462_v15 = vadd.f32 %v2016_v50, %v1951_v45  ;;  %v1825_v27 = vadd.f32 %v1824_v7, %v12868_v9  ;;  %v1889_v47 = vpop.f32.mrf.mxu1  ;;  %2448 = vmatpush.msra.mxu2 %v637_v4  ;;  %v12884_v7 = vld [vmem:[#allocation125_spill] sm:$0xff] }
 0x314   : > { %6660 = vmatpush.xpose.msk.msrb.mxu3 %vm12611_vm0, %v12867_v20 }
 0x315   : > { %2083 = vmatmul.f32.gmra.mxu0 %v12869_v10  ;;  %v9468_v22 = vadd.f32 %v1889_v47, %v1825_v27  ;;  %2449 = vmatpush.msra.mxu2 %v628_v63  ;;  %v340_v27 = vld [vmem:[#allocation5 + $0xd0] sm:$0xff] }
 0x316   : > { %2148 = vmatmul.f32.gmra.mxu1 %v12870_v49  ;;  %2213 = vmatmul.f32.gmra.mxu2 %v12871_v35  ;;  %v12885_v47 = vld [vmem:[#allocation121_spill] sm:$0xff]  ;;  %v12886_v49 = vld [vmem:[#allocation122_spill] sm:$0xff]  ;;  %v12887_v35 = vld [vmem:[#allocation120_spill] sm:$0xff] }
 0x317   : > { %2278 = vmatmul.f32.gmra.mxu3 %v12869_v10  ;;  %6629 = vmatpush.xpose.msk.msrb.mxu1 %vm12611_vm0, %v12872_v25 }
 0x318   : > { %6661 = vmatpush.xpose.msk.msrb.mxu3 %vm12611_vm0, %v12873_v28  ;;  %4945 = vrot.lane.b32.xlu1 %v9468_v22, %s7832_s21 }
 0x319   : > { %v1954_v54 = vpop.f32.mrf.mxu2  ;;  %2319 = vmatpush.msra.mxu0 %v340_v27  ;;  %2450 = vmatpush.msra.mxu2 %v619_v62  ;;  %v12898_v62 = vld [vmem:[#allocation140_spill] sm:$0xff] }
 0x31a   : > { %v2019_v59 = vpop.f32.mrf.mxu3  ;;  %v1827_v19 = vpop.f32.mrf.mxu0 }
 0x31b   : > { %6630 = vmatpush.xpose.msk.msrb.mxu1 %vm12611_vm0, %v12874_v48  ;;  %v9481_v8 = vadd.f32 %v2019_v59, %v1954_v54  ;;  %v1828_v1 = vadd.f32 %v1827_v19, %v12876_v53  ;;  %v1892_v6 = vpop.f32.mrf.mxu1  ;;  %v12888_v59 = vld [vmem:[#allocation131_spill] sm:$0xff] }
 0x31c   : > { %6662 = vmatpush.xpose.msk.msrb.mxu3 %vm12611_vm0, %v12875_v41  ;;  %v331_v41 = vld [vmem:[#allocation5 + $0x88] sm:$0xff] }
 0x31d   : > { %2086 = vmatmul.f32.gmra.mxu0 %v12877_v34  ;;  %v9487_v13 = vadd.f32 %v1892_v6, %v1828_v1  ;;  %v12889_v53 = vld [vmem:[#allocation127_spill] sm:$0xff]  ;;  %v12890_v6 = vld [vmem:[#allocation128_spill] sm:$0xff] }
 0x31e   : > { %2151 = vmatmul.f32.gmra.mxu1 %v12878_v33  ;;  %2216 = vmatmul.f32.gmra.mxu2 %v12879_v12 }
 0x31f   : > { %2281 = vmatmul.f32.gmra.mxu3 %v12877_v34  ;;  %4947 = vrot.lane.b32.xlu2 %v9487_v13, %s7832_s21  ;;  %v610_v34 = vld [vmem:[#allocation5 + $0x940] sm:$0xff] }
 0x320   : > { %2320 = vmatpush.msra.mxu0 %v331_v41  ;;  %2451 = vmatpush.msra.mxu2 %v610_v34  ;;  %v12901_v34 = vld [vmem:[#allocation144_spill] sm:$0xff] }
 0x321   : > { %v1957_v61 = vpop.f32.mrf.mxu2 }
 0x322   : > { %v2022_v29 = vpop.f32.mrf.mxu3  ;;  %v1830_v23 = vpop.f32.mrf.mxu0 }
 0x323   : > { %v9494_v5 = vadd.f32 %v2022_v29, %v1957_v61  ;;  %v1831_v60 = vadd.f32 %v1830_v23, %v12880_v38  ;;  %v1895_v40 = vpop.f32.mrf.mxu1  ;;  %v12892_v29 = vld [vmem:[#allocation137_spill] sm:$0xff] }
 0x325   : > { %2089 = vmatmul.f32.gmra.mxu0 %v12881_v0  ;;  %v9498_v58 = vadd.f32 %v1895_v40, %v1831_v60  ;;  %v322_v60 = vld [vmem:[#allocation5 + $0x40] sm:$0xff]  ;;  %v12893_v40 = vld [vmem:[#allocation133_spill] sm:$0xff] }
 0x326   : > { %2154 = vmatmul.f32.gmra.mxu1 %v12882_v55  ;;  %2219 = vmatmul.f32.gmra.mxu2 %v12883_v31  ;;  %v12894_v55 = vld [vmem:[#allocation134_spill] sm:$0xff]  ;;  %v12895_v31 = vld [vmem:[#allocation132_spill] sm:$0xff] }
 0x327   : > { %2284 = vmatmul.f32.gmra.mxu3 %v12881_v0  ;;  %4949 = vrot.lane.b32.xlu2 %v9498_v58, %s7832_s21 }
 0x328   : > { %2321 = vmatpush.msra.mxu0 %v322_v60 }
 0x329   : > { %v1960_v37 = vpop.f32.mrf.mxu2 }
 0x32a   : > { %v2025_v45 = vpop.f32.mrf.mxu3  ;;  %v1833_v50 = vpop.f32.mrf.mxu0 }
 0x32b   : > { %v9505_v57 = vadd.f32 %v2025_v45, %v1960_v37  ;;  %v1834_v20 = vadd.f32 %v1833_v50, %v12884_v7  ;;  %v1898_v9 = vpop.f32.mrf.mxu1 }
 0x32d   : > { %2092 = vmatmul.f32.gmra.mxu0 %v12885_v47  ;;  %v9509_v10 = vadd.f32 %v1898_v9, %v1834_v20  ;;  %v12896_v20 = vld [vmem:[#allocation141_spill] sm:$0xff] }
 0x32e   : > { %2157 = vmatmul.f32.gmra.mxu1 %v12886_v49  ;;  %2222 = vmatmul.f32.gmra.mxu2 %v12887_v35  ;;  %v9540_v63 = vpop.permute.xlu0 %3989  ;;  %v9546_v49 = vpop.permute.xlu2 %3971 }
 0x32f   : > { %2287 = vmatmul.f32.gmra.mxu3 %v12885_v47  ;;  %4951 = vrot.lane.b32.xlu1 %v9509_v10, %s7832_s21  ;;  %v12897_v47 = vld [vmem:[#allocation139_spill] sm:$0xff] }
 0x331   : > { %v1963_v25 = vpop.f32.mrf.mxu2 }
 0x332   : > { %v2028_v17 = vpop.f32.mrf.mxu3  ;;  %v1836_v28 = vpop.f32.mrf.mxu0 }
 0x333   : > { %v9516_v54 = vadd.f32 %v2028_v17, %v1963_v25  ;;  %v1837_v48 = vadd.f32 %v1836_v28, %v12888_v59  ;;  %v1901_v19 = vpop.f32.mrf.mxu1  ;;  %v12899_v25 = vld [vmem:[#allocation138_spill] sm:$0xff]  ;;  %v9553_v17 = vpop.permute.xlu1 %3969 }
 0x335   : > { %2095 = vmatmul.f32.gmra.mxu0 %v12889_v53  ;;  %v9520_v1 = vadd.f32 %v1901_v19, %v1837_v48 }
 0x336   : > { %2160 = vmatmul.f32.gmra.mxu1 %v12890_v6  ;;  %2225 = vmatmul.f32.gmra.mxu2 %v12891_v44  ;;  %v9557_v19 = vpop.permute.xlu0 %3991 }
 0x337   : > { %2290 = vmatmul.f32.gmra.mxu3 %v12889_v53  ;;  %4953 = vrot.lane.b32.xlu1 %v9520_v1, %s7832_s21  ;;  %v12900_v53 = vld [vmem:[#allocation146_spill] sm:$0xff] }
 0x339   : > { %v1966_v33 = vpop.f32.mrf.mxu2 }
 0x33a   : > { %v2031_v12 = vpop.f32.mrf.mxu3  ;;  %v1839_v4 = vpop.f32.mrf.mxu0 }
 0x33b   : > { %v9527_v61 = vadd.f32 %v2031_v12, %v1966_v33  ;;  %v1840_v23 = vadd.f32 %v1839_v4, %v12892_v29  ;;  %v1904_v38 = vpop.f32.mrf.mxu1  ;;  %v9563_v33 = vpop.permute.xlu2 %3975  ;;  %v12902_v4 = vld [vmem:[#allocation145_spill] sm:$0xff]  ;;  %v12903_v29 = vld [vmem:[#allocation142_spill] sm:$0xff] }
 0x33d   : > { %2098 = vmatmul.f32.gmra.mxu0 %v12893_v40  ;;  %v9533_v0 = vadd.f32 %v1904_v38, %v1840_v23  ;;  %v9568_v23 = vpop.permute.xlu1 %3973 }
 0x33e   : > { %2163 = vmatmul.f32.gmra.mxu1 %v12894_v55  ;;  %2228 = vmatmul.f32.gmra.mxu2 %v12895_v31 }
 0x33f   : > { %2293 = vmatmul.f32.gmra.mxu3 %v12893_v40  ;;  %4955 = vrot.lane.b32.xlu1 %v9533_v0, %s7832_s21 }
 0x341   : > { %v1969_v37 = vpop.f32.mrf.mxu2 }
 0x342   : > { %v2034_v45 = vpop.f32.mrf.mxu3  ;;  %v1842_v50 = vpop.f32.mrf.mxu0 }
 0x343   : > { %v9542_v7 = vadd.f32 %v2034_v45, %v1969_v37  ;;  %v1843_v9 = vadd.f32 %v1842_v50, %v12896_v20  ;;  %v1907_v27 = vpop.f32.mrf.mxu1  ;;  %v12904_v50 = vld [vmem:[#allocation148_spill] sm:$0xff]  ;;  %v9575_v20 = vpop.permute.xlu2 %3979 }
 0x345   : > { %2101 = vmatmul.f32.gmra.mxu0 %v12897_v47  ;;  %v9548_v35 = vadd.f32 %v1907_v27, %v1843_v9  ;;  %v9580_v27 = vpop.permute.xlu1 %3977 }
 0x346   : > { %2166 = vmatmul.f32.gmra.mxu1 %v12898_v62  ;;  %2231 = vmatmul.f32.gmra.mxu2 %v12899_v25  ;;  %v3996_v55 = vpop.permute.xlu0 %3995 }
 0x347   : > { %2296 = vmatmul.f32.gmra.mxu3 %v12897_v47  ;;  %4957 = vrot.lane.b32.xlu1 %v9548_v35, %s7832_s21 }
 0x349   : > { %v1972_v28 = vpop.f32.mrf.mxu2 }
 0x34a   : > { %v2037_v59 = vpop.f32.mrf.mxu3  ;;  %v1845_v48 = vpop.f32.mrf.mxu0 }
 0x34b   : > { %v9559_v41 = vadd.f32 %v2037_v59, %v1972_v28  ;;  %v1846_v6 = vadd.f32 %v1845_v48, %v12900_v53  ;;  %v1910_v44 = vpop.f32.mrf.mxu1  ;;  %v7581_v59 = vld [vmem:[%s7981_s20] sm:$0xff]  ;;  %v9586_v48 = vpop.permute.xlu2 %3983  ;;  %v7582_v53 = vld [vmem:[%s7981_s20 + $0x8] sm:$0xff] }
 0x34d   : > { %2104 = vmatmul.f32.gmra.mxu0 %v12901_v34  ;;  %v1911_v12 = vadd.f32 %v1910_v44, %v1846_v6  ;;  %v12905_v6 = vld [vmem:[#allocation15_spill] sm:$0xff]  ;;  %v9593_v44 = vpop.permute.xlu1 %3981 }
 0x34e   : > { %2169 = vmatmul.f32.gmra.mxu1 %v12902_v4  ;;  %2234 = vmatmul.f32.gmra.mxu2 %v12903_v29 }
 0x34f   : > { %2299 = vmatmul.f32.gmra.mxu3 %v12901_v34  ;;  %4959 = vrot.lane.b32.xlu1 %v1911_v12, %s7832_s21 }
 0x351   : > { %v1975_v38 = vpop.f32.mrf.mxu2 }
 0x352   : > { %v2040_v60 = vpop.f32.mrf.mxu3  ;;  %v1848_v40 = vpop.f32.mrf.mxu0 }
 0x353   : > { %v9571_v31 = vadd.f32 %v2040_v60, %v1975_v38  ;;  %v1849_v37 = vadd.f32 %v1848_v40, %v9333_v51  ;;  %v1913_v45 = vpop.f32.mrf.mxu1 }
 0x355   : > { %2107 = vmatmul.f32.gmra.mxu0 %v12904_v50  ;;  %v1914_v9 = vadd.f32 %v1913_v45, %v1849_v37  ;;  %v7584_v37 = vld [vmem:[%s7981_s20 + $0x18] sm:$0xff]  ;;  %v3994_v45 = vpop.permute.xlu2 %3993 }
 0x356   : > { %2172 = vmatmul.f32.gmra.mxu1 %v9327_v52  ;;  %2237 = vmatmul.f32.gmra.mxu2 %v9319_v3  ;;  %v3998_v52 = vpop.permute.xlu0 %3997  ;;  %v7583_v3 = vld [vmem:[%s7981_s20 + $0x10] sm:$0xff] }
 0x357   : > { %2302 = vmatmul.f32.gmra.mxu3 %v12904_v50  ;;  %4961 = vrot.lane.b32.xlu2 %v1914_v9, %s7832_s21 }
 0x359   : > { %v1978_v47 = vpop.f32.mrf.mxu2 }
 0x35a   : > { %v2043_v51 = vpop.f32.mrf.mxu3  ;;  %v2063_v62 = vpop.f32.mrf.mxu0 }
 0x35b   : > { %v9583_v25 = vadd.f32 %v2043_v51, %v1978_v47  ;;  %v2128_v28 = vpop.f32.mrf.mxu1  ;;  %v9598_v38 = vadd.f32 %v2063_v62, %v9350_v18  ;;  %v7586_v47 = vld [vmem:[%s7981_s20 + $0x28] sm:$0xff]  ;;  %v3986_v18 = vpop.permute.xlu1 %3985 }
 0x35d   : > { %2322 = vmatmul.f32.vlgmr.msra.gmra.mxu0 %v7581_v59 }
 0x35e   : > { %2387 = vmatmul.f32.vlgmr.msra.gmra.mxu1 %v7582_v53  ;;  %2452 = vmatmul.f32.vlgmr.msra.gmra.mxu2 %v7583_v3 }
 0x35f   : > { %6599 = vmatmul.msk.f32.vlgmr.msra.gmra.mxu3 %vm12611_vm0, %v12905_v6  ;;  %6679 = vmatpush.xpose.msk.msra.mxu1 %vm12611_vm0, %v3998_v52  ;;  %v7588_v6 = vld [vmem:[%s7981_s20 + $0x38] sm:$0xff] }
 0x360   : > { %6711 = vmatpush.xpose.msk.msra.mxu3 %vm12611_vm0, %v1914_v9  ;;  %v7585_v9 = vld [vmem:[%s7981_s20 + $0x20] sm:$0xff] }
 0x361   : > { %v2193_v34 = vpop.f32.mrf.mxu2 }
 0x362   : > { %v2258_v4 = vpop.f32.mrf.mxu3  ;;  %v2066_v29 = vpop.f32.mrf.mxu0 }
 0x363   : > { %6680 = vmatpush.xpose.msk.msra.mxu1 %vm12611_vm0, %v3996_v55  ;;  %v9602_v60 = vadd.f32 %v2066_v29, %v9367_v46  ;;  %v2131_v40 = vpop.f32.mrf.mxu1  ;;  %v12906_v55 = vld [vmem:[#allocation16_spill] sm:$0xff]  ;;  %v2194_v46 = vadd.f32 %v2193_v34, %v2128_v28  ;;  %v7589_v28 = vld [vmem:[%s7981_s20 + $0x40] sm:$0xff] }
 0x364   : > { %6712 = vmatpush.xpose.msk.msra.mxu3 %vm12611_vm0, %v1911_v12 }
 0x365   : > { %2325 = vmatmul.f32.gmra.mxu0 %v7584_v37  ;;  %v6866_v50 = vpack.i.bf16 %v9598_v38, %v9602_v60  ;;  %v9619_v53 = vadd.f32 %v2258_v4, %v2194_v46 }
 0x366   : > { %2390 = vmatmul.f32.gmra.mxu1 %v7585_v9  ;;  %2455 = vmatmul.f32.gmra.mxu2 %v7586_v47  ;;  %v7592_v9 = vld [vmem:[%s7981_s20 + $0x58] sm:$0xff] }
 0x367   : > { %6600 = vmatmul.msk.f32.gmra.mxu3 %vm12611_vm0, %v12906_v55  ;;  %6681 = vmatpush.xpose.msk.msra.mxu1 %vm12611_vm0, %v3994_v45  ;;  %v12908_v55 = vld [vmem:[#allocation18_spill] sm:$0xff] }
 0x368   : > { %6713 = vmatpush.xpose.msk.msra.mxu3 %vm12611_vm0, %v9548_v35  ;;  %6867 = vrot.lane.b32.xlu0 %v6866_v50, %s7832_s21  ;;  %v7587_v35 = vld [vmem:[%s7981_s20 + $0x30] sm:$0xff]  ;;  %v7590_v50 = vld [vmem:[%s7981_s20 + $0x48] sm:$0xff] }
 0x369   : > { %v2196_v12 = vpop.f32.mrf.mxu2 }
 0x36a   : > { %v2197_v51 = vadd.f32 %v2196_v12, %v2131_v40  ;;  %v2261_v62 = vpop.f32.mrf.mxu3  ;;  %v2069_v59 = vpop.f32.mrf.mxu0 }
 0x36b   : > { %6682 = vmatpush.xpose.msk.msra.mxu1 %vm12611_vm0, %v9557_v19  ;;  %v2134_v52 = vpop.f32.mrf.mxu1  ;;  %v12907_v19 = vld [vmem:[#allocation17_spill] sm:$0xff]  ;;  %v9639_v45 = vadd.f32 %v2069_v59, %v9386_v32  ;;  %v7594_v59 = vld [vmem:[%s7981_s20 + $0x68] sm:$0xff] }
 0x36c   : > { %6714 = vmatpush.xpose.msk.msra.mxu3 %vm12611_vm0, %v9533_v0  ;;  %v9621_v3 = vadd.f32 %v2261_v62, %v2197_v51  ;;  %v3988_v0 = vpop.permute.xlu1 %3987 }
 0x36d   : > { %2328 = vmatmul.f32.gmra.mxu0 %v7587_v35  ;;  %v12909_v35 = vld [vmem:[#allocation19_spill] sm:$0xff] }
 0x36e   : > { %2393 = vmatmul.f32.gmra.mxu1 %v7588_v6  ;;  %2458 = vmatmul.f32.gmra.mxu2 %v7589_v28  ;;  %v6871_v34 = vpack.i.bf16 %v9619_v53, %v9621_v3 }
 0x36f   : > { %6601 = vmatmul.msk.f32.gmra.mxu3 %vm12611_vm0, %v12907_v19  ;;  %6683 = vmatpush.xpose.msk.msra.mxu1 %vm12611_vm0, %v9540_v63 }
 0x370   : > { %6715 = vmatpush.xpose.msk.msra.mxu3 %vm12611_vm0, %v9520_v1  ;;  %6872 = vrot.lane.b32.xlu1 %v6871_v34, %s7832_s21  ;;  %v7591_v1 = vld [vmem:[%s7981_s20 + $0x50] sm:$0xff] }
 0x371   : > { %v2199_v4 = vpop.f32.mrf.mxu2 }
 0x372   : > { %v2264_v29 = vpop.f32.mrf.mxu3  ;;  %v2072_v40 = vpop.f32.mrf.mxu0  ;;  %v2200_v32 = vadd.f32 %v2199_v4, %v2134_v52  ;;  %v7595_v52 = vld [vmem:[%s7981_s20 + $0x70] sm:$0xff]  ;;  %v7598_v4 = vld [vmem:[%s7981_s20 + $0x88] sm:$0xff] }
 0x373   : > { %6684 = vmatpush.xpose.msk.msra.mxu1 %vm12611_vm0, %v3988_v0  ;;  %v2137_v37 = vpop.f32.mrf.mxu1  ;;  %v9642_v63 = vadd.f32 %v2072_v40, %v9405_v21  ;;  %v7596_v0 = vld [vmem:[%s7981_s20 + $0x78] sm:$0xff] }
 0x374   : > { %6716 = vmatpush.xpose.msk.msra.mxu3 %vm12611_vm0, %v9509_v10  ;;  %v9659_v62 = vadd.f32 %v2264_v29, %v2200_v32  ;;  %v12910_v29 = vld [vmem:[#allocation20_spill] sm:$0xff] }
 0x375   : > { %2331 = vmatmul.f32.gmra.mxu0 %v7590_v50  ;;  %v6876_v47 = vpack.i.bf16 %v9639_v45, %v9642_v63 }
 0x376   : > { %2396 = vmatmul.f32.gmra.mxu1 %v7591_v1  ;;  %2461 = vmatmul.f32.gmra.mxu2 %v7592_v9  ;;  %v7600_v9 = vld [vmem:[%s7981_s20 + $0x98] sm:$0xff] }
 0x377   : > { %6602 = vmatmul.msk.f32.gmra.mxu3 %vm12611_vm0, %v12908_v55  ;;  %6685 = vmatpush.xpose.msk.msra.mxu1 %vm12611_vm0, %v3986_v18  ;;  %v12911_v55 = vld [vmem:[#allocation21_spill] sm:$0xff] }
 0x378   : > { %6717 = vmatpush.xpose.msk.msra.mxu3 %vm12611_vm0, %v9498_v58  ;;  %6877 = vrot.lane.b32.xlu1 %v6876_v47, %s7832_s21  ;;  %v7593_v58 = vld [vmem:[%s7981_s20 + $0x60] sm:$0xff] }
 0x379   : > { %v2202_v21 = vpop.f32.mrf.mxu2  ;;  %v7601_v47 = vld [vmem:[%s7981_s20 + $0xa0] sm:$0xff] }
 0x37a   : > { %v2203_v10 = vadd.f32 %v2202_v21, %v2137_v37  ;;  %v2267_v46 = vpop.f32.mrf.mxu3  ;;  %v2075_v12 = vpop.f32.mrf.mxu0 }
 0x37b   : > { %6686 = vmatpush.xpose.msk.msra.mxu1 %vm12611_vm0, %v9586_v48  ;;  %v2140_v51 = vpop.f32.mrf.mxu1  ;;  %v9680_v19 = vadd.f32 %v2075_v12, %v9424_v14  ;;  %v7602_v12 = vld [vmem:[%s7981_s20 + $0xa8] sm:$0xff] }
 0x37c   : > { %6718 = vmatpush.xpose.msk.msra.mxu3 %vm12611_vm0, %v9487_v13  ;;  %v9661_v18 = vadd.f32 %v2267_v46, %v2203_v10 }
 0x37d   : > { %2334 = vmatmul.f32.gmra.mxu0 %v7593_v58  ;;  %v12912_v58 = vld [vmem:[#allocation22_spill] sm:$0xff] }
 0x37e   : > { %2399 = vmatmul.f32.gmra.mxu1 %v7594_v59  ;;  %2464 = vmatmul.f32.gmra.mxu2 %v7595_v52  ;;  %v6881_v48 = vpack.i.bf16 %v9659_v62, %v9661_v18 }
 0x37f   : > { %6603 = vmatmul.msk.f32.gmra.mxu3 %vm12611_vm0, %v12909_v35  ;;  %6687 = vmatpush.xpose.msk.msra.mxu1 %vm12611_vm0, %v9593_v44 }
 0x380   : > { %6719 = vmatpush.xpose.msk.msra.mxu3 %vm12611_vm0, %v9468_v22  ;;  %6882 = vrot.lane.b32.xlu0 %v6881_v48, %s7832_s21  ;;  %v7597_v22 = vld [vmem:[%s7981_s20 + $0x80] sm:$0xff] }
 0x381   : > { %v2205_v13 = vpop.f32.mrf.mxu2 }
 0x382   : > { %v2270_v6 = vpop.f32.mrf.mxu3  ;;  %v2078_v28 = vpop.f32.mrf.mxu0  ;;  %v2206_v14 = vadd.f32 %v2205_v13, %v2140_v51  ;;  %v7604_v51 = vld [vmem:[%s7981_s20 + $0xb8] sm:$0xff]  ;;  %v7606_v13 = vld [vmem:[%s7981_s20 + $0xc8] sm:$0xff] }
 0x383   : > { %6688 = vmatpush.xpose.msk.msra.mxu1 %vm12611_vm0, %v9575_v20  ;;  %v2143_v34 = vpop.f32.mrf.mxu1  ;;  %v9683_v44 = vadd.f32 %v2078_v28, %v9443_v16  ;;  %v12913_v28 = vld [vmem:[#allocation23_spill] sm:$0xff] }
 0x384   : > { %6720 = vmatpush.xpose.msk.msra.mxu3 %vm12611_vm0, %v9449_v24  ;;  %v9701_v1 = vadd.f32 %v2270_v6, %v2206_v14  ;;  %v7607_v6 = vld [vmem:[%s7981_s20 + $0xd0] sm:$0xff]  ;;  %v7609_v14 = vld [vmem:[%s7981_s20 + $0xe0] sm:$0xff] }
 0x385   : > { %2337 = vmatmul.f32.gmra.mxu0 %v7596_v0  ;;  %v6886_v20 = vpack.i.bf16 %v9680_v19, %v9683_v44 }
 0x386   : > { %2402 = vmatmul.f32.gmra.mxu1 %v7597_v22  ;;  %2467 = vmatmul.f32.gmra.mxu2 %v7598_v4 }
 0x387   : > { %6604 = vmatmul.msk.f32.gmra.mxu3 %vm12611_vm0, %v12910_v29  ;;  %6689 = vmatpush.xpose.msk.msra.mxu1 %vm12611_vm0, %v9580_v27  ;;  %v7608_v29 = vld [vmem:[%s7981_s20 + $0xd8] sm:$0xff] }
 0x388   : > { %6721 = vmatpush.xpose.msk.msra.mxu3 %vm12611_vm0, %v9430_v30  ;;  %6887 = vrot.lane.b32.xlu1 %v6886_v20, %s7832_s21  ;;  %v7599_v30 = vld [vmem:[%s7981_s20 + $0x90] sm:$0xff] }
 0x389   : > { %v2208_v16 = vpop.f32.mrf.mxu2 }
 0x38a   : > { %v2209_v24 = vadd.f32 %v2208_v16, %v2143_v34  ;;  %v2273_v40 = vpop.f32.mrf.mxu3  ;;  %v2081_v37 = vpop.f32.mrf.mxu0  ;;  %v7610_v16 = vld [vmem:[%s7981_s20 + $0xe8] sm:$0xff] }
 0x38b   : > { %6690 = vmatpush.xpose.msk.msra.mxu1 %vm12611_vm0, %v9563_v33  ;;  %v2146_v50 = vpop.f32.mrf.mxu1  ;;  %v9722_v46 = vadd.f32 %v2081_v37, %v9462_v15  ;;  %v9769_v37 = vpop.permute.xlu1 %4935 }
 0x38c   : > { %6722 = vmatpush.xpose.msk.msra.mxu3 %vm12611_vm0, %v9411_v56  ;;  %v9703_v27 = vadd.f32 %v2273_v40, %v2209_v24  ;;  %v12914_v40 = vld [vmem:[#allocation24_spill] sm:$0xff] }
 0x38d   : > { %2340 = vmatmul.f32.gmra.mxu0 %v7599_v30 }
 0x38e   : > { %2405 = vmatmul.f32.gmra.mxu1 %v7600_v9  ;;  %2470 = vmatmul.f32.gmra.mxu2 %v7601_v47  ;;  %v6891_v33 = vpack.i.bf16 %v9701_v1, %v9703_v27 }
 0x38f   : > { %6605 = vmatmul.msk.f32.gmra.mxu3 %vm12611_vm0, %v12911_v55  ;;  %6691 = vmatpush.xpose.msk.msra.mxu1 %vm12611_vm0, %v9568_v23 }
 0x390   : > { %6723 = vmatpush.xpose.msk.msra.mxu3 %vm12611_vm0, %v9392_v2  ;;  %6892 = vrot.lane.b32.xlu2 %v6891_v33, %s7832_s21  ;;  %v7603_v2 = vld [vmem:[%s7981_s20 + $0xb0] sm:$0xff] }
 0x391   : > { %v2211_v56 = vpop.f32.mrf.mxu2 }
 0x392   : > { %v2276_v32 = vpop.f32.mrf.mxu3  ;;  %v2084_v21 = vpop.f32.mrf.mxu0 }
 0x393   : > { %6692 = vmatpush.xpose.msk.msra.mxu1 %vm12611_vm0, %v9546_v49  ;;  %v2149_v10 = vpop.f32.mrf.mxu1  ;;  %v9725_v23 = vadd.f32 %v2084_v21, %v9481_v8  ;;  %v7613_v21 = vld [vmem:[%s7981_s20 + $0x100] sm:$0xff] }
 0x394   : > { %6724 = vmatpush.xpose.msk.msra.mxu3 %vm12611_vm0, %v9373_v26  ;;  %v2212_v26 = vadd.f32 %v2211_v56, %v2146_v50  ;;  %v7611_v56 = vld [vmem:[%s7981_s20 + $0xf0] sm:$0xff] }
 0x395   : > { %2343 = vmatmul.f32.gmra.mxu0 %v7602_v12  ;;  %v6896_v49 = vpack.i.bf16 %v9722_v46, %v9725_v23  ;;  %v12915_v12 = vld [vmem:[#allocation25_spill] sm:$0xff] }
 0x396   : > { %2408 = vmatmul.f32.gmra.mxu1 %v7603_v2  ;;  %2473 = vmatmul.f32.gmra.mxu2 %v7604_v51  ;;  %v9743_v35 = vadd.f32 %v2276_v32, %v2212_v26  ;;  %v7612_v32 = vld [vmem:[%s7981_s20 + $0xf8] sm:$0xff]  ;;  %v9783_v2 = vpop.permute.xlu2 %4931 }
 0x397   : > { %6606 = vmatmul.msk.f32.gmra.mxu3 %vm12611_vm0, %v12912_v58  ;;  %6693 = vmatpush.xpose.msk.msra.mxu1 %vm12611_vm0, %v9553_v17 }
 0x398   : > { %6725 = vmatpush.xpose.msk.msra.mxu3 %vm12611_vm0, %v9355_v36  ;;  %6897 = vrot.lane.b32.xlu0 %v6896_v49, %s7832_s21  ;;  %v7605_v36 = vld [vmem:[%s7981_s20 + $0xc0] sm:$0xff]  ;;  %v9785_v49 = vpop.permute.xlu1 %4945 }
 0x399   : > { %v2214_v15 = vpop.f32.mrf.mxu2 }
 0x39a   : > { %v2215_v8 = vadd.f32 %v2214_v15, %v2149_v10  ;;  %v2279_v59 = vpop.f32.mrf.mxu3  ;;  %v2087_v52 = vpop.f32.mrf.mxu0 }
 0x39b   : > { %6694 = vmatpush.xpose.msk.msra.mxu1 %vm12611_vm0, %v9531_v39  ;;  %v2152_v48 = vpop.f32.mrf.mxu1  ;;  %v9756_v4 = vadd.f32 %v2087_v52, %v9494_v5  ;;  %v7614_v52 = vld [vmem:[%s7981_s20 + $0x108] sm:$0xff] }
 0x39c   : > { %6726 = vmatpush.xpose.msk.msra.mxu3 %vm12611_vm0, %v9340_v43  ;;  %v9745_v17 = vadd.f32 %v2279_v59, %v2215_v8 }
 0x39d   : > { %2346 = vmatmul.f32.gmra.mxu0 %v7605_v36  ;;  %v7616_v36 = vld [vmem:[%s7981_s20 + $0x118] sm:$0xff] }
 0x39e   : > { %2411 = vmatmul.f32.gmra.mxu1 %v7606_v13  ;;  %2476 = vmatmul.f32.gmra.mxu2 %v7607_v6  ;;  %v6901_v39 = vpack.i.bf16 %v9743_v35, %v9745_v17  ;;  %v12916_v6 = vld [vmem:[#allocation26_spill] sm:$0xff] }
 0x39f   : > { %6607 = vmatmul.msk.f32.gmra.mxu3 %vm12611_vm0, %v12913_v28 }
 0x3a0   : > { %6902 = vrot.lane.b32.xlu1 %v6901_v39, %s7832_s21 }
 0x3a1   : > { %v2217_v43 = vpop.f32.mrf.mxu2  ;;  %v9801_v39 = vpop.permute.xlu1 %4951 }
 0x3a2   : > { %v2282_v34 = vpop.f32.mrf.mxu3  ;;  %v2090_v0 = vpop.f32.mrf.mxu0  ;;  %v2218_v5 = vadd.f32 %v2217_v43, %v2152_v48  ;;  %v7615_v48 = vld [vmem:[%s7981_s20 + $0x110] sm:$0xff] }
 0x3a3   : > { %v2155_v22 = vpop.f32.mrf.mxu1  ;;  %v9759_v20 = vadd.f32 %v2090_v0, %v9505_v57 }
 0x3a4   : > { %v9771_v33 = vadd.f32 %v2282_v34, %v2218_v5 }
 0x3a5   : > { %2349 = vmatmul.f32.gmra.mxu0 %v7608_v29  ;;  %v6906_v24 = vpack.i.bf16 %v9756_v4, %v9759_v20 }
 0x3a6   : > { %2414 = vmatmul.f32.gmra.mxu1 %v7609_v14  ;;  %2479 = vmatmul.f32.gmra.mxu2 %v7610_v16  ;;  %v7617_v16 = vld [vmem:[%s7981_s20 + $0x120] sm:$0xff] }
 0x3a7   : > { %6608 = vmatmul.msk.f32.gmra.mxu3 %vm12611_vm0, %v12914_v40  ;;  %v7619_v40 = vld [vmem:[%s7981_s20 + $0x130] sm:$0xff] }
 0x3a8   : > { %6907 = vrot.lane.b32.xlu1 %v6906_v24, %s7832_s21  ;;  %v7618_v24 = vld [vmem:[%s7981_s20 + $0x128] sm:$0xff] }
 0x3a9   : > { %v2220_v57 = vpop.f32.mrf.mxu2 }
 0x3aa   : > { %v2221_v50 = vadd.f32 %v2220_v57, %v2155_v22  ;;  %v2285_v30 = vpop.f32.mrf.mxu3  ;;  %v2093_v9 = vpop.f32.mrf.mxu0  ;;  %v12917_v57 = vld [vmem:[#allocation27_spill] sm:$0xff] }
 0x3ab   : > { %v2158_v47 = vpop.f32.mrf.mxu1  ;;  %v9788_v8 = vadd.f32 %v2093_v9, %v9516_v54  ;;  %v9803_v22 = vpop.permute.xlu2 %4933 }
 0x3ac   : > { %v9773_v55 = vadd.f32 %v2285_v30, %v2221_v50 }
 0x3ad   : > { %2352 = vmatmul.f32.gmra.mxu0 %v7611_v56 }
 0x3ae   : > { %2417 = vmatmul.f32.gmra.mxu1 %v7612_v32  ;;  %2482 = vmatmul.f32.gmra.mxu2 %v7613_v21  ;;  %v6911_v10 = vpack.i.bf16 %v9771_v33, %v9773_v55  ;;  %v9819_v32 = vpop.permute.xlu1 %4953 }
 0x3af   : > { %6609 = vmatmul.msk.f32.gmra.mxu3 %vm12611_vm0, %v12915_v12  ;;  %v7620_v12 = vld [vmem:[%s7981_s20 + $0x138] sm:$0xff] }
 0x3b0   : > { %6912 = vrot.lane.b32.xlu1 %v6911_v10, %s7832_s21 }
 0x3b1   : > { %v2223_v51 = vpop.f32.mrf.mxu2 }
 0x3b2   : > { %v2288_v58 = vpop.f32.mrf.mxu3  ;;  %v2096_v26 = vpop.f32.mrf.mxu0  ;;  %v2224_v54 = vadd.f32 %v2223_v51, %v2158_v47  ;;  %v7621_v51 = vld [vmem:[%s7981_s20 + $0x140] sm:$0xff] }
 0x3b3   : > { %v2161_v15 = vpop.f32.mrf.mxu1  ;;  %v9791_v59 = vadd.f32 %v2096_v26, %v9527_v61  ;;  %v9817_v56 = vpop.permute.xlu2 %4943 }
 0x3b4   : > { %v9805_v29 = vadd.f32 %v2288_v58, %v2224_v54  ;;  %v7622_v58 = vld [vmem:[%s7981_s20 + $0x148] sm:$0xff] }
 0x3b5   : > { %2355 = vmatmul.f32.gmra.mxu0 %v7614_v52  ;;  %v6916_v13 = vpack.i.bf16 %v9788_v8, %v9791_v59 }
 0x3b6   : > { %2420 = vmatmul.f32.gmra.mxu1 %v7615_v48  ;;  %2485 = vmatmul.f32.gmra.mxu2 %v7616_v36 }
 0x3b7   : > { %6610 = vmatmul.msk.f32.gmra.mxu3 %vm12611_vm0, %v12916_v6 }
 0x3b8   : > { %6917 = vrot.lane.b32.xlu1 %v6916_v13, %s7832_s21 }
 0x3b9   : > { %v2226_v61 = vpop.f32.mrf.mxu2 }
 0x3ba   : > { %v2227_v28 = vadd.f32 %v2226_v61, %v2161_v15  ;;  %v2291_v43 = vpop.f32.mrf.mxu3  ;;  %v2099_v34 = vpop.f32.mrf.mxu0  ;;  %v12918_v15 = vld [vmem:[#allocation28_spill] sm:$0xff] }
 0x3bb   : > { %v2164_v0 = vpop.f32.mrf.mxu1  ;;  %v2100_v21 = vadd.f32 %v2099_v34, %v9542_v7  ;;  %v9829_v6 = vpop.permute.xlu2 %4947  ;;  %v7625_v34 = vld [vmem:[%s7981_s20 + $0x160] sm:$0xff] }
 0x3bc   : > { %v9807_v14 = vadd.f32 %v2291_v43, %v2227_v28  ;;  %v7623_v28 = vld [vmem:[%s7981_s20 + $0x150] sm:$0xff]  ;;  %v7624_v43 = vld [vmem:[%s7981_s20 + $0x158] sm:$0xff] }
 0x3bd   : > { %2358 = vmatmul.f32.gmra.mxu0 %v7617_v16 }
 0x3be   : > { %2423 = vmatmul.f32.gmra.mxu1 %v7618_v24  ;;  %2488 = vmatmul.f32.gmra.mxu2 %v7619_v40  ;;  %v6921_v5 = vpack.i.bf16 %v9805_v29, %v9807_v14  ;;  %v12919_v24 = vld [vmem:[#allocation29_spill] sm:$0xff] }
 0x3bf   : > { %6611 = vmatmul.msk.f32.gmra.mxu3 %vm12611_vm0, %v12917_v57 }
 0x3c0   : > { %6922 = vrot.lane.b32.xlu2 %v6921_v5, %s7832_s21 }
 0x3c1   : > { %v2229_v50 = vpop.f32.mrf.mxu2 }
 0x3c2   : > { %v2294_v30 = vpop.f32.mrf.mxu3  ;;  %v2102_v9 = vpop.f32.mrf.mxu0  ;;  %v2230_v52 = vadd.f32 %v2229_v50, %v2164_v0 }
 0x3c3   : > { %v2167_v47 = vpop.f32.mrf.mxu1  ;;  %v2103_v10 = vadd.f32 %v2102_v9, %v9559_v41  ;;  %v9838_v0 = vpop.permute.xlu1 %4955 }
 0x3c4   : > { %v9831_v54 = vadd.f32 %v2294_v30, %v2230_v52 }
 0x3c5   : > { %2361 = vmatmul.f32.gmra.mxu0 %v7620_v12  ;;  %v6926_v26 = vpack.i.bf16 %v2100_v21, %v2103_v10  ;;  %v7627_v12 = vld [vmem:[%s7981_s20 + $0x170] sm:$0xff] }
 0x3c6   : > { %2426 = vmatmul.f32.gmra.mxu1 %v7621_v51  ;;  %2491 = vmatmul.f32.gmra.mxu2 %v7622_v58  ;;  %v7628_v51 = vld [vmem:[%s7981_s20 + $0x178] sm:$0xff]  ;;  %v9850_v58 = vpop.permute.xlu2 %4949 }
 0x3c7   : > { %6612 = vmatmul.msk.f32.gmra.mxu3 %vm12611_vm0, %v12918_v15  ;;  %6927 = vrot.lane.b32.xlu1 %v6926_v26, %s7832_s21  ;;  %v12920_v15 = vld [vmem:[#allocation30_spill] sm:$0xff] }
 0x3c9   : > { %v2232_v48 = vpop.f32.mrf.mxu2 }
 0x3ca   : > { %v2233_v7 = vadd.f32 %v2232_v48, %v2167_v47  ;;  %v2297_v36 = vpop.f32.mrf.mxu3  ;;  %v2105_v41 = vpop.f32.mrf.mxu0  ;;  %v7626_v47 = vld [vmem:[%s7981_s20 + $0x168] sm:$0xff] }
 0x3cb   : > { %v2170_v13 = vpop.f32.mrf.mxu1  ;;  %v2106_v30 = vadd.f32 %v2105_v41, %v9571_v31  ;;  %v4958_v52 = vpop.permute.xlu1 %4957  ;;  %v2501_v31 = vlaneseq }
 0x3cc   : > { %v9833_v61 = vadd.f32 %v2297_v36, %v2233_v7 }
 0x3cd   : > { %2364 = vmatmul.f32.gmra.mxu0 %v7623_v28 }
 0x3ce   : > { %2429 = vmatmul.f32.gmra.mxu1 %v7624_v43  ;;  %2494 = vmatmul.f32.gmra.mxu2 %v7625_v34  ;;  %v6931_v16 = vpack.i.bf16 %v9831_v54, %v9833_v61 }
 0x3cf   : > { %6613 = vmatmul.msk.f32.gmra.mxu3 %vm12611_vm0, %v12919_v24  ;;  %v9859_v24 = vand.u32 127, %v2501_v31 }
 0x3d0   : > { %6932 = vrot.lane.b32.xlu2 %v6931_v16, %s7832_s21  ;;  %v9857_v16 = vshrl.u32 %v2501_v31, 7 }
 0x3d1   : > { %v2235_v40 = vpop.f32.mrf.mxu2 }
 0x3d2   : > { %v2300_v5 = vpop.f32.mrf.mxu3  ;;  %v2108_v57 = vpop.f32.mrf.mxu0  ;;  %v2236_v48 = vadd.f32 %v2235_v40, %v2170_v13  ;;  %vm9872_vm1 = vcmp.ge.s32.totalorder %v9857_v16, %v9859_v24 }
 0x3d3   : > { %v2173_v50 = vpop.f32.mrf.mxu1  ;;  %v2109_v9 = vadd.f32 %v2108_v57, %v9583_v25  ;;  %v12921_v57 = vld [vmem:[#allocation57_spill] sm:$0xff]  ;;  %v4962_v13 = vpop.permute.xlu2 %4961 }
 0x3d4   : > { %v9855_v43 = vadd.f32 %v2300_v5, %v2236_v48  ;;  %v4960_v5 = vpop.permute.xlu1 %4959 }
 0x3d5   : > { %2367 = vmatmul.f32.gmra.mxu0 %v7626_v47  ;;  %v6936_v26 = vpack.i.bf16 %v2106_v30, %v2109_v9  ;;  %v2503_v47 = vadd.s32 8, %v9857_v16 }
 0x3d6   : > { %2432 = vmatmul.f32.gmra.mxu1 %v7627_v12  ;;  %2497 = vmatmul.f32.gmra.mxu2 %v7628_v51  ;;  %v12926_v12 = vld [vmem:[#allocation47_spill] sm:$0xff] }
 0x3d7   : > { %6614 = vmatmul.msk.f32.gmra.mxu3 %vm12611_vm0, %v12920_v15  ;;  %2906 = vmatpush.msrb.mxu0 %v2109_v9  ;;  %vm9893_vm2 = vcmp.ge.s32.totalorder %v2503_v47, %v9859_v24 }
 0x3d8   : > { %6937 = vrot.lane.b32.xlu2 %v6936_v26, %s7832_s21 }
 0x3d9   : > { %2907 = vmatpush.msrb.mxu0 %v2106_v30  ;;  %v2238_v25 = vpop.f32.mrf.mxu2 }
 0x3da   : > { %v2239_v7 = vadd.f32 %v2238_v25, %v2173_v50  ;;  %v2303_v36 = vpop.f32.mrf.mxu3  ;;  %v2323_v28 = vpop.f32.mrf.mxu0  ;;  %v12922_v50 = vld [vmem:[#allocation31_spill] sm:$0xff] }
 0x3db   : > { %2908 = vmatpush.msrb.mxu0 %v2103_v10  ;;  %v2388_v41 = vpop.f32.mrf.mxu1 }
 0x3dc   : > { %v2304_v34 = vadd.f32 %v2303_v36, %v2239_v7  ;;  %v2389_v51 = vadd.f32 %v2388_v41, %v2323_v28  ;;  %v2504_v36 = vadd.s32 16, %v9857_v16  ;;  %v12932_v41 = vld [vmem:[#allocation53_spill] sm:$0xff]  ;;  %v9927_v28 = vpop.permute.xlu0 %4937 }
 0x3dd   : > { %2909 = vmatpush.msrb.mxu0 %v2100_v21  ;;  %v12923_v21 = vmov 0 }
 0x3de   : > { %6631 = vmatmul.msk.f32.vlgmr.msrb.gmra.mxu1 %vm12611_vm0, %v12921_v57  ;;  %v6941_v40 = vpack.i.bf16 %v9855_v43, %v2304_v34  ;;  %v12924_v21 = vsel %vm9872_vm1, 4294967295, %v12923_v21  ;;  %vm9923_vm3 = vcmp.ge.s32.totalorder %v2504_v36, %v9859_v24 }
 0x3df   : > { %2910 = vmatpush.msrb.mxu0 %v9791_v59  ;;  %6663 = vmatmul.msk.f32.vlgmr.msrb.gmra.mxu3 %vm12611_vm0, %v12922_v50  ;;  %12925 = vst [vmem:[#allocation95_spill] sm:$0xff] %v12924_v21 }
 0x3e0   : > { %6743 = vmatpush.xpose.msk.msrb.mxu1 %vm12611_vm0, %v4962_v13  ;;  %6942 = vrot.lane.b32.xlu2 %v6941_v40, %s7832_s21  ;;  %v2505_v13 = vadd.s32 24, %v9857_v16  ;;  %v12936_v40 = vld [vmem:[#allocation59_spill] sm:$0xff] }
 0x3e1   : > { %2911 = vmatpush.msrb.mxu0 %v9788_v8  ;;  %v2453_v10 = vpop.f32.mrf.mxu2 }
 0x3e2   : > { %v2650_v30 = vpop.f32.mrf.mxu3  ;;  %v2326_v8 = vpop.f32.mrf.mxu0  ;;  %v9897_v48 = vadd.f32 %v2453_v10, %v2389_v51  ;;  %v12937_v10 = vld [vmem:[#allocation34_spill] sm:$0xff]  ;;  %vm9947_vm4 = vcmp.ge.s32.totalorder %v2505_v13, %v9859_v24  ;;  %v2507_v13 = vadd.s32 40, %v9857_v16 }
 0x3e3   : > { %2912 = vmatpush.msrb.mxu0 %v9759_v20  ;;  %v2391_v59 = vpop.f32.mrf.mxu1  ;;  %v9880_v9 = vsel %vm9872_vm1, %v2650_v30, -inf  ;;  %v12927_v20 = vld [vmem:[#allocation32_spill] sm:$0xff] }
 0x3e4   : > { %6744 = vmatpush.xpose.msk.msrb.mxu1 %vm12611_vm0, %v4960_v5  ;;  %2714 = vmax.xlane.f32.xlu0 %v9880_v9  ;;  %v2392_v26 = vadd.f32 %v2391_v59, %v2326_v8  ;;  %12930 = vst [vmem:[#allocation116_spill] sm:$0xff] %v9897_v48  ;;  %v9956_v59 = vpop.permute.xlu1 %6872  ;;  %v4940_v8 = vpop.permute.xlu0 %4939  ;;  %vm10064_vm7 = vcmp.ge.s32.totalorder %v2507_v13, %v9859_v24 }
 0x3e5   : > { %2913 = vmatpush.msrb.mxu0 %v9756_v4 }
 0x3e6   : > { %6632 = vmatmul.msk.f32.gmra.mxu1 %vm12611_vm0, %v12926_v12 }
 0x3e7   : > { %2914 = vmatpush.msrb.mxu0 %v9725_v23  ;;  %6664 = vmatmul.msk.f32.gmra.mxu3 %vm12611_vm0, %v12927_v20 }
 0x3e8   : > { %6745 = vmatpush.xpose.msk.msrb.mxu1 %vm12611_vm0, %v4958_v52 }
 0x3e9   : > { %2915 = vmatpush.msrb.mxu0 %v9722_v46  ;;  %v2456_v4 = vpop.f32.mrf.mxu2 }
 0x3ea   : > { %v9899_v31 = vadd.f32 %v2456_v4, %v2392_v26  ;;  %v2653_v25 = vpop.f32.mrf.mxu3  ;;  %v2329_v7 = vpop.f32.mrf.mxu0  ;;  %v12945_v4 = vld [vmem:[#allocation62_spill] sm:$0xff] }
 0x3eb   : > { %2916 = vmatpush.msrb.mxu0 %v9683_v44  ;;  %v2394_v23 = vpop.f32.mrf.mxu1  ;;  %v9906_v46 = vsel %vm9893_vm2, %v2653_v25, -inf  ;;  %v12933_v44 = vld [vmem:[#allocation33_spill] sm:$0xff] }
 0x3ec   : > { %12931 = vst [vmem:[#allocation92_spill] sm:$0xff] %v9899_v31  ;;  %6746 = vmatpush.xpose.msk.msrb.mxu1 %vm12611_vm0, %v9838_v0  ;;  %v6946_v52 = vpack.i.bf16 %v9897_v48, %v9899_v31  ;;  %2716 = vmax.xlane.f32.xlu0 %v9906_v46  ;;  %v9981_v26 = vpop.permute.xlu1 %6877 }
 0x3ed   : > { %2917 = vmatpush.msrb.mxu0 %v9680_v19 }
 0x3ee   : > { %6633 = vmatmul.msk.f32.gmra.mxu1 %vm12611_vm0, %v12932_v41  ;;  %6947 = vrot.lane.b32.xlu2 %v6946_v52, %s7832_s21  ;;  %v12948_v41 = vld [vmem:[#allocation65_spill] sm:$0xff] }
 0x3ef   : > { %2918 = vmatpush.msrb.mxu0 %v9642_v63  ;;  %6665 = vmatmul.msk.f32.gmra.mxu3 %vm12611_vm0, %v12933_v44 }
 0x3f0   : > { %6747 = vmatpush.xpose.msk.msrb.mxu1 %vm12611_vm0, %v9819_v32 }
 0x3f1   : > { %2919 = vmatpush.msrb.mxu0 %v9639_v45  ;;  %v2459_v0 = vpop.f32.mrf.mxu2 }
 0x3f2   : > { %v2656_v57 = vpop.f32.mrf.mxu3  ;;  %v2332_v45 = vpop.f32.mrf.mxu0 }
 0x3f3   : > { %2920 = vmatpush.msrb.mxu0 %v9602_v60  ;;  %v2397_v63 = vpop.f32.mrf.mxu1  ;;  %v9934_v32 = vsel %vm9923_vm3, %v2656_v57, -inf  ;;  %v2395_v60 = vadd.f32 %v2394_v23, %v2329_v7  ;;  %v12946_v23 = vld [vmem:[#allocation36_spill] sm:$0xff] }
 0x3f4   : > { %6748 = vmatpush.xpose.msk.msrb.mxu1 %vm12611_vm0, %v9801_v39  ;;  %2718 = vmax.xlane.f32.xlu1 %v9934_v32  ;;  %v2398_v50 = vadd.f32 %v2397_v63, %v2332_v45  ;;  %v12952_v45 = vld [vmem:[#allocation67_spill] sm:$0xff] }
 0x3f5   : > { %2921 = vmatpush.msrb.mxu0 %v9598_v38  ;;  %v12938_v38 = vmov 0 }
 0x3f6   : > { %6634 = vmatmul.msk.f32.gmra.mxu1 %vm12611_vm0, %v12936_v40  ;;  %v12939_v38 = vsel %vm9947_vm4, 4294967295, %v12938_v38 }
 0x3f7   : > { %3870 = vmatpush.msra.mxu0 %v2304_v34  ;;  %6666 = vmatmul.msk.f32.gmra.mxu3 %vm12611_vm0, %v12937_v10  ;;  %12940 = vst [vmem:[#allocation107_spill] sm:$0xff] %v12939_v38  ;;  %v9951_v34 = vadd.f32 %v2459_v0, %v2395_v60  ;;  %v10054_v60 = vpop.permute.xlu2 %6892  ;;  %v12957_v10 = vmov 0 }
 0x3f8   : > { %6749 = vmatpush.xpose.msk.msrb.mxu1 %vm12611_vm0, %v9850_v58  ;;  %v12958_v10 = vsel %vm10064_vm7, 4294967295, %v12957_v10 }
 0x3f9   : > { %3871 = vmatpush.msra.mxu0 %v9855_v43  ;;  %v2462_v39 = vpop.f32.mrf.mxu2  ;;  %12941 = vst [vmem:[#allocation105_spill] sm:$0xff] %v9951_v34 }
 0x3fa   : > { %v9953_v5 = vadd.f32 %v2462_v39, %v2398_v50  ;;  %v2659_v30 = vpop.f32.mrf.mxu3  ;;  %v2335_v12 = vpop.f32.mrf.mxu0  ;;  %12959 = vst [vmem:[#allocation88_spill] sm:$0xff] %v12958_v10 }
 0x3fb   : > { %3872 = vmatpush.msra.mxu0 %v9833_v61  ;;  %v2400_v58 = vpop.f32.mrf.mxu1  ;;  %v9962_v43 = vsel %vm9947_vm4, %v2659_v30, -inf  ;;  %v12943_v61 = vld [vmem:[#allocation61_spill] sm:$0xff]  ;;  %v12960_v30 = vld [vmem:[#allocation55_spill] sm:$0xff] }
 0x3fc   : > { %12942 = vst [vmem:[#allocation106_spill] sm:$0xff] %v9953_v5  ;;  %6750 = vmatpush.xpose.msk.msrb.mxu1 %vm12611_vm0, %v9829_v6  ;;  %v6951_v47 = vpack.i.bf16 %v9951_v34, %v9953_v5  ;;  %2720 = vmax.xlane.f32.xlu1 %v9962_v43  ;;  %v12944_v6 = vld [vmem:[#allocation35_spill] sm:$0xff]  ;;  %v6875_v34 = vunpack.i.h.bf16 %v9956_v59  ;;  %v13027_v5 = vld [vmem:[#allocation98_spill] sm:$0xff] }
 0x3fd   : > { %3873 = vmatpush.msra.mxu0 %v9831_v54 }
 0x3fe   : > { %6635 = vmatmul.msk.f32.gmra.mxu1 %vm12611_vm0, %v12943_v61 }
 0x3ff   : > { %3874 = vmatpush.msra.mxu0 %v9807_v14  ;;  %6667 = vmatmul.msk.f32.gmra.mxu3 %vm12611_vm0, %v12944_v6 }
 0x400   : > { %6751 = vmatpush.xpose.msk.msrb.mxu1 %vm12611_vm0, %v9785_v49  ;;  %6952 = vrot.lane.b32.xlu0 %v6951_v47, %s7832_s21  ;;  %v4942_v49 = vpop.permute.xlu0 %4941  ;;  %v12961_v47 = vld [vmem:[#allocation39_spill] sm:$0xff] }
 0x401   : > { %3875 = vmatpush.msra.mxu0 %v9805_v29  ;;  %v2465_v51 = vpop.f32.mrf.mxu2  ;;  %v2401_v29 = vadd.f32 %v2400_v58, %v2335_v12  ;;  %v2510_v12 = vadd.s32 64, %v9857_v16 }
 0x402   : > { %v2662_v54 = vpop.f32.mrf.mxu3  ;;  %v2338_v14 = vpop.f32.mrf.mxu0 }
 0x403   : > { %3876 = vmatpush.msra.mxu0 %v9773_v55  ;;  %v2403_v20 = vpop.f32.mrf.mxu1  ;;  %vm10083_vm8 = vcmp.ge.s32.totalorder %v2510_v12, %v9859_v24  ;;  %v12968_v12 = vmov 0 }
 0x404   : > { %6752 = vmatpush.xpose.msk.msrb.mxu1 %vm12611_vm0, %v9817_v56  ;;  %v2404_v25 = vadd.f32 %v2403_v20, %v2338_v14  ;;  %v12964_v20 = vld [vmem:[#allocation69_spill] sm:$0xff] }
 0x405   : > { %3877 = vmatpush.msra.mxu0 %v9771_v33  ;;  %v9990_v33 = vadd.f32 %v2465_v51, %v2401_v29 }
 0x406   : > { %6636 = vmatmul.msk.f32.gmra.mxu1 %vm12611_vm0, %v12945_v4  ;;  %v12965_v4 = vld [vmem:[#allocation40_spill] sm:$0xff] }
 0x407   : > { %3878 = vmatpush.msra.mxu0 %v9745_v17  ;;  %6668 = vmatmul.msk.f32.gmra.mxu3 %vm12611_vm0, %v12946_v23  ;;  %12947 = vst [vmem:[#allocation104_spill] sm:$0xff] %v9990_v33 }
 0x408   : > { %6753 = vmatpush.xpose.msk.msrb.mxu1 %vm12611_vm0, %v4942_v49 }
 0x409   : > { %3879 = vmatpush.msra.mxu0 %v9743_v35  ;;  %v2468_v55 = vpop.f32.mrf.mxu2  ;;  %v10003_v35 = vpop.permute.xlu1 %6887 }
 0x40a   : > { %v9992_v56 = vadd.f32 %v2468_v55, %v2404_v25  ;;  %v2665_v52 = vpop.f32.mrf.mxu3  ;;  %v10001_v36 = vpop.f32.mrf.mxu0 }
 0x40b   : > { %3880 = vmatpush.msra.mxu0 %v9703_v27  ;;  %v9996_v7 = vpop.f32.mrf.mxu1  ;;  %v12949_v27 = vld [vmem:[#allocation37_spill] sm:$0xff] }
 0x40c   : > { %6754 = vmatpush.xpose.msk.msrb.mxu1 %vm12611_vm0, %v4940_v8  ;;  %v6956_v17 = vpack.i.bf16 %v9990_v33, %v9992_v56 }
 0x40d   : > { %3881 = vmatpush.msra.mxu0 %v9701_v1  ;;  %v2506_v1 = vadd.s32 32, %v9857_v16 }
 0x40e   : > { %6637 = vmatmul.msk.f32.gmra.mxu1 %vm12611_vm0, %v12948_v41  ;;  %6957 = vrot.lane.b32.xlu0 %v6956_v17, %s7832_s21 }
 0x40f   : > { %3882 = vmatpush.msra.mxu0 %v9661_v18  ;;  %6669 = vmatmul.msk.f32.gmra.mxu3 %vm12611_vm0, %v12949_v27  ;;  %vm10026_vm5 = vcmp.ge.s32.totalorder %v2506_v1, %v9859_v24  ;;  %v12966_v1 = vld [vmem:[#allocation86_spill] sm:$0xff] }
 0x410   : > { %6755 = vmatpush.xpose.msk.msrb.mxu1 %vm12611_vm0, %v9927_v28 }
 0x411   : > { %3883 = vmatpush.msra.mxu0 %v9659_v62  ;;  %v10015_v44 = vpop.f32.mrf.mxu2  ;;  %v2509_v62 = vadd.s32 56, %v9857_v16 }
 0x412   : > { %v10017_v0 = vpop.f32.mrf.mxu3  ;;  %v10031_v57 = vpop.f32.mrf.mxu0 }
 0x413   : > { %3884 = vmatpush.msra.mxu0 %v9621_v3  ;;  %v10022_v18 = vpop.f32.mrf.mxu1  ;;  %v10033_v63 = vpop.permute.xlu1 %6902  ;;  %v12953_v3 = vld [vmem:[#allocation38_spill] sm:$0xff]  ;;  %vm10047_vm6 = vcmp.ge.s32.totalorder %v2509_v62, %v9859_v24 }
 0x414   : > { %6756 = vmatpush.xpose.msk.msrb.mxu1 %vm12611_vm0, %v9769_v37  ;;  %v12954_v37 = vmov 0 }
 0x415   : > { %3885 = vmatpush.msra.mxu0 %v9619_v53  ;;  %v10043_v53 = vsel %vm10026_vm5, %v2662_v54, -inf  ;;  %v12955_v37 = vsel %vm10047_vm6, 4294967295, %v12954_v37 }
 0x416   : > { %6638 = vmatmul.msk.f32.gmra.mxu1 %vm12611_vm0, %v12952_v45  ;;  %12956 = vst [vmem:[#allocation89_spill] sm:$0xff] %v12955_v37  ;;  %v12967_v45 = vld [vmem:[#allocation41_spill] sm:$0xff] }
 0x417   : > { %6670 = vmatmul.msk.f32.gmra.mxu3 %vm12611_vm0, %v12953_v3  ;;  %2722 = vmax.xlane.f32.xlu2 %v10043_v53  ;;  %v2508_v3 = vadd.s32 48, %v9857_v16 }
 0x418   : > { %6757 = vmatpush.xpose.msk.msrb.mxu1 %vm12611_vm0, %v9803_v22 }
 0x419   : > { %v10052_v40 = vpop.f32.mrf.mxu2  ;;  %vm10116_vm9 = vcmp.ge.s32.totalorder %v2508_v3, %v9859_v24 }
 0x41a   : > { %v2671_v50 = vpop.f32.mrf.mxu3  ;;  %v2347_v39 = vpop.f32.mrf.mxu0  ;;  %v12969_v12 = vsel %vm10116_vm9, 4294967295, %v12968_v12 }
 0x41b   : > { %v10060_v22 = vsel %vm10047_vm6, %v2671_v50, -inf  ;;  %v2412_v58 = vpop.f32.mrf.mxu1  ;;  %v10070_v8 = vpop.permute.xlu1 %6907  ;;  %12970 = vst [vmem:[#allocation102_spill] sm:$0xff] %v12969_v12 }
 0x41c   : > { %6758 = vmatpush.xpose.msk.msrb.mxu1 %vm12611_vm0, %v9783_v2  ;;  %2728 = vmax.xlane.f32.xlu1 %v10060_v22  ;;  %v10076_v2 = vsel %vm10064_vm7, %v2665_v52, -inf  ;;  %v10080_v6 = vpop.permute.xlu2 %6922  ;;  %v2413_v23 = vadd.f32 %v2412_v58, %v2347_v39 }
 0x41e   : > { %6639 = vmatmul.msk.f32.gmra.mxu1 %vm12611_vm0, %v12960_v30 }
 0x41f   : > { %6671 = vmatmul.msk.f32.gmra.mxu3 %vm12611_vm0, %v12961_v47  ;;  %2724 = vmax.xlane.f32.xlu2 %v10076_v2 }
 0x421   : > { %v2477_v61 = vpop.f32.mrf.mxu2 }
 0x422   : > { %v2674_v51 = vpop.f32.mrf.mxu3  ;;  %v2350_v14 = vpop.f32.mrf.mxu0  ;;  %v10102_v27 = vadd.f32 %v2477_v61, %v2413_v23  ;;  %v2513_v61 = vadd.s32 88, %v9857_v16  ;;  %v12973_v23 = vmov 0 }
 0x423   : > { %v10093_v49 = vsel %vm10083_vm8, %v2674_v51, -inf  ;;  %v2415_v29 = vpop.f32.mrf.mxu1  ;;  %v10096_v25 = vpop.permute.xlu1 %6912 }
 0x424   : > { %v2416_v55 = vadd.f32 %v2415_v29, %v2350_v14  ;;  %v10121_v51 = vpop.permute.xlu0 %6867  ;;  %v12971_v14 = vld [vmem:[#allocation71_spill] sm:$0xff]  ;;  %v10131_v29 = vsel %vm10116_vm9, %v10017_v0, -inf  ;;  %vm10135_vm10 = vcmp.ge.s32.totalorder %v2513_v61, %v9859_v24 }
 0x425   : > { %v12974_v23 = vsel %vm10135_vm10, 4294967295, %v12973_v23  ;;  %v12977_v61 = vld [vmem:[#allocation43_spill] sm:$0xff] }
 0x426   : > { %6640 = vmatmul.msk.f32.gmra.mxu1 %vm12611_vm0, %v12964_v20  ;;  %12975 = vst [vmem:[#allocation85_spill] sm:$0xff] %v12974_v23 }
 0x427   : > { %6672 = vmatmul.msk.f32.gmra.mxu3 %vm12611_vm0, %v12965_v4  ;;  %2730 = vmax.xlane.f32.xlu2 %v10093_v49  ;;  %v12972_v4 = vld [vmem:[#allocation42_spill] sm:$0xff] }
 0x429   : > { %v2480_v52 = vpop.f32.mrf.mxu2 }
 0x42a   : > { %v10098_v17 = vpop.f32.mrf.mxu3  ;;  %v10100_v41 = vpop.permute.xlu2 %6932  ;;  %v10106_v62 = vadd.f32 %v2480_v52, %v2416_v55 }
 0x42b   : > { %v6918_v30 = vpop.permute.xlu1 %6917  ;;  %v2418_v47 = vpop.f32.mrf.mxu1 }
 0x42c   : > { %v6966_v13 = vpack.i.bf16 %v10102_v27, %v10106_v62  ;;  %v6920_v11 = vunpack.i.h.bf16 %v6918_v30 }
 0x42e   : > { %6641 = vmatmul.msk.f32.gmra.mxu1 %vm12611_vm0, %v12966_v1 }
 0x42f   : > { %6673 = vmatmul.msk.f32.gmra.mxu3 %vm12611_vm0, %v12967_v45  ;;  %v2353_v45 = vpop.f32.mrf.mxu0 }
 0x432   : > { %v10113_v50 = vpop.f32.mrf.mxu3  ;;  %v6938_v39 = vpop.permute.xlu2 %6937 }
 0x433   : > { %v6939_v58 = vunpack.i.l.bf16 %v6938_v39  ;;  %v6940_v20 = vunpack.i.h.bf16 %v6938_v39  ;;  %v2421_v0 = vpop.f32.mrf.mxu1 }
 0x435   : > { %6967 = vrot.lane.b32.xlu1 %v6966_v13, %s7832_s21  ;;  %3436 = vmatpush.msrb.mxu2 %v6939_v58  ;;  %v10144_v13 = vpop.permute.xlu0 %6882  ;;  %v12976_v58 = vld [vmem:[#allocation73_spill] sm:$0xff] }
 0x436   : > { %6642 = vmatmul.msk.f32.gmra.mxu1 %vm12611_vm0, %v12971_v14  ;;  %v6919_v14 = vunpack.i.l.bf16 %v6918_v30 }
 0x437   : > { %6674 = vmatmul.msk.f32.gmra.mxu3 %vm12611_vm0, %v12972_v4  ;;  %3437 = vmatpush.msrb.mxu2 %v6940_v20  ;;  %v2483_v20 = vpop.f32.mrf.mxu2  ;;  %v2407_v4 = vadd.f32 %v9996_v7, %v10001_v36  ;;  %v2356_v48 = vpop.f32.mrf.mxu0  ;;  %v12978_v7 = vld [vmem:[#allocation74_spill] sm:$0xff]  ;;  %v12979_v36 = vld [vmem:[#allocation49_spill] sm:$0xff] }
 0x438   : > { %2726 = vmax.xlane.f32.xlu0 %v10131_v29  ;;  %v2422_v30 = vadd.f32 %v2421_v0, %v2356_v48  ;;  %v12981_v48 = vld [vmem:[#allocation54_spill] sm:$0xff] }
 0x439   : > { %v6928_v52 = vpop.permute.xlu1 %6927 }
 0x43a   : > { %v2683_v55 = vpop.f32.mrf.mxu3  ;;  %v6929_v3 = vunpack.i.l.bf16 %v6928_v52  ;;  %v6930_v39 = vunpack.i.h.bf16 %v6928_v52  ;;  %v6909_v52 = vunpack.i.l.bf16 %v10070_v8 }
 0x43b   : > { %v10141_v1 = vsel %vm10135_vm10, %v2683_v55, -inf  ;;  %v2410_v55 = vadd.f32 %v10022_v18, %v10031_v57  ;;  %v10166_v57 = vpop.f32.mrf.mxu1 }
 0x43c   : > { %2736 = vmax.xlane.f32.xlu2 %v10141_v1  ;;  %3438 = vmatpush.msrb.mxu2 %v6929_v3 }
 0x43d   : > { %v6898_v3 = vpop.permute.xlu0 %6897 }
 0x43e   : > { %6643 = vmatmul.msk.f32.gmra.mxu1 %vm12611_vm0, %v12976_v58  ;;  %3439 = vmatpush.msrb.mxu2 %v6930_v39  ;;  %v10156_v58 = vadd.f32 %v10015_v44, %v2407_v4  ;;  %v10160_v39 = vadd.f32 %v10052_v40, %v2410_v55  ;;  %v6899_v18 = vunpack.i.l.bf16 %v6898_v3  ;;  %v6889_v40 = vunpack.i.l.bf16 %v10003_v35 }
 0x43f   : > { %6675 = vmatmul.msk.f32.gmra.mxu3 %vm12611_vm0, %v12977_v61  ;;  %v6910_v61 = vunpack.i.h.bf16 %v10070_v8  ;;  %v2486_v44 = vpop.f32.mrf.mxu2 }
 0x440   : > { %3440 = vmatpush.msrb.mxu2 %v6919_v14  ;;  %v6900_v14 = vunpack.i.h.bf16 %v6898_v3  ;;  %v6961_v8 = vpack.i.bf16 %v10156_v58, %v10160_v39  ;;  %v10174_v55 = vadd.f32 %v2486_v44, %v2422_v30  ;;  %v6880_v3 = vunpack.i.h.bf16 %v9981_v26  ;;  %v12983_v44 = vld [vmem:[#allocation60_spill] sm:$0xff] }
 0x442   : > { %3441 = vmatpush.msrb.mxu2 %v6920_v11  ;;  %v2419_v11 = vadd.f32 %v2418_v47, %v2353_v45  ;;  %v12980_v47 = vld [vmem:[#allocation78_spill] sm:$0xff]  ;;  %v6879_v45 = vunpack.i.l.bf16 %v9981_v26  ;;  %v10182_v0 = vpop.f32.mrf.mxu3  ;;  %v2512_v26 = vadd.s32 80, %v9857_v16 }
 0x444   : > { %3442 = vmatpush.msrb.mxu2 %v6909_v52  ;;  %v10171_v4 = vadd.f32 %v2483_v20, %v2419_v11  ;;  %v6890_v52 = vunpack.i.h.bf16 %v10003_v35  ;;  %v10189_v35 = vpop.f32.mrf.mxu0  ;;  %v12982_v11 = vld [vmem:[#allocation80_spill] sm:$0xff]  ;;  %vm10203_vm11 = vcmp.ge.s32.totalorder %v2512_v26, %v9859_v24  ;;  %v6915_v26 = vunpack.i.h.bf16 %v10096_v25 }
 0x446   : > { %6644 = vmatmul.msk.f32.gmra.mxu1 %vm12611_vm0, %v12978_v7  ;;  %3443 = vmatpush.msrb.mxu2 %v6910_v61  ;;  %v6971_v20 = vpack.i.bf16 %v10171_v4, %v10174_v55  ;;  %v10187_v61 = vpop.f32.mrf.mxu1  ;;  %v6869_v7 = vunpack.i.l.bf16 %v10121_v51 }
 0x447   : > { %6676 = vmatmul.msk.f32.gmra.mxu3 %vm12611_vm0, %v12979_v36  ;;  %v6943_v36 = vpop.permute.xlu2 %6942 }
 0x448   : > { %3444 = vmatpush.msrb.mxu2 %v6899_v18  ;;  %v6870_v18 = vunpack.i.h.bf16 %v10121_v51  ;;  %v6944_v30 = vunpack.i.l.bf16 %v6943_v36  ;;  %v12984_v51 = vmov 0 }
 0x449   : > { %v12985_v51 = vsel %vm10203_vm11, 4294967295, %v12984_v51 }
 0x44a   : > { %3445 = vmatpush.msrb.mxu2 %v6900_v14  ;;  %v10199_v14 = vpop.f32.mrf.mxu2  ;;  %12986 = vst [vmem:[#allocation113_spill] sm:$0xff] %v12985_v51 }
 0x44c   : > { %6962 = vrot.lane.b32.xlu0 %v6961_v8, %s7832_s21  ;;  %3446 = vmatpush.msrb.mxu2 %v6889_v40  ;;  %v6945_v8 = vunpack.i.h.bf16 %v6943_v36  ;;  %v2689_v40 = vpop.f32.mrf.mxu3  ;;  %v2515_v36 = vadd.s32 104, %v9857_v16 }
 0x44e   : > { %6645 = vmatmul.msk.f32.gmra.mxu1 %vm12611_vm0, %v12980_v47  ;;  %3447 = vmatpush.msrb.mxu2 %v6890_v52  ;;  %v6934_v52 = vunpack.i.l.bf16 %v10100_v41  ;;  %v2430_v47 = vpop.f32.mrf.mxu1  ;;  %vm10227_vm12 = vcmp.ge.s32.totalorder %v2515_v36, %v9859_v24  ;;  %v6894_v36 = vunpack.i.l.bf16 %v10054_v60 }
 0x44f   : > { %6677 = vmatmul.msk.f32.gmra.mxu3 %vm12611_vm0, %v12981_v48  ;;  %v6935_v48 = vunpack.i.h.bf16 %v10100_v41  ;;  %v6925_v41 = vunpack.i.h.bf16 %v10080_v6 }
 0x450   : > { %3448 = vmatpush.msrb.mxu2 %v6879_v45  ;;  %v10208_v45 = vpop.f32.mrf.mxu0 }
 0x452   : > { %3449 = vmatpush.msrb.mxu2 %v6880_v3  ;;  %v12987_v3 = vld [vmem:[#allocation81_spill] sm:$0xff] }
 0x454   : > { %6972 = vrot.lane.b32.xlu2 %v6971_v20, %s7832_s21  ;;  %3450 = vmatpush.msrb.mxu2 %v6869_v7  ;;  %v10213_v20 = vsel %vm10203_vm11, %v10113_v50, -inf  ;;  %v6924_v7 = vunpack.i.l.bf16 %v10080_v6  ;;  %v6914_v50 = vunpack.i.l.bf16 %v10096_v25  ;;  %v12992_v6 = vld [vmem:[#allocation90_spill] sm:$0xff]  ;;  %v6905_v25 = vunpack.i.h.bf16 %v10033_v63 }
 0x456   : > { %6646 = vmatmul.msk.f32.gmra.mxu1 %vm12611_vm0, %v12982_v11  ;;  %3451 = vmatpush.msrb.mxu2 %v6870_v18  ;;  %v12988_v18 = vld [vmem:[#allocation63_spill] sm:$0xff]  ;;  %v10223_v11 = vpop.f32.mrf.mxu2 }
 0x457   : > { %6678 = vmatmul.msk.f32.gmra.mxu3 %vm12611_vm0, %v12983_v44  ;;  %v2692_v44 = vpop.f32.mrf.mxu3 }
 0x458   : > { %4400 = vmatpush.msra.mxu2 %v6944_v30  ;;  %v12989_v30 = vmov 0 }
 0x459   : > { %v12990_v30 = vsel %vm10227_vm12, 4294967295, %v12989_v30 }
 0x45a   : > { %4401 = vmatpush.msra.mxu2 %v6945_v8  ;;  %12991 = vst [vmem:[#allocation111_spill] sm:$0xff] %v12990_v30  ;;  %v2433_v8 = vpop.f32.mrf.mxu1 }
 0x45c   : > { %4402 = vmatpush.msra.mxu2 %v6934_v52  ;;  %v10234_v52 = vsel %vm10227_vm12, %v2689_v40, -inf }
 0x45e   : > { %6695 = vmatmul.msk.f32.vlgmr.msra.gmra.mxu1 %vm12611_vm0, %v12987_v3  ;;  %4403 = vmatpush.msra.mxu2 %v6935_v48  ;;  %v6904_v48 = vunpack.i.l.bf16 %v10033_v63  ;;  %v2365_v3 = vpop.f32.mrf.mxu0  ;;  %v2495_v40 = vpop.f32.mrf.mxu2  ;;  %v12995_v63 = vld [vmem:[#allocation66_spill] sm:$0xff] }
 0x45f   : > { %2734 = vmax.xlane.f32.xlu1 %v10213_v20  ;;  %6727 = vmatmul.msk.f32.vlgmr.msra.gmra.mxu3 %vm12611_vm0, %v12988_v18  ;;  %v6895_v18 = vunpack.i.h.bf16 %v10054_v60 }
 0x460   : > { %4404 = vmatpush.msra.mxu2 %v6924_v7  ;;  %v12993_v7 = vld [vmem:[#allocation64_spill] sm:$0xff] }
 0x462   : > { %4405 = vmatpush.msra.mxu2 %v6925_v41  ;;  %v10245_v41 = vpop.f32.mrf.mxu3 }
 0x464   : > { %4406 = vmatpush.msra.mxu2 %v6914_v50  ;;  %v12994_v50 = vld [vmem:[#allocation87_spill] sm:$0xff] }
 0x466   : > { %6696 = vmatmul.msk.f32.gmra.mxu1 %vm12611_vm0, %v12992_v6  ;;  %4407 = vmatpush.msra.mxu2 %v6915_v26  ;;  %v2511_v26 = vadd.s32 72, %v9857_v16  ;;  %v6884_v6 = vunpack.i.l.bf16 %v10144_v13  ;;  %v2368_v60 = vpop.f32.mrf.mxu0 }
 0x467   : > { %2740 = vmax.xlane.f32.xlu1 %v10234_v52  ;;  %6728 = vmatmul.msk.f32.gmra.mxu3 %vm12611_vm0, %v12993_v7  ;;  %v10251_v7 = vpop.f32.mrf.mxu1  ;;  %v2434_v31 = vadd.f32 %v2433_v8, %v2368_v60  ;;  %v13000_v8 = vld [vmem:[#allocation68_spill] sm:$0xff] }
 0x468   : > { %4408 = vmatpush.msra.mxu2 %v6904_v48  ;;  %v6885_v48 = vunpack.i.h.bf16 %v10144_v13  ;;  %vm10259_vm13 = vcmp.ge.s32.totalorder %v2511_v26, %v9859_v24  ;;  %v12999_v26 = vld [vmem:[#allocation93_spill] sm:$0xff] }
 0x469   : > { %v10268_v13 = vsel %vm10259_vm13, %v10098_v17, -inf }
 0x46a   : > { %4409 = vmatpush.msra.mxu2 %v6905_v25  ;;  %v10256_v25 = vpop.xlane.xlu0 %2714 }
 0x46c   : > { %4410 = vmatpush.msra.mxu2 %v6894_v36  ;;  %v12996_v36 = vmov 0 }
 0x46d   : > { %v12997_v36 = vsel %vm10259_vm13, 4294967295, %v12996_v36 }
 0x46e   : > { %6697 = vmatmul.msk.f32.gmra.mxu1 %vm12611_vm0, %v12994_v50  ;;  %4411 = vmatpush.msra.mxu2 %v6895_v18  ;;  %12998 = vst [vmem:[#allocation112_spill] sm:$0xff] %v12997_v36  ;;  %v6874_v50 = vunpack.i.l.bf16 %v9956_v59  ;;  %v2431_v18 = vadd.f32 %v2430_v47, %v2365_v3  ;;  %v10275_v47 = vpop.f32.mrf.mxu3  ;;  %v13001_v3 = vmov 0 }
 0x46f   : > { %6729 = vmatmul.msk.f32.gmra.mxu3 %vm12611_vm0, %v12995_v63  ;;  %v2516_v63 = vadd.s32 112, %v9857_v16  ;;  %v3119_v60 = vpop.f32.mrf.mxu1 }
 0x470   : > { %4412 = vmatpush.msra.mxu2 %v6884_v6  ;;  %v2498_v6 = vpop.f32.mrf.mxu2  ;;  %v10277_v59 = vadd.f32 %v2495_v40, %v2431_v18 }
 0x471   : > { %v10281_v17 = vadd.f32 %v2498_v6, %v2434_v31  ;;  %vm10284_vm14 = vcmp.ge.s32.totalorder %v2516_v63, %v9859_v24  ;;  %v13007_v63 = vld [vmem:[#allocation91_spill] sm:$0xff] }
 0x472   : > { %4413 = vmatpush.msra.mxu2 %v6885_v48  ;;  %v2514_v48 = vadd.s32 96, %v9857_v16  ;;  %v13002_v3 = vsel %vm10284_vm14, 4294967295, %v13001_v3  ;;  %v10297_v18 = vsel %vm10284_vm14, %v2692_v44, -inf }
 0x473   : > { %13003 = vst [vmem:[#allocation110_spill] sm:$0xff] %v13002_v3  ;;  %v6981_v40 = vpack.i.bf16 %v10277_v59, %v10281_v17 }
 0x474   : > { %4414 = vmatpush.msra.mxu2 %v6874_v50  ;;  %vm10289_vm15 = vcmp.ge.s32.totalorder %v2514_v48, %v9859_v24  ;;  %v13004_v50 = vmov 0 }
 0x475   : > { %v13005_v50 = vsel %vm10289_vm15, 4294967295, %v13004_v50  ;;  %v10303_v31 = vsel %vm10289_vm15, %v10182_v0, -inf  ;;  %v13010_v0 = vld [vmem:[#allocation96_spill] sm:$0xff] }
 0x476   : > { %2732 = vmax.xlane.f32.xlu0 %v10268_v13  ;;  %6698 = vmatmul.msk.f32.gmra.mxu1 %vm12611_vm0, %v12999_v26  ;;  %13006 = vst [vmem:[#allocation119_spill] sm:$0xff] %v13005_v50  ;;  %v13008_v26 = vld [vmem:[#allocation70_spill] sm:$0xff]  ;;  %v10312_v48 = vpop.f32.mrf.mxu3 }
 0x477   : > { %4415 = vmatpush.msra.mxu2 %v6875_v34  ;;  %6730 = vmatmul.msk.f32.gmra.mxu3 %vm12611_vm0, %v13000_v8  ;;  %v2717_v34 = vpop.xlane.xlu0 %2716  ;;  %v10314_v8 = vpop.permute.xlu2 %6947 }
 0x478   : > { %v2747_v6 = vsub.f32 %v9906_v46, %v2717_v34  ;;  %13009 = vst [vmem:[#allocation117_spill] sm:$0xff] %v10314_v8  ;;  %v10316_v42 = vpop.f32.mrf.mxu1  ;;  %v10320_v46 = vsel %vm9893_vm2, %v3119_v60, -inf  ;;  %v2425_v34 = vadd.f32 %v10166_v57, %v10189_v35 }
 0x47a   : > { %v2764_v44 = vmul.f32 1.442695, %v2747_v6  ;;  %v13011_v6 = vld [vmem:[#allocation72_spill] sm:$0xff]  ;;  %v10334_v60 = vadd.f32 %v10199_v14, %v2425_v34 }
 0x47c   : > { %7101 = vpow2.f32 %v2764_v44 }
 0x47d   : > { %2742 = vmax.xlane.f32.xlu2 %v10297_v18 }
 0x47e   : > { %2738 = vmax.xlane.f32.xlu0 %v10303_v31  ;;  %6699 = vmatmul.msk.f32.gmra.mxu1 %vm12611_vm0, %v13007_v63  ;;  %v10339_v8 = vpop.f32.mrf.mxu3 }
 0x47f   : > { %6731 = vmatmul.msk.f32.gmra.mxu3 %vm12611_vm0, %v13008_v26 }
 0x480   : > { %6982 = vrot.lane.b32.xlu1 %v6981_v40, %s7832_s21  ;;  %v2428_v40 = vadd.f32 %v10187_v61, %v10208_v45  ;;  %v3125_v57 = vpop.f32.mrf.mxu1  ;;  %v13012_v61 = vld [vmem:[#allocation99_spill] sm:$0xff] }
 0x482   : > { %v10331_v26 = vpop.eup %7101  ;;  %v10337_v44 = vadd.f32 %v10223_v11, %v2428_v40  ;;  %v10352_v11 = vsel %vm9947_vm4, %v3125_v57, -inf  ;;  %v13018_v57 = vld [vmem:[#allocation44_spill] sm:$0xff] }
 0x483   : > { %13014 = vst [vmem:[#allocation118_spill] sm:$0xff] %v10352_v11 }
 0x484   : > { %v6976_v45 = vpack.i.bf16 %v10334_v60, %v10337_v44 }
 0x485   : > { %3182 = vmax.xlane.f32.xlu2 %v10320_v46 }
 0x486   : > { %6700 = vmatmul.msk.f32.gmra.mxu1 %vm12611_vm0, %v13010_v0  ;;  %v13013_v0 = vld [vmem:[#allocation75_spill] sm:$0xff]  ;;  %v10355_v34 = vpop.f32.mrf.mxu3 }
 0x487   : > { %6732 = vmatmul.msk.f32.gmra.mxu3 %vm12611_vm0, %v13011_v6  ;;  %v13016_v6 = vld [vmem:[#allocation77_spill] sm:$0xff] }
 0x488   : > { %v10359_v40 = vpop.f32.mrf.mxu1 }
 0x48a   : > { %v2723_v63 = vpop.xlane.xlu2 %2722 }
 0x48b   : > { %v2750_v35 = vsub.f32 %v10043_v53, %v2723_v63  ;;  %v13015_v53 = vld [vmem:[#allocation83_spill] sm:$0xff]  ;;  %v2746_v63 = vsub.f32 %v9880_v9, %v10256_v25  ;;  %v13021_v9 = vld [vmem:[#allocation94_spill] sm:$0xff] }
 0x48c   : > { %v13022_v25 = vld [vmem:[#allocation79_spill] sm:$0xff] }
 0x48d   : > { %2796 = vadd.xlane.f32.xlu2 %v10331_v26  ;;  %v2770_v14 = vmul.f32 1.442695, %v2750_v35 }
 0x48e   : > { %6701 = vmatmul.msk.f32.gmra.mxu1 %vm12611_vm0, %v13012_v61  ;;  %v2762_v61 = vmul.f32 1.442695, %v2746_v63 }
 0x48f   : > { %6733 = vmatmul.msk.f32.gmra.mxu3 %vm12611_vm0, %v13013_v0  ;;  %7103 = vpow2.f32 %v2770_v14  ;;  %v13019_v0 = vld [vmem:[#allocation76_spill] sm:$0xff]  ;;  %v2719_v14 = vpop.xlane.xlu1 %2718 }
 0x490   : > { %7105 = vpow2.f32 %v2762_v61 }
 0x492   : > { %6977 = vrot.lane.b32.xlu0 %v6976_v45, %s7832_s21  ;;  %v3626_v45 = vpop.f32.mrf.mxu3 }
 0x495   : > { %3186 = vmax.xlane.f32.xlu2 %v10352_v11  ;;  %v10365_v35 = vpop.eup %7103 }
 0x496   : > { %6702 = vmatmul.msk.f32.gmra.mxu1 %vm12611_vm0, %v13015_v53  ;;  %13017 = vst [vmem:[#allocation115_spill] sm:$0xff] %v10365_v35  ;;  %v3131_v53 = vpop.f32.mrf.mxu1  ;;  %v10381_v63 = vpop.eup %7105 }
 0x497   : > { %6734 = vmatmul.msk.f32.gmra.mxu3 %vm12611_vm0, %v13016_v6  ;;  %v10374_v6 = vsel %vm10026_vm5, %v3626_v45, -inf  ;;  %v10388_v61 = vsel %vm10064_vm7, %v3131_v53, -inf  ;;  %v13024_v45 = vld [vmem:[#allocation45_spill] sm:$0xff] }
 0x498   : > { %13020 = vst [vmem:[#allocation125_spill] sm:$0xff] %v10374_v6 }
 0x499   : > { %13023 = vst [vmem:[#allocation121_spill] sm:$0xff] %v10388_v61 }
 0x49d   : > { %2802 = vadd.xlane.f32.xlu2 %v10365_v35 }
 0x49e   : > { %6703 = vmatmul.msk.f32.gmra.mxu1 %vm12611_vm0, %v13018_v57  ;;  %v3629_v57 = vpop.f32.mrf.mxu3  ;;  %v10384_v35 = vpop.f32.mrf.mxu1 }
 0x49f   : > { %6735 = vmatmul.msk.f32.gmra.mxu3 %vm12611_vm0, %v13019_v0  ;;  %v2721_v0 = vpop.xlane.xlu1 %2720  ;;  %v10405_v53 = vsel %vm10064_vm7, %v3629_v57, -inf }
 0x4a0   : > { %13026 = vst [vmem:[#allocation122_spill] sm:$0xff] %v10405_v53 }
 0x4a5   : > { %3686 = vmax.xlane.f32.xlu2 %v10374_v6 }
 0x4a6   : > { %6704 = vmatmul.msk.f32.gmra.mxu1 %vm12611_vm0, %v13021_v9  ;;  %v13025_v9 = vld [vmem:[#allocation82_spill] sm:$0xff]  ;;  %v10401_v6 = vpop.f32.mrf.mxu3 }
 0x4a7   : > { %6736 = vmatmul.msk.f32.gmra.mxu3 %vm12611_vm0, %v13022_v25  ;;  %v10398_v25 = vsel %vm9872_vm1, %v10275_v47, -inf  ;;  %v2729_v11 = vpop.xlane.xlu1 %2728  ;;  %v13028_v47 = vld [vmem:[#allocation84_spill] sm:$0xff] }
 0x4aa   : > { %2794 = vadd.xlane.f32.xlu1 %v10381_v63 }
 0x4ad   : > { %3190 = vmax.xlane.f32.xlu2 %v10388_v61  ;;  %v2517_v61 = vadd.s32 120, %v9857_v16  ;;  %v10422_v16 = vsel %vm9893_vm2, %v10312_v48, -inf }
 0x4ae   : > { %6705 = vmatmul.msk.f32.gmra.mxu1 %vm12611_vm0, %v13024_v45  ;;  %v2753_v45 = vsub.f32 %v10060_v22, %v2729_v11  ;;  %v10437_v48 = vpop.f32.mrf.mxu3  ;;  %v13032_v11 = vld [vmem:[#allocation52_spill] sm:$0xff] }
 0x4af   : > { %6737 = vmatmul.msk.f32.gmra.mxu3 %vm12611_vm0, %v13025_v9  ;;  %v3137_v9 = vpop.f32.mrf.mxu1  ;;  %vm10415_vm14 = vcmp.ge.s32.totalorder %v2517_v61, %v9859_v24  ;;  %v2748_v24 = vsub.f32 %v9934_v32, %v2719_v14  ;;  %v10441_v61 = vpop.permute.xlu0 %6952  ;;  %v10450_v32 = vsel %vm9923_vm3, %v10316_v42, -inf  ;;  %v2749_v14 = vsub.f32 %v9962_v43, %v2721_v0  ;;  %v13038_v43 = vld [vmem:[#allocation46_spill] sm:$0xff] }
 0x4b0   : > { %v2776_v57 = vmul.f32 1.442695, %v2753_v45  ;;  %v10432_v22 = vsel %vm10047_vm6, %v3137_v9, -inf  ;;  %13033 = vst [vmem:[#allocation131_spill] sm:$0xff] %v10441_v61  ;;  %v13034_v45 = vld [vmem:[#allocation50_spill] sm:$0xff]  ;;  %v10474_v0 = vsel %vm9923_vm3, %v10339_v8, -inf  ;;  %v10478_v61 = vpop.permute.xlu1 %6967 }
 0x4b1   : > { %13031 = vst [vmem:[#allocation120_spill] sm:$0xff] %v10432_v22  ;;  %v2766_v9 = vmul.f32 1.442695, %v2748_v24  ;;  %v13036_v24 = vld [vmem:[#allocation100_spill] sm:$0xff]  ;;  %v2768_v42 = vmul.f32 1.442695, %v2749_v14 }
 0x4b2   : > { %3678 = vmax.xlane.f32.xlu1 %v10398_v25  ;;  %7107 = vpow2.f32 %v2776_v57  ;;  %13039 = vst [vmem:[#allocation126_spill] sm:$0xff] %v10478_v61 }
 0x4b3   : > { %7109 = vpow2.f32 %v2766_v9 }
 0x4b4   : > { %7111 = vpow2.f32 %v2768_v42 }
 0x4b5   : > { %3688 = vmax.xlane.f32.xlu2 %v10405_v53 }
 0x4b6   : > { %6706 = vmatmul.msk.f32.gmra.mxu1 %vm12611_vm0, %v13027_v5  ;;  %v10428_v5 = vsel %vm10415_vm14, %v10245_v41, -inf }
 0x4b7   : > { %6738 = vmatmul.msk.f32.gmra.mxu3 %vm12611_vm0, %v13028_v47  ;;  %v10443_v41 = vpop.f32.mrf.mxu1  ;;  %v10457_v47 = vsel %vm9872_vm1, %v10251_v7, -inf  ;;  %v2725_v7 = vpop.xlane.xlu2 %2724 }
 0x4b8   : > { %v10459_v57 = vpop.eup %7107 }
 0x4b9   : > { %13035 = vst [vmem:[#allocation127_spill] sm:$0xff] %v10459_v57  ;;  %v10481_v14 = vpop.eup %7109 }
 0x4ba   : > { %3680 = vmax.xlane.f32.xlu1 %v10422_v16  ;;  %v10489_v8 = vpop.eup %7111 }
 0x4bb   : > { %13042 = vst [vmem:[#allocation137_spill] sm:$0xff] %v10489_v8 }
 0x4bc   : > { %2744 = vmax.xlane.f32.xlu0 %v10428_v5 }
 0x4bd   : > { %3194 = vmax.xlane.f32.xlu2 %v10432_v22 }
 0x4be   : > { %6707 = vmatmul.msk.f32.gmra.mxu1 %vm12611_vm0, %v13032_v11  ;;  %v10465_v11 = vpop.permute.xlu0 %6957 }
 0x4bf   : > { %6739 = vmatmul.msk.f32.gmra.mxu3 %vm12611_vm0, %v13034_v45  ;;  %13037 = vst [vmem:[#allocation128_spill] sm:$0xff] %v10465_v11  ;;  %v10467_v45 = vpop.f32.mrf.mxu3  ;;  %v10476_v9 = vpop.f32.mrf.mxu1 }
 0x4c2   : > { %3184 = vmax.xlane.f32.xlu1 %v10450_v32 }
 0x4c4   : > { %3180 = vmax.xlane.f32.xlu0 %v10457_v47 }
 0x4c5   : > { %2808 = vadd.xlane.f32.xlu2 %v10459_v57  ;;  %v13041_v57 = vld [vmem:[#allocation56_spill] sm:$0xff] }
 0x4c6   : > { %6708 = vmatmul.msk.f32.gmra.mxu1 %vm12611_vm0, %v13036_v24  ;;  %v2751_v24 = vsub.f32 %v10076_v2, %v2725_v7  ;;  %v2727_v11 = vpop.xlane.xlu0 %2726  ;;  %v10499_v2 = vsel %vm10026_vm5, %v10359_v40, -inf }
 0x4c7   : > { %6740 = vmatmul.msk.f32.gmra.mxu3 %vm12611_vm0, %v13038_v43  ;;  %v13040_v43 = vld [vmem:[#allocation48_spill] sm:$0xff]  ;;  %v10491_v61 = vpop.f32.mrf.mxu3  ;;  %v2752_v42 = vsub.f32 %v10131_v29, %v2727_v11  ;;  %v3146_v7 = vpop.f32.mrf.mxu1 }
 0x4c8   : > { %v2772_v53 = vmul.f32 1.442695, %v2751_v24  ;;  %v13043_v24 = vld [vmem:[#allocation101_spill] sm:$0xff]  ;;  %v2731_v29 = vpop.xlane.xlu2 %2730  ;;  %v10590_v37 = vsel %vm10203_vm11, %v3146_v7, -inf  ;;  %v10604_v7 = vsel %vm10259_vm13, %v10476_v9, -inf }
 0x4c9   : > { %13057 = vst [vmem:[#allocation144_spill] sm:$0xff] %v10590_v37  ;;  %v13063_v9 = vld [vmem:[#allocation97_spill] sm:$0xff] }
 0x4ca   : > { %3682 = vmax.xlane.f32.xlu1 %v10474_v0  ;;  %7113 = vpow2.f32 %v2772_v53 }
 0x4cc   : > { %2798 = vadd.xlane.f32.xlu0 %v10481_v14 }
 0x4ce   : > { %6709 = vmatmul.msk.f32.gmra.mxu1 %vm12611_vm0, %v13040_v43  ;;  %v2774_v43 = vmul.f32 1.442695, %v2752_v42 }
 0x4cf   : > { %6741 = vmatmul.msk.f32.gmra.mxu3 %vm12611_vm0, %v13041_v57  ;;  %v3644_v40 = vpop.f32.mrf.mxu3  ;;  %v3149_v11 = vpop.f32.mrf.mxu1 }
 0x4d2   : > { %v2735_v10 = vpop.xlane.xlu1 %2734  ;;  %2800 = vadd.xlane.f32.xlu1 %v10489_v8  ;;  %v13044_v8 = vld [vmem:[#allocation51_spill] sm:$0xff] }
 0x4d3   : > { %v2756_v22 = vsub.f32 %v10213_v20, %v2735_v10  ;;  %v10509_v10 = vsel %vm9947_vm4, %v10355_v34, -inf  ;;  %v10512_v20 = vpop.eup %7113 }
 0x4d4   : > { %3188 = vmax.xlane.f32.xlu0 %v10499_v2 }
 0x4d5   : > { %v2782_v57 = vmul.f32 1.442695, %v2756_v22  ;;  %v2754_v22 = vsub.f32 %v10093_v49, %v2731_v29  ;;  %v10532_v49 = vsel %vm10203_vm11, %v3644_v40, -inf  ;;  %v13048_v29 = vld [vmem:[#allocation58_spill] sm:$0xff]  ;;  %vm13064_vm11 = vcmask 523264  }
 0x4d6   : > { %6710 = vmatmul.msk.f32.gmra.mxu1 %vm12611_vm0, %v13043_v24  ;;  %13047 = vst [vmem:[#allocation134_spill] sm:$0xff] %v10532_v49 }
 0x4d7   : > { %7115 = vpow2.f32 %v2782_v57  ;;  %6742 = vmatmul.msk.f32.gmra.mxu3 %vm12611_vm0, %v13044_v8  ;;  %v13046_v8 = vld [vmem:[#allocation109_spill] sm:$0xff]  ;;  %v2778_v42 = vmul.f32 1.442695, %v2754_v22  ;;  %v10527_v57 = vsel %vm10116_vm9, %v10384_v35, -inf  ;;  %v10543_v35 = vsel %vm10116_vm9, %v10401_v6, -inf }
 0x4d8   : > { %7117 = vpow2.f32 %v2774_v43  ;;  %v10534_v43 = vpop.f32.mrf.mxu3 }
 0x4d9   : > { %7119 = vpow2.f32 %v2778_v42 }
 0x4da   : > { %3684 = vmax.xlane.f32.xlu1 %v10509_v10  ;;  %v2741_v24 = vpop.xlane.xlu1 %2740 }
 0x4db   : > { %v2759_v22 = vsub.f32 %v10234_v52, %v2741_v24  ;;  %v13050_v52 = vld [vmem:[#allocation108_spill] sm:$0xff]  ;;  %v10556_v24 = vpop.permute.xlu0 %6962 }
 0x4dc   : > { %2804 = vadd.xlane.f32.xlu0 %v10512_v20  ;;  %13051 = vst [vmem:[#allocation141_spill] sm:$0xff] %v10556_v24  ;;  %v10582_v24 = vsel %vm10083_vm8, %v10443_v41, -inf }
 0x4dd   : > { %v10515_v53 = vpop.eup %7115  ;;  %v2788_v40 = vmul.f32 1.442695, %v2759_v22  ;;  %13055 = vst [vmem:[#allocation138_spill] sm:$0xff] %v10582_v24 }
 0x4de   : > { %13045 = vst [vmem:[#allocation133_spill] sm:$0xff] %v10515_v53  ;;  %2814 = vadd.xlane.f32.xlu2 %v10515_v53  ;;  %6759 = vmatmul.msk.f32.vlgmr.msrb.gmra.mxu1 %vm12611_vm0, %v13046_v8  ;;  %v10521_v34 = vpop.eup %7117  ;;  %v3152_v8 = vpop.f32.mrf.mxu1 }
 0x4df   : > { %v10546_v42 = vpop.eup %7119  ;;  %v10551_v53 = vsel %vm10289_vm15, %v3152_v8, -inf  ;;  %7121 = vpow2.f32 %v2788_v40  ;;  %v2737_v8 = vpop.xlane.xlu2 %2736 }
 0x4e0   : > { %13049 = vst [vmem:[#allocation132_spill] sm:$0xff] %v10551_v53  ;;  %v10558_v6 = vpop.f32.mrf.mxu3 }
 0x4e2   : > { %2806 = vadd.xlane.f32.xlu1 %v10521_v34 }
 0x4e4   : > { %3192 = vmax.xlane.f32.xlu0 %v10527_v57 }
 0x4e5   : > { %v10574_v40 = vpop.eup %7121 }
 0x4e6   : > { %3698 = vmax.xlane.f32.xlu2 %v10532_v49  ;;  %6760 = vmatmul.msk.f32.gmra.mxu1 %vm12611_vm0, %v13048_v29  ;;  %v10563_v29 = vsel %vm10047_vm6, %v10437_v48, -inf  ;;  %v10565_v22 = vpop.f32.mrf.mxu1  ;;  %13053 = vst [vmem:[#allocation140_spill] sm:$0xff] %v10574_v40  ;;  %vm13068_vm6 = vmmov %vm13064_vm11 }
 0x4e8   : > { %v3653_v49 = vpop.f32.mrf.mxu3 }
 0x4e9   : > { %v2733_v48 = vpop.xlane.xlu0 %2732  ;;  %v10596_v41 = vsel %vm10227_vm12, %v3653_v49, -inf  ;;  %v10609_v49 = vsel %vm10135_vm10, %v3149_v11, -inf }
 0x4ea   : > { %3690 = vmax.xlane.f32.xlu1 %v10543_v35  ;;  %13058 = vst [vmem:[#allocation145_spill] sm:$0xff] %v10596_v41 }
 0x4eb   : > { %13060 = vst [vmem:[#allocation142_spill] sm:$0xff] %v10609_v49 }
 0x4ec   : > { %2810 = vadd.xlane.f32.xlu0 %v10546_v42 }
 0x4ee   : > { %3204 = vmax.xlane.f32.xlu2 %v10551_v53  ;;  %6761 = vmatmul.msk.f32.gmra.mxu1 %vm12611_vm0, %v13050_v52  ;;  %v10571_v53 = vsel %vm10083_vm8, %v10467_v45, -inf  ;;  %v13054_v52 = vld [vmem:[#allocation114_spill] sm:$0xff]  ;;  %v10585_v45 = vpop.permute.xlu2 %6972 }
 0x4ef   : > { %13052 = vst [vmem:[#allocation139_spill] sm:$0xff] %v10571_v53 }
 0x4f0   : > { %13056 = vst [vmem:[#allocation146_spill] sm:$0xff] %v10585_v45 }
 0x4f2   : > { %3692 = vmax.xlane.f32.xlu1 %v10563_v29 }
 0x4f4   : > { %3694 = vmax.xlane.f32.xlu0 %v10571_v53  ;;  %v2755_v53 = vsub.f32 %v10268_v13, %v2733_v48 }
 0x4f6   : > { %2820 = vadd.xlane.f32.xlu2 %v10574_v40  ;;  %6762 = vmatmul.msk.f32.gmra.mxu1 %vm12611_vm0, %v13054_v52  ;;  %v3158_v40 = vpop.f32.mrf.mxu1  ;;  %v2757_v52 = vsub.f32 %v10141_v1, %v2737_v8  ;;  %v2780_v45 = vmul.f32 1.442695, %v2755_v53  ;;  %v2743_v1 = vpop.xlane.xlu2 %2742 }
 0x4f7   : > { %v2739_v8 = vpop.xlane.xlu0 %2738 }
 0x4f8   : > { %v2784_v13 = vmul.f32 1.442695, %v2757_v52  ;;  %7123 = vpow2.f32 %v2780_v45  ;;  %v2758_v45 = vsub.f32 %v10303_v31, %v2739_v8  ;;  %v10639_v31 = vsel %vm10135_vm10, %v10534_v43, -inf  ;;  %v10642_v8 = vpop.permute.xlu1 %6982 }
 0x4f9   : > { %13069 = vst [vmem:[#allocation17_spill] sm:$0xff] %v10639_v31 }
 0x4fa   : > { %3196 = vmax.xlane.f32.xlu1 %v10582_v24  ;;  %v13059_v24 = vld [vmem:[#allocation123_spill] sm:$0xff]  ;;  %7125 = vpow2.f32 %v2784_v13  ;;  %v2786_v13 = vmul.f32 1.442695, %v2758_v45  ;;  %13070 = vst [vmem:[#allocation18_spill] sm:$0xff] %v10642_v8  ;;  %v3656_v45 = vpop.f32.mrf.mxu3 }
 0x4fc   : > { %3200 = vmax.xlane.f32.xlu0 %v10590_v37  ;;  %7127 = vpow2.f32 %v2786_v13 }
 0x4fe   : > { %3704 = vmax.xlane.f32.xlu2 %v10596_v41  ;;  %6763 = vmatmul.msk.f32.gmra.mxu1 %vm12611_vm0, %v13059_v24  ;;  %vm13061_vm0 = vnez %v13002_v3  ;;  %v3161_v24 = vpop.f32.mrf.mxu1  ;;  %v10619_v48 = vpop.eup %7123  ;;  %v2760_v3 = vsub.f32 %v10297_v18, %v2743_v1 }
 0x4ff   : > { %v10614_v53 = vsel %vm13061_vm0, %v3158_v40, -inf  ;;  %13065 = vst [vmem:[#allocation15_spill] sm:$0xff] %v10619_v48  ;;  %v3183_v52 = vpop.xlane.xlu2 %3182  ;;  %v13067_v40 = vld [vmem:[#allocation103_spill] sm:$0xff]  ;;  %v10653_v13 = vsel %vm13061_vm0, %v3656_v45, -inf }
 0x500   : > { %13062 = vst [vmem:[#allocation148_spill] sm:$0xff] %v10614_v53  ;;  %v10622_v11 = vpop.eup %7125  ;;  %v2790_v36 = vmul.f32 1.442695, %v2760_v3 }
 0x501   : > { %13066 = vst [vmem:[#allocation16_spill] sm:$0xff] %v10622_v11 }
 0x502   : > { %3198 = vmax.xlane.f32.xlu1 %v10604_v7  ;;  %v10646_v37 = vpop.eup %7127  ;;  %13073 = vst [vmem:[#allocation20_spill] sm:$0xff] %v10653_v13 }
 0x503   : > { %13072 = vst [vmem:[#allocation19_spill] sm:$0xff] %v10646_v37 }
 0x504   : > { %3202 = vmax.xlane.f32.xlu0 %v10609_v49  ;;  %v10679_v51 = vpop.permute.xlu0 %6977 }
 0x506   : > { %3208 = vmax.xlane.f32.xlu2 %v10614_v53  ;;  %6764 = vmatmul.msk.f32.gmra.mxu1 %vm13064_vm11, %v13063_v9  ;;  %v10628_v41 = vpop.f32.mrf.mxu1  ;;  %v10633_v9 = vsel %vm10259_vm13, %v10491_v61, -inf  ;;  %vm13075_vm11 = vmmov %vm13068_vm6  ;;  %v10665_v53 = vsel %vm10289_vm15, %v10558_v6, -inf  ;;  %v13078_v6 = vld [vmem:[#allocation136_spill] sm:$0xff] }
 0x507   : > { %v2797_v49 = vpop.xlane.xlu2 %2796  ;;  %13076 = vst [vmem:[#allocation21_spill] sm:$0xff] %v10665_v53 }
 0x508   : > { %7129 = vrcp.f32 %v2797_v49 }
 0x50a   : > { %2812 = vadd.xlane.f32.xlu1 %v10619_v48  ;;  %v10684_v48 = vsel %vm10227_vm12, %v10565_v22, -inf  ;;  %v13079_v22 = vld [vmem:[#allocation124_spill] sm:$0xff] }
 0x50c   : > { %2816 = vadd.xlane.f32.xlu0 %v10622_v11 }
 0x50e   : > { %6765 = vmatmul.msk.f32.gmra.mxu1 %vm13068_vm6, %v13067_v40  ;;  %v13071_v40 = vld [vmem:[#allocation135_spill] sm:$0xff]  ;;  %v10648_v61 = vpop.f32.mrf.mxu1  ;;  %v7130_v45 = vpop.eup %7129 }
 0x50f   : > { %v10660_v8 = vpop.xlane.xlu2 %3186 }
 0x512   : > { %3696 = vmax.xlane.f32.xlu1 %v10633_v9 }
 0x514   : > { %3700 = vmax.xlane.f32.xlu0 %v10639_v31  ;;  %v13074_v31 = vld [vmem:[#allocation129_spill] sm:$0xff] }
 0x516   : > { %6766 = vmatmul.msk.f32.gmra.mxu1 %vm13068_vm6, %v13071_v40  ;;  %v10658_v40 = vpop.f32.mrf.mxu3 }
 0x51a   : > { %2818 = vadd.xlane.f32.xlu1 %v10646_v37 }
 0x51c   : > { %3706 = vmax.xlane.f32.xlu0 %v10653_v13  ;;  %v10671_v13 = vsel %vm10415_vm14, %v3161_v24, -inf }
 0x51d   : > { %v2795_v43 = vpop.xlane.xlu1 %2794  ;;  %13077 = vst [vmem:[#allocation22_spill] sm:$0xff] %v10671_v13 }
 0x51e   : > { %7131 = vrcp.f32 %v2795_v43  ;;  %6767 = vmatmul.msk.f32.gmra.mxu1 %vm13075_vm11, %v13074_v31  ;;  %v10673_v31 = vpop.f32.mrf.mxu1  ;;  %vm13080_vm11 = vmmov %vm13068_vm6 }
 0x522   : > { %3702 = vmax.xlane.f32.xlu1 %v10665_v53  ;;  %v2843_v53 = vmul.f32 %v7130_v45, %v2797_v49 }
 0x524   : > { %v7132_v37 = vpop.eup %7131  ;;  %3210 = vmax.xlane.f32.xlu0 %v10671_v13  ;;  %v10686_v13 = vpop.f32.mrf.mxu3  ;;  %v2859_v3 = vsub.f32 2.0, %v2843_v53 }
 0x525   : > { %v2842_v23 = vmul.f32 %v7132_v37, %v2795_v43  ;;  %v3679_v11 = vpop.xlane.xlu1 %3678  ;;  %v3213_v43 = vsub.f32 %v10320_v46, %v3183_v52 }
 0x526   : > { %v3710_v50 = vsub.f32 %v10398_v25, %v3679_v11  ;;  %6768 = vmatmul.msk.f32.gmra.mxu1 %vm13068_vm6, %v13078_v6  ;;  %v10690_v25 = vpop.xlane.xlu2 %2802  ;;  %v2875_v11 = vmul.f32 %v7130_v45, %v2859_v3 }
 0x527   : > { %v2858_v18 = vsub.f32 2.0, %v2842_v23  ;;  %v3230_v49 = vmul.f32 1.442695, %v3213_v43 }
 0x528   : > { %v3726_v1 = vmul.f32 1.442695, %v3710_v50  ;;  %v10693_v50 = vpop.f32.mrf.mxu1 }
 0x529   : > { %v2874_v24 = vmul.f32 %v7132_v37, %v2858_v18 }
 0x52a   : > { %7133 = vpow2.f32 %v3726_v1  ;;  %3206 = vmax.xlane.f32.xlu1 %v10684_v48 }
 0x52b   : > { %7135 = vpow2.f32 %v2790_v36  ;;  %v2890_v23 = vmul.f32 %v10381_v63, %v2874_v24 }
 0x52c   : > { %7137 = vpow2.f32 %v3230_v49  ;;  %v10709_v45 = vpop.f32.mrf.mxu3  ;;  %v13084_v49 = vld [vmem:[#allocation104_spill] sm:$0xff] }
 0x52d   : > { %2922 = vmatmul.f32.vlgmr.msrb.gmra.mxu0 %v2890_v23  ;;  %v3681_v37 = vpop.xlane.xlu1 %3680 }
 0x52e   : > { %4834 = vmatpush.msrb.mxu0 %v10281_v17  ;;  %6769 = vmatmul.msk.f32.gmra.mxu1 %vm13080_vm11, %v13079_v22  ;;  %v3711_v63 = vsub.f32 %v10422_v16, %v3681_v37  ;;  %v2891_v17 = vmul.f32 %v10331_v26, %v2875_v11  ;;  %v13081_v16 = vld [vmem:[#allocation130_spill] sm:$0xff]  ;;  %vm13083_vm11 = vmmov %vm13068_vm6 }
 0x52f   : > { %v2745_v46 = vpop.xlane.xlu0 %2744  ;;  %v13086_v11 = vld [vmem:[#allocation150_spill] sm:$0xff] }
 0x530   : > { %v10698_v52 = vpop.eup %7133  ;;  %4835 = vmatpush.msrb.mxu0 %v10277_v59  ;;  %v2761_v36 = vsub.f32 %v10428_v5, %v2745_v46  ;;  %v10712_v59 = vpop.xlane.xlu2 %3686  ;;  %v3728_v18 = vmul.f32 1.442695, %v3711_v63  ;;  %v13085_v46 = vld [vmem:[#allocation106_spill] sm:$0xff] }
 0x531   : > { %v10702_v53 = vpop.eup %7135  ;;  %3758 = vadd.xlane.f32.xlu0 %v10698_v52  ;;  %v10721_v26 = vpop.f32.mrf.mxu1 }
 0x532   : > { %v2792_v6 = vmul.f32 1.442695, %v2761_v36  ;;  %4836 = vmatpush.msrb.mxu0 %v10337_v44  ;;  %2822 = vadd.xlane.f32.xlu1 %v10702_v53  ;;  %v10719_v1 = vpop.eup %7137 }
 0x534   : > { %7139 = vpow2.f32 %v2792_v6  ;;  %4837 = vmatpush.msrb.mxu0 %v10334_v60  ;;  %v10731_v3 = vpop.f32.mrf.mxu3  ;;  %v10767_v6 = vsel %vm9923_vm3, %v10673_v31, -inf  ;;  %v10783_v31 = vsel %vm9872_vm1, %v10686_v13, -inf }
 0x535   : > { %2925 = vmatmul.f32.gmra.mxu0 %v2891_v17  ;;  %v10714_v5 = vpop.xlane.xlu1 %3184  ;;  %7141 = vpow2.f32 %v3728_v18 }
 0x536   : > { %4838 = vmatpush.msrb.mxu0 %v10174_v55  ;;  %6770 = vmatmul.msk.f32.gmra.mxu1 %vm13068_vm6, %v13081_v16  ;;  %v13088_v16 = vld [vmem:[#allocation125_spill] sm:$0xff] }
 0x537   : > { %v3181_v44 = vpop.xlane.xlu0 %3180 }
 0x538   : > { %4839 = vmatpush.msrb.mxu0 %v10171_v4  ;;  %v3212_v60 = vsub.f32 %v10457_v47, %v3181_v44  ;;  %v13082_v4 = vld [vmem:[#allocation143_spill] sm:$0xff]  ;;  %v10736_v47 = vpop.xlane.xlu2 %3190  ;;  %v3714_v44 = vsub.f32 %v13088_v16, %v10712_v59 }
 0x539   : > { %3262 = vadd.xlane.f32.xlu0 %v10719_v1 }
 0x53a   : > { %v10726_v24 = vpop.eup %7139  ;;  %v3228_v43 = vmul.f32 1.442695, %v3212_v60  ;;  %4840 = vmatpush.msrb.mxu0 %v10106_v62  ;;  %v13089_v60 = vld [vmem:[#allocation92_spill] sm:$0xff]  ;;  %v3734_v16 = vmul.f32 1.442695, %v3714_v44  ;;  %v13094_v44 = vld [vmem:[#allocation121_spill] sm:$0xff] }
 0x53b   : > { %2824 = vadd.xlane.f32.xlu2 %v10726_v24  ;;  %v10738_v37 = vpop.eup %7141 }
 0x53c   : > { %7143 = vpow2.f32 %v3228_v43  ;;  %4841 = vmatpush.msrb.mxu0 %v10102_v27  ;;  %v10744_v27 = vpop.f32.mrf.mxu1  ;;  %v10760_v63 = vpop.f32.mrf.mxu3  ;;  %v10778_v43 = vsel %vm9872_vm1, %v10628_v41, -inf  ;;  %v13090_v41 = vld [vmem:[#allocation116_spill] sm:$0xff] }
 0x53d   : > { %v3683_v55 = vpop.xlane.xlu1 %3682  ;;  %v10869_v30 = vsel %vm10064_vm7, %v10744_v27, -inf }
 0x53e   : > { %4842 = vmatpush.msrb.mxu0 %v10160_v39  ;;  %6771 = vmatmul.msk.f32.gmra.mxu1 %vm13083_vm11, %v13082_v4  ;;  %v10750_v39 = vsel %vm10415_vm14, %v10658_v40, -inf  ;;  %v13087_v40 = vld [vmem:[#allocation105_spill] sm:$0xff]  ;;  %v3214_v4 = vsub.f32 %v10450_v32, %v10714_v5  ;;  %vm13092_vm11 = vmmov %vm13068_vm6  ;;  %13103 = vst [vmem:[#allocation26_spill] sm:$0xff] %v10869_v30 }
 0x53f   : > { %v2799_v23 = vpop.xlane.xlu0 %2798  ;;  %v13091_v32 = vld [vmem:[#allocation149_spill] sm:$0xff] }
 0x540   : > { %4843 = vmatpush.msrb.mxu0 %v10156_v58  ;;  %7145 = vrcp.f32 %v2799_v23  ;;  %v10769_v17 = vpop.xlane.xlu2 %3688  ;;  %v3232_v5 = vmul.f32 1.442695, %v3214_v4  ;;  %v3217_v4 = vsub.f32 %v13094_v44, %v10736_v47 }
 0x541   : > { %3760 = vadd.xlane.f32.xlu0 %v10738_v37 }
 0x542   : > { %v10742_v62 = vpop.eup %7143  ;;  %4844 = vmatpush.msrb.mxu0 %v9992_v56 }
 0x543   : > { %3708 = vmax.xlane.f32.xlu2 %v10750_v39  ;;  %3260 = vadd.xlane.f32.xlu1 %v10742_v62 }
 0x544   : > { %4845 = vmatpush.msrb.mxu0 %v13084_v49  ;;  %v10789_v49 = vpop.f32.mrf.mxu1 }
 0x545   : > { %v2801_v58 = vpop.xlane.xlu1 %2800 }
 0x546   : > { %v7146_v22 = vpop.eup %7145  ;;  %4846 = vmatpush.msrb.mxu0 %v13085_v46  ;;  %7147 = vrcp.f32 %v2801_v58  ;;  %6772 = vmatmul.msk.f32.gmra.mxu1 %vm13068_vm6, %v13086_v11  ;;  %v3712_v46 = vsub.f32 %v10474_v0, %v3683_v55  ;;  %v10801_v0 = vsel %vm10026_vm5, %v10721_v26, -inf  ;;  %v10817_v26 = vsel %vm9893_vm2, %v10648_v61, -inf  ;;  %v13097_v61 = vld [vmem:[#allocation147_spill] sm:$0xff] }
 0x547   : > { %v2844_v56 = vmul.f32 %v7146_v22, %v2799_v23  ;;  %v10758_v36 = vpop.xlane.xlu0 %3188  ;;  %7149 = vrcp.f32 %v10690_v25  ;;  %13093 = vst [vmem:[#allocation23_spill] sm:$0xff] %v10801_v0 }
 0x548   : > { %4847 = vmatpush.msrb.mxu0 %v13087_v40 }
 0x549   : > { %v2860_v18 = vsub.f32 2.0, %v2844_v56  ;;  %4148 = vmax.xlane.f32.xlu0 %v10767_v6 }
 0x54a   : > { %4848 = vmatpush.msrb.mxu0 %v13089_v60 }
 0x54b   : > { %4144 = vmax.xlane.f32.xlu2 %v10778_v43  ;;  %4642 = vmax.xlane.f32.xlu1 %v10783_v31  ;;  %v2876_v59 = vmul.f32 %v7146_v22, %v2860_v18  ;;  %v3730_v18 = vmul.f32 1.442695, %v3712_v46 }
 0x54c   : > { %v7148_v23 = vpop.eup %7147  ;;  %4849 = vmatpush.msrb.mxu0 %v13090_v41 }
 0x54d   : > { %v2845_v11 = vmul.f32 %v7148_v23, %v2801_v58  ;;  %v10793_v56 = vpop.xlane.xlu1 %3684  ;;  %v2892_v13 = vmul.f32 %v10481_v14, %v2876_v59  ;;  %v7150_v40 = vpop.eup %7149  ;;  %v10812_v59 = vsel %vm9893_vm2, %v10709_v45, -inf }
 0x54e   : > { %6773 = vmatmul.msk.f32.gmra.mxu1 %vm13092_vm11, %v13091_v32  ;;  %v2846_v55 = vmul.f32 %v7150_v40, %v10690_v25  ;;  %v10805_v58 = vpop.f32.mrf.mxu3  ;;  %v3195_v25 = vpop.xlane.xlu2 %3194  ;;  %v3238_v32 = vmul.f32 1.442695, %v3217_v4 }
 0x54f   : > { %v2861_v60 = vsub.f32 2.0, %v2845_v11  ;;  %2928 = vmatmul.f32.gmra.mxu0 %v2892_v13  ;;  %v2805_v22 = vpop.xlane.xlu0 %2804  ;;  %v13096_v11 = vld [vmem:[#allocation137_spill] sm:$0xff] }
 0x550   : > { %7151 = vrcp.f32 %v2805_v22  ;;  %v2862_v47 = vsub.f32 2.0, %v2846_v55 }
 0x551   : > { %4152 = vmax.xlane.f32.xlu0 %v10801_v0  ;;  %v2877_v14 = vmul.f32 %v7148_v23, %v2861_v60  ;;  %7153 = vpow2.f32 %v3734_v16  ;;  %v13095_v23 = vld [vmem:[#allocation118_spill] sm:$0xff]  ;;  %v10824_v16 = vpop.f32.mrf.mxu1 }
 0x552   : > { %7155 = vpow2.f32 %v3232_v5  ;;  %v3215_v46 = vsub.f32 %v13095_v23, %v10660_v8  ;;  %v2878_v55 = vmul.f32 %v7150_v40, %v2862_v47 }
 0x553   : > { %4644 = vmax.xlane.f32.xlu2 %v10812_v59  ;;  %4146 = vmax.xlane.f32.xlu1 %v10817_v26  ;;  %7157 = vpow2.f32 %v3730_v18  ;;  %v2893_v45 = vmul.f32 %v13096_v11, %v2877_v14 }
 0x554   : > { %v3234_v44 = vmul.f32 1.442695, %v3215_v46 }
 0x555   : > { %v2807_v41 = vpop.xlane.xlu1 %2806 }
 0x556   : > { %v7152_v13 = vpop.eup %7151  ;;  %6774 = vmatmul.msk.f32.gmra.mxu1 %vm13068_vm6, %v13097_v61  ;;  %7159 = vrcp.f32 %v2807_v41  ;;  %v10839_v4 = vpop.f32.mrf.mxu3 }
 0x557   : > { %2931 = vmatmul.f32.gmra.mxu0 %v2893_v45  ;;  %v10828_v5 = vpop.xlane.xlu0 %3192  ;;  %v10830_v60 = vpop.eup %7153  ;;  %v2847_v18 = vmul.f32 %v7152_v13, %v2805_v22  ;;  %7161 = vpow2.f32 %v3238_v32  ;;  %v13099_v45 = vld [vmem:[#allocation115_spill] sm:$0xff] }
 0x558   : > { %13098 = vst [vmem:[#allocation24_spill] sm:$0xff] %v10830_v60  ;;  %v10832_v8 = vpop.eup %7155  ;;  %7163 = vpow2.f32 %v3234_v44  ;;  %v2809_v23 = vpop.xlane.xlu2 %2808  ;;  %v2894_v61 = vmul.f32 %v13099_v45, %v2878_v55  ;;  %v13101_v44 = vld [vmem:[#allocation120_spill] sm:$0xff]  ;;  %v3216_v55 = vsub.f32 %v10499_v2, %v10758_v36 }
 0x559   : > { %3766 = vadd.xlane.f32.xlu0 %v10830_v60  ;;  %v10835_v14 = vpop.eup %7157  ;;  %v2863_v11 = vsub.f32 2.0, %v2847_v18  ;;  %7165 = vrcp.f32 %v2809_v23  ;;  %v3219_v60 = vsub.f32 %v13101_v44, %v3195_v25  ;;  %v10853_v18 = vsel %vm9923_vm3, %v10731_v3, -inf }
 0x55a   : > { %v3236_v3 = vmul.f32 1.442695, %v3216_v55 }
 0x55b   : > { %3264 = vadd.xlane.f32.xlu2 %v10832_v8  ;;  %3762 = vadd.xlane.f32.xlu1 %v10835_v14  ;;  %v2879_v32 = vmul.f32 %v7152_v13, %v2863_v11 }
 0x55c   : > { %v7160_v22 = vpop.eup %7159 }
 0x55d   : > { %v10841_v46 = vpop.xlane.xlu1 %3690  ;;  %v10844_v40 = vpop.eup %7161  ;;  %v2848_v47 = vmul.f32 %v7160_v22, %v2807_v41  ;;  %v3713_v41 = vsub.f32 %v10509_v10, %v10793_v56  ;;  %v2895_v45 = vmul.f32 %v10512_v20, %v2879_v32 }
 0x55e   : > { %13100 = vst [vmem:[#allocation25_spill] sm:$0xff] %v10844_v40  ;;  %v10847_v21 = vpop.eup %7163  ;;  %v10862_v44 = vpop.f32.mrf.mxu3 }
 0x55f   : > { %2934 = vmatmul.f32.gmra.mxu0 %v2894_v61  ;;  %v2811_v0 = vpop.xlane.xlu0 %2810  ;;  %v2864_v13 = vsub.f32 2.0, %v2848_v47  ;;  %v7166_v25 = vpop.eup %7165  ;;  %v3242_v61 = vmul.f32 1.442695, %v3219_v60  ;;  %v3732_v2 = vmul.f32 1.442695, %v3713_v41  ;;  %v10876_v60 = vsel %vm9947_vm4, %v10693_v50, -inf }
 0x560   : > { %7167 = vrcp.f32 %v2811_v0  ;;  %v2849_v10 = vmul.f32 %v7166_v25, %v2809_v23  ;;  %v10881_v47 = vsel %vm9947_vm4, %v10760_v63, -inf }
 0x561   : > { %3270 = vadd.xlane.f32.xlu0 %v10844_v40  ;;  %v2880_v56 = vmul.f32 %v7160_v22, %v2864_v13  ;;  %7169 = vpow2.f32 %v3242_v61  ;;  %v4104_v61 = vpop.f32.mrf.mxu1 }
 0x562   : > { %7171 = vpow2.f32 %v3236_v3  ;;  %v2865_v27 = vsub.f32 2.0, %v2849_v10  ;;  %v3716_v10 = vsub.f32 %v10543_v35, %v10841_v46  ;;  %v10915_v35 = vsel %vm10116_vm9, %v10789_v49, -inf }
 0x563   : > { %4646 = vmax.xlane.f32.xlu2 %v10853_v18  ;;  %3266 = vadd.xlane.f32.xlu1 %v10847_v21  ;;  %7173 = vpow2.f32 %v3732_v2  ;;  %v2815_v2 = vpop.xlane.xlu2 %2814  ;;  %v10920_v46 = vsel %vm10026_vm5, %v10805_v58, -inf }
 0x564   : > { %13108 = vst [vmem:[#allocation29_spill] sm:$0xff] %v10920_v46 }
 0x565   : > { %v3693_v11 = vpop.xlane.xlu1 %3692 }
 0x566   : > { %v3717_v20 = vsub.f32 %v10563_v29, %v3693_v11  ;;  %v2896_v29 = vmul.f32 %v10521_v34, %v2880_v56  ;;  %v7168_v22 = vpop.eup %7167  ;;  %v10894_v41 = vpop.f32.mrf.mxu3  ;;  %v2881_v11 = vmul.f32 %v7166_v25, %v2865_v27  ;;  %v13105_v34 = vld [vmem:[#allocation122_spill] sm:$0xff] }
 0x567   : > { %2937 = vmatmul.f32.gmra.mxu0 %v2895_v45  ;;  %v10864_v40 = vpop.xlane.xlu0 %3694  ;;  %v10890_v55 = vpop.eup %7169  ;;  %v2850_v13 = vmul.f32 %v7168_v22, %v2811_v0  ;;  %v3715_v3 = vsub.f32 %v13105_v34, %v10769_v17 }
 0x568   : > { %v3740_v32 = vmul.f32 1.442695, %v3717_v20  ;;  %13104 = vst [vmem:[#allocation27_spill] sm:$0xff] %v10890_v55  ;;  %v10892_v63 = vpop.eup %7171  ;;  %v13106_v20 = vld [vmem:[#allocation127_spill] sm:$0xff] }
 0x569   : > { %4154 = vmax.xlane.f32.xlu0 %v10869_v30  ;;  %v10897_v45 = vpop.eup %7173  ;;  %v2866_v56 = vsub.f32 2.0, %v2850_v13  ;;  %v3736_v25 = vmul.f32 1.442695, %v3715_v3  ;;  %v3738_v30 = vmul.f32 1.442695, %v3716_v10  ;;  %v10931_v10 = vsel %vm10083_vm8, %v4104_v61, -inf }
 0x56a   : > { %7175 = vpow2.f32 %v3740_v32  ;;  %13109 = vst [vmem:[#allocation30_spill] sm:$0xff] %v10931_v10 }
 0x56b   : > { %4150 = vmax.xlane.f32.xlu2 %v10876_v60  ;;  %4648 = vmax.xlane.f32.xlu1 %v10881_v47  ;;  %v2882_v17 = vmul.f32 %v7168_v22, %v2866_v56  ;;  %7177 = vpow2.f32 %v3736_v25  ;;  %v10926_v22 = vpop.f32.mrf.mxu1  ;;  %v3699_v49 = vpop.xlane.xlu2 %3698 }
 0x56c   : > { %7179 = vpow2.f32 %v3738_v30 }
 0x56d   : > { %v10885_v23 = vpop.xlane.xlu1 %3196  ;;  %7181 = vrcp.f32 %v2815_v2 }
 0x56e   : > { %v10922_v13 = vpop.f32.mrf.mxu3 }
 0x56f   : > { %2940 = vmatmul.f32.gmra.mxu0 %v2896_v29  ;;  %v10888_v50 = vpop.xlane.xlu0 %3200  ;;  %v2897_v29 = vmul.f32 %v13106_v20, %v2881_v11  ;;  %v2898_v11 = vmul.f32 %v10546_v42, %v2882_v17 }
 0x570   : > { %v10908_v32 = vpop.eup %7175 }
 0x571   : > { %3274 = vadd.xlane.f32.xlu0 %v10890_v55  ;;  %13107 = vst [vmem:[#allocation28_spill] sm:$0xff] %v10908_v32  ;;  %v10933_v56 = vpop.eup %7177 }
 0x572   : > { %13110 = vst [vmem:[#allocation57_spill] sm:$0xff] %v10933_v56  ;;  %v10936_v30 = vpop.eup %7179 }
 0x573   : > { %3764 = vadd.xlane.f32.xlu2 %v10897_v45  ;;  %3268 = vadd.xlane.f32.xlu1 %v10892_v63  ;;  %13111 = vst [vmem:[#allocation31_spill] sm:$0xff] %v10936_v30  ;;  %v7182_v42 = vpop.eup %7181  ;;  %v10947_v38 = vpop.xlane.xlu2 %3204 }
 0x575   : > { %v3199_v0 = vpop.xlane.xlu1 %3198 }
 0x576   : > { %v3221_v34 = vsub.f32 %v10604_v7, %v3199_v0  ;;  %v3218_v0 = vsub.f32 %v10527_v57, %v10828_v5  ;;  %v13113_v57 = vld [vmem:[#allocation89_spill] sm:$0xff] }
 0x577   : > { %2943 = vmatmul.f32.gmra.mxu0 %v2897_v29  ;;  %v10906_v27 = vpop.xlane.xlu0 %3202  ;;  %v10942_v29 = vpop.f32.mrf.mxu3  ;;  %vm13114_vm11 = vnez %v13113_v57  ;;  %v13124_v57 = vld [vmem:[#allocation113_spill] sm:$0xff] }
 0x578   : > { %v3246_v3 = vmul.f32 1.442695, %v3221_v34  ;;  %v4110_v34 = vpop.f32.mrf.mxu1  ;;  %v10955_v5 = vsel %vm13114_vm11, %v10824_v16, -inf  ;;  %vm13125_vm6 = vnez %v13124_v57 }
 0x579   : > { %3772 = vadd.xlane.f32.xlu0 %v10908_v32  ;;  %13115 = vst [vmem:[#allocation32_spill] sm:$0xff] %v10955_v5 }
 0x57b   : > { %4156 = vmax.xlane.f32.xlu2 %v10915_v35  ;;  %4650 = vmax.xlane.f32.xlu1 %v10920_v46  ;;  %v3240_v46 = vmul.f32 1.442695, %v3218_v0  ;;  %v13117_v0 = vld [vmem:[#allocation15_spill] sm:$0xff] }
 0x57d   : > { %v2813_v7 = vpop.xlane.xlu1 %2812 }
 0x57e   : > { %7183 = vrcp.f32 %v2813_v7 }
 0x57f   : > { %2946 = vmatmul.f32.gmra.mxu0 %v2898_v11  ;;  %v2817_v58 = vpop.xlane.xlu0 %2816  ;;  %7185 = vpow2.f32 %v3246_v3  ;;  %v2852_v3 = vmul.f32 %v7182_v42, %v2815_v2 }
 0x580   : > { %7187 = vrcp.f32 %v2817_v58 }
 0x581   : > { %4160 = vmax.xlane.f32.xlu0 %v10931_v10 }
 0x583   : > { %3770 = vadd.xlane.f32.xlu2 %v10936_v30  ;;  %3768 = vadd.xlane.f32.xlu1 %v10933_v56  ;;  %v10969_v30 = vpop.f32.mrf.mxu1 }
 0x584   : > { %v7184_v20 = vpop.eup %7183 }
 0x585   : > { %v3697_v61 = vpop.xlane.xlu1 %3696  ;;  %v2851_v25 = vmul.f32 %v7184_v20, %v2813_v7  ;;  %v10945_v11 = vpop.eup %7185  ;;  %v2868_v7 = vsub.f32 2.0, %v2852_v3 }
 0x586   : > { %v3719_v17 = vsub.f32 %v10633_v9, %v3697_v61  ;;  %13112 = vst [vmem:[#allocation47_spill] sm:$0xff] %v10945_v11  ;;  %v10960_v9 = vsel %vm10064_vm7, %v10839_v4, -inf  ;;  %v2821_v3 = vpop.xlane.xlu2 %2820 }
 0x587   : > { %v2867_v55 = vsub.f32 2.0, %v2851_v25  ;;  %v10949_v32 = vpop.xlane.xlu0 %3700  ;;  %13116 = vst [vmem:[#allocation53_spill] sm:$0xff] %v10960_v9  ;;  %v2884_v4 = vmul.f32 %v7182_v42, %v2868_v7 }
 0x588   : > { %v3744_v10 = vmul.f32 1.442695, %v3719_v17  ;;  %v10965_v17 = vpop.f32.mrf.mxu3 }
 0x589   : > { %3278 = vadd.xlane.f32.xlu0 %v10945_v11  ;;  %v2883_v2 = vmul.f32 %v7184_v20, %v2867_v55  ;;  %v13120_v20 = vld [vmem:[#allocation134_spill] sm:$0xff] }
 0x58a   : > { %7189 = vpow2.f32 %v3744_v10  ;;  %v7188_v10 = vpop.eup %7187 }
 0x58b   : > { %4158 = vmax.xlane.f32.xlu2 %v10955_v5  ;;  %4652 = vmax.xlane.f32.xlu1 %v10960_v9  ;;  %7191 = vpow2.f32 %v3240_v46  ;;  %v2899_v61 = vmul.f32 %v13117_v0, %v2883_v2  ;;  %v2853_v11 = vmul.f32 %v7188_v10, %v2817_v58  ;;  %v3720_v46 = vsub.f32 %v13120_v20, %v3699_v49  ;;  %v13122_v58 = vld [vmem:[#allocation138_spill] sm:$0xff] }
 0x58c   : > { %v10980_v0 = vsel %vm13114_vm11, %v10894_v41, -inf  ;;  %v3220_v42 = vsub.f32 %v13122_v58, %v10885_v23  ;;  %v10989_v41 = vsel %vm13125_vm6, %v4110_v34, -inf  ;;  %v13127_v23 = vld [vmem:[#allocation21_spill] sm:$0xff]  ;;  %v10996_v58 = vsel %vm10259_vm13, %v10926_v22, -inf  ;;  %v13131_v34 = vld [vmem:[#allocation132_spill] sm:$0xff] }
 0x58d   : > { %v2819_v25 = vpop.xlane.xlu1 %2818  ;;  %2949 = vmatmul.f32.gmra.mxu0 %v2899_v61  ;;  %13121 = vst [vmem:[#allocation34_spill] sm:$0xff] %v10980_v0  ;;  %v2869_v7 = vsub.f32 2.0, %v2853_v11  ;;  %v13123_v61 = vld [vmem:[#allocation133_spill] sm:$0xff]  ;;  %v3746_v20 = vmul.f32 1.442695, %v3720_v46  ;;  %v13132_v46 = vld [vmem:[#allocation139_spill] sm:$0xff] }
 0x58e   : > { %7193 = vrcp.f32 %v2819_v25  ;;  %v3244_v56 = vmul.f32 1.442695, %v3220_v42  ;;  %13126 = vst [vmem:[#allocation61_spill] sm:$0xff] %v10989_v41  ;;  %v3718_v42 = vsub.f32 %v13132_v46, %v10864_v40  ;;  %v11011_v22 = vpop.xlane.xlu2 %3704 }
 0x58f   : > { %v10975_v2 = vpop.xlane.xlu0 %3706  ;;  %7195 = vrcp.f32 %v2821_v3  ;;  %13129 = vst [vmem:[#allocation35_spill] sm:$0xff] %v10996_v58 }
 0x590   : > { %v10967_v16 = vpop.eup %7189  ;;  %v4611_v36 = vpop.f32.mrf.mxu3  ;;  %7197 = vpow2.f32 %v3746_v20 }
 0x591   : > { %13118 = vst [vmem:[#allocation33_spill] sm:$0xff] %v10967_v16  ;;  %3776 = vadd.xlane.f32.xlu0 %v10967_v16  ;;  %v10972_v55 = vpop.eup %7191  ;;  %v2900_v16 = vmul.f32 %v13123_v61, %v2884_v4  ;;  %7199 = vpow2.f32 %v3244_v56 }
 0x592   : > { %13119 = vst [vmem:[#allocation59_spill] sm:$0xff] %v10972_v55 }
 0x593   : > { %4656 = vmax.xlane.f32.xlu2 %v10980_v0  ;;  %3272 = vadd.xlane.f32.xlu1 %v10972_v55  ;;  %v2885_v0 = vmul.f32 %v7188_v10, %v2869_v7  ;;  %v3224_v10 = vsub.f32 %v13131_v34, %v10947_v38 }
 0x594   : > { %v7194_v9 = vpop.eup %7193 }
 0x595   : > { %v3703_v49 = vpop.xlane.xlu1 %3702  ;;  %2952 = vmatmul.f32.gmra.mxu0 %v2900_v16  ;;  %v2854_v5 = vmul.f32 %v7194_v9, %v2819_v25  ;;  %v11001_v25 = vsel %vm10116_vm9, %v10862_v44, -inf  ;;  %v11003_v16 = vpop.f32.mrf.mxu1  ;;  %v13133_v44 = vld [vmem:[#allocation16_spill] sm:$0xff]  ;;  %v3252_v38 = vmul.f32 1.442695, %v3224_v10 }
 0x596   : > { %v3722_v11 = vsub.f32 %v13127_v23, %v3703_v49  ;;  %13130 = vst [vmem:[#allocation62_spill] sm:$0xff] %v11001_v25  ;;  %v2901_v49 = vmul.f32 %v13133_v44, %v2885_v0  ;;  %v7196_v20 = vpop.eup %7195 }
 0x597   : > { %v2870_v7 = vsub.f32 2.0, %v2854_v5  ;;  %v11013_v61 = vpop.xlane.xlu0 %3210  ;;  %v11018_v34 = vpop.eup %7197  ;;  %v2855_v55 = vmul.f32 %v7196_v20, %v2821_v3  ;;  %v11025_v5 = vsel %vm10135_vm10, %v4611_v36, -inf  ;;  %v13138_v3 = vld [vmem:[#allocation19_spill] sm:$0xff] }
 0x598   : > { %13134 = vst [vmem:[#allocation36_spill] sm:$0xff] %v11018_v34  ;;  %v11021_v40 = vpop.eup %7199  ;;  %v4614_v0 = vpop.f32.mrf.mxu3 }
 0x599   : > { %4164 = vmax.xlane.f32.xlu0 %v10989_v41  ;;  %v3750_v41 = vmul.f32 1.442695, %v3722_v11  ;;  %13135 = vst [vmem:[#allocation65_spill] sm:$0xff] %v11021_v40  ;;  %v2871_v11 = vsub.f32 2.0, %v2855_v55 }
 0x59a   : > { %13137 = vst [vmem:[#allocation37_spill] sm:$0xff] %v11025_v5 }
 0x59b   : > { %4162 = vmax.xlane.f32.xlu2 %v10996_v58  ;;  %4654 = vmax.xlane.f32.xlu1 %v11001_v25  ;;  %v3742_v58 = vmul.f32 1.442695, %v3718_v42  ;;  %v2886_v25 = vmul.f32 %v7194_v9, %v2870_v7  ;;  %7201 = vpow2.f32 %v3750_v41  ;;  %v3209_v7 = vpop.xlane.xlu2 %3208  ;;  %v2887_v36 = vmul.f32 %v7196_v20, %v2871_v11 }
 0x59c   : > { %7203 = vpow2.f32 %v3252_v38 }
 0x59d   : > { %v11016_v23 = vpop.xlane.xlu1 %3206  ;;  %2955 = vmatmul.f32.gmra.mxu0 %v2901_v49  ;;  %7205 = vpow2.f32 %v3742_v58  ;;  %v2902_v9 = vmul.f32 %v13138_v3, %v2886_v25  ;;  %v11030_v46 = vpop.f32.mrf.mxu1  ;;  %v13142_v58 = vld [vmem:[#allocation148_spill] sm:$0xff] }
 0x59e   : > { %v3226_v55 = vsub.f32 %v13142_v58, %v3209_v7  ;;  %v13143_v3 = vld [vmem:[#allocation140_spill] sm:$0xff]  ;;  %v11047_v7 = vsel %vm10289_vm15, %v4614_v0, -inf }
 0x59f   : > { %13145 = vst [vmem:[#allocation39_spill] sm:$0xff] %v11047_v7  ;;  %v13150_v0 = vld [vmem:[#allocation144_spill] sm:$0xff] }
 0x5a0   : > { %v3256_v20 = vmul.f32 1.442695, %v3226_v55  ;;  %v3222_v55 = vsub.f32 %v13150_v0, %v10888_v50 }
 0x5a1   : > { %3778 = vadd.xlane.f32.xlu0 %v11018_v34  ;;  %v11032_v41 = vpop.eup %7201 }
 0x5a2   : > { %13139 = vst [vmem:[#allocation67_spill] sm:$0xff] %v11032_v41  ;;  %v11034_v44 = vpop.eup %7203 }
 0x5a3   : > { %4664 = vmax.xlane.f32.xlu2 %v11025_v5  ;;  %3276 = vadd.xlane.f32.xlu1 %v11021_v40  ;;  %13140 = vst [vmem:[#allocation38_spill] sm:$0xff] %v11034_v44  ;;  %v11037_v49 = vpop.eup %7205  ;;  %v2903_v5 = vmul.f32 %v13143_v3, %v2887_v36  ;;  %v13146_v36 = vld [vmem:[#allocation20_spill] sm:$0xff] }
 0x5a4   : > { %v3759_v10 = vpop.xlane.xlu0 %3758  ;;  %13141 = vst [vmem:[#allocation55_spill] sm:$0xff] %v11037_v49  ;;  %v3724_v3 = vsub.f32 %v13146_v36, %v10975_v2 }
 0x5a5   : > { %v2823_v42 = vpop.xlane.xlu1 %2822  ;;  %2958 = vmatmul.f32.gmra.mxu0 %v2902_v9  ;;  %v11043_v9 = vpop.f32.mrf.mxu3 }
 0x5a6   : > { %7207 = vrcp.f32 %v2823_v42 }
 0x5a7   : > { %7209 = vrcp.f32 %v3759_v10 }
 0x5a9   : > { %3782 = vadd.xlane.f32.xlu0 %v11032_v41  ;;  %v4122_v41 = vpop.f32.mrf.mxu1 }
 0x5ab   : > { %3284 = vadd.xlane.f32.xlu2 %v11034_v44  ;;  %3774 = vadd.xlane.f32.xlu1 %v11037_v49 }
 0x5ac   : > { %v7208_v25 = vpop.eup %7207  ;;  %v3263_v38 = vpop.xlane.xlu0 %3262 }
 0x5ad   : > { %v2856_v34 = vmul.f32 %v7208_v25, %v2823_v42  ;;  %2961 = vmatmul.f32.gmra.mxu0 %v2903_v5  ;;  %v11054_v42 = vsel %vm13061_vm0, %v4122_v41, -inf  ;;  %v3754_v41 = vmul.f32 1.442695, %v3724_v3 }
 0x5ae   : > { %v2825_v11 = vpop.xlane.xlu2 %2824  ;;  %13148 = vst [vmem:[#allocation69_spill] sm:$0xff] %v11054_v42 }
 0x5af   : > { %v2872_v40 = vsub.f32 2.0, %v2856_v34  ;;  %7211 = vrcp.f32 %v2825_v11  ;;  %v11059_v34 = vsel %vm10083_vm8, %v10922_v13, -inf }
 0x5b0   : > { %7213 = vpow2.f32 %v3256_v20  ;;  %13149 = vst [vmem:[#allocation40_spill] sm:$0xff] %v11059_v34 }
 0x5b1   : > { %4666 = vmax.xlane.f32.xlu0 %v11047_v7  ;;  %v2888_v58 = vmul.f32 %v7208_v25, %v2872_v40  ;;  %v7210_v40 = vpop.eup %7209  ;;  %7215 = vrcp.f32 %v3263_v38  ;;  %v4620_v7 = vpop.f32.mrf.mxu3 }
 0x5b2   : > { %v3806_v49 = vmul.f32 %v7210_v40, %v3759_v10  ;;  %v11071_v50 = vsel %vm13061_vm0, %v4620_v7, -inf  ;;  %v4125_v4 = vpop.f32.mrf.mxu1 }
 0x5b3   : > { %4172 = vmax.xlane.f32.xlu2 %v11054_v42  ;;  %4658 = vmax.xlane.f32.xlu1 %v11059_v34  ;;  %v2904_v5 = vmul.f32 %v10702_v53, %v2888_v58  ;;  %v3248_v34 = vmul.f32 1.442695, %v3222_v55  ;;  %13152 = vst [vmem:[#allocation41_spill] sm:$0xff] %v11071_v50 }
 0x5b4   : > { %v3761_v2 = vpop.xlane.xlu0 %3760  ;;  %v3822_v10 = vsub.f32 2.0, %v3806_v49 }
 0x5b5   : > { %v7212_v25 = vpop.eup %7211  ;;  %7217 = vrcp.f32 %v3761_v2  ;;  %2964 = vmatmul.f32.gmra.mxu0 %v2904_v5  ;;  %v13215_v57 = vld [vmem:[#allocation69_spill] sm:$0xff] }
 0x5b6   : > { %v2857_v20 = vmul.f32 %v7212_v25, %v2825_v11  ;;  %v3709_v36 = vpop.xlane.xlu2 %3708  ;;  %v3261_v13 = vpop.xlane.xlu1 %3260  ;;  %v11076_v11 = vsel %vm10259_vm13, %v10942_v29, -inf  ;;  %v3838_v29 = vmul.f32 %v7210_v40, %v3822_v10 }
 0x5b7   : > { %7219 = vrcp.f32 %v3261_v13  ;;  %v11066_v42 = vpop.eup %7213  ;;  %13153 = vst [vmem:[#allocation71_spill] sm:$0xff] %v11076_v11 }
 0x5b8   : > { %13151 = vst [vmem:[#allocation86_spill] sm:$0xff] %v11066_v42  ;;  %v2873_v53 = vsub.f32 2.0, %v2857_v20  ;;  %7221 = vpow2.f32 %v3754_v41  ;;  %v7216_v3 = vpop.eup %7215 }
 0x5b9   : > { %3288 = vadd.xlane.f32.xlu0 %v11066_v42  ;;  %7223 = vpow2.f32 %v3248_v34 }
 0x5ba   : > { %v2889_v58 = vmul.f32 %v7212_v25, %v2873_v53  ;;  %v3309_v53 = vmul.f32 %v7216_v3, %v3263_v38 }
 0x5bb   : > { %4670 = vmax.xlane.f32.xlu2 %v11071_v50  ;;  %4660 = vmax.xlane.f32.xlu1 %v11076_v11  ;;  %v7218_v5 = vpop.eup %7217 }
 0x5bc   : > { %v11080_v0 = vpop.xlane.xlu0 %4148  ;;  %v2905_v55 = vmul.f32 %v10726_v24, %v2889_v58  ;;  %v3807_v50 = vmul.f32 %v7218_v5, %v3761_v2  ;;  %v3725_v24 = vsub.f32 %v10750_v39, %v3709_v36  ;;  %v3854_v58 = vmul.f32 %v10698_v52, %v3838_v29  ;;  %v13155_v2 = vld [vmem:[#allocation18_spill] sm:$0xff] }
 0x5bd   : > { %v7220_v7 = vpop.eup %7219  ;;  %v3325_v40 = vsub.f32 2.0, %v3309_v53  ;;  %v6984_v10 = vunpack.i.l.bf16 %v13155_v2  ;;  %v6985_v52 = vunpack.i.h.bf16 %v13155_v2 }
 0x5be   : > { %v3308_v41 = vmul.f32 %v7220_v7, %v3261_v13  ;;  %v11083_v20 = vpop.xlane.xlu2 %4144  ;;  %v4643_v42 = vpop.xlane.xlu1 %4642  ;;  %2967 = vmatmul.f32.gmra.mxu0 %v2905_v55  ;;  %v13156_v55 = vld [vmem:[#allocation142_spill] sm:$0xff] }
 0x5bf   : > { %v4674_v25 = vsub.f32 %v10783_v31, %v4643_v42  ;;  %v11086_v49 = vpop.eup %7221  ;;  %v3823_v31 = vsub.f32 2.0, %v3807_v50  ;;  %v11106_v50 = vsel %vm10415_vm14, %v4125_v4, -inf }
 0x5c0   : > { %13154 = vst [vmem:[#allocation42_spill] sm:$0xff] %v11086_v49  ;;  %v3324_v44 = vsub.f32 2.0, %v3308_v41  ;;  %v11089_v11 = vpop.eup %7223  ;;  %v3223_v41 = vsub.f32 %v13156_v55, %v10906_v27 }
 0x5c1   : > { %v4690_v34 = vmul.f32 1.442695, %v4674_v25  ;;  %3786 = vadd.xlane.f32.xlu0 %v11086_v49  ;;  %v3756_v25 = vmul.f32 1.442695, %v3725_v24  ;;  %v3839_v36 = vmul.f32 %v7218_v5, %v3823_v31  ;;  %v11113_v24 = vpop.f32.mrf.mxu1 }
 0x5c2   : > { %v3340_v13 = vmul.f32 %v7220_v7, %v3324_v44  ;;  %v6979_v7 = vunpack.i.l.bf16 %v10679_v51  ;;  %v3250_v27 = vmul.f32 1.442695, %v3223_v41  ;;  %v4178_v41 = vsub.f32 %v10767_v6, %v11080_v0 }
 0x5c3   : > { %3280 = vadd.xlane.f32.xlu1 %v11089_v11  ;;  %7225 = vpow2.f32 %v4690_v34  ;;  %v6980_v34 = vunpack.i.h.bf16 %v10679_v51  ;;  %v3855_v5 = vmul.f32 %v10738_v37, %v3839_v36  ;;  %v13157_v51 = vld [vmem:[#allocation146_spill] sm:$0xff]  ;;  %v4176_v37 = vsub.f32 %v10778_v43, %v11083_v20  ;;  %v13160_v43 = vld [vmem:[#allocation17_spill] sm:$0xff] }
 0x5c4   : > { %v3356_v42 = vmul.f32 %v10742_v62, %v3340_v13  ;;  %v11095_v38 = vpop.xlane.xlu0 %4152  ;;  %v3341_v62 = vmul.f32 %v7216_v3, %v3325_v40  ;;  %7227 = vpow2.f32 %v3756_v25  ;;  %v6974_v13 = vunpack.i.l.bf16 %v13157_v51 }
 0x5c5   : > { %v3721_v20 = vsub.f32 %v13160_v43, %v10949_v32 }
 0x5c6   : > { %v11100_v49 = vpop.xlane.xlu2 %4644  ;;  %3452 = vmatmul.f32.vlgmr.msrb.gmra.mxu2 %v3356_v42  ;;  %v4147_v39 = vpop.xlane.xlu1 %4146  ;;  %3886 = vmatmul.f32.vlgmr.msra.gmra.mxu0 %v3854_v58  ;;  %v3357_v3 = vmul.f32 %v10719_v1, %v3341_v62  ;;  %v13158_v42 = vld [vmem:[#allocation126_spill] sm:$0xff] }
 0x5c7   : > { %5364 = vmatpush.msrb.mxu2 %v6984_v10  ;;  %v4177_v44 = vsub.f32 %v10817_v26, %v4147_v39  ;;  %v11119_v26 = vsel %vm13125_vm6, %v10965_v17, -inf  ;;  %v6975_v17 = vunpack.i.h.bf16 %v13157_v51  ;;  %v6969_v2 = vunpack.i.l.bf16 %v13158_v42  ;;  %v4623_v62 = vpop.f32.mrf.mxu3 }
 0x5c8   : > { %v6970_v55 = vunpack.i.h.bf16 %v13158_v42  ;;  %v3748_v32 = vmul.f32 1.442695, %v3721_v20 }
 0x5c9   : > { %v4194_v29 = vmul.f32 1.442695, %v4177_v44  ;;  %5365 = vmatpush.msrb.mxu2 %v6985_v52  ;;  %4174 = vmax.xlane.f32.xlu0 %v11106_v50  ;;  %v11110_v53 = vpop.eup %7225  ;;  %v13159_v52 = vld [vmem:[#allocation141_spill] sm:$0xff]  ;;  %v5047_v36 = vpop.f32.mrf.mxu1 }
 0x5ca   : > { %4722 = vadd.xlane.f32.xlu2 %v11110_v53  ;;  %v11128_v31 = vpop.eup %7227  ;;  %v6964_v44 = vunpack.i.l.bf16 %v13159_v52  ;;  %v6965_v6 = vunpack.i.h.bf16 %v13159_v52 }
 0x5cb   : > { %5366 = vmatpush.msrb.mxu2 %v6979_v7  ;;  %7229 = vpow2.f32 %v4194_v29  ;;  %4662 = vmax.xlane.f32.xlu1 %v11119_v26 }
 0x5cc   : > { %v11122_v4 = vpop.xlane.xlu0 %3766  ;;  %7231 = vpow2.f32 %v3250_v27  ;;  %v4192_v27 = vmul.f32 1.442695, %v4176_v37  ;;  %v11159_v37 = vsel %vm9893_vm2, %v5047_v36, -inf }
 0x5cd   : > { %5367 = vmatpush.msrb.mxu2 %v6980_v34 }
 0x5ce   : > { %v3265_v58 = vpop.xlane.xlu2 %3264  ;;  %v3763_v40 = vpop.xlane.xlu1 %3762  ;;  %3455 = vmatmul.f32.gmra.mxu2 %v3357_v3  ;;  %3889 = vmatmul.f32.gmra.mxu0 %v3855_v5  ;;  %v4196_v5 = vmul.f32 1.442695, %v4178_v41  ;;  %v11166_v41 = vsel %vm10135_vm10, %v10969_v30, -inf }
 0x5cf   : > { %7233 = vrcp.f32 %v3265_v58  ;;  %5368 = vmatpush.msrb.mxu2 %v6974_v13  ;;  %v11151_v13 = vsel %vm10415_vm14, %v4623_v62, -inf }
 0x5d0   : > { %7235 = vrcp.f32 %v3763_v40  ;;  %13161 = vst [vmem:[#allocation73_spill] sm:$0xff] %v11151_v13 }
 0x5d1   : > { %5369 = vmatpush.msrb.mxu2 %v6975_v17  ;;  %3788 = vadd.xlane.f32.xlu0 %v11128_v31  ;;  %v11132_v1 = vpop.eup %7229  ;;  %v13162_v17 = vld [vmem:[#allocation128_spill] sm:$0xff] }
 0x5d2   : > { %v11136_v10 = vpop.eup %7231  ;;  %4226 = vadd.xlane.f32.xlu2 %v11132_v1  ;;  %v6959_v42 = vunpack.i.l.bf16 %v13162_v17 }
 0x5d3   : > { %5370 = vmatpush.msrb.mxu2 %v6969_v2  ;;  %3282 = vadd.xlane.f32.xlu1 %v11136_v10 }
 0x5d4   : > { %v11143_v25 = vpop.xlane.xlu0 %3270 }
 0x5d5   : > { %v7234_v39 = vpop.eup %7233  ;;  %5371 = vmatpush.msrb.mxu2 %v6970_v55  ;;  %v6960_v55 = vunpack.i.h.bf16 %v13162_v17 }
 0x5d6   : > { %v7236_v7 = vpop.eup %7235  ;;  %v3310_v29 = vmul.f32 %v7234_v39, %v3265_v58  ;;  %v4647_v34 = vpop.xlane.xlu2 %4646  ;;  %v4675_v58 = vsub.f32 %v10812_v59, %v11100_v49 }
 0x5d7   : > { %v3267_v3 = vpop.xlane.xlu1 %3266  ;;  %v3808_v0 = vmul.f32 %v7236_v7, %v3763_v40  ;;  %5372 = vmatpush.msrb.mxu2 %v6964_v44  ;;  %v4676_v44 = vsub.f32 %v10853_v18, %v4647_v34 }
 0x5d8   : > { %7237 = vrcp.f32 %v3267_v3  ;;  %v3326_v51 = vsub.f32 2.0, %v3310_v29  ;;  %v4692_v43 = vmul.f32 1.442695, %v4675_v58 }
 0x5d9   : > { %v3824_v2 = vsub.f32 2.0, %v3808_v0  ;;  %5373 = vmatpush.msrb.mxu2 %v6965_v6  ;;  %4672 = vmax.xlane.f32.xlu0 %v11151_v13  ;;  %7239 = vpow2.f32 %v4192_v27  ;;  %v5050_v27 = vpop.f32.mrf.mxu1  ;;  %v13164_v6 = vld [vmem:[#allocation117_spill] sm:$0xff] }
 0x5da   : > { %v3342_v40 = vmul.f32 %v7234_v39, %v3326_v51  ;;  %5110 = vmax.xlane.f32.xlu2 %v11159_v37  ;;  %7241 = vpow2.f32 %v4196_v5  ;;  %v13163_v39 = vld [vmem:[#allocation131_spill] sm:$0xff]  ;;  %v6949_v0 = vunpack.i.l.bf16 %v13164_v6  ;;  %v6950_v51 = vunpack.i.h.bf16 %v13164_v6 }
 0x5db   : > { %5374 = vmatpush.msrb.mxu2 %v6959_v42  ;;  %v3840_v52 = vmul.f32 %v7236_v7, %v3824_v2  ;;  %4166 = vmax.xlane.f32.xlu1 %v11166_v41  ;;  %v6954_v62 = vunpack.i.l.bf16 %v13163_v39  ;;  %7243 = vpow2.f32 %v3748_v32  ;;  %v6955_v18 = vunpack.i.h.bf16 %v13163_v39 }
 0x5dc   : > { %v11170_v59 = vpop.xlane.xlu0 %4154  ;;  %v3358_v15 = vmul.f32 %v10832_v8, %v3342_v40  ;;  %v4694_v8 = vmul.f32 1.442695, %v4676_v44  ;;  %7245 = vpow2.f32 %v4692_v43  ;;  %v3225_v2 = vsub.f32 %v10684_v48, %v11016_v23 }
 0x5dd   : > { %5375 = vmatpush.msrb.mxu2 %v6960_v55  ;;  %v3856_v36 = vmul.f32 %v10835_v14, %v3840_v52 }
 0x5de   : > { %v7238_v49 = vpop.eup %7237  ;;  %v4151_v20 = vpop.xlane.xlu2 %4150  ;;  %3458 = vmatmul.f32.gmra.mxu2 %v3358_v15  ;;  %7247 = vpow2.f32 %v4694_v8  ;;  %v3254_v44 = vmul.f32 1.442695, %v3225_v2  ;;  %v11207_v15 = vsel %vm10289_vm15, %v11003_v16, -inf  ;;  %v11217_v16 = vsel %vm9923_vm3, %v5050_v27, -inf  ;;  %v13165_v2 = vld [vmem:[#allocation145_spill] sm:$0xff] }
 0x5df   : > { %v3311_v30 = vmul.f32 %v7238_v49, %v3267_v3  ;;  %v4649_v7 = vpop.xlane.xlu1 %4648  ;;  %5376 = vmatpush.msrb.mxu2 %v6954_v62  ;;  %3892 = vmatmul.f32.gmra.mxu0 %v3856_v36  ;;  %v11176_v29 = vpop.eup %7239  ;;  %v4179_v17 = vsub.f32 %v10876_v60, %v4151_v20  ;;  %7249 = vrcp.f32 %v11122_v4 }
 0x5e0   : > { %v11180_v14 = vpop.eup %7241  ;;  %7251 = vrcp.f32 %v11143_v25  ;;  %v4677_v48 = vsub.f32 %v10881_v47, %v4649_v7 }
 0x5e1   : > { %v3327_v34 = vsub.f32 2.0, %v3311_v30  ;;  %5377 = vmatpush.msrb.mxu2 %v6955_v18  ;;  %4224 = vadd.xlane.f32.xlu0 %v11176_v29  ;;  %v11182_v5 = vpop.eup %7243  ;;  %v4198_v60 = vmul.f32 1.442695, %v4179_v17  ;;  %v11197_v52 = vpop.f32.mrf.mxu1 }
 0x5e2   : > { %4228 = vadd.xlane.f32.xlu2 %v11180_v14  ;;  %v11195_v55 = vpop.eup %7245  ;;  %v4696_v43 = vmul.f32 1.442695, %v4677_v48 }
 0x5e3   : > { %v3343_v3 = vmul.f32 %v7238_v49, %v3327_v34  ;;  %5378 = vmatpush.msrb.mxu2 %v6949_v0  ;;  %3780 = vadd.xlane.f32.xlu1 %v11182_v5 }
 0x5e4   : > { %v11188_v42 = vpop.xlane.xlu0 %3274 }
 0x5e5   : > { %v3359_v32 = vmul.f32 %v10847_v21, %v3343_v3  ;;  %5379 = vmatpush.msrb.mxu2 %v6950_v51  ;;  %v11200_v21 = vpop.eup %7247 }
 0x5e6   : > { %v3765_v58 = vpop.xlane.xlu2 %3764  ;;  %v7250_v23 = vpop.eup %7249 }
 0x5e7   : > { %v3269_v40 = vpop.xlane.xlu1 %3268  ;;  %3461 = vmatmul.f32.gmra.mxu2 %v3359_v32  ;;  %7253 = vrcp.f32 %v3765_v58  ;;  %v7252_v49 = vpop.eup %7251  ;;  %v3810_v18 = vmul.f32 %v7250_v23, %v11122_v4 }
 0x5e8   : > { %7255 = vrcp.f32 %v3269_v40  ;;  %v3313_v34 = vmul.f32 %v7252_v49, %v11143_v25 }
 0x5e9   : > { %4724 = vadd.xlane.f32.xlu0 %v11195_v55  ;;  %7257 = vpow2.f32 %v4198_v60  ;;  %v5056_v32 = vpop.f32.mrf.mxu1  ;;  %v3826_v19 = vsub.f32 2.0, %v3810_v18 }
 0x5ea   : > { %4726 = vadd.xlane.f32.xlu2 %v11200_v21  ;;  %7259 = vpow2.f32 %v3254_v44 }
 0x5eb   : > { %4168 = vmax.xlane.f32.xlu1 %v11207_v15  ;;  %7261 = vpow2.f32 %v4696_v43 }
 0x5ec   : > { %v11210_v39 = vpop.xlane.xlu0 %3772 }
 0x5ed   : > { %v7254_v62 = vpop.eup %7253 }
 0x5ee   : > { %v7256_v36 = vpop.eup %7255  ;;  %v3809_v30 = vmul.f32 %v7254_v62, %v3765_v58  ;;  %v4157_v47 = vpop.xlane.xlu2 %4156  ;;  %v3723_v58 = vsub.f32 %v13165_v2, %v11011_v22  ;;  %v11245_v22 = vsel %vm10227_vm12, %v11030_v46, -inf }
 0x5ef   : > { %v11212_v20 = vpop.xlane.xlu1 %4650  ;;  %v3312_v7 = vmul.f32 %v7256_v36, %v3269_v40  ;;  %v11221_v0 = vpop.eup %7257  ;;  %v4182_v51 = vsub.f32 %v10915_v35, %v4157_v47  ;;  %v3329_v40 = vsub.f32 2.0, %v3313_v34  ;;  %v13168_v47 = vld [vmem:[#allocation24_spill] sm:$0xff] }
 0x5f0   : > { %v3825_v8 = vsub.f32 2.0, %v3809_v30  ;;  %v11224_v17 = vpop.eup %7259  ;;  %v3752_v43 = vmul.f32 1.442695, %v3723_v58 }
 0x5f1   : > { %v3328_v6 = vsub.f32 2.0, %v3312_v7  ;;  %5112 = vmax.xlane.f32.xlu0 %v11217_v16  ;;  %v4204_v35 = vmul.f32 1.442695, %v4182_v51  ;;  %v3345_v30 = vmul.f32 %v7252_v49, %v3329_v40  ;;  %v5059_v18 = vpop.f32.mrf.mxu1  ;;  %v13172_v40 = vld [vmem:[#allocation32_spill] sm:$0xff] }
 0x5f2   : > { %v3841_v3 = vmul.f32 %v7254_v62, %v3825_v8  ;;  %4230 = vadd.xlane.f32.xlu2 %v11221_v0  ;;  %v11234_v62 = vpop.eup %7261  ;;  %v13169_v8 = vld [vmem:[#allocation25_spill] sm:$0xff] }
 0x5f3   : > { %v3344_v4 = vmul.f32 %v7256_v36, %v3328_v6  ;;  %3286 = vadd.xlane.f32.xlu1 %v11224_v17  ;;  %v3842_v36 = vmul.f32 %v7250_v23, %v3826_v19  ;;  %v3361_v28 = vmul.f32 %v13169_v8, %v3345_v30 }
 0x5f4   : > { %v11228_v27 = vpop.xlane.xlu0 %4160  ;;  %v3857_v25 = vmul.f32 %v10897_v45, %v3841_v3  ;;  %v11239_v45 = vsel %vm10026_vm5, %v5056_v32, -inf }
 0x5f5   : > { %v3360_v60 = vmul.f32 %v10892_v63, %v3344_v4  ;;  %13166 = vst [vmem:[#allocation43_spill] sm:$0xff] %v11239_v45  ;;  %v3858_v49 = vmul.f32 %v13168_v47, %v3842_v36 }
 0x5f6   : > { %v3771_v44 = vpop.xlane.xlu2 %3770  ;;  %3895 = vmatmul.f32.gmra.mxu0 %v3857_v25  ;;  %v11260_v25 = vsel %vm10064_vm7, %v5059_v18, -inf }
 0x5f7   : > { %v3769_v48 = vpop.xlane.xlu1 %3768  ;;  %7263 = vrcp.f32 %v3771_v44  ;;  %3464 = vmatmul.f32.gmra.mxu2 %v3360_v60  ;;  %13171 = vst [vmem:[#allocation74_spill] sm:$0xff] %v11260_v25 }
 0x5f8   : > { %7265 = vrcp.f32 %v3769_v48 }
 0x5f9   : > { %4728 = vadd.xlane.f32.xlu0 %v11234_v62  ;;  %7267 = vpow2.f32 %v4204_v35  ;;  %v5062_v8 = vpop.f32.mrf.mxu1 }
 0x5fa   : > { %5116 = vmax.xlane.f32.xlu2 %v11239_v45  ;;  %7269 = vpow2.f32 %v3752_v43  ;;  %v13174_v43 = vld [vmem:[#allocation57_spill] sm:$0xff]  ;;  %v11276_v19 = vsel %vm10116_vm9, %v5062_v8, -inf }
 0x5fb   : > { %4170 = vmax.xlane.f32.xlu1 %v11245_v22  ;;  %7271 = vrcp.f32 %v11210_v39 }
 0x5fc   : > { %v11248_v23 = vpop.xlane.xlu0 %3278  ;;  %7273 = vrcp.f32 %v11188_v42 }
 0x5fd   : > { %v7264_v7 = vpop.eup %7263 }
 0x5fe   : > { %v7266_v34 = vpop.eup %7265  ;;  %v4159_v6 = vpop.xlane.xlu2 %4158  ;;  %3898 = vmatmul.f32.gmra.mxu0 %v3858_v49  ;;  %v3812_v32 = vmul.f32 %v7264_v7, %v3771_v44  ;;  %v13173_v44 = vld [vmem:[#allocation22_spill] sm:$0xff] }
 0x5ff   : > { %v11252_v3 = vpop.xlane.xlu1 %4652  ;;  %v3811_v51 = vmul.f32 %v7266_v34, %v3769_v48  ;;  %3467 = vmatmul.f32.gmra.mxu2 %v3361_v28  ;;  %v11254_v46 = vpop.eup %7267  ;;  %v4183_v60 = vsub.f32 %v13172_v40, %v4159_v6  ;;  %v3227_v48 = vsub.f32 %v13173_v44, %v11013_v61  ;;  %v11282_v61 = vsel %vm10227_vm12, %v11043_v9, -inf }
 0x600   : > { %v11262_v2 = vpop.eup %7269  ;;  %v3828_v36 = vsub.f32 2.0, %v3812_v32  ;;  %13176 = vst [vmem:[#allocation49_spill] sm:$0xff] %v11282_v61 }
 0x601   : > { %v3827_v4 = vsub.f32 2.0, %v3811_v51  ;;  %4236 = vadd.xlane.f32.xlu0 %v11254_v46  ;;  %v7272_v47 = vpop.eup %7271  ;;  %v4206_v28 = vmul.f32 1.442695, %v4183_v60 }
 0x602   : > { %5118 = vmax.xlane.f32.xlu2 %v11260_v25  ;;  %v3813_v6 = vmul.f32 %v7272_v47, %v11210_v39  ;;  %v3844_v51 = vmul.f32 %v7264_v7, %v3828_v36  ;;  %v7274_v32 = vpop.eup %7273  ;;  %v13177_v7 = vld [vmem:[#allocation31_spill] sm:$0xff] }
 0x603   : > { %v3843_v58 = vmul.f32 %v7266_v34, %v3827_v4  ;;  %3784 = vadd.xlane.f32.xlu1 %v11262_v2  ;;  %v3258_v34 = vmul.f32 1.442695, %v3227_v48  ;;  %v3315_v9 = vmul.f32 %v7274_v32, %v11188_v42 }
 0x604   : > { %v11267_v35 = vpop.xlane.xlu0 %3776  ;;  %v3829_v39 = vsub.f32 2.0, %v3813_v6  ;;  %v3860_v60 = vmul.f32 %v13177_v7, %v3844_v51  ;;  %v13181_v7 = vld [vmem:[#allocation59_spill] sm:$0xff] }
 0x605   : > { %v3859_v30 = vmul.f32 %v13174_v43, %v3843_v58  ;;  %v13178_v43 = vld [vmem:[#allocation62_spill] sm:$0xff] }
 0x606   : > { %v4657_v49 = vpop.xlane.xlu2 %4656 }
 0x607   : > { %v3273_v18 = vpop.xlane.xlu1 %3272  ;;  %3901 = vmatmul.f32.gmra.mxu0 %v3859_v30 }
 0x608   : > { %7275 = vrcp.f32 %v3273_v18 }
 0x609   : > { %7277 = vpow2.f32 %v4206_v28  ;;  %v3845_v28 = vmul.f32 %v7272_v47, %v3829_v39  ;;  %v13182_v47 = vld [vmem:[#allocation28_spill] sm:$0xff] }
 0x60a   : > { %5120 = vmax.xlane.f32.xlu2 %v11276_v19  ;;  %7279 = vpow2.f32 %v3258_v34  ;;  %v3331_v34 = vsub.f32 2.0, %v3315_v9 }
 0x60b   : > { %4668 = vmax.xlane.f32.xlu1 %v11282_v61  ;;  %v3861_v39 = vmul.f32 %v13182_v47, %v3845_v28 }
 0x60c   : > { %v11285_v58 = vpop.xlane.xlu0 %4164 }
 0x60e   : > { %v7276_v40 = vpop.eup %7275  ;;  %v11288_v48 = vpop.xlane.xlu2 %4162 }
 0x60f   : > { %v3314_v44 = vmul.f32 %v7276_v40, %v3273_v18  ;;  %v4655_v36 = vpop.xlane.xlu1 %4654  ;;  %3904 = vmatmul.f32.gmra.mxu0 %v3860_v60  ;;  %v11292_v13 = vpop.eup %7277  ;;  %v13180_v18 = vld [vmem:[#allocation34_spill] sm:$0xff] }
 0x610   : > { %v4680_v30 = vsub.f32 %v13178_v43, %v4655_v36  ;;  %13179 = vst [vmem:[#allocation78_spill] sm:$0xff] %v11292_v13  ;;  %v11294_v25 = vpop.eup %7279  ;;  %v4681_v6 = vsub.f32 %v13180_v18, %v4657_v49  ;;  %v5065_v60 = vpop.f32.mrf.mxu1  ;;  %v13187_v18 = vld [vmem:[#allocation27_spill] sm:$0xff] }
 0x611   : > { %v3330_v8 = vsub.f32 2.0, %v3314_v44  ;;  %v3347_v44 = vmul.f32 %v7274_v32, %v3331_v34  ;;  %v11310_v9 = vsel %vm13114_vm11, %v5065_v60, -inf  ;;  %v13186_v32 = vld [vmem:[#allocation30_spill] sm:$0xff] }
 0x612   : > { %v4702_v4 = vmul.f32 1.442695, %v4680_v30  ;;  %4238 = vadd.xlane.f32.xlu2 %v11292_v13  ;;  %v4704_v36 = vmul.f32 1.442695, %v4681_v6 }
 0x613   : > { %v3346_v61 = vmul.f32 %v7276_v40, %v3330_v8  ;;  %3290 = vadd.xlane.f32.xlu1 %v11294_v25  ;;  %v11317_v8 = vsel %vm9872_vm1, %v11113_v24, -inf  ;;  %v3363_v6 = vmul.f32 %v13187_v18, %v3347_v44 }
 0x614   : > { %7281 = vpow2.f32 %v4702_v4  ;;  %v11299_v51 = vpop.xlane.xlu0 %3778  ;;  %v4184_v4 = vsub.f32 %v13186_v32, %v11228_v27 }
 0x615   : > { %v3362_v42 = vmul.f32 %v13181_v7, %v3346_v61  ;;  %7283 = vrcp.f32 %v11248_v23 }
 0x616   : > { %v11304_v43 = vpop.xlane.xlu2 %4664  ;;  %v4208_v30 = vmul.f32 1.442695, %v4184_v4 }
 0x617   : > { %v3277_v40 = vpop.xlane.xlu1 %3276  ;;  %3470 = vmatmul.f32.gmra.mxu2 %v3362_v42  ;;  %3907 = vmatmul.f32.gmra.mxu0 %v3861_v39  ;;  %13183 = vst [vmem:[#allocation54_spill] sm:$0xff] %v11304_v43  ;;  %v13188_v42 = vld [vmem:[#allocation23_spill] sm:$0xff] }
 0x618   : > { %7285 = vrcp.f32 %v3277_v40  ;;  %v4180_v60 = vsub.f32 %v13188_v42, %v11095_v38  ;;  %v5068_v24 = vpop.f32.mrf.mxu1  ;;  %v13193_v42 = vld [vmem:[#allocation29_spill] sm:$0xff] }
 0x619   : > { %7287 = vpow2.f32 %v4704_v36  ;;  %v11335_v38 = vsel %vm10083_vm8, %v5068_v24, -inf }
 0x61a   : > { %v11306_v49 = vpop.eup %7281  ;;  %5122 = vmax.xlane.f32.xlu2 %v11310_v9  ;;  %7289 = vrcp.f32 %v11267_v35  ;;  %v4200_v61 = vmul.f32 1.442695, %v4180_v60  ;;  %v4678_v60 = vsub.f32 %v13193_v42, %v11212_v20 }
 0x61b   : > { %4734 = vadd.xlane.f32.xlu0 %v11306_v49  ;;  %v7284_v28 = vpop.eup %7283  ;;  %5108 = vmax.xlane.f32.xlu1 %v11317_v8 }
 0x61c   : > { %v11322_v34 = vpop.xlane.xlu0 %3782  ;;  %v3317_v27 = vmul.f32 %v7284_v28, %v11248_v23  ;;  %v11342_v23 = vsel %vm9947_vm4, %v11197_v52, -inf }
 0x61e   : > { %v7286_v7 = vpop.eup %7285  ;;  %v11331_v44 = vpop.xlane.xlu2 %3284  ;;  %v3333_v4 = vsub.f32 2.0, %v3317_v27 }
 0x61f   : > { %v3316_v47 = vmul.f32 %v7286_v7, %v3277_v40  ;;  %v3775_v39 = vpop.xlane.xlu1 %3774  ;;  %3473 = vmatmul.f32.gmra.mxu2 %v3363_v6  ;;  %v11329_v32 = vpop.eup %7287  ;;  %v13192_v6 = vld [vmem:[#allocation65_spill] sm:$0xff]  ;;  %v13194_v40 = vld [vmem:[#allocation40_spill] sm:$0xff] }
 0x620   : > { %7291 = vrcp.f32 %v3775_v39  ;;  %13189 = vst [vmem:[#allocation80_spill] sm:$0xff] %v11329_v32  ;;  %v7290_v54 = vpop.eup %7289 }
 0x621   : > { %v3332_v36 = vsub.f32 2.0, %v3316_v47  ;;  %7293 = vpow2.f32 %v4208_v30  ;;  %v4698_v30 = vmul.f32 1.442695, %v4678_v60  ;;  %v3815_v27 = vmul.f32 %v7290_v54, %v11267_v35 }
 0x622   : > { %5124 = vmax.xlane.f32.xlu2 %v11335_v38  ;;  %7295 = vpow2.f32 %v4200_v61 }
 0x623   : > { %v3348_v43 = vmul.f32 %v7286_v7, %v3332_v36  ;;  %4736 = vadd.xlane.f32.xlu0 %v11329_v32  ;;  %5114 = vmax.xlane.f32.xlu1 %v11342_v23  ;;  %v3349_v32 = vmul.f32 %v7284_v28, %v3333_v4  ;;  %7297 = vrcp.f32 %v11299_v51  ;;  %v13197_v4 = vld [vmem:[#allocation47_spill] sm:$0xff]  ;;  %v3831_v60 = vsub.f32 2.0, %v3815_v27  ;;  %v13203_v27 = vld [vmem:[#allocation53_spill] sm:$0xff] }
 0x624   : > { %v11345_v18 = vpop.xlane.xlu0 %4666 }
 0x625   : > { %13191 = vst [vmem:[#allocation60_spill] sm:$0xff] %v11345_v18  ;;  %v3364_v7 = vmul.f32 %v13192_v6, %v3348_v43  ;;  %v11357_v6 = vpop.f32.mrf.mxu0  ;;  %v3365_v35 = vmul.f32 %v13197_v4, %v3349_v32  ;;  %v13201_v32 = vld [vmem:[#allocation71_spill] sm:$0xff] }
 0x626   : > { %v7292_v47 = vpop.eup %7291  ;;  %13196 = vst [vmem:[#allocation63_spill] sm:$0xff] %v11357_v6 }
 0x627   : > { %v4659_v24 = vpop.xlane.xlu1 %4658  ;;  %3476 = vmatmul.f32.gmra.mxu2 %v3364_v7  ;;  %v3814_v36 = vmul.f32 %v7292_v47, %v3775_v39  ;;  %v11353_v43 = vpop.eup %7293  ;;  %v13198_v7 = vld [vmem:[#allocation26_spill] sm:$0xff] }
 0x628   : > { %v4682_v52 = vsub.f32 %v13194_v40, %v4659_v24  ;;  %13195 = vst [vmem:[#allocation81_spill] sm:$0xff] %v11353_v43  ;;  %v11355_v61 = vpop.eup %7295  ;;  %v11360_v39 = vpop.xlane.xlu2 %4172  ;;  %v4181_v42 = vsub.f32 %v13198_v7, %v11170_v59  ;;  %v13199_v24 = vld [vmem:[#allocation55_spill] sm:$0xff] }
 0x629   : > { %v3830_v18 = vsub.f32 2.0, %v3814_v36  ;;  %v7298_v40 = vpop.eup %7297 }
 0x62a   : > { %v4706_v13 = vmul.f32 1.442695, %v4682_v52  ;;  %v3847_v52 = vmul.f32 %v7290_v54, %v3831_v60  ;;  %v5071_v60 = vpop.f32.mrf.mxu1 }
 0x62b   : > { %v3846_v20 = vmul.f32 %v7292_v47, %v3830_v18  ;;  %4240 = vadd.xlane.f32.xlu0 %v11353_v43  ;;  %4232 = vadd.xlane.f32.xlu1 %v11355_v61  ;;  %v4202_v47 = vmul.f32 1.442695, %v4181_v42 }
 0x62c   : > { %7299 = vpow2.f32 %v4706_v13  ;;  %v11363_v28 = vpop.xlane.xlu0 %3288  ;;  %v3816_v13 = vmul.f32 %v7298_v40, %v11299_v51  ;;  %v13204_v51 = vld [vmem:[#allocation33_spill] sm:$0xff] }
 0x62d   : > { %7301 = vpow2.f32 %v4698_v30  ;;  %v3862_v36 = vmul.f32 %v13199_v24, %v3846_v20  ;;  %v11377_v30 = vpop.f32.mrf.mxu0  ;;  %v4679_v20 = vsub.f32 %v13203_v27, %v11252_v3  ;;  %v13207_v3 = vld [vmem:[#allocation61_spill] sm:$0xff] }
 0x62e   : > { %13202 = vst [vmem:[#allocation64_spill] sm:$0xff] %v11377_v30  ;;  %7303 = vpow2.f32 %v4202_v47  ;;  %v3832_v4 = vsub.f32 2.0, %v3816_v13  ;;  %v11388_v47 = vsel %vm10259_vm13, %v5071_v60, -inf }
 0x62f   : > { %v4661_v18 = vpop.xlane.xlu1 %4660  ;;  %3479 = vmatmul.f32.gmra.mxu2 %v3365_v35  ;;  %3910 = vmatmul.f32.gmra.mxu0 %v3862_v36  ;;  %v3863_v35 = vmul.f32 %v13204_v51, %v3847_v52  ;;  %v4700_v36 = vmul.f32 1.442695, %v4679_v20  ;;  %v4186_v52 = vsub.f32 %v13207_v3, %v11285_v58 }
 0x630   : > { %v4683_v59 = vsub.f32 %v13201_v32, %v4661_v18  ;;  %v11384_v7 = vpop.xlane.xlu2 %4670  ;;  %v3848_v18 = vmul.f32 %v7298_v40, %v3832_v4  ;;  %v13209_v40 = vld [vmem:[#allocation36_spill] sm:$0xff] }
 0x631   : > { %13205 = vst [vmem:[#allocation87_spill] sm:$0xff] %v11384_v7  ;;  %v4212_v58 = vmul.f32 1.442695, %v4186_v52 }
 0x632   : > { %v11370_v6 = vpop.eup %7299  ;;  %v4708_v24 = vmul.f32 1.442695, %v4683_v59  ;;  %v13208_v59 = vld [vmem:[#allocation35_spill] sm:$0xff]  ;;  %v3864_v20 = vmul.f32 %v13209_v40, %v3848_v18 }
 0x633   : > { %13200 = vst [vmem:[#allocation90_spill] sm:$0xff] %v11370_v6  ;;  %v11372_v43 = vpop.eup %7301  ;;  %4738 = vadd.xlane.f32.xlu2 %v11370_v6  ;;  %v4185_v27 = vsub.f32 %v13208_v59, %v11288_v48 }
 0x634   : > { %4730 = vadd.xlane.f32.xlu1 %v11372_v43  ;;  %v11381_v54 = vpop.xlane.xlu0 %3786  ;;  %v11390_v30 = vpop.eup %7303 }
 0x635   : > { %v11399_v4 = vpop.f32.mrf.mxu0  ;;  %v4210_v3 = vmul.f32 1.442695, %v4185_v27  ;;  %v5074_v27 = vpop.f32.mrf.mxu1 }
 0x636   : > { %13210 = vst [vmem:[#allocation66_spill] sm:$0xff] %v11399_v4 }
 0x637   : > { %v3281_v42 = vpop.xlane.xlu1 %3280  ;;  %3913 = vmatmul.f32.gmra.mxu0 %v3863_v35 }
 0x638   : > { %7305 = vrcp.f32 %v3281_v42 }
 0x639   : > { %7307 = vpow2.f32 %v4708_v24 }
 0x63a   : > { %7309 = vpow2.f32 %v4700_v36 }
 0x63b   : > { %5126 = vmax.xlane.f32.xlu2 %v11388_v47  ;;  %7311 = vpow2.f32 %v4212_v58 }
 0x63c   : > { %4234 = vadd.xlane.f32.xlu1 %v11390_v30  ;;  %v11403_v60 = vpop.xlane.xlu0 %4174  ;;  %7313 = vpow2.f32 %v4210_v3 }
 0x63d   : > { %v11401_v35 = vpop.xlane.xlu2 %4722  ;;  %7315 = vrcp.f32 %v11331_v44 }
 0x63e   : > { %v7306_v13 = vpop.eup %7305 }
 0x63f   : > { %v3318_v51 = vmul.f32 %v7306_v13, %v3281_v42  ;;  %v11405_v32 = vpop.xlane.xlu1 %4662  ;;  %3916 = vmatmul.f32.gmra.mxu0 %v3864_v20  ;;  %v11407_v7 = vpop.eup %7307 }
 0x640   : > { %13211 = vst [vmem:[#allocation93_spill] sm:$0xff] %v11407_v7  ;;  %v11409_v6 = vpop.eup %7309 }
 0x641   : > { %v3334_v24 = vsub.f32 2.0, %v3318_v51 }
 0x643   : > { %v3350_v36 = vmul.f32 %v7306_v13, %v3334_v24  ;;  %4740 = vadd.xlane.f32.xlu2 %v11407_v7  ;;  %v11419_v13 = vpop.eup %7311 }
 0x644   : > { %4732 = vadd.xlane.f32.xlu1 %v11409_v6  ;;  %v11417_v52 = vpop.xlane.xlu0 %3788  ;;  %13212 = vst [vmem:[#allocation68_spill] sm:$0xff] %v11419_v13  ;;  %v11421_v59 = vpop.eup %7313 }
 0x645   : > { %v3366_v48 = vmul.f32 %v11089_v11, %v3350_v36  ;;  %v11414_v42 = vpop.xlane.xlu2 %4226  ;;  %13213 = vst [vmem:[#allocation91_spill] sm:$0xff] %v11421_v59  ;;  %v7316_v11 = vpop.eup %7315 }
 0x646   : > { %v3320_v3 = vmul.f32 %v7316_v11, %v11331_v44 }
 0x647   : > { %3482 = vmatmul.f32.gmra.mxu2 %v3366_v48  ;;  %v3283_v18 = vpop.xlane.xlu1 %3282 }
 0x648   : > { %7317 = vrcp.f32 %v3283_v18 }
 0x64b   : > { %4244 = vadd.xlane.f32.xlu2 %v11419_v13  ;;  %v11433_v13 = vsel %vm13125_vm6, %v5074_v27, -inf  ;;  %v4190_v27 = vsub.f32 %v13215_v57, %v11360_v39  ;;  %v11453_v39 = vpop.f32.mrf.mxu0 }
 0x64c   : > { %4242 = vadd.xlane.f32.xlu1 %v11421_v59  ;;  %v11429_v7 = vpop.xlane.xlu0 %4672  ;;  %v3336_v59 = vsub.f32 2.0, %v3320_v3  ;;  %13218 = vst [vmem:[#allocation72_spill] sm:$0xff] %v11453_v39 }
 0x64d   : > { %v11425_v58 = vpop.xlane.xlu2 %5110  ;;  %13214 = vst [vmem:[#allocation70_spill] sm:$0xff] %v11429_v7  ;;  %v4220_v3 = vmul.f32 1.442695, %v4190_v27 }
 0x64e   : > { %v7318_v40 = vpop.eup %7317  ;;  %v3352_v44 = vmul.f32 %v7316_v11, %v3336_v59 }
 0x64f   : > { %v3319_v20 = vmul.f32 %v7318_v40, %v3283_v18  ;;  %v4167_v51 = vpop.xlane.xlu1 %4166  ;;  %v5077_v18 = vpop.f32.mrf.mxu1 }
 0x650   : > { %v4187_v24 = vsub.f32 %v11166_v41, %v4167_v51  ;;  %v11447_v51 = vsel %vm10135_vm10, %v5077_v18, -inf }
 0x651   : > { %v3335_v36 = vsub.f32 2.0, %v3319_v20  ;;  %13216 = vst [vmem:[#allocation96_spill] sm:$0xff] %v11447_v51 }
 0x652   : > { %v4214_v48 = vmul.f32 1.442695, %v4187_v24 }
 0x653   : > { %v3351_v4 = vmul.f32 %v7318_v40, %v3335_v36 }
 0x654   : > { %7319 = vpow2.f32 %v4214_v48  ;;  %5128 = vmax.xlane.f32.xlu1 %v11433_v13 }
 0x655   : > { %v3367_v45 = vmul.f32 %v11136_v10, %v3351_v4  ;;  %7321 = vrcp.f32 %v11322_v34  ;;  %v11440_v20 = vpop.xlane.xlu2 %4228  ;;  %v11450_v4 = vpop.xlane.xlu0 %4224 }
 0x657   : > { %v3781_v41 = vpop.xlane.xlu1 %3780  ;;  %3485 = vmatmul.f32.gmra.mxu2 %v3367_v45  ;;  %v13217_v45 = vld [vmem:[#allocation38_spill] sm:$0xff]  ;;  %v5080_v24 = vpop.f32.mrf.mxu1 }
 0x658   : > { %7323 = vrcp.f32 %v3781_v41  ;;  %v3368_v59 = vmul.f32 %v13217_v45, %v3352_v44 }
 0x659   : > { %7325 = vpow2.f32 %v4220_v3  ;;  %v11474_v3 = vpop.f32.mrf.mxu0 }
 0x65a   : > { %v11438_v40 = vpop.eup %7319  ;;  %13221 = vst [vmem:[#allocation83_spill] sm:$0xff] %v11474_v3 }
 0x65b   : > { %4246 = vadd.xlane.f32.xlu0 %v11438_v40  ;;  %v7322_v10 = vpop.eup %7321 }
 0x65c   : > { %5130 = vmax.xlane.f32.xlu1 %v11447_v51  ;;  %v3818_v56 = vmul.f32 %v7322_v10, %v11322_v34  ;;  %v11459_v51 = vsel %vm10289_vm15, %v5080_v24, -inf  ;;  %v11470_v24 = vpop.f32.mrf.mxu2 }
 0x65d   : > { %13219 = vst [vmem:[#allocation99_spill] sm:$0xff] %v11459_v51  ;;  %v11462_v27 = vpop.xlane.xlu2 %4726 }
 0x65e   : > { %v7324_v11 = vpop.eup %7323 }
 0x65f   : > { %v3817_v36 = vmul.f32 %v7324_v11, %v3781_v41  ;;  %v4169_v48 = vpop.xlane.xlu1 %4168  ;;  %3488 = vmatmul.f32.gmra.mxu2 %v3368_v59  ;;  %v3834_v41 = vsub.f32 2.0, %v3818_v56  ;;  %v11468_v12 = vpop.eup %7325 }
 0x660   : > { %v4188_v57 = vsub.f32 %v11207_v15, %v4169_v48  ;;  %v11466_v15 = vpop.xlane.xlu0 %4724  ;;  %13220 = vst [vmem:[#allocation75_spill] sm:$0xff] %v11468_v12 }
 0x661   : > { %v3833_v18 = vsub.f32 2.0, %v3817_v36  ;;  %v3850_v59 = vmul.f32 %v7322_v10, %v3834_v41  ;;  %v13222_v36 = vld [vmem:[#allocation67_spill] sm:$0xff] }
 0x662   : > { %v4216_v7 = vmul.f32 1.442695, %v4188_v57 }
 0x663   : > { %v3849_v44 = vmul.f32 %v7324_v11, %v3833_v18  ;;  %5132 = vmax.xlane.f32.xlu0 %v11459_v51  ;;  %v3866_v48 = vmul.f32 %v13222_v36, %v3850_v59  ;;  %v4191_v59 = vsub.f32 %v11106_v50, %v11403_v60 }
 0x664   : > { %7327 = vpow2.f32 %v4216_v7  ;;  %v5083_v7 = vpop.f32.mrf.mxu1  ;;  %v11489_v36 = vpop.f32.mrf.mxu2 }
 0x665   : > { %v3865_v45 = vmul.f32 %v11182_v5, %v3849_v44  ;;  %7329 = vrcp.f32 %v11363_v28  ;;  %v11479_v56 = vpop.xlane.xlu2 %4230  ;;  %v11485_v51 = vsel %vm10227_vm12, %v5083_v7, -inf  ;;  %v4222_v63 = vmul.f32 1.442695, %v4191_v59 }
 0x667   : > { %v3287_v34 = vpop.xlane.xlu1 %3286  ;;  %3919 = vmatmul.f32.gmra.mxu0 %v3865_v45 }
 0x668   : > { %7331 = vrcp.f32 %v3287_v34  ;;  %v5113_v45 = vpop.xlane.xlu0 %5112 }
 0x66a   : > { %v11472_v11 = vpop.eup %7327 }
 0x66b   : > { %4248 = vadd.xlane.f32.xlu1 %v11472_v11  ;;  %4252 = vadd.xlane.f32.xlu0 %v11468_v12  ;;  %v7330_v5 = vpop.eup %7329 }
 0x66c   : > { %v3322_v41 = vmul.f32 %v7330_v5, %v11363_v28 }
 0x66d   : > { %v11497_v60 = vpop.xlane.xlu2 %5116 }
 0x66e   : > { %v7332_v57 = vpop.eup %7331  ;;  %v3338_v28 = vsub.f32 2.0, %v3322_v41 }
 0x66f   : > { %v3321_v18 = vmul.f32 %v7332_v57, %v3287_v34  ;;  %v4171_v44 = vpop.xlane.xlu1 %4170  ;;  %3922 = vmatmul.f32.gmra.mxu0 %v3866_v48  ;;  %v11492_v34 = vpop.f32.mrf.mxu0 }
 0x670   : > { %v4189_v10 = vsub.f32 %v11245_v22, %v4171_v44  ;;  %13223 = vst [vmem:[#allocation77_spill] sm:$0xff] %v11492_v34  ;;  %v5142_v22 = vsub.f32 %v11217_v16, %v5113_v45 }
 0x671   : > { %v3337_v3 = vsub.f32 2.0, %v3321_v18  ;;  %v5086_v18 = vpop.f32.mrf.mxu1 }
 0x672   : > { %v4218_v39 = vmul.f32 1.442695, %v4189_v10  ;;  %v5160_v50 = vmul.f32 1.442695, %v5142_v22  ;;  %v11503_v16 = vsel %vm13061_vm0, %v5086_v18, -inf  ;;  %vm13252_vm0 = vcmask 523264  }
 0x673   : > { %v3353_v12 = vmul.f32 %v7332_v57, %v3337_v3  ;;  %5134 = vmax.xlane.f32.xlu1 %v11485_v51  ;;  %v3354_v3 = vmul.f32 %v7330_v5, %v3338_v28  ;;  %vm13258_vm1 = vmmov %vm13252_vm0 }
 0x674   : > { %7333 = vpow2.f32 %v4218_v39  ;;  %v11505_v39 = vpop.f32.mrf.mxu2  ;;  %vm13261_vm2 = vmmov %vm13252_vm0 }
 0x675   : > { %v3369_v48 = vmul.f32 %v11224_v17, %v3353_v12  ;;  %7335 = vrcp.f32 %v11381_v54  ;;  %v13226_v12 = vld [vmem:[#allocation86_spill] sm:$0xff]  ;;  %vm13263_vm3 = vmmov %vm13252_vm0 }
 0x676   : > { %v3370_v10 = vmul.f32 %v13226_v12, %v3354_v3  ;;  %vm13267_vm4 = vmmov %vm13252_vm0 }
 0x677   : > { %v3785_v7 = vpop.xlane.xlu1 %3784  ;;  %3491 = vmatmul.f32.gmra.mxu2 %v3369_v48  ;;  %v11510_v45 = vpop.f32.mrf.mxu0  ;;  %vm13269_vm5 = vmmov %vm13252_vm0 }
 0x678   : > { %7337 = vrcp.f32 %v3785_v7  ;;  %13227 = vst [vmem:[#allocation76_spill] sm:$0xff] %v11510_v45  ;;  %vm13273_vm7 = vmmov %vm13252_vm0 }
 0x679   : > { %7339 = vpow2.f32 %v4222_v63  ;;  %v11520_v63 = vpop.xlane.xlu2 %5118  ;;  %vm13275_vm8 = vmmov %vm13252_vm0 }
 0x67a   : > { %v11499_v57 = vpop.eup %7333  ;;  %7341 = vpow2.f32 %v5160_v50  ;;  %vm13277_vm9 = vmmov %vm13252_vm0 }
 0x67b   : > { %13224 = vst [vmem:[#allocation44_spill] sm:$0xff] %v11499_v57  ;;  %5136 = vmax.xlane.f32.xlu1 %v11503_v16  ;;  %4250 = vadd.xlane.f32.xlu2 %v11499_v57  ;;  %v7336_v17 = vpop.eup %7335  ;;  %7343 = vrcp.f32 %v11417_v52  ;;  %vm13278_vm10 = vmmov %vm13252_vm0 }
 0x67c   : > { %v3820_v28 = vmul.f32 %v7336_v17, %v11381_v54  ;;  %v11526_v44 = vpop.f32.mrf.mxu2  ;;  %7345 = vrcp.f32 %v11401_v35  ;;  %v5089_v54 = vpop.f32.mrf.mxu1  ;;  %vm13281_vm12 = vmmov %vm13252_vm0 }
 0x67d   : > { %7347 = vrcp.f32 %v11450_v4  ;;  %vm13283_vm13 = vmmov %vm13252_vm0 }
 0x67e   : > { %v7338_v41 = vpop.eup %7337  ;;  %v3836_v3 = vsub.f32 2.0, %v3820_v28  ;;  %vm13287_vm15 = vmmov %vm13252_vm0 }
 0x67f   : > { %v3819_v5 = vmul.f32 %v7338_v41, %v3785_v7  ;;  %v11512_v59 = vpop.xlane.xlu1 %4668  ;;  %3494 = vmatmul.f32.gmra.mxu2 %v3370_v10  ;;  %v11515_v22 = vpop.eup %7339  ;;  %v5141_v7 = vsub.f32 %v11159_v37, %v11425_v58  ;;  %v11536_v58 = vsel %vm10415_vm14, %v5089_v54, -inf  ;;  %vm13286_vm14 = vmmov %vm13252_vm0 }
 0x680   : > { %13228 = vst [vmem:[#allocation94_spill] sm:$0xff] %v11512_v59  ;;  %v11518_v18 = vpop.eup %7341  ;;  %v3852_v45 = vmul.f32 %v7336_v17, %v3836_v3  ;;  %vm13288_vm11 = vmmov %vm13252_vm0 }
 0x681   : > { %13229 = vst [vmem:[#allocation79_spill] sm:$0xff] %v11515_v22  ;;  %v3835_v48 = vsub.f32 2.0, %v3819_v5  ;;  %v7344_v10 = vpop.eup %7343  ;;  %v11539_v28 = vpop.xlane.xlu2 %5120  ;;  %vm13289_vm6 = vmmov %vm13252_vm0 }
 0x682   : > { %13230 = vst [vmem:[#allocation45_spill] sm:$0xff] %v11518_v18  ;;  %v3821_v37 = vmul.f32 %v7344_v10, %v11417_v52 }
 0x683   : > { %v3851_v50 = vmul.f32 %v7338_v41, %v3835_v48  ;;  %4254 = vadd.xlane.f32.xlu2 %v11515_v22  ;;  %5192 = vadd.xlane.f32.xlu1 %v11518_v18  ;;  %v11531_v41 = vpop.f32.mrf.mxu0  ;;  %v5158_v48 = vmul.f32 1.442695, %v5141_v7  ;;  %v13232_v18 = vld [vmem:[#allocation42_spill] sm:$0xff] }
 0x684   : > { %13231 = vst [vmem:[#allocation82_spill] sm:$0xff] %v11531_v41  ;;  %v3837_v34 = vsub.f32 2.0, %v3821_v37  ;;  %v3868_v41 = vmul.f32 %v13232_v18, %v3852_v45 }
 0x685   : > { %v3867_v12 = vmul.f32 %v11262_v2, %v3851_v50  ;;  %v7346_v2 = vpop.eup %7345 }
 0x686   : > { %v7348_v50 = vpop.eup %7347  ;;  %v4770_v33 = vmul.f32 %v7346_v2, %v11401_v35  ;;  %v3853_v54 = vmul.f32 %v7344_v10, %v3837_v34 }
 0x687   : > { %v3291_v5 = vpop.xlane.xlu1 %3290  ;;  %3925 = vmatmul.f32.gmra.mxu0 %v3867_v12  ;;  %v3465_v12 = vpop.f32.mrf.mxu2 }
 0x688   : > { %7349 = vrcp.f32 %v3291_v5 }
 0x689   : > { %7351 = vpow2.f32 %v5158_v48  ;;  %v4272_v48 = vmul.f32 %v7348_v50, %v11450_v4  ;;  %v11554_v10 = vpop.xlane.xlu2 %4238 }
 0x68a   : > { %7353 = vrcp.f32 %v11414_v42 }
 0x68b   : > { %5138 = vmax.xlane.f32.xlu2 %v11536_v58  ;;  %7355 = vrcp.f32 %v11466_v15  ;;  %v11549_v22 = vpop.f32.mrf.mxu0  ;;  %v4288_v35 = vsub.f32 2.0, %v4272_v48  ;;  %v4729_v48 = vpop.xlane.xlu0 %4728 }
 0x68e   : > { %v7350_v7 = vpop.eup %7349 }
 0x68f   : > { %v3323_v17 = vmul.f32 %v7350_v7, %v3291_v5  ;;  %v5109_v52 = vpop.xlane.xlu1 %5108  ;;  %3928 = vmatmul.f32.gmra.mxu0 %v3868_v41  ;;  %v11547_v37 = vpop.eup %7351  ;;  %v4786_v5 = vsub.f32 2.0, %v4770_v33 }
 0x690   : > { %v5140_v3 = vsub.f32 %v11317_v8, %v5109_v52  ;;  %v7354_v41 = vpop.eup %7353  ;;  %v3869_v8 = vmul.f32 %v11128_v31, %v3853_v54  ;;  %v3468_v4 = vpop.f32.mrf.mxu2 }
 0x691   : > { %v3339_v59 = vsub.f32 2.0, %v3323_v17  ;;  %v7356_v34 = vpop.eup %7355  ;;  %v4802_v52 = vmul.f32 %v7346_v2, %v4786_v5 }
 0x692   : > { %v5156_v45 = vmul.f32 1.442695, %v5140_v3  ;;  %v4771_v33 = vmul.f32 %v7356_v34, %v11466_v15  ;;  %v6996_v3 = vpack.i.bf16 %v3468_v4, %v3465_v12 }
 0x693   : > { %v3355_v18 = vmul.f32 %v7350_v7, %v3339_v59  ;;  %5190 = vadd.xlane.f32.xlu2 %v11547_v37  ;;  %v4273_v59 = vmul.f32 %v7354_v41, %v11414_v42  ;;  %v4304_v7 = vmul.f32 %v7348_v50, %v4288_v35  ;;  %v11564_v31 = vpop.f32.mrf.mxu0 }
 0x694   : > { %7357 = vpow2.f32 %v5156_v45  ;;  %v4787_v42 = vsub.f32 2.0, %v4771_v33 }
 0x695   : > { %v3371_v57 = vmul.f32 %v11294_v25, %v3355_v18  ;;  %7359 = vrcp.f32 %v11440_v20  ;;  %v4289_v2 = vsub.f32 2.0, %v4273_v59  ;;  %v4320_v54 = vmul.f32 %v11176_v29, %v4304_v7  ;;  %v11571_v18 = vpop.xlane.xlu2 %5122 }
 0x696   : > { %7361 = vrcp.f32 %v11462_v27  ;;  %v4803_v35 = vmul.f32 %v7356_v34, %v4787_v42  ;;  %v4237_v34 = vpop.xlane.xlu0 %4236 }
 0x697   : > { %v11556_v17 = vpop.xlane.xlu1 %5114  ;;  %3497 = vmatmul.f32.gmra.mxu2 %v3371_v57  ;;  %3931 = vmatmul.f32.gmra.mxu0 %v3869_v8  ;;  %v4818_v57 = vmul.f32 %v11110_v53, %v4802_v52  ;;  %7363 = vrcp.f32 %v11479_v56  ;;  %v4305_v12 = vmul.f32 %v7354_v41, %v4289_v2 }
 0x698   : > { %7365 = vrcp.f32 %v4729_v48  ;;  %v4819_v52 = vmul.f32 %v11195_v55, %v4803_v35  ;;  %v6986_v55 = vpack.i.bf16 %v11489_v36, %v11470_v24 }
 0x699   : > { %v4321_v4 = vmul.f32 %v11132_v1, %v4305_v12 }
 0x69a   : > { %v11562_v25 = vpop.eup %7357 }
 0x69b   : > { %5188 = vadd.xlane.f32.xlu0 %v11562_v25  ;;  %v7360_v50 = vpop.eup %7359  ;;  %v11575_v8 = vpop.f32.mrf.mxu0 }
 0x69c   : > { %6997 = vrot.lane.b32.xlu1 %v6996_v3, %s7832_s21  ;;  %v7362_v15 = vpop.eup %7361  ;;  %v4274_v5 = vmul.f32 %v7360_v50, %v11440_v20 }
 0x69d   : > { %v4772_v53 = vmul.f32 %v7362_v15, %v11462_v27  ;;  %v7364_v59 = vpop.eup %7363  ;;  %v6991_v27 = vpack.i.bf16 %v11526_v44, %v11505_v39  ;;  %v11582_v1 = vpop.xlane.xlu2 %5124 }
 0x69e   : > { %v4290_v29 = vsub.f32 2.0, %v4274_v5  ;;  %v7366_v33 = vpop.eup %7365  ;;  %v4275_v20 = vmul.f32 %v7364_v59, %v11479_v56 }
 0x69f   : > { %v4233_v45 = vpop.xlane.xlu1 %4232  ;;  %4416 = vmatmul.f32.vlgmr.msra.gmra.mxu2 %v4320_v54  ;;  %4850 = vmatmul.f32.vlgmr.msrb.gmra.mxu0 %v4818_v57  ;;  %v4788_v7 = vsub.f32 2.0, %v4772_v53  ;;  %v4773_v2 = vmul.f32 %v7366_v33, %v4729_v48 }
 0x6a0   : > { %7367 = vrcp.f32 %v4233_v45  ;;  %v4306_v41 = vmul.f32 %v7360_v50, %v4290_v29  ;;  %v4291_v54 = vsub.f32 2.0, %v4275_v20 }
 0x6a1   : > { %v4804_v57 = vmul.f32 %v7362_v15, %v4788_v7  ;;  %v4789_v56 = vsub.f32 2.0, %v4773_v2  ;;  %v4735_v15 = vpop.xlane.xlu0 %4734  ;;  %v5146_v7 = vsub.f32 %v11276_v19, %v11539_v28 }
 0x6a2   : > { %v4322_v42 = vmul.f32 %v11180_v14, %v4306_v41  ;;  %v4307_v48 = vmul.f32 %v7364_v59, %v4291_v54 }
 0x6a3   : > { %v11588_v12 = vpop.f32.mrf.mxu0  ;;  %v4820_v39 = vmul.f32 %v11200_v21, %v4804_v57  ;;  %v4805_v24 = vmul.f32 %v7366_v33, %v4789_v56  ;;  %v5168_v20 = vmul.f32 1.442695, %v5146_v7 }
 0x6a4   : > { %v4323_v29 = vmul.f32 %v11221_v0, %v4307_v48 }
 0x6a5   : > { %v4821_v21 = vmul.f32 %v11234_v62, %v4805_v24 }
 0x6a6   : > { %v7368_v50 = vpop.eup %7367  ;;  %v11592_v36 = vpop.xlane.xlu2 %4738 }
 0x6a7   : > { %v4731_v3 = vpop.xlane.xlu1 %4730  ;;  %4419 = vmatmul.f32.gmra.mxu2 %v4321_v4  ;;  %4853 = vmatmul.f32.gmra.mxu0 %v4819_v52  ;;  %v4276_v35 = vmul.f32 %v7368_v50, %v4233_v45 }
 0x6a8   : > { %7369 = vrcp.f32 %v4731_v3 }
 0x6a9   : > { %v4292_v53 = vsub.f32 2.0, %v4276_v35  ;;  %v4737_v0 = vpop.xlane.xlu0 %4736 }
 0x6ab   : > { %6992 = vrot.lane.b32.xlu2 %v6991_v27, %s7832_s21  ;;  %v11598_v59 = vpop.f32.mrf.mxu0  ;;  %v4308_v45 = vmul.f32 %v7368_v50, %v4292_v53 }
 0x6ad   : > { %v4324_v62 = vmul.f32 %v11355_v61, %v4308_v45  ;;  %v5143_v45 = vsub.f32 %v11342_v23, %v11556_v17 }
 0x6ae   : > { %v7370_v44 = vpop.eup %7369  ;;  %v5127_v27 = vpop.xlane.xlu2 %5126 }
 0x6af   : > { %v4235_v5 = vpop.xlane.xlu1 %4234  ;;  %6987 = vrot.lane.b32.xlu0 %v6986_v55, %s7832_s21  ;;  %4422 = vmatmul.f32.gmra.mxu2 %v4322_v42  ;;  %v4774_v14 = vmul.f32 %v7370_v44, %v4731_v3  ;;  %v5149_v54 = vsub.f32 %v11388_v47, %v5127_v27  ;;  %v5147_v47 = vsub.f32 %v11310_v9, %v11571_v18 }
 0x6b0   : > { %7371 = vrcp.f32 %v4235_v5  ;;  %4856 = vmatmul.f32.gmra.mxu0 %v4820_v39 }
 0x6b1   : > { %v4790_v52 = vsub.f32 2.0, %v4774_v14  ;;  %7373 = vrcp.f32 %v4237_v34  ;;  %v5174_v48 = vmul.f32 1.442695, %v5149_v54  ;;  %v4241_v14 = vpop.xlane.xlu0 %4240 }
 0x6b3   : > { %v4806_v3 = vmul.f32 %v7370_v44, %v4790_v52 }
 0x6b5   : > { %v4822_v19 = vmul.f32 %v11372_v43, %v4806_v3 }
 0x6b6   : > { %v7372_v4 = vpop.eup %7371 }
 0x6b7   : > { %v4733_v41 = vpop.xlane.xlu1 %4732  ;;  %4425 = vmatmul.f32.gmra.mxu2 %v4323_v29  ;;  %v4277_v33 = vmul.f32 %v7372_v4, %v4235_v5  ;;  %v7374_v57 = vpop.eup %7373 }
 0x6b8   : > { %7375 = vrcp.f32 %v4733_v41  ;;  %4859 = vmatmul.f32.gmra.mxu0 %v4821_v21  ;;  %v4278_v50 = vmul.f32 %v7374_v57, %v4237_v34  ;;  %v11606_v5 = vpop.f32.mrf.mxu0  ;;  %v11615_v21 = vpop.f32.mrf.mxu2 }
 0x6b9   : > { %7377 = vrcp.f32 %v4735_v15  ;;  %v4293_v2 = vsub.f32 2.0, %v4277_v33  ;;  %v4741_v33 = vpop.xlane.xlu2 %4740 }
 0x6ba   : > { %7379 = vpow2.f32 %v5168_v20  ;;  %v4294_v24 = vsub.f32 2.0, %v4278_v50 }
 0x6bb   : > { %7381 = vrcp.f32 %v11554_v10  ;;  %v4309_v39 = vmul.f32 %v7372_v4, %v4293_v2 }
 0x6bc   : > { %7383 = vrcp.f32 %v4737_v0  ;;  %v4310_v9 = vmul.f32 %v7374_v57, %v4294_v24 }
 0x6bd   : > { %v4325_v53 = vmul.f32 %v11390_v30, %v4309_v39  ;;  %7385 = vpow2.f32 %v5174_v48  ;;  %v5170_v30 = vmul.f32 1.442695, %v5147_v47  ;;  %v13234_v48 = vld [vmem:[#allocation78_spill] sm:$0xff] }
 0x6be   : > { %v7376_v55 = vpop.eup %7375  ;;  %7387 = vrcp.f32 %v4241_v14 }
 0x6bf   : > { %v7378_v28 = vpop.eup %7377  ;;  %v4775_v42 = vmul.f32 %v7376_v55, %v4733_v41  ;;  %v11603_v56 = vpop.xlane.xlu1 %4242  ;;  %4428 = vmatmul.f32.gmra.mxu2 %v4324_v62  ;;  %7389 = vrcp.f32 %v11592_v36 }
 0x6c0   : > { %4862 = vmatmul.f32.gmra.mxu0 %v4822_v19  ;;  %v4776_v61 = vmul.f32 %v7378_v28, %v4735_v15  ;;  %v11608_v35 = vpop.eup %7379  ;;  %v11622_v20 = vpop.f32.mrf.mxu0  ;;  %7391 = vpow2.f32 %v5170_v30 }
 0x6c1   : > { %v4791_v44 = vsub.f32 2.0, %v4775_v42  ;;  %v7382_v34 = vpop.eup %7381 }
 0x6c2   : > { %v4792_v52 = vsub.f32 2.0, %v4776_v61  ;;  %v7384_v4 = vpop.eup %7383  ;;  %v4279_v18 = vmul.f32 %v7382_v34, %v11554_v10  ;;  %v4326_v10 = vmul.f32 %v11254_v46, %v4310_v9  ;;  %v11634_v46 = vpop.f32.mrf.mxu2 }
 0x6c3   : > { %v4807_v43 = vmul.f32 %v7376_v55, %v4791_v44  ;;  %v4777_v41 = vmul.f32 %v7384_v4, %v4737_v0  ;;  %v11624_v27 = vpop.eup %7385  ;;  %v5162_v55 = vmul.f32 1.442695, %v5143_v45  ;;  %v4684_v0 = vsub.f32 %v11119_v26, %v11405_v32  ;;  %v4245_v61 = vpop.xlane.xlu2 %4244 }
 0x6c4   : > { %v4295_v2 = vsub.f32 2.0, %v4279_v18  ;;  %v7388_v57 = vpop.eup %7387  ;;  %v13238_v18 = vld [vmem:[#allocation74_spill] sm:$0xff] }
 0x6c5   : > { %v4823_v29 = vmul.f32 %v11409_v6, %v4807_v43  ;;  %v4808_v6 = vmul.f32 %v7378_v28, %v4792_v52  ;;  %v4793_v62 = vsub.f32 2.0, %v4777_v41  ;;  %v7390_v17 = vpop.eup %7389  ;;  %v13233_v28 = vld [vmem:[#allocation43_spill] sm:$0xff]  ;;  %v4710_v26 = vmul.f32 1.442695, %v4684_v0  ;;  %v13237_v52 = vld [vmem:[#allocation37_spill] sm:$0xff] }
 0x6c6   : > { %5200 = vadd.xlane.f32.xlu1 %v11608_v35  ;;  %v4311_v19 = vmul.f32 %v7382_v34, %v4295_v2  ;;  %v5144_v54 = vsub.f32 %v13233_v28, %v11497_v60  ;;  %v11639_v50 = vpop.eup %7391  ;;  %v13236_v34 = vld [vmem:[#allocation54_spill] sm:$0xff]  ;;  %v5145_v30 = vsub.f32 %v13238_v18, %v11520_v63 }
 0x6c7   : > { %v5129_v15 = vpop.xlane.xlu1 %5128  ;;  %4431 = vmatmul.f32.gmra.mxu2 %v4325_v53  ;;  %v4824_v23 = vmul.f32 %v11306_v49, %v4808_v6  ;;  %v4809_v42 = vmul.f32 %v7384_v4, %v4793_v62  ;;  %v4778_v49 = vmul.f32 %v7390_v17, %v11592_v36  ;;  %v13235_v36 = vld [vmem:[#allocation80_spill] sm:$0xff]  ;;  %v4685_v4 = vsub.f32 %v13237_v52, %v13236_v34 }
 0x6c8   : > { %v5150_v7 = vsub.f32 %v11433_v13, %v5129_v15  ;;  %4865 = vmatmul.f32.gmra.mxu0 %v4823_v29  ;;  %v5148_v13 = vsub.f32 %v11335_v38, %v11582_v1  ;;  %v4280_v1 = vmul.f32 %v7388_v57, %v4241_v14  ;;  %v11641_v32 = vpop.f32.mrf.mxu0  ;;  %v4327_v43 = vmul.f32 %v13234_v48, %v4311_v19  ;;  %v13242_v48 = vld [vmem:[#allocation91_spill] sm:$0xff]  ;;  %v5711_v34 = vld [vmem:[#allocation7 + $0x150] sm:$0xff] }
 0x6c9   : > { %v5164_v60 = vmul.f32 1.442695, %v5144_v54  ;;  %v4794_v47 = vsub.f32 2.0, %v4778_v49  ;;  %v4825_v53 = vmul.f32 %v13235_v36, %v4809_v42  ;;  %v5166_v0 = vmul.f32 1.442695, %v5145_v30  ;;  %v5714_v42 = vld [vmem:[#allocation7 + $0x168] sm:$0xff] }
 0x6ca   : > { %v5176_v3 = vmul.f32 1.442695, %v5150_v7  ;;  %v5172_v38 = vmul.f32 1.442695, %v5148_v13  ;;  %v4296_v44 = vsub.f32 2.0, %v4280_v1  ;;  %v11661_v2 = vpop.f32.mrf.mxu2  ;;  %5821 = vmatpush.msrb.mxu3 %v5714_v42  ;;  %v13243_v36 = vld [vmem:[#allocation93_spill] sm:$0xff] }
 0x6cb   : > { %v4810_v6 = vmul.f32 %v7390_v17, %v4794_v47 }
 0x6cc   : > { %7393 = vpow2.f32 %v5176_v3  ;;  %v4312_v7 = vmul.f32 %v7388_v57, %v4296_v44  ;;  %v4712_v3 = vmul.f32 1.442695, %v4685_v4  ;;  %5822 = vmatpush.msrb.mxu3 %v5711_v34  ;;  %v5684_v34 = vld [vmem:[#allocation7 + $0x78] sm:$0xff] }
 0x6cd   : > { %7395 = vrcp.f32 %v11603_v56 }
 0x6ce   : > { %5206 = vadd.xlane.f32.xlu1 %v11624_v27  ;;  %7397 = vrcp.f32 %v4741_v33  ;;  %v4247_v57 = vpop.xlane.xlu0 %4246 }
 0x6cf   : > { %4434 = vmatmul.f32.gmra.mxu2 %v4326_v10  ;;  %7399 = vpow2.f32 %v5162_v55  ;;  %v11647_v14 = vpop.xlane.xlu1 %5130 }
 0x6d0   : > { %4868 = vmatmul.f32.gmra.mxu0 %v4824_v23  ;;  %7401 = vpow2.f32 %v5172_v38  ;;  %v11667_v23 = vpop.f32.mrf.mxu0 }
 0x6d1   : > { %7403 = vpow2.f32 %v4710_v26  ;;  %13240 = vst [vmem:[#allocation98_spill] sm:$0xff] %v11667_v23 }
 0x6d2   : > { %v11644_v39 = vpop.eup %7393  ;;  %7405 = vrcp.f32 %v4245_v61  ;;  %v11676_v26 = vpop.f32.mrf.mxu2 }
 0x6d3   : > { %v7396_v24 = vpop.eup %7395  ;;  %7407 = vpow2.f32 %v5164_v60 }
 0x6d4   : > { %5202 = vadd.xlane.f32.xlu2 %v11639_v50  ;;  %v7398_v29 = vpop.eup %7397  ;;  %v4281_v9 = vmul.f32 %v7396_v24, %v11603_v56  ;;  %v13239_v56 = vld [vmem:[#allocation81_spill] sm:$0xff]  ;;  %7409 = vpow2.f32 %v4712_v3 }
 0x6d5   : > { %v11653_v15 = vpop.eup %7399  ;;  %v4779_v41 = vmul.f32 %v7398_v29, %v4741_v33  ;;  %v4328_v62 = vmul.f32 %v13239_v56, %v4312_v7  ;;  %v13241_v33 = vld [vmem:[#allocation90_spill] sm:$0xff]  ;;  %7411 = vrcp.f32 %v4247_v57 }
 0x6d6   : > { %5208 = vadd.xlane.f32.xlu1 %v11644_v39  ;;  %v11659_v45 = vpop.eup %7401  ;;  %v4297_v10 = vsub.f32 2.0, %v4281_v9  ;;  %v4826_v19 = vmul.f32 %v13241_v33, %v4810_v6  ;;  %7413 = vpow2.f32 %v5166_v0  ;;  %v5708_v9 = vld [vmem:[#allocation7 + $0x138] sm:$0xff]  ;;  %v11687_v18 = vpop.xlane.xlu0 %5132  ;;  %v5699_v0 = vld [vmem:[#allocation7 + $0xf0] sm:$0xff] }
 0x6d7   : > { %4437 = vmatmul.f32.gmra.mxu2 %v4327_v43  ;;  %v11664_v13 = vpop.eup %7403  ;;  %v4795_v63 = vsub.f32 2.0, %v4779_v41  ;;  %5823 = vmatpush.msrb.mxu3 %v5708_v9  ;;  %v13245_v41 = vld [vmem:[#allocation68_spill] sm:$0xff] }
 0x6d8   : > { %4871 = vmatmul.f32.gmra.mxu0 %v4825_v53  ;;  %v7406_v55 = vpop.eup %7405  ;;  %v4313_v28 = vmul.f32 %v7396_v24, %v4297_v10  ;;  %v5678_v9 = vld [vmem:[#allocation7 + $0x48] sm:$0xff] }
 0x6d9   : > { %5194 = vadd.xlane.f32.xlu0 %v11653_v15  ;;  %v11671_v38 = vpop.eup %7407  ;;  %v4282_v1 = vmul.f32 %v7406_v55, %v4245_v61  ;;  %v4811_v54 = vmul.f32 %v7398_v29, %v4795_v63  ;;  %v11684_v29 = vpop.f32.mrf.mxu0 }
 0x6da   : > { %v11674_v49 = vpop.eup %7409  ;;  %v4329_v43 = vmul.f32 %v13242_v48, %v4313_v28  ;;  %13244 = vst [vmem:[#allocation84_spill] sm:$0xff] %v11684_v29  ;;  %v11689_v30 = vpop.f32.mrf.mxu2  ;;  %v5696_v28 = vld [vmem:[#allocation7 + $0xd8] sm:$0xff] }
 0x6db   : > { %v4298_v44 = vsub.f32 2.0, %v4282_v1  ;;  %v7412_v60 = vpop.eup %7411  ;;  %v4827_v61 = vmul.f32 %v13243_v36, %v4811_v54  ;;  %v5693_v54 = vld [vmem:[#allocation7 + $0xc0] sm:$0xff]  ;;  %v5690_v36 = vld [vmem:[#allocation7 + $0xa8] sm:$0xff] }
 0x6dc   : > { %5204 = vadd.xlane.f32.xlu2 %v11659_v45  ;;  %v11682_v53 = vpop.eup %7413  ;;  %v4283_v4 = vmul.f32 %v7412_v60, %v4247_v57  ;;  %v5702_v57 = vld [vmem:[#allocation7 + $0x108] sm:$0xff] }
 0x6dd   : > { %v4314_v52 = vmul.f32 %v7406_v55, %v4298_v44 }
 0x6de   : > { %v4249_v17 = vpop.xlane.xlu1 %4248  ;;  %4742 = vadd.xlane.f32.xlu1 %v11664_v13  ;;  %v4299_v6 = vsub.f32 2.0, %v4283_v4  ;;  %v4253_v44 = vpop.xlane.xlu0 %4252 }
 0x6df   : > { %4440 = vmatmul.f32.gmra.mxu2 %v4328_v62  ;;  %7415 = vrcp.f32 %v4249_v17  ;;  %v4330_v3 = vmul.f32 %v13245_v41, %v4314_v52  ;;  %v5681_v52 = vld [vmem:[#allocation7 + $0x60] sm:$0xff] }
 0x6e0   : > { %4874 = vmatmul.f32.gmra.mxu0 %v4826_v19  ;;  %v4315_v33 = vmul.f32 %v7412_v60, %v4299_v6 }
 0x6e1   : > { %5196 = vadd.xlane.f32.xlu0 %v11671_v38 }
 0x6e5   : > { %v7416_v10 = vpop.eup %7415 }
 0x6e6   : > { %v5135_v47 = vpop.xlane.xlu1 %5134  ;;  %4744 = vadd.xlane.f32.xlu1 %v11674_v49  ;;  %v4284_v19 = vmul.f32 %v7416_v10, %v4249_v17  ;;  %v5687_v17 = vld [vmem:[#allocation7 + $0x90] sm:$0xff] }
 0x6e7   : > { %v5153_v24 = vsub.f32 %v11485_v51, %v5135_v47  ;;  %4443 = vmatmul.f32.gmra.mxu2 %v4329_v43  ;;  %v5705_v51 = vld [vmem:[#allocation7 + $0x120] sm:$0xff]  ;;  %v11697_v43 = vpop.f32.mrf.mxu2 }
 0x6e8   : > { %4877 = vmatmul.f32.gmra.mxu0 %v4827_v61  ;;  %5824 = vmatpush.msrb.mxu3 %v5705_v51  ;;  %v4300_v42 = vsub.f32 2.0, %v4284_v19 }
 0x6e9   : > { %v5182_v7 = vmul.f32 1.442695, %v5153_v24  ;;  %5198 = vadd.xlane.f32.xlu0 %v11682_v53 }
 0x6ea   : > { %5825 = vmatpush.msrb.mxu3 %v5702_v57  ;;  %v4316_v61 = vmul.f32 %v7416_v10, %v4300_v42 }
 0x6eb   : > { %7417 = vpow2.f32 %v5182_v7 }
 0x6ec   : > { %5826 = vmatpush.msrb.mxu3 %v5699_v0  ;;  %v4332_v7 = vmul.f32 %v11472_v11, %v4316_v61  ;;  %v5669_v11 = vld [vmem:[#allocation7] sm:$0xff] }
 0x6ee   : > { %v5137_v56 = vpop.xlane.xlu1 %5136  ;;  %v4251_v62 = vpop.xlane.xlu2 %4250  ;;  %5827 = vmatpush.msrb.mxu3 %v5696_v28 }
 0x6ef   : > { %v5154_v55 = vsub.f32 %v11503_v16, %v5137_v56  ;;  %4446 = vmatmul.f32.gmra.mxu2 %v4330_v3  ;;  %7419 = vrcp.f32 %v4251_v62  ;;  %v4331_v16 = vmul.f32 %v11438_v40, %v4315_v33  ;;  %v7001_v40 = vpack.i.bf16 %v11634_v46, %v11615_v21  ;;  %v5675_v3 = vld [vmem:[#allocation7 + $0x30] sm:$0xff]  ;;  %v11707_v10 = vpop.f32.mrf.mxu2 }
 0x6f0   : > { %5828 = vmatpush.msrb.mxu3 %v5693_v54 }
 0x6f1   : > { %v11693_v63 = vpop.eup %7417  ;;  %v5184_v1 = vmul.f32 1.442695, %v5154_v55  ;;  %v13246_v55 = vld [vmem:[#allocation44_spill] sm:$0xff] }
 0x6f2   : > { %5214 = vadd.xlane.f32.xlu2 %v11693_v63  ;;  %5829 = vmatpush.msrb.mxu3 %v5690_v36  ;;  %v7006_v36 = vpack.i.bf16 %v11676_v26, %v11661_v2 }
 0x6f3   : > { %7421 = vpow2.f32 %v5184_v1 }
 0x6f4   : > { %7423 = vrcp.f32 %v4253_v44  ;;  %5830 = vmatpush.msrb.mxu3 %v5687_v17 }
 0x6f5   : > { %v7420_v48 = vpop.eup %7419 }
 0x6f6   : > { %v4255_v47 = vpop.xlane.xlu2 %4254  ;;  %v4285_v24 = vmul.f32 %v7420_v48, %v4251_v62  ;;  %5831 = vmatpush.msrb.mxu3 %v5684_v34  ;;  %v5672_v62 = vld [vmem:[#allocation7 + $0x18] sm:$0xff]  ;;  %v13248_v34 = vld [vmem:[#allocation79_spill] sm:$0xff] }
 0x6f7   : > { %4449 = vmatmul.f32.gmra.mxu2 %v4331_v16  ;;  %7425 = vrcp.f32 %v4255_v47 }
 0x6f8   : > { %v4301_v4 = vsub.f32 2.0, %v4285_v24  ;;  %5832 = vmatpush.msrb.mxu3 %v5681_v52 }
 0x6f9   : > { %v11699_v60 = vpop.eup %7421 }
 0x6fa   : > { %5216 = vadd.xlane.f32.xlu2 %v11699_v60  ;;  %v7424_v51 = vpop.eup %7423  ;;  %5833 = vmatpush.msrb.mxu3 %v5678_v9  ;;  %v4317_v46 = vmul.f32 %v7420_v48, %v4301_v4 }
 0x6fb   : > { %v4286_v21 = vmul.f32 %v7424_v51, %v4253_v44  ;;  %v13247_v44 = vld [vmem:[#allocation75_spill] sm:$0xff] }
 0x6fc   : > { %5834 = vmatpush.msrb.mxu3 %v5675_v3  ;;  %v4333_v0 = vmul.f32 %v13246_v55, %v4317_v46 }
 0x6fd   : > { %7002 = vrot.lane.b32.xlu0 %v7001_v40, %s7832_s21  ;;  %v4302_v57 = vsub.f32 2.0, %v4286_v21  ;;  %v7426_v33 = vpop.eup %7425 }
 0x6fe   : > { %v5139_v6 = vpop.xlane.xlu2 %5138  ;;  %5835 = vmatpush.msrb.mxu3 %v5672_v62  ;;  %v4287_v28 = vmul.f32 %v7426_v33, %v4255_v47  ;;  %v5193_v47 = vpop.xlane.xlu1 %5192 }
 0x6ff   : > { %v5155_v41 = vsub.f32 %v11536_v58, %v5139_v6  ;;  %4452 = vmatmul.f32.gmra.mxu2 %v4332_v7  ;;  %v11710_v58 = vpop.f32.mrf.mxu2  ;;  %v4318_v1 = vmul.f32 %v7424_v51, %v4302_v57  ;;  %v13249_v7 = vld [vmem:[#allocation96_spill] sm:$0xff] }
 0x700   : > { %5836 = vmatpush.msrb.mxu3 %v5669_v11  ;;  %v4303_v42 = vsub.f32 2.0, %v4287_v28  ;;  %v5151_v9 = vsub.f32 %v13249_v7, %v11647_v14  ;;  %v7011_v11 = vpack.i.bf16 %v11697_v43, %v11689_v30  ;;  %v13251_v28 = vld [vmem:[#allocation63_spill] sm:$0xff]  ;;  %v13253_v30 = vld [vmem:[#allocation94_spill] sm:$0xff]  ;;  %v13254_v43 = vld [vmem:[#allocation49_spill] sm:$0xff] }
 0x701   : > { %v5186_v56 = vmul.f32 1.442695, %v5155_v41  ;;  %v4334_v16 = vmul.f32 %v13247_v44, %v4318_v1  ;;  %v4687_v44 = vsub.f32 %v13254_v43, %v13253_v30 }
 0x702   : > { %v4319_v17 = vmul.f32 %v7426_v33, %v4303_v42  ;;  %v5178_v41 = vmul.f32 1.442695, %v5151_v9 }
 0x703   : > { %7427 = vpow2.f32 %v5186_v56  ;;  %v13250_v56 = vld [vmem:[#allocation99_spill] sm:$0xff] }
 0x704   : > { %v4335_v40 = vmul.f32 %v13248_v34, %v4319_v17  ;;  %v5152_v62 = vsub.f32 %v13250_v56, %v11687_v18  ;;  %v13255_v17 = vld [vmem:[#allocation60_spill] sm:$0xff]  ;;  %v4716_v34 = vmul.f32 1.442695, %v4687_v44  ;;  %v13266_v44 = vld [vmem:[#allocation83_spill] sm:$0xff] }
 0x706   : > { %v5191_v54 = vpop.xlane.xlu2 %5190  ;;  %v5180_v1 = vmul.f32 1.442695, %v5152_v62 }
 0x707   : > { %4455 = vmatmul.f32.gmra.mxu2 %v4333_v0  ;;  %7429 = vrcp.f32 %v5191_v54  ;;  %v11718_v61 = vpop.f32.mrf.mxu2 }
 0x709   : > { %v11712_v19 = vpop.eup %7427 }
 0x70a   : > { %5218 = vadd.xlane.f32.xlu1 %v11712_v19 }
 0x70d   : > { %v7430_v24 = vpop.eup %7429 }
 0x70e   : > { %v5189_v48 = vpop.xlane.xlu0 %5188  ;;  %v5237_v51 = vmul.f32 %v7430_v24, %v5191_v54 }
 0x70f   : > { %4458 = vmatmul.f32.gmra.mxu2 %v4334_v16  ;;  %7431 = vrcp.f32 %v5189_v48 }
 0x710   : > { %7433 = vrcp.f32 %v5193_v47  ;;  %v5253_v3 = vsub.f32 2.0, %v5237_v51 }
 0x711   : > { %7435 = vpow2.f32 %v5178_v41 }
 0x712   : > { %7007 = vrot.lane.b32.xlu2 %v7006_v36, %s7832_s21  ;;  %v5269_v57 = vmul.f32 %v7430_v24, %v5253_v3  ;;  %7437 = vpow2.f32 %v5180_v1  ;;  %v13256_v24 = vld [vmem:[#allocation39_spill] sm:$0xff]  ;;  %v13260_v3 = vld [vmem:[#allocation66_spill] sm:$0xff]  ;;  %v13265_v1 = vld [vmem:[#allocation41_spill] sm:$0xff] }
 0x713   : > { %7439 = vpow2.f32 %v4716_v34 }
 0x714   : > { %v5285_v18 = vmul.f32 %v11547_v37, %v5269_v57  ;;  %v13262_v57 = vld [vmem:[#allocation72_spill] sm:$0xff] }
 0x715   : > { %v7432_v52 = vpop.eup %7431 }
 0x716   : > { %v5236_v4 = vmul.f32 %v7432_v52, %v5189_v48  ;;  %v7434_v46 = vpop.eup %7433 }
 0x717   : > { %4461 = vmatmul.f32.gmra.mxu2 %v4335_v40  ;;  %v5238_v14 = vmul.f32 %v7434_v46, %v5193_v47  ;;  %v11740_v42 = vpop.eup %7435  ;;  %v4686_v47 = vsub.f32 %v13256_v24, %v13255_v17  ;;  %v13257_v40 = vld [vmem:[#allocation64_spill] sm:$0xff]  ;;  %v7016_v17 = vpack.i.bf16 %v11710_v58, %v11707_v10 }
 0x718   : > { %v5252_v6 = vsub.f32 2.0, %v5236_v4  ;;  %v13259_v4 = vld [vmem:[#allocation45_spill] sm:$0xff]  ;;  %v11755_v9 = vpop.eup %7437 }
 0x719   : > { %v5254_v54 = vsub.f32 2.0, %v5238_v14  ;;  %v4714_v51 = vmul.f32 1.442695, %v4686_v47 }
 0x71a   : > { %v11724_v2 = vpop.f32.mrf.mxu2  ;;  %v5268_v26 = vmul.f32 %v7432_v52, %v5252_v6  ;;  %v6993_v52 = vpop.permute.xlu2 %6992 }
 0x71b   : > { %v5270_v48 = vmul.f32 %v7434_v46, %v5254_v54  ;;  %v6994_v6 = vunpack.i.l.bf16 %v6993_v52  ;;  %7441 = vpow2.f32 %v4714_v51  ;;  %v11765_v46 = vpop.eup %7439  ;;  %v6995_v56 = vunpack.i.h.bf16 %v6993_v52  ;;  %v13268_v52 = vld [vmem:[#allocation77_spill] sm:$0xff] }
 0x71c   : > { %v5284_v21 = vmul.f32 %v11562_v25, %v5268_v26  ;;  %v6998_v26 = vpop.permute.xlu1 %6997 }
 0x71d   : > { %v5286_v7 = vmul.f32 %v13259_v4, %v5270_v48  ;;  %v6999_v54 = vunpack.i.l.bf16 %v6998_v26  ;;  %v7000_v48 = vunpack.i.h.bf16 %v6998_v26 }
 0x71f   : > { %5380 = vmatmul.f32.vlgmr.msrb.gmra.mxu2 %v5284_v21  ;;  %v11762_v21 = vsel %vm13261_vm2, %v13260_v3, %v6994_v6  ;;  %v11802_v4 = vsel %vm13269_vm5, %v13268_v52, %v7000_v48  ;;  %vm13294_vm2 = vmmov %vm13252_vm0 }
 0x720   : > { %vm13297_vm5 = vmmov %vm13252_vm0 }
 0x721   : > { %v6988_v55 = vpop.permute.xlu0 %6987 }
 0x722   : > { %v6989_v0 = vunpack.i.l.bf16 %v6988_v55  ;;  %v11731_v33 = vpop.f32.mrf.mxu2  ;;  %v6990_v16 = vunpack.i.h.bf16 %v6988_v55  ;;  %v11777_v55 = vsel %vm13263_vm3, %v13262_v57, %v6995_v56  ;;  %vm13295_vm3 = vmmov %vm13252_vm0 }
 0x723   : > { %7012 = vrot.lane.b32.xlu1 %v7011_v11, %s7832_s21  ;;  %v11770_v11 = vpop.eup %7441 }
 0x724   : > { %v11736_v25 = vsel %vm13252_vm0, %v13251_v28, %v6989_v0  ;;  %v11751_v37 = vsel %vm13258_vm1, %v13257_v40, %v6990_v16  ;;  %v13264_v0 = vld [vmem:[#allocation87_spill] sm:$0xff]  ;;  %v11788_v16 = vsel %vm13267_vm4, %v13266_v44, %v6999_v54  ;;  %vm13292_vm1 = vmmov %vm13252_vm0 }
 0x725   : > { %5837 = vmatmul.f32.vlgmr.msrb.gmra.mxu3 %v11736_v25  ;;  %v4688_v28 = vsub.f32 %v13265_v1, %v13264_v0  ;;  %vm13296_vm4 = vmmov %vm13252_vm0 }
 0x727   : > { %5210 = vadd.xlane.f32.xlu0 %v11740_v42  ;;  %5383 = vmatmul.f32.gmra.mxu2 %v5285_v18  ;;  %v4718_v30 = vmul.f32 1.442695, %v4688_v28 }
 0x729   : > { %7443 = vpow2.f32 %v4718_v30 }
 0x72a   : > { %v11745_v36 = vpop.f32.mrf.mxu2 }
 0x72d   : > { %5840 = vmatmul.f32.gmra.mxu3 %v11751_v37 }
 0x72f   : > { %5212 = vadd.xlane.f32.xlu0 %v11755_v9  ;;  %5386 = vmatmul.f32.gmra.mxu2 %v5286_v7  ;;  %v11798_v34 = vpop.eup %7443 }
 0x732   : > { %v11758_v41 = vpop.f32.mrf.mxu2 }
 0x735   : > { %5843 = vmatmul.f32.gmra.mxu3 %v11762_v21 }
 0x737   : > { %4748 = vadd.xlane.f32.xlu0 %v11765_v46 }
 0x739   : > { %v11768_v62 = vpop.xlane.xlu1 %5200 }
 0x73a   : > { %v11772_v14 = vpop.f32.mrf.mxu2 }
 0x73b   : > { %4746 = vadd.xlane.f32.xlu2 %v11770_v11 }
 0x73d   : > { %5846 = vmatmul.f32.gmra.mxu3 %v11777_v55 }
 0x741   : > { %v11782_v18 = vpop.xlane.xlu1 %5206 }
 0x742   : > { %v11784_v43 = vpop.f32.mrf.mxu2 }
 0x745   : > { %5849 = vmatmul.f32.gmra.mxu3 %v11788_v16 }
 0x747   : > { %v5203_v26 = vpop.xlane.xlu2 %5202 }
 0x749   : > { %v11793_v24 = vpop.xlane.xlu1 %5208 }
 0x74a   : > { %v11795_v47 = vpop.f32.mrf.mxu2 }
 0x74b   : > { %7017 = vrot.lane.b32.xlu0 %v7016_v17, %s7832_s21 }
 0x74c   : > { %v5195_v40 = vpop.xlane.xlu0 %5194 }
 0x74d   : > { %7445 = vrcp.f32 %v5195_v40  ;;  %4750 = vadd.xlane.f32.xlu1 %v11798_v34  ;;  %5852 = vmatmul.f32.gmra.mxu3 %v11802_v4 }
 0x74f   : > { %v5205_v52 = vpop.xlane.xlu2 %5204 }
 0x751   : > { %v4743_v7 = vpop.xlane.xlu1 %4742 }
 0x752   : > { %7447 = vrcp.f32 %v4743_v7  ;;  %v11806_v10 = vpop.f32.mrf.mxu2 }
 0x753   : > { %v7446_v58 = vpop.eup %7445  ;;  %5473 = vrot.lane.b32.xlu2 %v11718_v61, %s7832_s21 }
 0x754   : > { %v5239_v51 = vmul.f32 %v7446_v58, %v5195_v40  ;;  %v5197_v6 = vpop.xlane.xlu0 %5196 }
 0x755   : > { %7449 = vrcp.f32 %v5197_v6 }
 0x756   : > { %v5255_v3 = vsub.f32 2.0, %v5239_v51 }
 0x758   : > { %v7448_v56 = vpop.eup %7447  ;;  %v5271_v57 = vmul.f32 %v7446_v58, %v5255_v3  ;;  %v11815_v3 = vpop.f32.mrf.mxu0 }
 0x759   : > { %v4780_v0 = vmul.f32 %v7448_v56, %v4743_v7  ;;  %v4745_v1 = vpop.xlane.xlu1 %4744 }
 0x75a   : > { %7451 = vrcp.f32 %v4745_v1  ;;  %v11810_v28 = vpop.f32.mrf.mxu2  ;;  %v5287_v54 = vmul.f32 %v11653_v15, %v5271_v57 }
 0x75b   : > { %v7450_v30 = vpop.eup %7449  ;;  %v4796_v44 = vsub.f32 2.0, %v4780_v0  ;;  %7453 = vrcp.f32 %v11768_v62 }
 0x75c   : > { %v5240_v48 = vmul.f32 %v7450_v30, %v5197_v6  ;;  %5389 = vmatmul.f32.gmra.mxu2 %v5287_v54  ;;  %v5199_v61 = vpop.xlane.xlu0 %5198 }
 0x75d   : > { %v4812_v17 = vmul.f32 %v7448_v56, %v4796_v44  ;;  %7455 = vrcp.f32 %v5199_v61  ;;  %v13270_v44 = vld [vmem:[#allocation70_spill] sm:$0xff] }
 0x75e   : > { %v5256_v40 = vsub.f32 2.0, %v5240_v48  ;;  %7457 = vrcp.f32 %v5203_v26  ;;  %v13271_v48 = vld [vmem:[#allocation73_spill] sm:$0xff] }
 0x75f   : > { %v4828_v58 = vmul.f32 %v11664_v13, %v4812_v17  ;;  %v4689_v13 = vsub.f32 %v13271_v48, %v13270_v44  ;;  %7459 = vrcp.f32 %v5205_v52 }
 0x760   : > { %v7452_v7 = vpop.eup %7451  ;;  %v5272_v51 = vmul.f32 %v7450_v30, %v5256_v40 }
 0x761   : > { %v4781_v29 = vmul.f32 %v7452_v7, %v4745_v1  ;;  %4880 = vmatmul.f32.gmra.mxu0 %v4828_v58  ;;  %v7454_v15 = vpop.eup %7453  ;;  %v11828_v58 = vpop.f32.mrf.mxu0 }
 0x762   : > { %v11817_v57 = vpop.f32.mrf.mxu2  ;;  %v5288_v0 = vmul.f32 %v11671_v38, %v5272_v51  ;;  %v5242_v30 = vmul.f32 %v7454_v15, %v11768_v62 }
 0x763   : > { %v7456_v6 = vpop.eup %7455  ;;  %v4797_v54 = vsub.f32 2.0, %v4781_v29  ;;  %v4720_v29 = vmul.f32 1.442695, %v4689_v13 }
 0x764   : > { %v5241_v23 = vmul.f32 %v7456_v6, %v5199_v61  ;;  %5392 = vmatmul.f32.gmra.mxu2 %v5288_v0  ;;  %v5258_v61 = vsub.f32 2.0, %v5242_v30  ;;  %v7458_v0 = vpop.eup %7457 }
 0x765   : > { %v4813_v56 = vmul.f32 %v7452_v7, %v4797_v54  ;;  %v11825_v1 = vpop.xlane.xlu2 %5214  ;;  %7461 = vpow2.f32 %v4720_v29 }
 0x766   : > { %v5257_v17 = vsub.f32 2.0, %v5241_v23  ;;  %5475 = vrot.lane.b32.xlu1 %v11724_v2, %s7832_s21  ;;  %v5274_v23 = vmul.f32 %v7454_v15, %v5258_v61  ;;  %v5243_v2 = vmul.f32 %v7458_v0, %v5203_v26  ;;  %7463 = vrcp.f32 %v11782_v18  ;;  %v13274_v61 = vld [vmem:[#allocation82_spill] sm:$0xff] }
 0x767   : > { %v4829_v40 = vmul.f32 %v11674_v49, %v4813_v56  ;;  %v13272_v56 = vld [vmem:[#allocation76_spill] sm:$0xff]  ;;  %7465 = vrcp.f32 %v11793_v24 }
 0x768   : > { %v5273_v38 = vmul.f32 %v7456_v6, %v5257_v17  ;;  %v5259_v49 = vsub.f32 2.0, %v5243_v2  ;;  %v5290_v13 = vmul.f32 %v11608_v35, %v5274_v23 }
 0x769   : > { %4883 = vmatmul.f32.gmra.mxu0 %v4829_v40  ;;  %v11847_v40 = vpop.f32.mrf.mxu0 }
 0x76a   : > { %v11830_v7 = vpop.f32.mrf.mxu2  ;;  %v5289_v51 = vmul.f32 %v11682_v53, %v5273_v38  ;;  %v7460_v53 = vpop.eup %7459  ;;  %v5275_v26 = vmul.f32 %v7458_v0, %v5259_v49 }
 0x76b   : > { %v11843_v30 = vpop.eup %7461  ;;  %v5244_v15 = vmul.f32 %v7460_v53, %v5205_v52 }
 0x76c   : > { %5395 = vmatmul.f32.gmra.mxu2 %v5289_v51  ;;  %v5291_v51 = vmul.f32 %v11639_v50, %v5275_v26  ;;  %v7464_v23 = vpop.eup %7463 }
 0x76d   : > { %v11833_v44 = vpop.xlane.xlu2 %5216  ;;  %v5260_v38 = vsub.f32 2.0, %v5244_v15  ;;  %v5245_v52 = vmul.f32 %v7464_v23, %v11782_v18  ;;  %v7466_v26 = vpop.eup %7465 }
 0x76e   : > { %v5246_v18 = vmul.f32 %v7466_v26, %v11793_v24 }
 0x76f   : > { %v7003_v62 = vpop.permute.xlu0 %7002  ;;  %v5276_v0 = vmul.f32 %v7460_v53, %v5260_v38  ;;  %v5261_v49 = vsub.f32 2.0, %v5245_v52 }
 0x770   : > { %v7004_v54 = vunpack.i.l.bf16 %v7003_v62  ;;  %v7005_v17 = vunpack.i.h.bf16 %v7003_v62 }
 0x771   : > { %v5292_v50 = vmul.f32 %v11659_v45, %v5276_v0  ;;  %v5277_v15 = vmul.f32 %v7464_v23, %v5261_v49  ;;  %v5709_v49 = vld [vmem:[#allocation7 + $0x140] sm:$0xff] }
 0x772   : > { %v11835_v6 = vpop.f32.mrf.mxu2  ;;  %v11839_v48 = vsel %vm13273_vm7, %v13272_v56, %v7004_v54  ;;  %v11853_v35 = vsel %vm13275_vm8, %v13274_v61, %v7005_v17  ;;  %v11859_v54 = vpop.f32.mrf.mxu0  ;;  %v5262_v17 = vsub.f32 2.0, %v5246_v18  ;;  %v5703_v18 = vld [vmem:[#allocation7 + $0x110] sm:$0xff]  ;;  %vm13298_vm7 = vmmov %vm13252_vm0 }
 0x773   : > { %5855 = vmatmul.f32.gmra.mxu3 %v11839_v48  ;;  %13276 = vst [vmem:[#allocation52_spill] sm:$0xff] %v11859_v54  ;;  %vm13299_vm8 = vmmov %vm13252_vm0 }
 0x774   : > { %5398 = vmatmul.f32.gmra.mxu2 %v5290_v13  ;;  %v5278_v23 = vmul.f32 %v7466_v26, %v5262_v17  ;;  %v5706_v26 = vld [vmem:[#allocation7 + $0x128] sm:$0xff]  ;;  %v5700_v17 = vld [vmem:[#allocation7 + $0xf8] sm:$0xff] }
 0x775   : > { %4752 = vadd.xlane.f32.xlu0 %v11843_v30  ;;  %v7008_v2 = vpop.permute.xlu2 %7007 }
 0x776   : > { %v7009_v62 = vunpack.i.l.bf16 %v7008_v2  ;;  %v7010_v53 = vunpack.i.h.bf16 %v7008_v2  ;;  %v5294_v24 = vmul.f32 %v11644_v39, %v5278_v23  ;;  %v5715_v2 = vld [vmem:[#allocation7 + $0x170] sm:$0xff]  ;;  %v5697_v23 = vld [vmem:[#allocation7 + $0xe0] sm:$0xff] }
 0x777   : > { %6016 = vmatpush.msra.mxu2 %v5715_v2  ;;  %v5694_v2 = vld [vmem:[#allocation7 + $0xc8] sm:$0xff] }
 0x778   : > { %v11865_v13 = vsel %vm13277_vm9, %v11549_v22, %v7009_v62  ;;  %v11874_v61 = vsel %vm13278_vm10, %v11564_v31, %v7010_v53  ;;  %v5293_v22 = vmul.f32 %v11624_v27, %v5277_v15  ;;  %v5712_v31 = vld [vmem:[#allocation7 + $0x158] sm:$0xff]  ;;  %vm13300_vm9 = vmmov %vm13252_vm0 }
 0x779   : > { %6017 = vmatpush.msra.mxu2 %v5712_v31  ;;  %vm13301_vm10 = vmmov %vm13252_vm0 }
 0x77a   : > { %v11849_v29 = vpop.f32.mrf.mxu2  ;;  %v11878_v45 = vpop.f32.mrf.mxu0 }
 0x77b   : > { %5858 = vmatmul.f32.gmra.mxu3 %v11853_v35  ;;  %13279 = vst [vmem:[#allocation50_spill] sm:$0xff] %v11878_v45  ;;  %6018 = vmatpush.msra.mxu2 %v5709_v49  ;;  %v5682_v45 = vld [vmem:[#allocation7 + $0x68] sm:$0xff] }
 0x77c   : > { %5401 = vmatmul.f32.gmra.mxu2 %v5291_v51 }
 0x77d   : > { %v11880_v51 = vpop.xlane.xlu1 %5218  ;;  %6019 = vmatpush.msra.mxu2 %v5706_v26  ;;  %v5691_v26 = vld [vmem:[#allocation7 + $0xb0] sm:$0xff] }
 0x77f   : > { %6020 = vmatpush.msra.mxu2 %v5703_v18 }
 0x781   : > { %6021 = vmatpush.msra.mxu2 %v5700_v17  ;;  %v5685_v17 = vld [vmem:[#allocation7 + $0x80] sm:$0xff] }
 0x782   : > { %v11861_v56 = vpop.f32.mrf.mxu2  ;;  %v11885_v62 = vpop.f32.mrf.mxu0 }
 0x783   : > { %5861 = vmatmul.f32.gmra.mxu3 %v11865_v13  ;;  %13280 = vst [vmem:[#allocation100_spill] sm:$0xff] %v11885_v62  ;;  %6022 = vmatpush.msra.mxu2 %v5697_v23 }
 0x784   : > { %5404 = vmatmul.f32.gmra.mxu2 %v5292_v50 }
 0x785   : > { %6023 = vmatpush.msra.mxu2 %v5694_v2 }
 0x787   : > { %6024 = vmatpush.msra.mxu2 %v5691_v26 }
 0x78a   : > { %v11870_v38 = vpop.f32.mrf.mxu2 }
 0x78b   : > { %5864 = vmatmul.f32.gmra.mxu3 %v11874_v61 }
 0x78c   : > { %5407 = vmatmul.f32.gmra.mxu2 %v5293_v22  ;;  %v11894_v22 = vpop.f32.mrf.mxu0 }
 0x78d   : > { %13282 = vst [vmem:[#allocation46_spill] sm:$0xff] %v11894_v22 }
 0x792   : > { %v11882_v52 = vpop.f32.mrf.mxu2 }
 0x794   : > { %5410 = vmatmul.f32.gmra.mxu2 %v5294_v24  ;;  %v11904_v22 = vpop.f32.mrf.mxu0 }
 0x795   : > { %v7013_v0 = vpop.permute.xlu1 %7012  ;;  %13284 = vst [vmem:[#allocation48_spill] sm:$0xff] %v11904_v22 }
 0x796   : > { %v7014_v27 = vunpack.i.l.bf16 %v7013_v0  ;;  %v7015_v53 = vunpack.i.h.bf16 %v7013_v0 }
 0x798   : > { %v11889_v50 = vsel %vm13281_vm12, %v11575_v8, %v7014_v27  ;;  %v11898_v8 = vsel %vm13283_vm13, %v11588_v12, %v7015_v53  ;;  %v5688_v12 = vld [vmem:[#allocation7 + $0x98] sm:$0xff]  ;;  %vm13303_vm12 = vmmov %vm13252_vm0 }
 0x799   : > { %5867 = vmatmul.f32.gmra.mxu3 %v11889_v50  ;;  %6025 = vmatpush.msra.mxu2 %v5688_v12  ;;  %v5763_v12 = vld [vmem:[#allocation7 + $0x2f0] sm:$0xff]  ;;  %vm13304_vm13 = vmmov %vm13252_vm0 }
 0x79a   : > { %v11892_v15 = vpop.f32.mrf.mxu2  ;;  %v5211_v39 = vpop.xlane.xlu0 %5210  ;;  %6081 = vmatpush.msra.mxu3 %v5763_v12 }
 0x79b   : > { %7467 = vrcp.f32 %v5211_v39  ;;  %6026 = vmatpush.msra.mxu2 %v5685_v17 }
 0x79c   : > { %7469 = vrcp.f32 %v11825_v1 }
 0x79d   : > { %6027 = vmatpush.msra.mxu2 %v5682_v45 }
 0x7a1   : > { %v7468_v24 = vpop.eup %7467  ;;  %5870 = vmatmul.f32.gmra.mxu3 %v11898_v8 }
 0x7a2   : > { %v5247_v31 = vmul.f32 %v7468_v24, %v5211_v39  ;;  %v5381_v27 = vpop.f32.mrf.mxu2  ;;  %v5213_v0 = vpop.xlane.xlu0 %5212 }
 0x7a3   : > { %v7021_v49 = vpack.i.bf16 %v5381_v27, %v11731_v33  ;;  %7471 = vrcp.f32 %v5213_v0  ;;  %v7470_v23 = vpop.eup %7469 }
 0x7a4   : > { %v5263_v18 = vsub.f32 2.0, %v5247_v31  ;;  %7473 = vrcp.f32 %v11833_v44 }
 0x7a5   : > { %7022 = vrot.lane.b32.xlu2 %v7021_v49, %s7832_s21  ;;  %v5249_v49 = vmul.f32 %v7470_v23, %v11825_v1  ;;  %v5670_v1 = vld [vmem:[#allocation7 + $0x8] sm:$0xff] }
 0x7a6   : > { %v5279_v53 = vmul.f32 %v7468_v24, %v5263_v18  ;;  %v5679_v24 = vld [vmem:[#allocation7 + $0x50] sm:$0xff]  ;;  %v5676_v18 = vld [vmem:[#allocation7 + $0x38] sm:$0xff] }
 0x7a7   : > { %6028 = vmatpush.msra.mxu2 %v5679_v24  ;;  %v5265_v17 = vsub.f32 2.0, %v5249_v49  ;;  %v5807_v24 = vld [vmem:[#allocation7 + $0x450] sm:$0xff] }
 0x7a8   : > { %v5295_v39 = vmul.f32 %v11740_v42, %v5279_v53  ;;  %v5673_v53 = vld [vmem:[#allocation7 + $0x20] sm:$0xff] }
 0x7a9   : > { %v7472_v62 = vpop.eup %7471  ;;  %6029 = vmatpush.msra.mxu2 %v5676_v18 }
 0x7aa   : > { %v5248_v33 = vmul.f32 %v7472_v62, %v5213_v0  ;;  %v5384_v27 = vpop.f32.mrf.mxu2  ;;  %5413 = vmatmul.f32.gmra.mxu2 %v5295_v39  ;;  %v4749_v31 = vpop.xlane.xlu0 %4748  ;;  %v5810_v39 = vld [vmem:[#allocation7 + $0x468] sm:$0xff] }
 0x7ab   : > { %v7026_v2 = vpack.i.bf16 %v5384_v27, %v11745_v36  ;;  %7475 = vrcp.f32 %v4749_v31  ;;  %v7474_v45 = vpop.eup %7473  ;;  %6030 = vmatpush.msra.mxu2 %v5673_v53  ;;  %5951 = vmatpush.msra.mxu1 %v5810_v39 }
 0x7ac   : > { %v5264_v26 = vsub.f32 2.0, %v5248_v33  ;;  %v11912_v33 = vpop.f32.mrf.mxu0  ;;  %v5250_v18 = vmul.f32 %v7474_v45, %v11833_v44 }
 0x7ad   : > { %7027 = vrot.lane.b32.xlu2 %v7026_v2, %s7832_s21  ;;  %13285 = vst [vmem:[#allocation56_spill] sm:$0xff] %v11912_v33  ;;  %v5762_v2 = vld [vmem:[#allocation7 + $0x2e8] sm:$0xff]  ;;  %6031 = vmatpush.msra.mxu2 %v5670_v1  ;;  %v5759_v1 = vld [vmem:[#allocation7 + $0x2d0] sm:$0xff] }
 0x7ae   : > { %v5280_v42 = vmul.f32 %v7472_v62, %v5264_v26  ;;  %v4747_v0 = vpop.xlane.xlu2 %4746  ;;  %v5760_v62 = vld [vmem:[#allocation7 + $0x2d8] sm:$0xff]  ;;  %5886 = vmatpush.msra.mxu0 %v5762_v2  ;;  %5952 = vmatpush.msra.mxu1 %v5807_v24  ;;  %v5266_v53 = vsub.f32 2.0, %v5250_v18 }
 0x7af   : > { %7477 = vrcp.f32 %v4747_v0  ;;  %6082 = vmatpush.msra.mxu3 %v5760_v62 }
 0x7b0   : > { %v5296_v36 = vmul.f32 %v11755_v9, %v5280_v42  ;;  %7479 = vrcp.f32 %v11880_v51  ;;  %v5281_v9 = vmul.f32 %v7470_v23, %v5265_v17  ;;  %5887 = vmatpush.msra.mxu0 %v5759_v1  ;;  %v5282_v23 = vmul.f32 %v7474_v45, %v5266_v53  ;;  %v5804_v45 = vld [vmem:[#allocation7 + $0x438] sm:$0xff]  ;;  %v5750_v1 = vld [vmem:[#allocation7 + $0x288] sm:$0xff] }
 0x7b1   : > { %v7476_v49 = vpop.eup %7475  ;;  %5953 = vmatpush.msra.mxu1 %v5804_v45  ;;  %v5738_v45 = vld [vmem:[#allocation7 + $0x228] sm:$0xff] }
 0x7b2   : > { %v5387_v27 = vpop.f32.mrf.mxu2  ;;  %5416 = vmatmul.f32.gmra.mxu2 %v5296_v36  ;;  %v4783_v36 = vmul.f32 %v7476_v49, %v4749_v31  ;;  %v5297_v33 = vmul.f32 %v11693_v63, %v5281_v9  ;;  %v5757_v31 = vld [vmem:[#allocation7 + $0x2c0] sm:$0xff] }
 0x7b3   : > { %v7031_v26 = vpack.i.bf16 %v5387_v27, %v11758_v41  ;;  %6083 = vmatpush.msra.mxu3 %v5757_v31  ;;  %v5744_v31 = vld [vmem:[#allocation7 + $0x258] sm:$0xff] }
 0x7b4   : > { %v11919_v54 = vpop.f32.mrf.mxu0  ;;  %v4799_v17 = vsub.f32 2.0, %v4783_v36  ;;  %v5801_v36 = vld [vmem:[#allocation7 + $0x420] sm:$0xff] }
 0x7b5   : > { %v7478_v12 = vpop.eup %7477  ;;  %7032 = vrot.lane.b32.xlu0 %v7031_v26, %s7832_s21  ;;  %5954 = vmatpush.msra.mxu1 %v5801_v36  ;;  %v5733_v36 = vld [vmem:[#allocation7 + $0x200] sm:$0xff] }
 0x7b6   : > { %v4782_v42 = vmul.f32 %v7478_v12, %v4747_v0  ;;  %v7480_v22 = vpop.eup %7479  ;;  %v4815_v63 = vmul.f32 %v7476_v49, %v4799_v17  ;;  %v5474_v17 = vpop.permute.xlu2 %5473 }
 0x7b7   : > { %v5251_v44 = vmul.f32 %v7480_v22, %v11880_v51 }
 0x7b8   : > { %v4798_v39 = vsub.f32 2.0, %v4782_v42  ;;  %v4831_v49 = vmul.f32 %v11765_v46, %v4815_v63  ;;  %v5745_v63 = vld [vmem:[#allocation7 + $0x260] sm:$0xff] }
 0x7b9   : > { %v5267_v62 = vsub.f32 2.0, %v5251_v44  ;;  %v5751_v44 = vld [vmem:[#allocation7 + $0x290] sm:$0xff] }
 0x7ba   : > { %v4814_v41 = vmul.f32 %v7478_v12, %v4798_v39  ;;  %5419 = vmatmul.f32.gmra.mxu2 %v5297_v33  ;;  %v5298_v33 = vmul.f32 %v11699_v60, %v5282_v23  ;;  %v5754_v12 = vld [vmem:[#allocation7 + $0x2a8] sm:$0xff] }
 0x7bb   : > { %v5283_v9 = vmul.f32 %v7480_v22, %v5267_v62  ;;  %6084 = vmatpush.msra.mxu3 %v5754_v12  ;;  %v5753_v22 = vld [vmem:[#allocation7 + $0x2a0] sm:$0xff]  ;;  %v5798_v23 = vld [vmem:[#allocation7 + $0x408] sm:$0xff]  ;;  %v5792_v62 = vld [vmem:[#allocation7 + $0x3d8] sm:$0xff] }
 0x7bc   : > { %v4830_v27 = vmul.f32 %v11770_v11, %v4814_v41  ;;  %v5756_v11 = vld [vmem:[#allocation7 + $0x2b8] sm:$0xff]  ;;  %v11929_v51 = vpop.f32.mrf.mxu0  ;;  %5955 = vmatpush.msra.mxu1 %v5798_v23  ;;  %v5726_v23 = vld [vmem:[#allocation7 + $0x1c8] sm:$0xff] }
 0x7bd   : > { %v7018_v2 = vpop.permute.xlu0 %7017  ;;  %5888 = vmatpush.msra.mxu0 %v5756_v11  ;;  %v5299_v53 = vmul.f32 %v11712_v19, %v5283_v9  ;;  %6085 = vmatpush.msra.mxu3 %v5751_v44  ;;  %v5747_v19 = vld [vmem:[#allocation7 + $0x270] sm:$0xff]  ;;  %v5786_v11 = vld [vmem:[#allocation7 + $0x3a8] sm:$0xff]  ;;  %v5736_v12 = vld [vmem:[#allocation7 + $0x218] sm:$0xff] }
 0x7be   : > { %v7019_v0 = vunpack.i.l.bf16 %v7018_v2  ;;  %4886 = vmatmul.f32.gmra.mxu0 %v4830_v27  ;;  %v7020_v18 = vunpack.i.h.bf16 %v7018_v2  ;;  %v5795_v27 = vld [vmem:[#allocation7 + $0x3f0] sm:$0xff]  ;;  %v5748_v2 = vld [vmem:[#allocation7 + $0x278] sm:$0xff]  ;;  %v5774_v44 = vld [vmem:[#allocation7 + $0x348] sm:$0xff] }
 0x7bf   : > { %5889 = vmatpush.msra.mxu0 %v5753_v22  ;;  %5956 = vmatpush.msra.mxu1 %v5795_v27  ;;  %v5729_v22 = vld [vmem:[#allocation7 + $0x1e0] sm:$0xff] }
 0x7c0   : > { %v4751_v24 = vpop.xlane.xlu1 %4750  ;;  %v11925_v26 = vsel %vm13286_vm14, %v11598_v59, %v7019_v0  ;;  %v11934_v60 = vsel %vm13287_vm15, %v11606_v5, %v7020_v18  ;;  %v11943_v0 = vsel %vm13288_vm11, %v11622_v20, %v5474_v17  ;;  %6086 = vmatpush.msra.mxu3 %v5748_v2  ;;  %v5739_v20 = vld [vmem:[#allocation7 + $0x230] sm:$0xff]  ;;  %vm13306_vm14 = vmmov %vm13252_vm0 }
 0x7c1   : > { %7481 = vrcp.f32 %v4751_v24  ;;  %5873 = vmatmul.f32.gmra.mxu3 %v11925_v26  ;;  %5890 = vmatpush.msra.mxu0 %v5750_v1  ;;  %v5735_v18 = vld [vmem:[#allocation7 + $0x210] sm:$0xff]  ;;  %v5730_v1 = vld [vmem:[#allocation7 + $0x1e8] sm:$0xff]  ;;  %vm13307_vm15 = vmmov %vm13252_vm0 }
 0x7c2   : > { %5422 = vmatmul.f32.gmra.mxu2 %v5298_v33  ;;  %5957 = vmatpush.msra.mxu1 %v5792_v62  ;;  %v5742_v33 = vld [vmem:[#allocation7 + $0x248] sm:$0xff]  ;;  %v5727_v17 = vld [vmem:[#allocation7 + $0x1d0] sm:$0xff]  ;;  %v5720_v62 = vld [vmem:[#allocation7 + $0x198] sm:$0xff] }
 0x7c3   : > { %5891 = vmatpush.msra.mxu0 %v5747_v19  ;;  %6087 = vmatpush.msra.mxu3 %v5745_v63  ;;  %v5724_v19 = vld [vmem:[#allocation7 + $0x1b8] sm:$0xff]  ;;  %vm13309_vm11 = vmmov %vm13252_vm0 }
 0x7c4   : > { %v11938_v46 = vpop.f32.mrf.mxu0  ;;  %v5768_v63 = vld [vmem:[#allocation7 + $0x318] sm:$0xff] }
 0x7c5   : > { %5892 = vmatpush.msra.mxu0 %v5744_v31  ;;  %6088 = vmatpush.msra.mxu3 %v5742_v33  ;;  %v5765_v33 = vld [vmem:[#allocation7 + $0x300] sm:$0xff] }
 0x7c6   : > { %4889 = vmatmul.f32.gmra.mxu0 %v4831_v49  ;;  %v5783_v49 = vld [vmem:[#allocation7 + $0x390] sm:$0xff] }
 0x7c7   : > { %v7482_v59 = vpop.eup %7481  ;;  %6089 = vmatpush.msra.mxu3 %v5739_v20 }
 0x7c8   : > { %v4784_v42 = vmul.f32 %v7482_v59, %v4751_v24  ;;  %v5789_v24 = vld [vmem:[#allocation7 + $0x3c0] sm:$0xff] }
 0x7c9   : > { %5876 = vmatmul.f32.gmra.mxu3 %v11934_v60  ;;  %5958 = vmatpush.msra.mxu1 %v5789_v24  ;;  %v5717_v24 = vld [vmem:[#allocation7 + $0x180] sm:$0xff] }
 0x7ca   : > { %v4800_v39 = vsub.f32 2.0, %v4784_v42  ;;  %5425 = vmatmul.f32.gmra.mxu2 %v5299_v53  ;;  %v5732_v42 = vld [vmem:[#allocation7 + $0x1f8] sm:$0xff]  ;;  %6090 = vmatpush.msra.mxu3 %v5736_v12 }
 0x7cb   : > { %5959 = vmatpush.msra.mxu1 %v5786_v11  ;;  %v5780_v53 = vld [vmem:[#allocation7 + $0x378] sm:$0xff] }
 0x7cc   : > { %v4816_v41 = vmul.f32 %v7482_v59, %v4800_v39  ;;  %v11947_v9 = vpop.f32.mrf.mxu0  ;;  %6091 = vmatpush.msra.mxu3 %v5733_v36 }
 0x7cd   : > { %5960 = vmatpush.msra.mxu1 %v5783_v49 }
 0x7ce   : > { %v4832_v5 = vmul.f32 %v11798_v34, %v4816_v41  ;;  %v5741_v34 = vld [vmem:[#allocation7 + $0x240] sm:$0xff]  ;;  %6092 = vmatpush.msra.mxu3 %v5730_v1 }
 0x7cf   : > { %5893 = vmatpush.msra.mxu0 %v5741_v34  ;;  %v5777_v41 = vld [vmem:[#allocation7 + $0x360] sm:$0xff]  ;;  %5961 = vmatpush.msra.mxu1 %v5780_v53 }
 0x7d0   : > { %4892 = vmatmul.f32.gmra.mxu0 %v4832_v5  ;;  %v5771_v5 = vld [vmem:[#allocation7 + $0x330] sm:$0xff]  ;;  %6093 = vmatpush.msra.mxu3 %v5727_v17  ;;  %v5721_v34 = vld [vmem:[#allocation7 + $0x1a0] sm:$0xff] }
 0x7d1   : > { %5879 = vmatmul.f32.gmra.mxu3 %v11943_v0  ;;  %5894 = vmatpush.msra.mxu0 %v5738_v45  ;;  %v5718_v45 = vld [vmem:[#allocation7 + $0x188] sm:$0xff] }
 0x7d2   : > { %6032 = vmatmul.f32.vlgmr.msra.gmra.mxu2 %v11736_v25  ;;  %5962 = vmatpush.msra.mxu1 %v5777_v41 }
 0x7d3   : > { %5895 = vmatpush.msra.mxu0 %v5735_v18  ;;  %6094 = vmatpush.msra.mxu3 %v5724_v19 }
 0x7d4   : > { %5963 = vmatpush.msra.mxu1 %v5774_v44  ;;  %v11955_v2 = vpop.f32.mrf.mxu0 }
 0x7d5   : > { %5896 = vmatpush.msra.mxu0 %v5732_v42  ;;  %6095 = vmatpush.msra.mxu3 %v5721_v34 }
 0x7d6   : > { %5964 = vmatpush.msra.mxu1 %v5771_v5 }
 0x7d7   : > { %5897 = vmatpush.msra.mxu0 %v5729_v22  ;;  %6096 = vmatpush.msra.mxu3 %v5718_v45 }
 0x7d8   : > { %v5476_v59 = vpop.permute.xlu1 %5475  ;;  %5965 = vmatpush.msra.mxu1 %v5768_v63 }
 0x7d9   : > { %v11951_v39 = vsel %vm13289_vm6, %v11641_v32, %v5476_v59  ;;  %5898 = vmatpush.msra.mxu0 %v5726_v23  ;;  %v5723_v32 = vld [vmem:[#allocation7 + $0x1b0] sm:$0xff]  ;;  %vm13310_vm6 = vmmov %vm13252_vm0 }
 0x7da   : > { %13290 = vst [vmem:[#allocation101_spill] sm:$0xff] %v11951_v39  ;;  %5882 = vmatmul.f32.gmra.mxu3 %v11951_v39  ;;  %6035 = vmatmul.f32.gmra.mxu2 %v11751_v37 }
 0x7db   : > { %5899 = vmatpush.msra.mxu0 %v5723_v32  ;;  %5966 = vmatpush.msra.mxu1 %v5765_v33 }
 0x7dc   : > { %v4851_v18 = vpop.f32.mrf.mxu0 }
 0x7dd   : > { %5900 = vmatpush.msra.mxu0 %v5720_v62 }
 0x7df   : > { %v5390_v27 = vpop.f32.mrf.mxu2  ;;  %5901 = vmatpush.msra.mxu0 %v5717_v24  ;;  %v13293_v24 = vld [vmem:[#allocation84_spill] sm:$0xff] }
 0x7e0   : > { %v7036_v31 = vpack.i.bf16 %v5390_v27, %v11772_v14 }
 0x7e2   : > { %7037 = vrot.lane.b32.xlu2 %v7036_v31, %s7832_s21  ;;  %6038 = vmatmul.f32.gmra.mxu2 %v11762_v21 }
 0x7e4   : > { %v4854_v36 = vpop.f32.mrf.mxu0 }
 0x7e7   : > { %v5393_v14 = vpop.f32.mrf.mxu2 }
 0x7e8   : > { %v7041_v11 = vpack.i.bf16 %v5393_v14, %v11784_v43  ;;  %v4753_v20 = vpop.xlane.xlu0 %4752 }
 0x7e9   : > { %7483 = vrcp.f32 %v4753_v20 }
 0x7ea   : > { %7042 = vrot.lane.b32.xlu2 %v7041_v11, %s7832_s21  ;;  %6041 = vmatmul.f32.gmra.mxu2 %v11777_v55 }
 0x7ec   : > { %v11970_v23 = vpop.f32.mrf.mxu0 }
 0x7ef   : > { %v7484_v49 = vpop.eup %7483  ;;  %v5396_v12 = vpop.f32.mrf.mxu2 }
 0x7f0   : > { %v4785_v59 = vmul.f32 %v7484_v49, %v4753_v20  ;;  %v7046_v42 = vpack.i.bf16 %v5396_v12, %v11795_v47  ;;  %v5764_v20 = vld [vmem:[#allocation7 + $0x2f8] sm:$0xff] }
 0x7f1   : > { %6276 = vmatpush.msrb.mxu2 %v5764_v20 }
 0x7f2   : > { %v4801_v53 = vsub.f32 2.0, %v4785_v59  ;;  %7047 = vrot.lane.b32.xlu1 %v7046_v42, %s7832_s21  ;;  %6044 = vmatmul.f32.gmra.mxu2 %v11788_v16  ;;  %v5755_v42 = vld [vmem:[#allocation7 + $0x2b0] sm:$0xff] }
 0x7f4   : > { %v4817_v22 = vmul.f32 %v7484_v49, %v4801_v53  ;;  %v5758_v49 = vld [vmem:[#allocation7 + $0x2c8] sm:$0xff] }
 0x7f6   : > { %v4833_v43 = vmul.f32 %v11843_v30, %v4817_v22  ;;  %v13291_v30 = vld [vmem:[#allocation98_spill] sm:$0xff]  ;;  %v5746_v22 = vld [vmem:[#allocation7 + $0x268] sm:$0xff] }
 0x7f7   : > { %v5399_v41 = vpop.f32.mrf.mxu2 }
 0x7f8   : > { %v7051_v1 = vpack.i.bf16 %v5399_v41, %v11806_v10  ;;  %4895 = vmatmul.f32.gmra.mxu0 %v4833_v43  ;;  %v5743_v43 = vld [vmem:[#allocation7 + $0x250] sm:$0xff]  ;;  %v5737_v41 = vld [vmem:[#allocation7 + $0x220] sm:$0xff] }
 0x7fa   : > { %7052 = vrot.lane.b32.xlu0 %v7051_v1, %s7832_s21  ;;  %6047 = vmatmul.f32.gmra.mxu2 %v11802_v4 }
 0x7ff   : > { %v7023_v47 = vpop.permute.xlu2 %7022  ;;  %v5402_v44 = vpop.f32.mrf.mxu2 }
 0x800   : > { %v7025_v17 = vunpack.i.h.bf16 %v7023_v47  ;;  %v7024_v32 = vunpack.i.l.bf16 %v7023_v47  ;;  %v7056_v5 = vpack.i.bf16 %v5402_v44, %v11810_v28  ;;  %v11985_v28 = vpop.f32.mrf.mxu0  ;;  %v5734_v47 = vld [vmem:[#allocation7 + $0x208] sm:$0xff]  ;;  %v12013_v44 = vpop.f32.mrf.mxu3 }
 0x802   : > { %7057 = vrot.lane.b32.xlu2 %v7056_v5, %s7832_s21  ;;  %6050 = vmatmul.f32.gmra.mxu2 %v11839_v48  ;;  %v11977_v10 = vsel %vm13252_vm0, %v13291_v30, %v7024_v32  ;;  %v11980_v19 = vsel %vm13292_vm1, %v4851_v18, %v7025_v17  ;;  %v5761_v18 = vld [vmem:[#allocation7 + $0x2e0] sm:$0xff]  ;;  %v5731_v30 = vld [vmem:[#allocation7 + $0x1f0] sm:$0xff]  ;;  %vm13312_vm1 = vmmov %vm13252_vm0 }
 0x803   : > { %5902 = vmatmul.f32.vlgmr.msra.gmra.mxu0 %v11977_v10  ;;  %5967 = vmatmul.f32.vlgmr.msra.gmra.mxu1 %v11980_v19 }
 0x804   : > { %6097 = vmatmul.f32.vlgmr.msra.gmra.mxu3 %v11977_v10  ;;  %6277 = vmatpush.msrb.mxu2 %v5761_v18  ;;  %v5719_v18 = vld [vmem:[#allocation7 + $0x190] sm:$0xff] }
 0x806   : > { %6278 = vmatpush.msrb.mxu2 %v5758_v49 }
 0x807   : > { %v7028_v27 = vpop.permute.xlu2 %7027  ;;  %v5405_v31 = vpop.f32.mrf.mxu2 }
 0x808   : > { %v7030_v62 = vunpack.i.h.bf16 %v7028_v27  ;;  %v7029_v63 = vunpack.i.l.bf16 %v7028_v27  ;;  %v7061_v34 = vpack.i.bf16 %v5405_v31, %v11817_v57  ;;  %v12001_v11 = vpop.f32.mrf.mxu0  ;;  %6279 = vmatpush.msrb.mxu2 %v5755_v42  ;;  %v12031_v20 = vpop.f32.mrf.mxu3  ;;  %v5713_v42 = vld [vmem:[#allocation7 + $0x160] sm:$0xff] }
 0x80a   : > { %7062 = vrot.lane.b32.xlu1 %v7061_v34, %s7832_s21  ;;  %6053 = vmatmul.f32.gmra.mxu2 %v11853_v35  ;;  %v11992_v33 = vsel %vm13294_vm2, %v13293_v24, %v7029_v63  ;;  %v11995_v45 = vsel %vm13295_vm3, %v4854_v36, %v7030_v62  ;;  %v5749_v36 = vld [vmem:[#allocation7 + $0x280] sm:$0xff]  ;;  %v5728_v62 = vld [vmem:[#allocation7 + $0x1d8] sm:$0xff]  ;;  %vm13315_vm2 = vmmov %vm13252_vm0 }
 0x80b   : > { %5905 = vmatmul.f32.gmra.mxu0 %v11992_v33  ;;  %5970 = vmatmul.f32.gmra.mxu1 %v11995_v45  ;;  %v5725_v34 = vld [vmem:[#allocation7 + $0x1c0] sm:$0xff]  ;;  %vm13316_vm3 = vmmov %vm13252_vm0 }
 0x80c   : > { %6100 = vmatmul.f32.gmra.mxu3 %v11992_v33 }
 0x80f   : > { %v5408_v14 = vpop.f32.mrf.mxu2 }
 0x810   : > { %v7066_v57 = vpack.i.bf16 %v5408_v14, %v11830_v7  ;;  %v5752_v7 = vld [vmem:[#allocation7 + $0x298] sm:$0xff]  ;;  %v12008_v53 = vpop.f32.mrf.mxu0 }
 0x811   : > { %6280 = vmatpush.msrb.mxu2 %v5752_v7  ;;  %v5812_v14 = vld [vmem:[#allocation7 + $0x478] sm:$0xff] }
 0x812   : > { %7067 = vrot.lane.b32.xlu0 %v7066_v57, %s7832_s21  ;;  %6056 = vmatmul.f32.gmra.mxu2 %v11865_v13 }
 0x813   : > { %6281 = vmatpush.msrb.mxu2 %v5749_v36  ;;  %6341 = vmatpush.msrb.mxu3 %v5812_v14  ;;  %v5808_v36 = vld [vmem:[#allocation7 + $0x458] sm:$0xff] }
 0x815   : > { %6282 = vmatpush.msrb.mxu2 %v5746_v22  ;;  %v12039_v22 = vpop.f32.mrf.mxu3 }
 0x817   : > { %v5411_v12 = vpop.f32.mrf.mxu2  ;;  %6283 = vmatpush.msrb.mxu2 %v5743_v43 }
 0x818   : > { %v7071_v59 = vpack.i.bf16 %v5411_v12, %v11835_v6  ;;  %v5740_v6 = vld [vmem:[#allocation7 + $0x238] sm:$0xff]  ;;  %v12011_v1 = vpop.f32.mrf.mxu0 }
 0x819   : > { %6284 = vmatpush.msrb.mxu2 %v5740_v6 }
 0x81a   : > { %7072 = vrot.lane.b32.xlu2 %v7071_v59, %s7832_s21  ;;  %6059 = vmatmul.f32.gmra.mxu2 %v11874_v61  ;;  %v5809_v59 = vld [vmem:[#allocation7 + $0x460] sm:$0xff] }
 0x81b   : > { %6285 = vmatpush.msrb.mxu2 %v5737_v41  ;;  %6342 = vmatpush.msrb.mxu3 %v5809_v59 }
 0x81d   : > { %6286 = vmatpush.msrb.mxu2 %v5734_v47 }
 0x81f   : > { %6287 = vmatpush.msrb.mxu2 %v5731_v30 }
 0x820   : > { %v12028_v57 = vpop.f32.mrf.mxu0 }
 0x821   : > { %6288 = vmatpush.msrb.mxu2 %v5728_v62 }
 0x822   : > { %6062 = vmatmul.f32.gmra.mxu2 %v11889_v50 }
 0x823   : > { %6289 = vmatpush.msrb.mxu2 %v5725_v34 }
 0x827   : > { %v7033_v17 = vpop.permute.xlu0 %7032 }
 0x828   : > { %v7035_v32 = vunpack.i.h.bf16 %v7033_v17  ;;  %v7034_v5 = vunpack.i.l.bf16 %v7033_v17  ;;  %v12036_v7 = vpop.f32.mrf.mxu0  ;;  %v5806_v17 = vld [vmem:[#allocation7 + $0x448] sm:$0xff] }
 0x829   : > { %6343 = vmatpush.msrb.mxu3 %v5806_v17  ;;  %v5794_v17 = vld [vmem:[#allocation7 + $0x3e8] sm:$0xff] }
 0x82a   : > { %6065 = vmatmul.f32.gmra.mxu2 %v11898_v8  ;;  %v12018_v27 = vsel %vm13296_vm4, %v11815_v3, %v7034_v5  ;;  %v12022_v31 = vsel %vm13297_vm5, %v11970_v23, %v7035_v32  ;;  %v5716_v3 = vld [vmem:[#allocation7 + $0x178] sm:$0xff]  ;;  %v5722_v23 = vld [vmem:[#allocation7 + $0x1a8] sm:$0xff]  ;;  %vm13318_vm4 = vmmov %vm13252_vm0 }
 0x82b   : > { %5908 = vmatmul.f32.gmra.mxu0 %v12018_v27  ;;  %5973 = vmatmul.f32.gmra.mxu1 %v12022_v31  ;;  %v5710_v32 = vld [vmem:[#allocation7 + $0x148] sm:$0xff]  ;;  %vm13319_vm5 = vmmov %vm13252_vm0 }
 0x82c   : > { %6103 = vmatmul.f32.gmra.mxu3 %v12018_v27  ;;  %6211 = vmatpush.msrb.mxu1 %v5716_v3  ;;  %v5803_v3 = vld [vmem:[#allocation7 + $0x430] sm:$0xff] }
 0x82d   : > { %v5414_v63 = vpop.f32.mrf.mxu2  ;;  %6290 = vmatpush.msrb.mxu2 %v5722_v23  ;;  %6344 = vmatpush.msrb.mxu3 %v5803_v3 }
 0x82e   : > { %v7076_v24 = vpack.i.bf16 %v5414_v63, %v11849_v29  ;;  %v5811_v29 = vld [vmem:[#allocation7 + $0x470] sm:$0xff]  ;;  %6212 = vmatpush.msrb.mxu1 %v5713_v42  ;;  %v12057_v63 = vpop.f32.mrf.mxu3  ;;  %v5704_v42 = vld [vmem:[#allocation7 + $0x118] sm:$0xff] }
 0x82f   : > { %6291 = vmatpush.msrb.mxu2 %v5719_v18  ;;  %6146 = vmatpush.msrb.mxu0 %v5811_v29 }
 0x830   : > { %7077 = vrot.lane.b32.xlu1 %v7076_v24, %s7832_s21  ;;  %6213 = vmatpush.msrb.mxu1 %v5710_v32 }
 0x831   : > { %6147 = vmatpush.msrb.mxu0 %v5808_v36  ;;  %v5799_v36 = vld [vmem:[#allocation7 + $0x410] sm:$0xff] }
 0x832   : > { %6068 = vmatmul.f32.gmra.mxu2 %v11925_v26 }
 0x835   : > { %v5417_v49 = vpop.f32.mrf.mxu2 }
 0x836   : > { %v7081_v12 = vpack.i.bf16 %v5417_v49, %v11861_v56  ;;  %v5707_v49 = vld [vmem:[#allocation7 + $0x130] sm:$0xff]  ;;  %v12076_v59 = vpop.f32.mrf.mxu3 }
 0x837   : > { %6214 = vmatpush.msrb.mxu1 %v5707_v49 }
 0x838   : > { %7082 = vrot.lane.b32.xlu0 %v7081_v12, %s7832_s21  ;;  %v5800_v12 = vld [vmem:[#allocation7 + $0x418] sm:$0xff] }
 0x839   : > { %6345 = vmatpush.msrb.mxu3 %v5800_v12  ;;  %6215 = vmatpush.msrb.mxu1 %v5704_v42  ;;  %v5695_v12 = vld [vmem:[#allocation7 + $0xd0] sm:$0xff]  ;;  %v5790_v42 = vld [vmem:[#allocation7 + $0x3c8] sm:$0xff] }
 0x83a   : > { %6071 = vmatmul.f32.gmra.mxu2 %v11934_v60 }
 0x83c   : > { %v7038_v43 = vpop.permute.xlu2 %7037 }
 0x83d   : > { %v7040_v6 = vunpack.i.h.bf16 %v7038_v43  ;;  %v7039_v41 = vunpack.i.l.bf16 %v7038_v43  ;;  %v5420_v47 = vpop.f32.mrf.mxu2 }
 0x83e   : > { %v7086_v56 = vpack.i.bf16 %v5420_v47, %v11870_v38  ;;  %v5805_v38 = vld [vmem:[#allocation7 + $0x440] sm:$0xff] }
 0x83f   : > { %v12044_v5 = vsel %vm13298_vm7, %v11828_v58, %v7039_v41  ;;  %v12048_v30 = vsel %vm13299_vm8, %v11985_v28, %v7040_v6  ;;  %6148 = vmatpush.msrb.mxu0 %v5805_v38  ;;  %v12055_v58 = vpop.f32.mrf.mxu0  ;;  %v5797_v6 = vld [vmem:[#allocation7 + $0x400] sm:$0xff]  ;;  %v12082_v41 = vpop.f32.mrf.mxu3  ;;  %vm13321_vm7 = vmmov %vm13252_vm0 }
 0x840   : > { %7087 = vrot.lane.b32.xlu2 %v7086_v56, %s7832_s21  ;;  %5911 = vmatmul.f32.gmra.mxu0 %v12044_v5  ;;  %v5701_v47 = vld [vmem:[#allocation7 + $0x100] sm:$0xff]  ;;  %vm13322_vm8 = vmmov %vm13252_vm0 }
 0x841   : > { %5976 = vmatmul.f32.gmra.mxu1 %v12048_v30  ;;  %6106 = vmatmul.f32.gmra.mxu3 %v12044_v5 }
 0x842   : > { %6074 = vmatmul.f32.gmra.mxu2 %v11943_v0  ;;  %6346 = vmatpush.msrb.mxu3 %v5797_v6 }
 0x843   : > { %6216 = vmatpush.msrb.mxu1 %v5701_v47 }
 0x844   : > { %v7043_v62 = vpop.permute.xlu2 %7042  ;;  %6347 = vmatpush.msrb.mxu3 %v5794_v17  ;;  %v5692_v17 = vld [vmem:[#allocation7 + $0xb8] sm:$0xff] }
 0x845   : > { %v7045_v28 = vunpack.i.h.bf16 %v7043_v62  ;;  %v7044_v34 = vunpack.i.l.bf16 %v7043_v62  ;;  %v5423_v24 = vpop.f32.mrf.mxu2 }
 0x846   : > { %v7091_v14 = vpack.i.bf16 %v5423_v24, %v11882_v52  ;;  %v5802_v52 = vld [vmem:[#allocation7 + $0x428] sm:$0xff] }
 0x847   : > { %v12062_v23 = vsel %vm13300_vm9, %v11847_v40, %v7044_v34  ;;  %v12066_v18 = vsel %vm13301_vm10, %v12001_v11, %v7045_v28  ;;  %6149 = vmatpush.msrb.mxu0 %v5802_v52  ;;  %v12073_v40 = vpop.f32.mrf.mxu0  ;;  %v5698_v28 = vld [vmem:[#allocation7 + $0xe8] sm:$0xff]  ;;  %v5793_v34 = vld [vmem:[#allocation7 + $0x3e0] sm:$0xff]  ;;  %vm13323_vm9 = vmmov %vm13252_vm0 }
 0x848   : > { %7092 = vrot.lane.b32.xlu1 %v7091_v14, %s7832_s21  ;;  %5914 = vmatmul.f32.gmra.mxu0 %v12062_v23  ;;  %v13302_v24 = vld [vmem:[#allocation52_spill] sm:$0xff]  ;;  %vm13324_vm10 = vmmov %vm13252_vm0 }
 0x849   : > { %5979 = vmatmul.f32.gmra.mxu1 %v12066_v18  ;;  %6109 = vmatmul.f32.gmra.mxu3 %v12062_v23 }
 0x84a   : > { %6077 = vmatmul.f32.gmra.mxu2 %v11951_v39  ;;  %6150 = vmatpush.msrb.mxu0 %v5799_v36 }
 0x84b   : > { %6217 = vmatpush.msrb.mxu1 %v5698_v28 }
 0x84d   : > { %v5426_v29 = vpop.f32.mrf.mxu2  ;;  %6218 = vmatpush.msrb.mxu1 %v5695_v12  ;;  %v5784_v12 = vld [vmem:[#allocation7 + $0x398] sm:$0xff] }
 0x84e   : > { %v7096_v11 = vpack.i.bf16 %v5426_v29, %v11892_v15  ;;  %v5796_v15 = vld [vmem:[#allocation7 + $0x3f8] sm:$0xff] }
 0x84f   : > { %v12080_v43 = vpop.f32.mrf.mxu0  ;;  %6151 = vmatpush.msrb.mxu0 %v5796_v15  ;;  %v5788_v15 = vld [vmem:[#allocation7 + $0x3b8] sm:$0xff]  ;;  %6219 = vmatpush.msrb.mxu1 %v5692_v17 }
 0x850   : > { %7097 = vrot.lane.b32.xlu0 %v7096_v11, %s7832_s21 }
 0x851   : > { %6152 = vmatpush.msrb.mxu0 %v5793_v34  ;;  %v5689_v34 = vld [vmem:[#allocation7 + $0xa0] sm:$0xff] }
 0x852   : > { %6292 = vmatmul.f32.vlgmr.msrb.gmra.mxu2 %v11977_v10  ;;  %v12087_v10 = vpop.f32.mrf.mxu3  ;;  %6220 = vmatpush.msrb.mxu1 %v5689_v34 }
 0x853   : > { %6153 = vmatpush.msrb.mxu0 %v5790_v42 }
 0x857   : > { %v12085_v56 = vpop.f32.mrf.mxu0 }
 0x85a   : > { %6295 = vmatmul.f32.gmra.mxu2 %v11992_v33  ;;  %v12100_v49 = vpop.f32.mrf.mxu3 }
 0x85f   : > { %v12096_v3 = vpop.f32.mrf.mxu0 }
 0x862   : > { %6298 = vmatmul.f32.gmra.mxu2 %v12018_v27  ;;  %v5791_v27 = vld [vmem:[#allocation7 + $0x3d0] sm:$0xff]  ;;  %v12112_v28 = vpop.f32.mrf.mxu3 }
 0x863   : > { %6348 = vmatpush.msrb.mxu3 %v5791_v27 }
 0x864   : > { %v7048_v32 = vpop.permute.xlu1 %7047 }
 0x865   : > { %v7050_v38 = vunpack.i.h.bf16 %v7048_v32  ;;  %v7049_v62 = vunpack.i.l.bf16 %v7048_v32  ;;  %6349 = vmatpush.msrb.mxu3 %v5788_v15  ;;  %v5787_v32 = vld [vmem:[#allocation7 + $0x3b0] sm:$0xff]  ;;  %v5686_v15 = vld [vmem:[#allocation7 + $0x88] sm:$0xff] }
 0x866   : > { %6154 = vmatpush.msrb.mxu0 %v5787_v32  ;;  %6221 = vmatpush.msrb.mxu1 %v5686_v15 }
 0x867   : > { %v5642_v33 = vsel %vm13303_vm12, %v13302_v24, %v7049_v62  ;;  %v12094_v14 = vsel %vm13304_vm13, %v12008_v53, %v7050_v38  ;;  %v13305_v53 = vld [vmem:[#allocation50_spill] sm:$0xff]  ;;  %v12108_v47 = vpop.f32.mrf.mxu0  ;;  %v13308_v24 = vld [vmem:[#allocation100_spill] sm:$0xff]  ;;  %vm13325_vm12 = vmmov %vm13252_vm0 }
 0x868   : > { %5917 = vmatmul.f32.gmra.mxu0 %v5642_v33  ;;  %5982 = vmatmul.f32.gmra.mxu1 %v12094_v14  ;;  %vm13326_vm13 = vmmov %vm13252_vm0 }
 0x869   : > { %6112 = vmatmul.f32.gmra.mxu3 %v5642_v33  ;;  %6155 = vmatpush.msrb.mxu0 %v5784_v12  ;;  %v5781_v12 = vld [vmem:[#allocation7 + $0x380] sm:$0xff] }
 0x86a   : > { %6301 = vmatmul.f32.gmra.mxu2 %v12044_v5  ;;  %v7058_v5 = vpop.permute.xlu2 %7057  ;;  %v12130_v32 = vpop.f32.mrf.mxu3 }
 0x86b   : > { %v7060_v38 = vunpack.i.h.bf16 %v7058_v5  ;;  %v7059_v62 = vunpack.i.l.bf16 %v7058_v5  ;;  %v5782_v5 = vld [vmem:[#allocation7 + $0x388] sm:$0xff]  ;;  %6156 = vmatpush.msrb.mxu0 %v5781_v12 }
 0x86c   : > { %v7053_v52 = vpop.permute.xlu0 %7052 }
 0x86d   : > { %v7055_v29 = vunpack.i.h.bf16 %v7053_v52  ;;  %v7054_v11 = vunpack.i.l.bf16 %v7053_v52  ;;  %v5644_v27 = vsel %vm13309_vm11, %v13308_v24, %v7059_v62  ;;  %v12118_v52 = vsel %vm13310_vm6, %v12028_v57, %v7060_v38  ;;  %v13311_v38 = vld [vmem:[#allocation46_spill] sm:$0xff]  ;;  %vm13329_vm11 = vmmov %vm13252_vm0 }
 0x86e   : > { %vm13330_vm6 = vmmov %vm13252_vm0 }
 0x86f   : > { %v5643_v36 = vsel %vm13306_vm14, %v13305_v53, %v7054_v11  ;;  %v12106_v6 = vsel %vm13307_vm15, %v12011_v1, %v7055_v29  ;;  %v5785_v1 = vld [vmem:[#allocation7 + $0x3a0] sm:$0xff]  ;;  %vm13327_vm14 = vmmov %vm13252_vm0 }
 0x870   : > { %5920 = vmatmul.f32.gmra.mxu0 %v5643_v36  ;;  %5985 = vmatmul.f32.gmra.mxu1 %v12106_v6  ;;  %vm13328_vm15 = vmmov %vm13252_vm0 }
 0x871   : > { %6115 = vmatmul.f32.gmra.mxu3 %v5643_v36 }
 0x872   : > { %6304 = vmatmul.f32.gmra.mxu2 %v12062_v23  ;;  %6350 = vmatpush.msrb.mxu3 %v5785_v1  ;;  %v12120_v23 = vld [vmem:[#allocation8] sm:$0x7]  ;;  %v12148_v15 = vpop.f32.mrf.mxu3 }
 0x873   : > { %v12126_v11 = vperm.slane %v12120_v23, 0 }
 0x874   : > { %6351 = vmatpush.msrb.mxu3 %v5782_v5 }
 0x875   : > { %v12122_v29 = vpop.f32.mrf.mxu0  ;;  %v5839_v17 = vadd.f32 %v12013_v44, %v12126_v11  ;;  %v5842_v5 = vadd.f32 %v12031_v20, %v12126_v11 }
 0x878   : > { %5923 = vmatmul.f32.gmra.mxu0 %v5644_v27  ;;  %5988 = vmatmul.f32.gmra.mxu1 %v12118_v52 }
 0x879   : > { %6118 = vmatmul.f32.gmra.mxu3 %v5644_v27 }
 0x87a   : > { %6307 = vmatmul.f32.gmra.mxu2 %v5642_v33 }
 0x87c   : > { %v7063_v42 = vpop.permute.xlu1 %7062 }
 0x87d   : > { %v7065_v53 = vunpack.i.h.bf16 %v7063_v42  ;;  %v7064_v57 = vunpack.i.l.bf16 %v7063_v42  ;;  %v12139_v42 = vpop.f32.mrf.mxu2 }
 0x87e   : > { %13313 = vst [vmem:[#allocation51_spill] sm:$0xff] %v12139_v42 }
 0x87f   : > { %v5645_v62 = vsel %vm13252_vm0, %v13311_v38, %v7064_v57  ;;  %v12136_v33 = vsel %vm13312_vm1, %v12036_v7, %v7065_v53 }
 0x880   : > { %v5903_v1 = vpop.f32.mrf.mxu0  ;;  %5926 = vmatmul.f32.gmra.mxu0 %v5645_v62  ;;  %v5968_v34 = vpop.f32.mrf.mxu1  ;;  %5991 = vmatmul.f32.gmra.mxu1 %v12136_v33 }
 0x881   : > { %v5904_v24 = vadd.f32 %v5903_v1, %v5839_v17  ;;  %6121 = vmatmul.f32.gmra.mxu3 %v5645_v62  ;;  %v13314_v17 = vld [vmem:[#allocation48_spill] sm:$0xff] }
 0x882   : > { %6310 = vmatmul.f32.gmra.mxu2 %v5643_v36  ;;  %v5779_v1 = vld [vmem:[#allocation7 + $0x370] sm:$0xff] }
 0x883   : > { %v5969_v44 = vadd.f32 %v5968_v34, %v5904_v24  ;;  %v7073_v34 = vpop.permute.xlu2 %7072  ;;  %6352 = vmatpush.msrb.mxu3 %v5779_v1  ;;  %v5680_v1 = vld [vmem:[#allocation7 + $0x58] sm:$0xff] }
 0x884   : > { %v7068_v57 = vpop.permute.xlu0 %7067  ;;  %v7075_v20 = vunpack.i.h.bf16 %v7073_v34 }
 0x885   : > { %6406 = vst [vmem:[%s12143_s26] sm:$0xff] %v5969_v44  ;;  %v7070_v7 = vunpack.i.h.bf16 %v7068_v57  ;;  %v7069_v53 = vunpack.i.l.bf16 %v7068_v57  ;;  %v7074_v57 = vunpack.i.l.bf16 %v7073_v34  ;;  %v12158_v39 = vpop.f32.mrf.mxu2  ;;  %v5775_v34 = vld [vmem:[#allocation7 + $0x350] sm:$0xff] }
 0x887   : > { %v5646_v36 = vsel %vm13315_vm2, %v13314_v17, %v7069_v53  ;;  %v12154_v38 = vsel %vm13316_vm3, %v12055_v58, %v7070_v7  ;;  %v5683_v53 = vld [vmem:[#allocation7 + $0x70] sm:$0xff]  ;;  %v5778_v17 = vld [vmem:[#allocation7 + $0x368] sm:$0xff] }
 0x888   : > { %v5906_v24 = vpop.f32.mrf.mxu0  ;;  %5929 = vmatmul.f32.gmra.mxu0 %v5646_v36  ;;  %5994 = vmatmul.f32.gmra.mxu1 %v12154_v38  ;;  %v5971_v12 = vpop.f32.mrf.mxu1  ;;  %v13317_v58 = vld [vmem:[#allocation56_spill] sm:$0xff] }
 0x889   : > { %v5907_v44 = vadd.f32 %v5906_v24, %v5842_v5  ;;  %6124 = vmatmul.f32.gmra.mxu3 %v5646_v36  ;;  %6222 = vmatpush.msrb.mxu1 %v5683_v53  ;;  %v5647_v7 = vsel %vm13318_vm4, %v13317_v58, %v7074_v57  ;;  %v12164_v5 = vsel %vm13319_vm5, %v12073_v40, %v7075_v20  ;;  %v5773_v24 = vld [vmem:[#allocation7 + $0x340] sm:$0xff]  ;;  %v5772_v20 = vld [vmem:[#allocation7 + $0x338] sm:$0xff] }
 0x88a   : > { %6313 = vmatmul.f32.gmra.mxu2 %v5644_v27  ;;  %6157 = vmatpush.msrb.mxu0 %v5778_v17  ;;  %v5776_v27 = vld [vmem:[#allocation7 + $0x358] sm:$0xff]  ;;  %v5770_v17 = vld [vmem:[#allocation7 + $0x328] sm:$0xff] }
 0x88b   : > { %v5972_v42 = vadd.f32 %v5971_v12, %v5907_v44  ;;  %6223 = vmatpush.msrb.mxu1 %v5680_v1  ;;  %6353 = vmatpush.msrb.mxu3 %v5776_v27  ;;  %v5677_v44 = vld [vmem:[#allocation7 + $0x40] sm:$0xff] }
 0x88c   : > { %6158 = vmatpush.msrb.mxu0 %v5775_v34 }
 0x88d   : > { %6409 = vst [vmem:[%s12143_s26 + $0x18] sm:$0xff] %v5972_v42  ;;  %v12167_v42 = vpop.f32.mrf.mxu3  ;;  %v12169_v12 = vpop.f32.mrf.mxu2  ;;  %6354 = vmatpush.msrb.mxu3 %v5773_v24  ;;  %6224 = vmatpush.msrb.mxu1 %v5677_v44  ;;  %v5769_v24 = vld [vmem:[#allocation7 + $0x320] sm:$0xff] }
 0x88e   : > { %6159 = vmatpush.msrb.mxu0 %v5772_v20 }
 0x88f   : > { %6355 = vmatpush.msrb.mxu3 %v5770_v17 }
 0x890   : > { %5932 = vmatmul.f32.gmra.mxu0 %v5647_v7  ;;  %5997 = vmatmul.f32.gmra.mxu1 %v12164_v5 }
 0x891   : > { %6127 = vmatmul.f32.gmra.mxu3 %v5647_v7  ;;  %6160 = vmatpush.msrb.mxu0 %v5769_v24 }
 0x892   : > { %6316 = vmatmul.f32.gmra.mxu2 %v5645_v62  ;;  %v5674_v62 = vld [vmem:[#allocation7 + $0x28] sm:$0xff] }
 0x893   : > { %6225 = vmatpush.msrb.mxu1 %v5674_v62  ;;  %v5671_v62 = vld [vmem:[#allocation7 + $0x10] sm:$0xff] }
 0x895   : > { %v12171_v40 = vpop.f32.mrf.mxu3  ;;  %v12173_v57 = vpop.f32.mrf.mxu2  ;;  %6226 = vmatpush.msrb.mxu1 %v5671_v62 }
 0x896   : > { %13320 = vst [vmem:[#allocation109_spill] sm:$0xff] %v12173_v57 }
 0x89a   : > { %6319 = vmatmul.f32.gmra.mxu2 %v5646_v36 }
 0x89d   : > { %v12175_v1 = vpop.f32.mrf.mxu3  ;;  %v12186_v57 = vpop.f32.mrf.mxu2 }
 0x8a2   : > { %v7078_v53 = vpop.permute.xlu1 %7077  ;;  %6322 = vmatmul.f32.gmra.mxu2 %v5647_v7  ;;  %v5845_v7 = vadd.f32 %v12039_v22, %v12126_v11 }
 0x8a3   : > { %v7080_v58 = vunpack.i.h.bf16 %v7078_v53  ;;  %v7079_v27 = vunpack.i.l.bf16 %v7078_v53 }
 0x8a5   : > { %v5648_v34 = vsel %vm13321_vm7, %v11919_v54, %v7079_v27  ;;  %v12181_v36 = vsel %vm13322_vm8, %v12080_v43, %v7080_v58  ;;  %v5767_v54 = vld [vmem:[#allocation7 + $0x310] sm:$0xff] }
 0x8a6   : > { %5935 = vmatmul.f32.gmra.mxu0 %v5648_v34  ;;  %6000 = vmatmul.f32.gmra.mxu1 %v12181_v36 }
 0x8a7   : > { %6130 = vmatmul.f32.gmra.mxu3 %v5648_v34 }
 0x8a8   : > { %v5909_v44 = vpop.f32.mrf.mxu0  ;;  %v5974_v53 = vpop.f32.mrf.mxu1  ;;  %6356 = vmatpush.msrb.mxu3 %v5767_v54 }
 0x8a9   : > { %v5910_v20 = vadd.f32 %v5909_v44, %v5845_v7  ;;  %v5766_v7 = vld [vmem:[#allocation7 + $0x308] sm:$0xff]  ;;  %v12195_v44 = vpop.f32.mrf.mxu3 }
 0x8aa   : > { %v7083_v17 = vpop.permute.xlu0 %7082  ;;  %6325 = vmatmul.f32.gmra.mxu2 %v5648_v34  ;;  %v7088_v34 = vpop.permute.xlu2 %7087  ;;  %6161 = vmatpush.msrb.mxu0 %v5766_v7 }
 0x8ab   : > { %v5975_v27 = vadd.f32 %v5974_v53, %v5910_v20  ;;  %v7085_v43 = vunpack.i.h.bf16 %v7083_v17  ;;  %v7084_v58 = vunpack.i.l.bf16 %v7083_v17  ;;  %v7090_v20 = vunpack.i.h.bf16 %v7088_v34 }
 0x8ac   : > { %v7089_v53 = vunpack.i.l.bf16 %v7088_v34 }
 0x8ad   : > { %6412 = vst [vmem:[%s12143_s26 + $0x30] sm:$0xff] %v5975_v27  ;;  %v5649_v22 = vsel %vm13323_vm9, %v11929_v51, %v7084_v58  ;;  %v12193_v24 = vsel %vm13324_vm10, %v12085_v56, %v7085_v43  ;;  %v12202_v51 = vsel %vm13326_vm13, %v12096_v3, %v7090_v20  ;;  %v12204_v56 = vpop.f32.mrf.mxu2 }
 0x8ae   : > { %5938 = vmatmul.f32.gmra.mxu0 %v5649_v22  ;;  %6003 = vmatmul.f32.gmra.mxu1 %v12193_v24  ;;  %v5650_v17 = vsel %vm13325_vm12, %v11938_v46, %v7089_v53  ;;  %v5848_v46 = vadd.f32 %v12057_v63, %v12126_v11 }
 0x8af   : > { %6133 = vmatmul.f32.gmra.mxu3 %v5649_v22 }
 0x8b1   : > { %v12207_v54 = vpop.f32.mrf.mxu3 }
 0x8b2   : > { %6328 = vmatmul.f32.gmra.mxu2 %v5649_v22 }
 0x8b5   : > { %v12218_v20 = vpop.f32.mrf.mxu2 }
 0x8b6   : > { %5941 = vmatmul.f32.gmra.mxu0 %v5650_v17  ;;  %6006 = vmatmul.f32.gmra.mxu1 %v12202_v51 }
 0x8b7   : > { %6136 = vmatmul.f32.gmra.mxu3 %v5650_v17 }
 0x8b9   : > { %v12220_v53 = vpop.f32.mrf.mxu3 }
 0x8ba   : > { %v7093_v62 = vpop.permute.xlu1 %7092  ;;  %6331 = vmatmul.f32.gmra.mxu2 %v5650_v17 }
 0x8bb   : > { %v7095_v27 = vunpack.i.h.bf16 %v7093_v62  ;;  %v7094_v43 = vunpack.i.l.bf16 %v7093_v62 }
 0x8bd   : > { %v5912_v58 = vpop.f32.mrf.mxu0  ;;  %v5651_v3 = vsel %vm13327_vm14, %v11947_v9, %v7094_v43  ;;  %v12215_v22 = vsel %vm13328_vm15, %v12108_v47, %v7095_v27  ;;  %v5851_v47 = vadd.f32 %v12076_v59, %v12126_v11 }
 0x8be   : > { %v5913_v7 = vadd.f32 %v5912_v58, %v5848_v46  ;;  %v5977_v34 = vpop.f32.mrf.mxu1  ;;  %5944 = vmatmul.f32.gmra.mxu0 %v5651_v3  ;;  %6009 = vmatmul.f32.gmra.mxu1 %v12215_v22 }
 0x8bf   : > { %6139 = vmatmul.f32.gmra.mxu3 %v5651_v3 }
 0x8c0   : > { %v5978_v17 = vadd.f32 %v5977_v34, %v5913_v7  ;;  %v12232_v34 = vpop.f32.mrf.mxu2 }
 0x8c2   : > { %6415 = vst [vmem:[%s12143_s26 + $0x48] sm:$0xff] %v5978_v17  ;;  %v7098_v63 = vpop.permute.xlu0 %7097  ;;  %6334 = vmatmul.f32.gmra.mxu2 %v5651_v3  ;;  %v12234_v17 = vpop.f32.mrf.mxu3 }
 0x8c3   : > { %v7100_v9 = vunpack.i.h.bf16 %v7098_v63  ;;  %v7099_v62 = vunpack.i.l.bf16 %v7098_v63 }
 0x8c5   : > { %v5915_v27 = vpop.f32.mrf.mxu0  ;;  %v5652_v43 = vsel %vm13329_vm11, %v11955_v2, %v7099_v62  ;;  %v12229_v46 = vsel %vm13330_vm6, %v12122_v29, %v7100_v9 }
 0x8c6   : > { %v5916_v58 = vadd.f32 %v5915_v27, %v5851_v47  ;;  %5947 = vmatmul.f32.gmra.mxu0 %v5652_v43  ;;  %6012 = vmatmul.f32.gmra.mxu1 %v12229_v46  ;;  %v5980_v7 = vpop.f32.mrf.mxu1 }
 0x8c7   : > { %6142 = vmatmul.f32.gmra.mxu3 %v5652_v43 }
 0x8c8   : > { %v5981_v3 = vadd.f32 %v5980_v7, %v5916_v58 }
 0x8ca   : > { %6418 = vst [vmem:[%s12143_s26 + $0x60] sm:$0xff] %v5981_v3  ;;  %6337 = vmatmul.f32.gmra.mxu2 %v5652_v43  ;;  %v12240_v2 = vpop.f32.mrf.mxu3 }
 0x8ce   : > { %6162 = vmatmul.f32.vlgmr.msrb.gmra.mxu0 %v11980_v19  ;;  %6227 = vmatmul.f32.vlgmr.msrb.gmra.mxu1 %v11736_v25  ;;  %v6057_v25 = vpop.f32.mrf.mxu2 }
 0x8cf   : > { %6357 = vmatmul.f32.vlgmr.msrb.gmra.mxu3 %v11980_v19  ;;  %v5854_v19 = vadd.f32 %v12082_v41, %v12126_v11 }
 0x8d2   : > { %v12245_v59 = vpop.f32.mrf.mxu3 }
 0x8d6   : > { %6165 = vmatmul.f32.gmra.mxu0 %v11995_v45  ;;  %6230 = vmatmul.f32.gmra.mxu1 %v11751_v37 }
 0x8d7   : > { %6360 = vmatmul.f32.gmra.mxu3 %v11995_v45 }
 0x8da   : > { %v12252_v29 = vpop.f32.mrf.mxu3 }
 0x8de   : > { %6168 = vmatmul.f32.gmra.mxu0 %v12022_v31  ;;  %6233 = vmatmul.f32.gmra.mxu1 %v11762_v21  ;;  %v5857_v21 = vadd.f32 %v12087_v10, %v12126_v11 }
 0x8df   : > { %6363 = vmatmul.f32.gmra.mxu3 %v12022_v31  ;;  %v6060_v31 = vpop.f32.mrf.mxu2 }
 0x8e5   : > { %v5918_v63 = vpop.f32.mrf.mxu0  ;;  %v5983_v9 = vpop.f32.mrf.mxu1 }
 0x8e6   : > { %v5919_v37 = vadd.f32 %v5918_v63, %v5854_v19  ;;  %6171 = vmatmul.f32.gmra.mxu0 %v12048_v30  ;;  %6236 = vmatmul.f32.gmra.mxu1 %v11777_v55 }
 0x8e7   : > { %6366 = vmatmul.f32.gmra.mxu3 %v12048_v30  ;;  %v5860_v30 = vadd.f32 %v12100_v49, %v12126_v11  ;;  %v6063_v7 = vpop.f32.mrf.mxu2 }
 0x8e8   : > { %v5984_v45 = vadd.f32 %v5983_v9, %v5919_v37 }
 0x8ea   : > { %6421 = vst [vmem:[%s12143_s26 + $0x78] sm:$0xff] %v5984_v45  ;;  %v5866_v45 = vadd.f32 %v12130_v32, %v12126_v11  ;;  %v5869_v32 = vadd.f32 %v12148_v15, %v12126_v11 }
 0x8ec   : > { %v12260_v62 = vpop.f32.mrf.mxu3 }
 0x8ed   : > { %v5921_v41 = vpop.f32.mrf.mxu0  ;;  %v5986_v47 = vpop.f32.mrf.mxu1 }
 0x8ee   : > { %v5922_v27 = vadd.f32 %v5921_v41, %v5857_v21  ;;  %6174 = vmatmul.f32.gmra.mxu0 %v12066_v18  ;;  %6239 = vmatmul.f32.gmra.mxu1 %v11788_v16 }
 0x8ef   : > { %6369 = vmatmul.f32.gmra.mxu3 %v12066_v18  ;;  %v5863_v18 = vadd.f32 %v12112_v28, %v12126_v11  ;;  %v6066_v37 = vpop.f32.mrf.mxu2 }
 0x8f0   : > { %v5987_v55 = vadd.f32 %v5986_v47, %v5922_v27 }
 0x8f2   : > { %6424 = vst [vmem:[%s12143_s26 + $0x90] sm:$0xff] %v5987_v55 }
 0x8f4   : > { %v12268_v43 = vpop.f32.mrf.mxu3 }
 0x8f5   : > { %v5924_v10 = vpop.f32.mrf.mxu0  ;;  %v5989_v58 = vpop.f32.mrf.mxu1 }
 0x8f6   : > { %v5925_v3 = vadd.f32 %v5924_v10, %v5860_v30  ;;  %6177 = vmatmul.f32.gmra.mxu0 %v12094_v14  ;;  %6242 = vmatmul.f32.gmra.mxu1 %v11802_v4 }
 0x8f7   : > { %6372 = vmatmul.f32.gmra.mxu3 %v12094_v14  ;;  %v12282_v14 = vperm.slane %v12120_v23, 1  ;;  %v6069_v55 = vpop.f32.mrf.mxu2 }
 0x8f8   : > { %v5990_v16 = vadd.f32 %v5989_v58, %v5925_v3 }
 0x8f9   : > { %v6058_v28 = vadd.f32 %v6057_v25, %v12282_v14  ;;  %v6061_v25 = vadd.f32 %v6060_v31, %v12282_v14 }
 0x8fa   : > { %6427 = vst [vmem:[%s12143_s26 + $0xa8] sm:$0xff] %v5990_v16  ;;  %v6064_v16 = vadd.f32 %v6063_v7, %v12282_v14 }
 0x8fc   : > { %v12276_v19 = vpop.f32.mrf.mxu3 }
 0x8fd   : > { %v5927_v49 = vpop.f32.mrf.mxu0  ;;  %v5992_v63 = vpop.f32.mrf.mxu1 }
 0x8fe   : > { %v5928_v9 = vadd.f32 %v5927_v49, %v5863_v18  ;;  %6180 = vmatmul.f32.gmra.mxu0 %v12106_v6  ;;  %6245 = vmatmul.f32.gmra.mxu1 %v11839_v48 }
 0x8ff   : > { %6375 = vmatmul.f32.gmra.mxu3 %v12106_v6  ;;  %v6072_v31 = vpop.f32.mrf.mxu2 }
 0x900   : > { %v5993_v4 = vadd.f32 %v5992_v63, %v5928_v9 }
 0x902   : > { %6430 = vst [vmem:[%s12143_s26 + $0xc0] sm:$0xff] %v5993_v4 }
 0x904   : > { %v6122_v21 = vpop.f32.mrf.mxu3 }
 0x905   : > { %v12288_v41 = vadd.f32 %v6122_v21, %v6058_v28  ;;  %v5930_v47 = vpop.f32.mrf.mxu0  ;;  %v5995_v27 = vpop.f32.mrf.mxu1 }
 0x906   : > { %v5931_v48 = vadd.f32 %v5930_v47, %v5866_v45  ;;  %6183 = vmatmul.f32.gmra.mxu0 %v12118_v52  ;;  %6248 = vmatmul.f32.gmra.mxu1 %v11853_v35 }
 0x907   : > { %6378 = vmatmul.f32.gmra.mxu3 %v12118_v52  ;;  %v6075_v15 = vpop.f32.mrf.mxu2 }
 0x908   : > { %v5996_v6 = vadd.f32 %v5995_v27, %v5931_v48 }
 0x90a   : > { %6433 = vst [vmem:[%s12143_s26 + $0xd8] sm:$0xff] %v5996_v6 }
 0x90c   : > { %v6125_v30 = vpop.f32.mrf.mxu3 }
 0x90d   : > { %v12297_v10 = vadd.f32 %v6125_v30, %v6061_v25  ;;  %v5933_v58 = vpop.f32.mrf.mxu0  ;;  %v5998_v35 = vpop.f32.mrf.mxu1 }
 0x90e   : > { %v5934_v3 = vadd.f32 %v5933_v58, %v5869_v32  ;;  %6186 = vmatmul.f32.gmra.mxu0 %v12136_v33  ;;  %6251 = vmatmul.f32.gmra.mxu1 %v11865_v13  ;;  %v5872_v13 = vadd.f32 %v12167_v42, %v12126_v11 }
 0x90f   : > { %6381 = vmatmul.f32.gmra.mxu3 %v12136_v33 }
 0x910   : > { %v5999_v52 = vadd.f32 %v5998_v35, %v5934_v3 }
 0x912   : > { %6436 = vst [vmem:[%s12143_s26 + $0xf0] sm:$0xff] %v5999_v52 }
 0x914   : > { %v6128_v18 = vpop.f32.mrf.mxu3 }
 0x915   : > { %v12304_v49 = vadd.f32 %v6128_v18, %v6064_v16 }
 0x916   : > { %6189 = vmatmul.f32.gmra.mxu0 %v12154_v38  ;;  %6254 = vmatmul.f32.gmra.mxu1 %v11874_v61  ;;  %v6078_v61 = vpop.f32.mrf.mxu2 }
 0x917   : > { %6384 = vmatmul.f32.gmra.mxu3 %v12154_v38  ;;  %v5875_v38 = vadd.f32 %v12171_v40, %v12126_v11  ;;  %v5878_v40 = vadd.f32 %v12175_v1, %v12126_v11  ;;  %v5881_v1 = vadd.f32 %v12195_v44, %v12126_v11  ;;  %v5884_v44 = vadd.f32 %v12207_v54, %v12126_v11 }
 0x918   : > { %v6079_v11 = vadd.f32 %v6078_v61, %v12282_v14  ;;  %v12358_v54 = vperm.slane %v12120_v23, 2 }
 0x91e   : > { %6192 = vmatmul.f32.gmra.mxu0 %v12164_v5  ;;  %6257 = vmatmul.f32.gmra.mxu1 %v11889_v50  ;;  %v6067_v50 = vadd.f32 %v6066_v37, %v12282_v14 }
 0x91f   : > { %6387 = vmatmul.f32.gmra.mxu3 %v12164_v5 }
 0x923   : > { %v5936_v33 = vpop.f32.mrf.mxu0  ;;  %v6001_v7 = vpop.f32.mrf.mxu1 }
 0x924   : > { %v5937_v63 = vadd.f32 %v5936_v33, %v5872_v13 }
 0x926   : > { %v6002_v9 = vadd.f32 %v6001_v7, %v5937_v63  ;;  %6195 = vmatmul.f32.gmra.mxu0 %v12181_v36  ;;  %6260 = vmatmul.f32.gmra.mxu1 %v11898_v8  ;;  %v6070_v8 = vadd.f32 %v6069_v55, %v12282_v14 }
 0x927   : > { %6390 = vmatmul.f32.gmra.mxu3 %v12181_v36  ;;  %v6293_v36 = vpop.f32.mrf.mxu2 }
 0x928   : > { %6439 = vst [vmem:[%s12143_s26 + $0x108] sm:$0xff] %v6002_v9 }
 0x92a   : > { %v6131_v5 = vpop.f32.mrf.mxu3 }
 0x92b   : > { %v12321_v42 = vadd.f32 %v6131_v5, %v6067_v50  ;;  %v5939_v4 = vpop.f32.mrf.mxu0  ;;  %v6004_v28 = vpop.f32.mrf.mxu1 }
 0x92c   : > { %v5940_v45 = vadd.f32 %v5939_v4, %v5875_v38  ;;  %v6037_v4 = vadd.f32 %v12158_v39, %v12282_v14 }
 0x92e   : > { %v6005_v21 = vadd.f32 %v6004_v28, %v5940_v45  ;;  %6198 = vmatmul.f32.gmra.mxu0 %v12193_v24  ;;  %6263 = vmatmul.f32.gmra.mxu1 %v11925_v26  ;;  %v6073_v26 = vadd.f32 %v6072_v31, %v12282_v14  ;;  %v6102_v23 = vadd.f32 %v12234_v17, %v6037_v4 }
 0x92f   : > { %6393 = vmatmul.f32.gmra.mxu3 %v12193_v24  ;;  %v6296_v58 = vpop.f32.mrf.mxu2 }
 0x930   : > { %6442 = vst [vmem:[%s12143_s26 + $0x120] sm:$0xff] %v6005_v21 }
 0x932   : > { %v6134_v37 = vpop.f32.mrf.mxu3 }
 0x933   : > { %v12330_v47 = vadd.f32 %v6134_v37, %v6070_v8  ;;  %v5942_v27 = vpop.f32.mrf.mxu0  ;;  %v6007_v48 = vpop.f32.mrf.mxu1 }
 0x934   : > { %v5943_v6 = vadd.f32 %v5942_v27, %v5878_v40  ;;  %v6040_v27 = vadd.f32 %v12169_v12, %v12282_v14 }
 0x936   : > { %v6008_v25 = vadd.f32 %v6007_v48, %v5943_v6  ;;  %6201 = vmatmul.f32.gmra.mxu0 %v12202_v51  ;;  %6266 = vmatmul.f32.gmra.mxu1 %v11934_v60  ;;  %v6076_v60 = vadd.f32 %v6075_v15, %v12282_v14  ;;  %v6105_v39 = vadd.f32 %v12240_v2, %v6040_v27 }
 0x937   : > { %6396 = vmatmul.f32.gmra.mxu3 %v12202_v51  ;;  %v6299_v13 = vpop.f32.mrf.mxu2  ;;  %v6055_v27 = vadd.f32 %v12232_v34, %v12282_v14 }
 0x938   : > { %6445 = vst [vmem:[%s12143_s26 + $0x138] sm:$0xff] %v6008_v25 }
 0x93a   : > { %v6137_v24 = vpop.f32.mrf.mxu3 }
 0x93b   : > { %v12339_v55 = vadd.f32 %v6137_v24, %v6073_v26  ;;  %v5945_v32 = vpop.f32.mrf.mxu0  ;;  %v6010_v30 = vpop.f32.mrf.mxu1 }
 0x93c   : > { %v5946_v3 = vadd.f32 %v5945_v32, %v5881_v1  ;;  %v13333_v32 = vld [vmem:[#allocation109_spill] sm:$0xff] }
 0x93e   : > { %v6011_v35 = vadd.f32 %v6010_v30, %v5946_v3  ;;  %6204 = vmatmul.f32.gmra.mxu0 %v12215_v22  ;;  %6269 = vmatmul.f32.gmra.mxu1 %v11943_v0  ;;  %v13331_v0 = vld [vmem:[#allocation101_spill] sm:$0xff]  ;;  %v6043_v30 = vadd.f32 %v13333_v32, %v12282_v14 }
 0x93f   : > { %6399 = vmatmul.f32.gmra.mxu3 %v12215_v22  ;;  %v13332_v22 = vld [vmem:[#allocation51_spill] sm:$0xff]  ;;  %v6302_v61 = vpop.f32.mrf.mxu2 }
 0x940   : > { %6448 = vst [vmem:[%s12143_s26 + $0x150] sm:$0xff] %v6011_v35  ;;  %v6034_v15 = vadd.f32 %v13332_v22, %v12282_v14  ;;  %v6108_v12 = vadd.f32 %v12245_v59, %v6043_v30 }
 0x942   : > { %v6140_v51 = vpop.f32.mrf.mxu3  ;;  %v6099_v7 = vadd.f32 %v12220_v53, %v6034_v15 }
 0x943   : > { %v12348_v52 = vadd.f32 %v6140_v51, %v6076_v60  ;;  %v5948_v16 = vpop.f32.mrf.mxu0  ;;  %v6013_v31 = vpop.f32.mrf.mxu1 }
 0x944   : > { %v5949_v18 = vadd.f32 %v5948_v16, %v5884_v44 }
 0x946   : > { %v6014_v33 = vadd.f32 %v6013_v31, %v5949_v18  ;;  %6207 = vmatmul.f32.gmra.mxu0 %v12229_v46  ;;  %6272 = vmatmul.f32.gmra.mxu1 %v13331_v0  ;;  %v6046_v31 = vadd.f32 %v12186_v57, %v12282_v14 }
 0x947   : > { %6402 = vmatmul.f32.gmra.mxu3 %v12229_v46 }
 0x948   : > { %6451 = vst [vmem:[%s12143_s26 + $0x168] sm:$0xff] %v6014_v33 }
 0x94a   : > { %v6143_v63 = vpop.f32.mrf.mxu3 }
 0x94b   : > { %v12361_v9 = vadd.f32 %v6143_v63, %v6079_v11  ;;  %v6163_v50 = vpop.f32.mrf.mxu0  ;;  %v6228_v38 = vpop.f32.mrf.mxu1  ;;  %v6049_v63 = vadd.f32 %v12204_v56, %v12282_v14 }
 0x94c   : > { %v6164_v5 = vadd.f32 %v6163_v50, %v6099_v7  ;;  %v6229_v46 = vadd.f32 %v6228_v38, %v12358_v54 }
 0x94d   : > { %v6114_v57 = vadd.f32 %v12260_v62, %v6049_v63 }
 0x94e   : > { %6407 = vst [vmem:[%s12143_s26 + $0x8] sm:$0xff] %v6164_v5  ;;  %v6294_v28 = vadd.f32 %v6293_v36, %v6229_v46  ;;  %v6305_v36 = vpop.f32.mrf.mxu2 }
 0x952   : > { %v6358_v45 = vpop.f32.mrf.mxu3 }
 0x953   : > { %v6359_v53 = vadd.f32 %v6358_v45, %v6294_v28  ;;  %v6166_v21 = vpop.f32.mrf.mxu0  ;;  %v6231_v8 = vpop.f32.mrf.mxu1  ;;  %v6052_v28 = vadd.f32 %v12218_v20, %v12282_v14  ;;  %v6120_v20 = vadd.f32 %v12276_v19, %v6055_v27 }
 0x954   : > { %v6167_v40 = vadd.f32 %v6166_v21, %v6102_v23  ;;  %v6232_v37 = vadd.f32 %v6231_v8, %v12358_v54 }
 0x955   : > { %6408 = vst [vmem:[%s12143_s26 + $0x10] sm:$0xff] %v6359_v53  ;;  %v6117_v56 = vadd.f32 %v12268_v43, %v6052_v28 }
 0x956   : > { %6410 = vst [vmem:[%s12143_s26 + $0x20] sm:$0xff] %v6167_v40  ;;  %v6297_v48 = vadd.f32 %v6296_v58, %v6232_v37  ;;  %v6308_v44 = vpop.f32.mrf.mxu2 }
 0x95a   : > { %v6361_v6 = vpop.f32.mrf.mxu3 }
 0x95b   : > { %v6362_v17 = vadd.f32 %v6361_v6, %v6297_v48  ;;  %v6169_v25 = vpop.f32.mrf.mxu0  ;;  %v6234_v26 = vpop.f32.mrf.mxu1 }
 0x95c   : > { %v6170_v1 = vadd.f32 %v6169_v25, %v6105_v39  ;;  %v6235_v24 = vadd.f32 %v6234_v26, %v12358_v54 }
 0x95d   : > { %6411 = vst [vmem:[%s12143_s26 + $0x28] sm:$0xff] %v6362_v17 }
 0x95e   : > { %6413 = vst [vmem:[%s12143_s26 + $0x38] sm:$0xff] %v6170_v1  ;;  %v6300_v3 = vadd.f32 %v6299_v13, %v6235_v24  ;;  %v6111_v13 = vadd.f32 %v12252_v29, %v6046_v31  ;;  %v6311_v7 = vpop.f32.mrf.mxu2 }
 0x962   : > { %v6364_v58 = vpop.f32.mrf.mxu3 }
 0x963   : > { %v6365_v2 = vadd.f32 %v6364_v58, %v6300_v3  ;;  %v6172_v35 = vpop.f32.mrf.mxu0  ;;  %v6237_v60 = vpop.f32.mrf.mxu1 }
 0x964   : > { %v6173_v51 = vadd.f32 %v6172_v35, %v6108_v12  ;;  %v6238_v16 = vadd.f32 %v6237_v60, %v12358_v54 }
 0x965   : > { %6414 = vst [vmem:[%s12143_s26 + $0x40] sm:$0xff] %v6365_v2 }
 0x966   : > { %6416 = vst [vmem:[%s12143_s26 + $0x50] sm:$0xff] %v6173_v51  ;;  %v6303_v18 = vadd.f32 %v6302_v61, %v6238_v16  ;;  %v6314_v23 = vpop.f32.mrf.mxu2 }
 0x96a   : > { %v6367_v33 = vpop.f32.mrf.mxu3 }
 0x96b   : > { %v6368_v59 = vadd.f32 %v6367_v33, %v6303_v18  ;;  %v6175_v0 = vpop.f32.mrf.mxu0  ;;  %v6240_v22 = vpop.f32.mrf.mxu1 }
 0x96c   : > { %v6176_v15 = vadd.f32 %v6175_v0, %v6111_v13  ;;  %v6241_v11 = vadd.f32 %v6240_v22, %v12358_v54 }
 0x96d   : > { %6417 = vst [vmem:[%s12143_s26 + $0x58] sm:$0xff] %v6368_v59 }
 0x96e   : > { %6419 = vst [vmem:[%s12143_s26 + $0x68] sm:$0xff] %v6176_v15  ;;  %v6306_v50 = vadd.f32 %v6305_v36, %v6241_v11  ;;  %v6317_v39 = vpop.f32.mrf.mxu2 }
 0x972   : > { %v6370_v38 = vpop.f32.mrf.mxu3 }
 0x973   : > { %v6371_v29 = vadd.f32 %v6370_v38, %v6306_v50  ;;  %v6178_v5 = vpop.f32.mrf.mxu0  ;;  %v6243_v46 = vpop.f32.mrf.mxu1 }
 0x974   : > { %v6179_v4 = vadd.f32 %v6178_v5, %v6114_v57  ;;  %v6244_v61 = vadd.f32 %v6243_v46, %v12358_v54 }
 0x975   : > { %6420 = vst [vmem:[%s12143_s26 + $0x70] sm:$0xff] %v6371_v29 }
 0x976   : > { %6422 = vst [vmem:[%s12143_s26 + $0x80] sm:$0xff] %v6179_v4  ;;  %v6309_v45 = vadd.f32 %v6308_v44, %v6244_v61  ;;  %v6320_v19 = vpop.f32.mrf.mxu2 }
 0x97a   : > { %v6373_v53 = vpop.f32.mrf.mxu3 }
 0x97b   : > { %v6374_v62 = vadd.f32 %v6373_v53, %v6309_v45  ;;  %v6181_v21 = vpop.f32.mrf.mxu0  ;;  %v6246_v8 = vpop.f32.mrf.mxu1 }
 0x97c   : > { %v6182_v40 = vadd.f32 %v6181_v21, %v6117_v56  ;;  %v6247_v37 = vadd.f32 %v6246_v8, %v12358_v54 }
 0x97d   : > { %6423 = vst [vmem:[%s12143_s26 + $0x88] sm:$0xff] %v6374_v62 }
 0x97e   : > { %6425 = vst [vmem:[%s12143_s26 + $0x98] sm:$0xff] %v6182_v40  ;;  %v6312_v48 = vadd.f32 %v6311_v7, %v6247_v37  ;;  %v6323_v16 = vpop.f32.mrf.mxu2 }
 0x982   : > { %v6376_v43 = vpop.f32.mrf.mxu3 }
 0x983   : > { %v6377_v36 = vadd.f32 %v6376_v43, %v6312_v48  ;;  %v6184_v6 = vpop.f32.mrf.mxu0  ;;  %v6249_v17 = vpop.f32.mrf.mxu1 }
 0x984   : > { %v6185_v25 = vadd.f32 %v6184_v6, %v6120_v20  ;;  %v6250_v26 = vadd.f32 %v6249_v17, %v12358_v54 }
 0x985   : > { %6426 = vst [vmem:[%s12143_s26 + $0xa0] sm:$0xff] %v6377_v36 }
 0x986   : > { %6428 = vst [vmem:[%s12143_s26 + $0xb0] sm:$0xff] %v6185_v25  ;;  %v6315_v1 = vadd.f32 %v6314_v23, %v6250_v26  ;;  %v6326_v22 = vpop.f32.mrf.mxu2 }
 0x98a   : > { %v6379_v24 = vpop.f32.mrf.mxu3 }
 0x98b   : > { %v6380_v32 = vadd.f32 %v6379_v24, %v6315_v1  ;;  %v6187_v34 = vpop.f32.mrf.mxu0  ;;  %v6252_v14 = vpop.f32.mrf.mxu1 }
 0x98c   : > { %v6188_v30 = vadd.f32 %v6187_v34, %v12288_v41  ;;  %v6253_v3 = vadd.f32 %v6252_v14, %v12358_v54 }
 0x98d   : > { %6429 = vst [vmem:[%s12143_s26 + $0xb8] sm:$0xff] %v6380_v32 }
 0x98e   : > { %6431 = vst [vmem:[%s12143_s26 + $0xc8] sm:$0xff] %v6188_v30  ;;  %v6318_v12 = vadd.f32 %v6317_v39, %v6253_v3 }
 0x992   : > { %v6382_v58 = vpop.f32.mrf.mxu3 }
 0x993   : > { %v6383_v2 = vadd.f32 %v6382_v58, %v6318_v12  ;;  %v6190_v35 = vpop.f32.mrf.mxu0  ;;  %v6255_v60 = vpop.f32.mrf.mxu1 }
 0x994   : > { %v6191_v44 = vadd.f32 %v6190_v35, %v12297_v10  ;;  %v6256_v51 = vadd.f32 %v6255_v60, %v12358_v54 }
 0x995   : > { %6432 = vst [vmem:[%s12143_s26 + $0xd0] sm:$0xff] %v6383_v2 }
 0x996   : > { %6434 = vst [vmem:[%s12143_s26 + $0xe0] sm:$0xff] %v6191_v44  ;;  %v6321_v31 = vadd.f32 %v6320_v19, %v6256_v51 }
 0x99a   : > { %v6385_v41 = vpop.f32.mrf.mxu3 }
 0x99b   : > { %v6386_v18 = vadd.f32 %v6385_v41, %v6321_v31  ;;  %v6193_v13 = vpop.f32.mrf.mxu0  ;;  %v6258_v33 = vpop.f32.mrf.mxu1 }
 0x99c   : > { %v6194_v59 = vadd.f32 %v6193_v13, %v12304_v49  ;;  %v6259_v0 = vadd.f32 %v6258_v33, %v12358_v54  ;;  %v6329_v49 = vpop.f32.mrf.mxu2 }
 0x99d   : > { %6435 = vst [vmem:[%s12143_s26 + $0xe8] sm:$0xff] %v6386_v18 }
 0x99e   : > { %6437 = vst [vmem:[%s12143_s26 + $0xf8] sm:$0xff] %v6194_v59  ;;  %v6324_v10 = vadd.f32 %v6323_v16, %v6259_v0 }
 0x9a2   : > { %v6388_v15 = vpop.f32.mrf.mxu3 }
 0x9a3   : > { %v6389_v11 = vadd.f32 %v6388_v15, %v6324_v10  ;;  %v6196_v7 = vpop.f32.mrf.mxu0  ;;  %v6261_v63 = vpop.f32.mrf.mxu1 }
 0x9a4   : > { %v6197_v50 = vadd.f32 %v6196_v7, %v12321_v42  ;;  %v6262_v57 = vadd.f32 %v6261_v63, %v12358_v54  ;;  %v6332_v62 = vpop.f32.mrf.mxu2 }
 0x9a5   : > { %6438 = vst [vmem:[%s12143_s26 + $0x100] sm:$0xff] %v6389_v11 }
 0x9a6   : > { %6440 = vst [vmem:[%s12143_s26 + $0x110] sm:$0xff] %v6197_v50  ;;  %v6327_v38 = vadd.f32 %v6326_v22, %v6262_v57 }
 0x9aa   : > { %v6391_v29 = vpop.f32.mrf.mxu3 }
 0x9ab   : > { %v6392_v5 = vadd.f32 %v6391_v29, %v6327_v38  ;;  %v6199_v46 = vpop.f32.mrf.mxu0  ;;  %v6264_v4 = vpop.f32.mrf.mxu1 }
 0x9ac   : > { %v6200_v61 = vadd.f32 %v6199_v46, %v12330_v47  ;;  %v6265_v28 = vadd.f32 %v6264_v4, %v12358_v54  ;;  %v6335_v43 = vpop.f32.mrf.mxu2 }
 0x9ad   : > { %6441 = vst [vmem:[%s12143_s26 + $0x118] sm:$0xff] %v6392_v5 }
 0x9ae   : > { %6443 = vst [vmem:[%s12143_s26 + $0x128] sm:$0xff] %v6200_v61  ;;  %v6330_v23 = vadd.f32 %v6329_v49, %v6265_v28 }
 0x9b2   : > { %v6394_v42 = vpop.f32.mrf.mxu3 }
 0x9b3   : > { %v6395_v45 = vadd.f32 %v6394_v42, %v6330_v23  ;;  %v6202_v56 = vpop.f32.mrf.mxu0  ;;  %v6267_v53 = vpop.f32.mrf.mxu1 }
 0x9b4   : > { %v6203_v21 = vadd.f32 %v6202_v56, %v12339_v55  ;;  %v6268_v8 = vadd.f32 %v6267_v53, %v12358_v54  ;;  %v6338_v1 = vpop.f32.mrf.mxu2 }
 0x9b5   : > { %6444 = vst [vmem:[%s12143_s26 + $0x130] sm:$0xff] %v6395_v45 }
 0x9b6   : > { %6446 = vst [vmem:[%s12143_s26 + $0x140] sm:$0xff] %v6203_v21  ;;  %v6333_v47 = vadd.f32 %v6332_v62, %v6268_v8 }
 0x9ba   : > { %v6397_v40 = vpop.f32.mrf.mxu3 }
 0x9bb   : > { %v6398_v37 = vadd.f32 %v6397_v40, %v6333_v47  ;;  %v6205_v27 = vpop.f32.mrf.mxu0  ;;  %v6270_v48 = vpop.f32.mrf.mxu1 }
 0x9bc   : > { %v6206_v20 = vadd.f32 %v6205_v27, %v12348_v52  ;;  %v6271_v39 = vadd.f32 %v6270_v48, %v12358_v54 }
 0x9bd   : > { %6447 = vst [vmem:[%s12143_s26 + $0x148] sm:$0xff] %v6398_v37 }
 0x9be   : > { %6449 = vst [vmem:[%s12143_s26 + $0x158] sm:$0xff] %v6206_v20  ;;  %v6336_v55 = vadd.f32 %v6335_v43, %v6271_v39 }
 0x9c2   : > { %v6400_v36 = vpop.f32.mrf.mxu3 }
 0x9c3   : > { %v6401_v6 = vadd.f32 %v6400_v36, %v6336_v55  ;;  %v6208_v17 = vpop.f32.mrf.mxu0  ;;  %v6273_v25 = vpop.f32.mrf.mxu1 }
 0x9c4   : > { %v6209_v26 = vadd.f32 %v6208_v17, %v12361_v9  ;;  %v6274_v52 = vadd.f32 %v6273_v25, %v12358_v54 }
 0x9c5   : > { %6450 = vst [vmem:[%s12143_s26 + $0x160] sm:$0xff] %v6401_v6 }
 0x9c6   : > { %6452 = vst [vmem:[%s12143_s26 + $0x170] sm:$0xff] %v6209_v26  ;;  %v6339_v24 = vadd.f32 %v6338_v1, %v6274_v52 }
 0x9ca   : > { %v6403_v32 = vpop.f32.mrf.mxu3 }
 0x9cb   : > { %v6404_v34 = vadd.f32 %v6403_v32, %v6339_v24 }
 0x9cd   : > { %6453 = vst [vmem:[%s12143_s26 + $0x178] sm:$0xff] %v6404_v34 }
 0x9ce   : > { %7776 = shalt.err (!%p7773_p10)
}
 0x9cf   : > { %s7833_s10 = smov 384   ;;  %s7834_s20 = smov 24  }
 0x9d0   : > { %6796 = dma.vmem_to_hbm [thread:$0]  (%p7946_p7), %s6468_s27, 6144, %s6470_s19, %s6455_s28, %s7833_s10, %s7833_s10, %s7834_s20  }
 0x9d1 PF: > { %s6484_s21 = sand.u32 1, %s7811_s15   ;;  %p13334_p12 = scmp.ge.s32.totalorder %s7823_s18, 2 }
 0x9d2   : > { %s6485_s26 = scalar_lea.sflag [#allocation4], %s6484_s21 }
 0x9d3   : > { %p6813_p13 = pnand %p13334_p12, %p7895_p6 }
 0x9d5   : > { %p6814_p0 = pneg %p6813_p13 }
 0x9d7   : > { %7806 = dma.done.wait (%p6814_p0), %s6485_s26, 6144  }
 0x9d8   : > { %7808 = vsyncadd (%p6814_p0), %s6485_s26, 4294961152  ;;  %p19_p3 = scmp.ge.s32.totalorder %s7932_s25, 4   ;;  %s13335_s15 = smov %s7815_s16 }
 0x9d9   : > { %s13336_s16 = smov %s7819_s17  ;;  %s13337_s17 = smov %s7942_s30 }
 0x9da   : > { %s13338_s18 = smov %s7932_s25  ;;  %21 = sbr.rel (!%p19_p3) target bundleno = 7 (0x7), region = 93 }
 0x9df   :  { %6491 = vsyncpa [#allocation3], 1 }
 0x9e0   :  { %6493 = vsyncpa [#allocation3 + $0x1], 1 }
 0x9e1   :  { %6494 = vsyncpa [#allocation6], 1 }
 0x9e2   :  { %6495 = vsyncpa [#allocation9], 1 }
 0x9e3   :  { %6496 = vsyncpa [#allocation4], 1 }
 0x9e4   :  { %6498 = vsyncpa [#allocation4 + $0x1], 1 }

</bundles_post_ra>
